<compile_context>
chip_gen: v7x
topology: tpu7x:2x2x1
jax: 0.10.0
libtpu: 0.0.40
codegen_flags: <defaults>
</compile_context>

<pallas_src>
import functools

import jax
import jax.numpy as jnp
from jax.experimental import pallas as pl
from jax.experimental.pallas import tpu as pltpu


# ----------------------------------------------------------------------------
# Pallas kernel: fused implicit-im2col conv (single MXU matmul) + ConvLSTM math
# ----------------------------------------------------------------------------
def clstm_kernel(xp_ref, w_ref, b_ref, c_ref, h_out_ref, c_out_ref,
                 *, k, td, hdim, wdim, ct, use_bf16_mxu):
    # xp_ref:    (1, Dp, Hp, Wp, Ct)   zero-padded [x, h_prev], channels-last,
    #                                  full padded volume (resident across j)
    # w_ref:     (4*Chid, k^3*Ct)      lane-dense conv weight, cols (kd,kh,kw,cin)
    # b_ref:     (4*Chid, 1)           conv bias (broadcast over pixel lanes)
    # c_ref:     (1, Chid, npix_t)     previous cell state tile, pixels on lanes
    # h_out_ref: (1, Chid, npix_t)     new hidden state tile
    # c_out_ref: (1, Chid, npix_t)     new cell state tile
    j = pl.program_id(1)                      # depth-tile index
    npix_t = td * hdim * wdim
    d0 = j * td                               # start plane of this tile (padded coords)

    # Implicit im2col for this depth tile: k^3 shifted windows laid side by
    # side along the contraction axis.  No patch tensor ever exists in HBM.
    slabs = []
    for kd in range(k):
        for kh in range(k):
            for kw in range(k):
                slab = xp_ref[0, pl.ds(d0 + kd, td), kh:kh + hdim, kw:kw + wdim, :]
                slabs.append(slab.reshape(npix_t, ct))          # (npix_t, Ct)
    patch = jnp.concatenate(slabs, axis=-1)                     # (npix_t, k^3*Ct)

    lhs = w_ref[...]                                            # (4*Chid, k^3*Ct)
    rhs = patch
    if use_bf16_mxu:
        lhs = lhs.astype(jnp.bfloat16)
        rhs = rhs.astype(jnp.bfloat16)

    # ONE fused matmul, emitted directly in (4*Chid, npix_t) orientation:
    # contract the k^3*Ct axis of the weight with the patch (A @ B^T form).
    a = jax.lax.dot_general(
        lhs, rhs,
        dimension_numbers=(((1,), (1,)), ((), ())),
        preferred_element_type=jnp.float32,
    ) + b_ref[...]                                              # (4*Chid, npix_t)

    chid = c_ref.shape[1]
    i = jax.nn.sigmoid(a[0 * chid:1 * chid])
    f = jax.nn.sigmoid(a[1 * chid:2 * chid])
    o = jax.nn.sigmoid(a[2 * chid:3 * chid])
    g = jnp.tanh(a[3 * chid:4 * chid])

    c_prev = c_ref[0]                                           # (Chid, npix_t)
    c_new = c_prev * f + i * g
    h_new = o * jnp.tanh(c_new)

    h_out_ref[0] = h_new.astype(h_out_ref.dtype)
    c_out_ref[0] = c_new.astype(c_out_ref.dtype)


# ----------------------------------------------------------------------------
# Wrapper: PyTorch NCDHW in / NCDHW out
# ----------------------------------------------------------------------------
@functools.partial(jax.jit,
                   static_argnames=("kernel_size", "depth_tile", "use_bf16_mxu"))
def clstm_cell_forward(x, h, c, weight, bias, kernel_size,
                       depth_tile=None, use_bf16_mxu=False):
    # x:      (B, Cin,  D, H, W)
    # h, c:   (B, Chid, D, H, W)
    # weight: (4*Chid, Cin+Chid, k, k, k)   (PyTorch Conv3d OIDHW layout)
    # bias:   (4*Chid,)
    B, Cin, D, H, W = x.shape
    Chid = h.shape[1]
    k = kernel_size
    p = (k - 1) // 2
    Ct = Cin + Chid
    npix = D * H * W

    # Pick a depth tile: largest divisor of D whose pixel count is a multiple
    # of 128 (lane-dense output tiles) and stays <= ~1024 pixels per step.
    if depth_tile is None:
        depth_tile = D
        for cand in range(D, 0, -1):
            if D % cand == 0 and (cand * H * W) % 128 == 0 and cand * H * W <= 1024:
                depth_tile = cand
                break
    td = depth_tile
    assert D % td == 0, "depth_tile must divide D"
    npix_t = td * H * W
    assert td == D or npix_t % 128 == 0, "pixel tile must be lane-aligned (x128)"
    n_dt = D // td

    # Conv input: channels-last combined activations, zero-padded once (~1x the
    # activation volume; no materialized 27x im2col stream in HBM).
    comb = jnp.concatenate(
        [jnp.transpose(x, (0, 2, 3, 4, 1)), jnp.transpose(h, (0, 2, 3, 4, 1))],
        axis=-1)                                            # (B, D, H, W, Ct)
    xp = jnp.pad(comb, ((0, 0), (p, p), (p, p), (p, p), (0, 0)))
    Dp, Hp, Wp = D + 2 * p, H + 2 * p, W + 2 * p

    # Cell state and outputs stay in native NCDHW memory order: reshape only.
    c2 = c.reshape(B, Chid, npix)

    # (O, I, kD, kH, kW) -> (O, kD, kH, kW, I) -> (4*Chid, k^3*Ct): lane-dense,
    # column order (kd, kh, kw, cin) matches the in-kernel patch columns.
    w_mat = jnp.transpose(weight, (0, 2, 3, 4, 1)).reshape(4 * Chid, k * k * k * Ct)
    b2 = bias.reshape(4 * Chid, 1)

    kernel = functools.partial(clstm_kernel, k=k, td=td, hdim=H, wdim=W, ct=Ct,
                               use_bf16_mxu=use_bf16_mxu)

    h_out, c_out = pl.pallas_call(
        kernel,
        out_shape=(
            jax.ShapeDtypeStruct((B, Chid, npix), x.dtype),
            jax.ShapeDtypeStruct((B, Chid, npix), x.dtype),
        ),
        grid_spec=pltpu.PrefetchScalarGridSpec(
            num_scalar_prefetch=0,
            grid=(B, n_dt),
            in_specs=[
                # Padded input: whole padded volume per batch, resident across j
                # (index map ignores j -> DMA'd once per batch).
                pl.BlockSpec((1, Dp, Hp, Wp, Ct), lambda b, j: (b, 0, 0, 0, 0)),
                pl.BlockSpec((4 * Chid, k * k * k * Ct), lambda b, j: (0, 0)),
                pl.BlockSpec((4 * Chid, 1), lambda b, j: (0, 0)),
                pl.BlockSpec((1, Chid, npix_t), lambda b, j: (b, 0, j)),
            ],
            out_specs=[
                pl.BlockSpec((1, Chid, npix_t), lambda b, j: (b, 0, j)),
                pl.BlockSpec((1, Chid, npix_t), lambda b, j: (b, 0, j)),
            ],
        ),
        compiler_params=pltpu.CompilerParams(
            dimension_semantics=("parallel", "arbitrary"),
            # Per-step footprint here is ~2-3 MiB; 32 MiB is safe even on
            # v7x's 64 MiB physical VMEM.
            vmem_limit_bytes=32 * 1024 * 1024,
        ),
    )(xp, w_mat, b2, c2)

    h_new = h_out.reshape(B, Chid, D, H, W)
    c_new = c_out.reshape(B, Chid, D, H, W)
    return h_new, c_new


# ----------------------------------------------------------------------------
# Pure-JAX reference (mirrors PyTorch semantics) for a correctness check
# ----------------------------------------------------------------------------
def clstm_cell_reference(x, h, c, weight, bias, kernel_size):
    p = (kernel_size - 1) // 2
    combined = jnp.concatenate([x, h], axis=1)
    a = jax.lax.conv_general_dilated(
        combined, weight,
        window_strides=(1, 1, 1),
        padding=[(p, p), (p, p), (p, p)],
        dimension_numbers=("NCDHW", "OIDHW", "NCDHW"),
    ) + bias.reshape(1, -1, 1, 1, 1)
    chid = h.shape[1]
    a_i, a_f, a_o, a_g = jnp.split(a, 4, axis=1)
    i = jax.nn.sigmoid(a_i)
    f = jax.nn.sigmoid(a_f)
    o = jax.nn.sigmoid(a_o)
    g = jnp.tanh(a_g)
    c_new = c * f + i * g
    h_new = o * jnp.tanh(c_new)
    return h_new, c_new


if __name__ == "__main__":
    # Module hyper-params (hidden_channels must be even)
    input_channels = 4
    hidden_channels = 8
    kernel_size = 3

    # Small 3-D volume: (B, C, D, H, W)
    B, D, H, W = 2, 8, 8, 8

    key = jax.random.PRNGKey(0)
    k_x, k_h, k_c, k_w, k_b = jax.random.split(key, 5)

    x = jax.random.normal(k_x, (B, input_channels, D, H, W), dtype=jnp.float32)
    h0 = jax.random.normal(k_h, (B, hidden_channels, D, H, W), dtype=jnp.float32)
    c0 = jax.random.normal(k_c, (B, hidden_channels, D, H, W), dtype=jnp.float32)

    # Deterministic synthetic Conv3d parameters (same shapes as the PyTorch module)
    weight = 0.1 * jax.random.normal(
        k_w,
        (4 * hidden_channels, input_channels + hidden_channels,
         kernel_size, kernel_size, kernel_size),
        dtype=jnp.float32)
    bias = 0.1 * jax.random.normal(k_b, (4 * hidden_channels,), dtype=jnp.float32)

    # depth_tile=4 -> grid=(2, 2): 256-pixel lane-dense tiles, pipelined c/h/c
    # DMA across depth tiles, and 2 parallel batch blocks for v7x megacore.
    h_new, c_new = clstm_cell_forward(x, h0, c0, weight, bias, kernel_size,
                                      depth_tile=4)
    jax.block_until_ready((h_new, c_new))

    h_ref, c_ref = clstm_cell_reference(x, h0, c0, weight, bias, kernel_size)
    assert h_new.shape == (B, hidden_channels, D, H, W)
    assert c_new.shape == (B, hidden_channels, D, H, W)
    assert jnp.allclose(h_new, h_ref, atol=2e-4, rtol=2e-4), "h mismatch vs reference"
    assert jnp.allclose(c_new, c_ref, atol=2e-4, rtol=2e-4), "c mismatch vs reference"

    print("KERNEL_OK")
</pallas_src>

<mosaic_0001>
module attributes {stable_mosaic.version = 11 : i64} {
  func.func @clstm_kernel(%arg0: i32, %arg1: i32, %arg2: memref<1x10x10x10x12xf32, #tpu.memory_space<vmem>>, %arg3: memref<32x324xf32, #tpu.memory_space<vmem>>, %arg4: memref<32x1xf32, #tpu.memory_space<vmem>>, %arg5: memref<1x8x256xf32, #tpu.memory_space<vmem>>, %arg6: memref<1x8x256xf32, #tpu.memory_space<vmem>>, %arg7: memref<1x8x256xf32, #tpu.memory_space<vmem>>) attributes {dimension_semantics = [#tpu.dimension_semantics<parallel>, #tpu.dimension_semantics<arbitrary>], iteration_bounds = array<i64: 2, 2>, scalar_prefetch = 0 : i64, scratch_operands = 0 : i64, tpu.core_type = #tpu.core_type<tc>, window_params = [{transform_indices = @transform_0, window_bounds = array<i64: 1, 10, 10, 10, 12>}, {pipeline_mode = #tpu.pipeline_mode<synchronous>, transform_indices = @transform_1, window_bounds = array<i64: 32, 324>}, {pipeline_mode = #tpu.pipeline_mode<synchronous>, transform_indices = @transform_2, window_bounds = array<i64: 32, 1>}, {transform_indices = @transform_3, window_bounds = array<i64: 1, 8, 256>}, {transform_indices = @transform_4, window_bounds = array<i64: 1, 8, 256>}, {transform_indices = @transform_5, window_bounds = array<i64: 1, 8, 256>}]} {
    %c4_i32 = arith.constant 4 : i32
    %0 = arith.muli %arg1, %c4_i32 : i32
    %c0_i32 = arith.constant 0 : i32
    %1 = arith.addi %0, %c0_i32 : i32
    %c0 = arith.constant 0 : index
    %2 = arith.index_cast %1 : i32 to index
    %c0_0 = arith.constant 0 : index
    %c0_1 = arith.constant 0 : index
    %c0_2 = arith.constant 0 : index
    %3 = vector.load %arg2[%c0, %2, %c0_0, %c0_1, %c0_2] : memref<1x10x10x10x12xf32, #tpu.memory_space<vmem>>, vector<1x4x8x8x12xf32>
    %4 = vector.shape_cast %3 : vector<1x4x8x8x12xf32> to vector<4x8x8x12xf32>
    %5 = vector.shape_cast %4 : vector<4x8x8x12xf32> to vector<256x12xf32>
    %c0_i32_3 = arith.constant 0 : i32
    %6 = arith.addi %0, %c0_i32_3 : i32
    %c0_4 = arith.constant 0 : index
    %7 = arith.index_cast %6 : i32 to index
    %c0_5 = arith.constant 0 : index
    %c1 = arith.constant 1 : index
    %c0_6 = arith.constant 0 : index
    %8 = vector.load %arg2[%c0_4, %7, %c0_5, %c1, %c0_6] : memref<1x10x10x10x12xf32, #tpu.memory_space<vmem>>, vector<1x4x8x8x12xf32>
    %9 = vector.shape_cast %8 : vector<1x4x8x8x12xf32> to vector<4x8x8x12xf32>
    %10 = vector.shape_cast %9 : vector<4x8x8x12xf32> to vector<256x12xf32>
    %c0_i32_7 = arith.constant 0 : i32
    %11 = arith.addi %0, %c0_i32_7 : i32
    %c0_8 = arith.constant 0 : index
    %12 = arith.index_cast %11 : i32 to index
    %c0_9 = arith.constant 0 : index
    %c2 = arith.constant 2 : index
    %c0_10 = arith.constant 0 : index
    %13 = vector.load %arg2[%c0_8, %12, %c0_9, %c2, %c0_10] : memref<1x10x10x10x12xf32, #tpu.memory_space<vmem>>, vector<1x4x8x8x12xf32>
    %14 = vector.shape_cast %13 : vector<1x4x8x8x12xf32> to vector<4x8x8x12xf32>
    %15 = vector.shape_cast %14 : vector<4x8x8x12xf32> to vector<256x12xf32>
    %c0_i32_11 = arith.constant 0 : i32
    %16 = arith.addi %0, %c0_i32_11 : i32
    %c0_12 = arith.constant 0 : index
    %17 = arith.index_cast %16 : i32 to index
    %c1_13 = arith.constant 1 : index
    %c0_14 = arith.constant 0 : index
    %c0_15 = arith.constant 0 : index
    %18 = vector.load %arg2[%c0_12, %17, %c1_13, %c0_14, %c0_15] : memref<1x10x10x10x12xf32, #tpu.memory_space<vmem>>, vector<1x4x8x8x12xf32>
    %19 = vector.shape_cast %18 : vector<1x4x8x8x12xf32> to vector<4x8x8x12xf32>
    %20 = vector.shape_cast %19 : vector<4x8x8x12xf32> to vector<256x12xf32>
    %c0_i32_16 = arith.constant 0 : i32
    %21 = arith.addi %0, %c0_i32_16 : i32
    %c0_17 = arith.constant 0 : index
    %22 = arith.index_cast %21 : i32 to index
    %c1_18 = arith.constant 1 : index
    %c1_19 = arith.constant 1 : index
    %c0_20 = arith.constant 0 : index
    %23 = vector.load %arg2[%c0_17, %22, %c1_18, %c1_19, %c0_20] : memref<1x10x10x10x12xf32, #tpu.memory_space<vmem>>, vector<1x4x8x8x12xf32>
    %24 = vector.shape_cast %23 : vector<1x4x8x8x12xf32> to vector<4x8x8x12xf32>
    %25 = vector.shape_cast %24 : vector<4x8x8x12xf32> to vector<256x12xf32>
    %c0_i32_21 = arith.constant 0 : i32
    %26 = arith.addi %0, %c0_i32_21 : i32
    %c0_22 = arith.constant 0 : index
    %27 = arith.index_cast %26 : i32 to index
    %c1_23 = arith.constant 1 : index
    %c2_24 = arith.constant 2 : index
    %c0_25 = arith.constant 0 : index
    %28 = vector.load %arg2[%c0_22, %27, %c1_23, %c2_24, %c0_25] : memref<1x10x10x10x12xf32, #tpu.memory_space<vmem>>, vector<1x4x8x8x12xf32>
    %29 = vector.shape_cast %28 : vector<1x4x8x8x12xf32> to vector<4x8x8x12xf32>
    %30 = vector.shape_cast %29 : vector<4x8x8x12xf32> to vector<256x12xf32>
    %c0_i32_26 = arith.constant 0 : i32
    %31 = arith.addi %0, %c0_i32_26 : i32
    %c0_27 = arith.constant 0 : index
    %32 = arith.index_cast %31 : i32 to index
    %c2_28 = arith.constant 2 : index
    %c0_29 = arith.constant 0 : index
    %c0_30 = arith.constant 0 : index
    %33 = vector.load %arg2[%c0_27, %32, %c2_28, %c0_29, %c0_30] : memref<1x10x10x10x12xf32, #tpu.memory_space<vmem>>, vector<1x4x8x8x12xf32>
    %34 = vector.shape_cast %33 : vector<1x4x8x8x12xf32> to vector<4x8x8x12xf32>
    %35 = vector.shape_cast %34 : vector<4x8x8x12xf32> to vector<256x12xf32>
    %c0_i32_31 = arith.constant 0 : i32
    %36 = arith.addi %0, %c0_i32_31 : i32
    %c0_32 = arith.constant 0 : index
    %37 = arith.index_cast %36 : i32 to index
    %c2_33 = arith.constant 2 : index
    %c1_34 = arith.constant 1 : index
    %c0_35 = arith.constant 0 : index
    %38 = vector.load %arg2[%c0_32, %37, %c2_33, %c1_34, %c0_35] : memref<1x10x10x10x12xf32, #tpu.memory_space<vmem>>, vector<1x4x8x8x12xf32>
    %39 = vector.shape_cast %38 : vector<1x4x8x8x12xf32> to vector<4x8x8x12xf32>
    %40 = vector.shape_cast %39 : vector<4x8x8x12xf32> to vector<256x12xf32>
    %c0_i32_36 = arith.constant 0 : i32
    %41 = arith.addi %0, %c0_i32_36 : i32
    %c0_37 = arith.constant 0 : index
    %42 = arith.index_cast %41 : i32 to index
    %c2_38 = arith.constant 2 : index
    %c2_39 = arith.constant 2 : index
    %c0_40 = arith.constant 0 : index
    %43 = vector.load %arg2[%c0_37, %42, %c2_38, %c2_39, %c0_40] : memref<1x10x10x10x12xf32, #tpu.memory_space<vmem>>, vector<1x4x8x8x12xf32>
    %44 = vector.shape_cast %43 : vector<1x4x8x8x12xf32> to vector<4x8x8x12xf32>
    %45 = vector.shape_cast %44 : vector<4x8x8x12xf32> to vector<256x12xf32>
    %c1_i32 = arith.constant 1 : i32
    %46 = arith.addi %0, %c1_i32 : i32
    %c0_41 = arith.constant 0 : index
    %47 = arith.index_cast %46 : i32 to index
    %c0_42 = arith.constant 0 : index
    %c0_43 = arith.constant 0 : index
    %c0_44 = arith.constant 0 : index
    %48 = vector.load %arg2[%c0_41, %47, %c0_42, %c0_43, %c0_44] : memref<1x10x10x10x12xf32, #tpu.memory_space<vmem>>, vector<1x4x8x8x12xf32>
    %49 = vector.shape_cast %48 : vector<1x4x8x8x12xf32> to vector<4x8x8x12xf32>
    %50 = vector.shape_cast %49 : vector<4x8x8x12xf32> to vector<256x12xf32>
    %c1_i32_45 = arith.constant 1 : i32
    %51 = arith.addi %0, %c1_i32_45 : i32
    %c0_46 = arith.constant 0 : index
    %52 = arith.index_cast %51 : i32 to index
    %c0_47 = arith.constant 0 : index
    %c1_48 = arith.constant 1 : index
    %c0_49 = arith.constant 0 : index
    %53 = vector.load %arg2[%c0_46, %52, %c0_47, %c1_48, %c0_49] : memref<1x10x10x10x12xf32, #tpu.memory_space<vmem>>, vector<1x4x8x8x12xf32>
    %54 = vector.shape_cast %53 : vector<1x4x8x8x12xf32> to vector<4x8x8x12xf32>
    %55 = vector.shape_cast %54 : vector<4x8x8x12xf32> to vector<256x12xf32>
    %c1_i32_50 = arith.constant 1 : i32
    %56 = arith.addi %0, %c1_i32_50 : i32
    %c0_51 = arith.constant 0 : index
    %57 = arith.index_cast %56 : i32 to index
    %c0_52 = arith.constant 0 : index
    %c2_53 = arith.constant 2 : index
    %c0_54 = arith.constant 0 : index
    %58 = vector.load %arg2[%c0_51, %57, %c0_52, %c2_53, %c0_54] : memref<1x10x10x10x12xf32, #tpu.memory_space<vmem>>, vector<1x4x8x8x12xf32>
    %59 = vector.shape_cast %58 : vector<1x4x8x8x12xf32> to vector<4x8x8x12xf32>
    %60 = vector.shape_cast %59 : vector<4x8x8x12xf32> to vector<256x12xf32>
    %c1_i32_55 = arith.constant 1 : i32
    %61 = arith.addi %0, %c1_i32_55 : i32
    %c0_56 = arith.constant 0 : index
    %62 = arith.index_cast %61 : i32 to index
    %c1_57 = arith.constant 1 : index
    %c0_58 = arith.constant 0 : index
    %c0_59 = arith.constant 0 : index
    %63 = vector.load %arg2[%c0_56, %62, %c1_57, %c0_58, %c0_59] : memref<1x10x10x10x12xf32, #tpu.memory_space<vmem>>, vector<1x4x8x8x12xf32>
    %64 = vector.shape_cast %63 : vector<1x4x8x8x12xf32> to vector<4x8x8x12xf32>
    %65 = vector.shape_cast %64 : vector<4x8x8x12xf32> to vector<256x12xf32>
    %c1_i32_60 = arith.constant 1 : i32
    %66 = arith.addi %0, %c1_i32_60 : i32
    %c0_61 = arith.constant 0 : index
    %67 = arith.index_cast %66 : i32 to index
    %c1_62 = arith.constant 1 : index
    %c1_63 = arith.constant 1 : index
    %c0_64 = arith.constant 0 : index
    %68 = vector.load %arg2[%c0_61, %67, %c1_62, %c1_63, %c0_64] : memref<1x10x10x10x12xf32, #tpu.memory_space<vmem>>, vector<1x4x8x8x12xf32>
    %69 = vector.shape_cast %68 : vector<1x4x8x8x12xf32> to vector<4x8x8x12xf32>
    %70 = vector.shape_cast %69 : vector<4x8x8x12xf32> to vector<256x12xf32>
    %c1_i32_65 = arith.constant 1 : i32
    %71 = arith.addi %0, %c1_i32_65 : i32
    %c0_66 = arith.constant 0 : index
    %72 = arith.index_cast %71 : i32 to index
    %c1_67 = arith.constant 1 : index
    %c2_68 = arith.constant 2 : index
    %c0_69 = arith.constant 0 : index
    %73 = vector.load %arg2[%c0_66, %72, %c1_67, %c2_68, %c0_69] : memref<1x10x10x10x12xf32, #tpu.memory_space<vmem>>, vector<1x4x8x8x12xf32>
    %74 = vector.shape_cast %73 : vector<1x4x8x8x12xf32> to vector<4x8x8x12xf32>
    %75 = vector.shape_cast %74 : vector<4x8x8x12xf32> to vector<256x12xf32>
    %c1_i32_70 = arith.constant 1 : i32
    %76 = arith.addi %0, %c1_i32_70 : i32
    %c0_71 = arith.constant 0 : index
    %77 = arith.index_cast %76 : i32 to index
    %c2_72 = arith.constant 2 : index
    %c0_73 = arith.constant 0 : index
    %c0_74 = arith.constant 0 : index
    %78 = vector.load %arg2[%c0_71, %77, %c2_72, %c0_73, %c0_74] : memref<1x10x10x10x12xf32, #tpu.memory_space<vmem>>, vector<1x4x8x8x12xf32>
    %79 = vector.shape_cast %78 : vector<1x4x8x8x12xf32> to vector<4x8x8x12xf32>
    %80 = vector.shape_cast %79 : vector<4x8x8x12xf32> to vector<256x12xf32>
    %c1_i32_75 = arith.constant 1 : i32
    %81 = arith.addi %0, %c1_i32_75 : i32
    %c0_76 = arith.constant 0 : index
    %82 = arith.index_cast %81 : i32 to index
    %c2_77 = arith.constant 2 : index
    %c1_78 = arith.constant 1 : index
    %c0_79 = arith.constant 0 : index
    %83 = vector.load %arg2[%c0_76, %82, %c2_77, %c1_78, %c0_79] : memref<1x10x10x10x12xf32, #tpu.memory_space<vmem>>, vector<1x4x8x8x12xf32>
    %84 = vector.shape_cast %83 : vector<1x4x8x8x12xf32> to vector<4x8x8x12xf32>
    %85 = vector.shape_cast %84 : vector<4x8x8x12xf32> to vector<256x12xf32>
    %c1_i32_80 = arith.constant 1 : i32
    %86 = arith.addi %0, %c1_i32_80 : i32
    %c0_81 = arith.constant 0 : index
    %87 = arith.index_cast %86 : i32 to index
    %c2_82 = arith.constant 2 : index
    %c2_83 = arith.constant 2 : index
    %c0_84 = arith.constant 0 : index
    %88 = vector.load %arg2[%c0_81, %87, %c2_82, %c2_83, %c0_84] : memref<1x10x10x10x12xf32, #tpu.memory_space<vmem>>, vector<1x4x8x8x12xf32>
    %89 = vector.shape_cast %88 : vector<1x4x8x8x12xf32> to vector<4x8x8x12xf32>
    %90 = vector.shape_cast %89 : vector<4x8x8x12xf32> to vector<256x12xf32>
    %c2_i32 = arith.constant 2 : i32
    %91 = arith.addi %0, %c2_i32 : i32
    %c0_85 = arith.constant 0 : index
    %92 = arith.index_cast %91 : i32 to index
    %c0_86 = arith.constant 0 : index
    %c0_87 = arith.constant 0 : index
    %c0_88 = arith.constant 0 : index
    %93 = vector.load %arg2[%c0_85, %92, %c0_86, %c0_87, %c0_88] : memref<1x10x10x10x12xf32, #tpu.memory_space<vmem>>, vector<1x4x8x8x12xf32>
    %94 = vector.shape_cast %93 : vector<1x4x8x8x12xf32> to vector<4x8x8x12xf32>
    %95 = vector.shape_cast %94 : vector<4x8x8x12xf32> to vector<256x12xf32>
    %c2_i32_89 = arith.constant 2 : i32
    %96 = arith.addi %0, %c2_i32_89 : i32
    %c0_90 = arith.constant 0 : index
    %97 = arith.index_cast %96 : i32 to index
    %c0_91 = arith.constant 0 : index
    %c1_92 = arith.constant 1 : index
    %c0_93 = arith.constant 0 : index
    %98 = vector.load %arg2[%c0_90, %97, %c0_91, %c1_92, %c0_93] : memref<1x10x10x10x12xf32, #tpu.memory_space<vmem>>, vector<1x4x8x8x12xf32>
    %99 = vector.shape_cast %98 : vector<1x4x8x8x12xf32> to vector<4x8x8x12xf32>
    %100 = vector.shape_cast %99 : vector<4x8x8x12xf32> to vector<256x12xf32>
    %c2_i32_94 = arith.constant 2 : i32
    %101 = arith.addi %0, %c2_i32_94 : i32
    %c0_95 = arith.constant 0 : index
    %102 = arith.index_cast %101 : i32 to index
    %c0_96 = arith.constant 0 : index
    %c2_97 = arith.constant 2 : index
    %c0_98 = arith.constant 0 : index
    %103 = vector.load %arg2[%c0_95, %102, %c0_96, %c2_97, %c0_98] : memref<1x10x10x10x12xf32, #tpu.memory_space<vmem>>, vector<1x4x8x8x12xf32>
    %104 = vector.shape_cast %103 : vector<1x4x8x8x12xf32> to vector<4x8x8x12xf32>
    %105 = vector.shape_cast %104 : vector<4x8x8x12xf32> to vector<256x12xf32>
    %c2_i32_99 = arith.constant 2 : i32
    %106 = arith.addi %0, %c2_i32_99 : i32
    %c0_100 = arith.constant 0 : index
    %107 = arith.index_cast %106 : i32 to index
    %c1_101 = arith.constant 1 : index
    %c0_102 = arith.constant 0 : index
    %c0_103 = arith.constant 0 : index
    %108 = vector.load %arg2[%c0_100, %107, %c1_101, %c0_102, %c0_103] : memref<1x10x10x10x12xf32, #tpu.memory_space<vmem>>, vector<1x4x8x8x12xf32>
    %109 = vector.shape_cast %108 : vector<1x4x8x8x12xf32> to vector<4x8x8x12xf32>
    %110 = vector.shape_cast %109 : vector<4x8x8x12xf32> to vector<256x12xf32>
    %c2_i32_104 = arith.constant 2 : i32
    %111 = arith.addi %0, %c2_i32_104 : i32
    %c0_105 = arith.constant 0 : index
    %112 = arith.index_cast %111 : i32 to index
    %c1_106 = arith.constant 1 : index
    %c1_107 = arith.constant 1 : index
    %c0_108 = arith.constant 0 : index
    %113 = vector.load %arg2[%c0_105, %112, %c1_106, %c1_107, %c0_108] : memref<1x10x10x10x12xf32, #tpu.memory_space<vmem>>, vector<1x4x8x8x12xf32>
    %114 = vector.shape_cast %113 : vector<1x4x8x8x12xf32> to vector<4x8x8x12xf32>
    %115 = vector.shape_cast %114 : vector<4x8x8x12xf32> to vector<256x12xf32>
    %c2_i32_109 = arith.constant 2 : i32
    %116 = arith.addi %0, %c2_i32_109 : i32
    %c0_110 = arith.constant 0 : index
    %117 = arith.index_cast %116 : i32 to index
    %c1_111 = arith.constant 1 : index
    %c2_112 = arith.constant 2 : index
    %c0_113 = arith.constant 0 : index
    %118 = vector.load %arg2[%c0_110, %117, %c1_111, %c2_112, %c0_113] : memref<1x10x10x10x12xf32, #tpu.memory_space<vmem>>, vector<1x4x8x8x12xf32>
    %119 = vector.shape_cast %118 : vector<1x4x8x8x12xf32> to vector<4x8x8x12xf32>
    %120 = vector.shape_cast %119 : vector<4x8x8x12xf32> to vector<256x12xf32>
    %c2_i32_114 = arith.constant 2 : i32
    %121 = arith.addi %0, %c2_i32_114 : i32
    %c0_115 = arith.constant 0 : index
    %122 = arith.index_cast %121 : i32 to index
    %c2_116 = arith.constant 2 : index
    %c0_117 = arith.constant 0 : index
    %c0_118 = arith.constant 0 : index
    %123 = vector.load %arg2[%c0_115, %122, %c2_116, %c0_117, %c0_118] : memref<1x10x10x10x12xf32, #tpu.memory_space<vmem>>, vector<1x4x8x8x12xf32>
    %124 = vector.shape_cast %123 : vector<1x4x8x8x12xf32> to vector<4x8x8x12xf32>
    %125 = vector.shape_cast %124 : vector<4x8x8x12xf32> to vector<256x12xf32>
    %c2_i32_119 = arith.constant 2 : i32
    %126 = arith.addi %0, %c2_i32_119 : i32
    %c0_120 = arith.constant 0 : index
    %127 = arith.index_cast %126 : i32 to index
    %c2_121 = arith.constant 2 : index
    %c1_122 = arith.constant 1 : index
    %c0_123 = arith.constant 0 : index
    %128 = vector.load %arg2[%c0_120, %127, %c2_121, %c1_122, %c0_123] : memref<1x10x10x10x12xf32, #tpu.memory_space<vmem>>, vector<1x4x8x8x12xf32>
    %129 = vector.shape_cast %128 : vector<1x4x8x8x12xf32> to vector<4x8x8x12xf32>
    %130 = vector.shape_cast %129 : vector<4x8x8x12xf32> to vector<256x12xf32>
    %c2_i32_124 = arith.constant 2 : i32
    %131 = arith.addi %0, %c2_i32_124 : i32
    %c0_125 = arith.constant 0 : index
    %132 = arith.index_cast %131 : i32 to index
    %c2_126 = arith.constant 2 : index
    %c2_127 = arith.constant 2 : index
    %c0_128 = arith.constant 0 : index
    %133 = vector.load %arg2[%c0_125, %132, %c2_126, %c2_127, %c0_128] : memref<1x10x10x10x12xf32, #tpu.memory_space<vmem>>, vector<1x4x8x8x12xf32>
    %134 = vector.shape_cast %133 : vector<1x4x8x8x12xf32> to vector<4x8x8x12xf32>
    %135 = vector.shape_cast %134 : vector<4x8x8x12xf32> to vector<256x12xf32>
    %136 = tpu.concatenate %5, %10, %15, %20, %25, %30, %35, %40, %45, %50, %55, %60, %65, %70, %75, %80 in 1 : vector<256x12xf32>, vector<256x12xf32>, vector<256x12xf32>, vector<256x12xf32>, vector<256x12xf32>, vector<256x12xf32>, vector<256x12xf32>, vector<256x12xf32>, vector<256x12xf32>, vector<256x12xf32>, vector<256x12xf32>, vector<256x12xf32>, vector<256x12xf32>, vector<256x12xf32>, vector<256x12xf32>, vector<256x12xf32> -> vector<256x192xf32>
    %137 = tpu.concatenate %85, %90, %95, %100, %105, %110, %115, %120, %125, %130, %135 in 1 : vector<256x12xf32>, vector<256x12xf32>, vector<256x12xf32>, vector<256x12xf32>, vector<256x12xf32>, vector<256x12xf32>, vector<256x12xf32>, vector<256x12xf32>, vector<256x12xf32>, vector<256x12xf32>, vector<256x12xf32> -> vector<256x132xf32>
    %138 = tpu.concatenate %136, %137 in 1 : vector<256x192xf32>, vector<256x132xf32> -> vector<256x324xf32>
    %c0_129 = arith.constant 0 : index
    %c0_130 = arith.constant 0 : index
    %139 = vector.load %arg3[%c0_129, %c0_130] : memref<32x324xf32, #tpu.memory_space<vmem>>, vector<32x324xf32>
    %cst = arith.constant dense<0.000000e+00> : vector<32x256xf32>
    %140 = tpu.matmul %139, %138, %cst {dimension_numbers = #tpu.dot_dimension_numbers<[1], [1], [0], [0], [0, 0, 1, 0], [], []>} : vector<32x324xf32>, vector<256x324xf32>, vector<32x256xf32> -> vector<32x256xf32>
    %c0_131 = arith.constant 0 : index
    %c0_132 = arith.constant 0 : index
    %141 = vector.load %arg4[%c0_131, %c0_132] : memref<32x1xf32, #tpu.memory_space<vmem>>, vector<32x1xf32>
    %142 = vector.broadcast %141 : vector<32x1xf32> to vector<32x256xf32>
    %143 = arith.addf %140, %142 : vector<32x256xf32>
    %144 = vector.extract_strided_slice %143 {offsets = [0, 0], sizes = [8, 256], strides = [1, 1]} : vector<32x256xf32> to vector<8x256xf32>
    %145 = arith.negf %144 : vector<8x256xf32>
    %146 = math.exp %145 : vector<8x256xf32>
    %cst_133 = arith.constant 1.000000e+00 : f32
    %147 = vector.broadcast %cst_133 : f32 to vector<8x256xf32>
    %148 = arith.addf %147, %146 : vector<8x256xf32>
    %149 = arith.divf %147, %148 : vector<8x256xf32>
    %150 = vector.extract_strided_slice %143 {offsets = [8, 0], sizes = [8, 256], strides = [1, 1]} : vector<32x256xf32> to vector<8x256xf32>
    %151 = arith.negf %150 : vector<8x256xf32>
    %152 = math.exp %151 : vector<8x256xf32>
    %cst_134 = arith.constant 1.000000e+00 : f32
    %153 = vector.broadcast %cst_134 : f32 to vector<8x256xf32>
    %154 = arith.addf %153, %152 : vector<8x256xf32>
    %155 = arith.divf %153, %154 : vector<8x256xf32>
    %156 = vector.extract_strided_slice %143 {offsets = [16, 0], sizes = [8, 256], strides = [1, 1]} : vector<32x256xf32> to vector<8x256xf32>
    %157 = arith.negf %156 : vector<8x256xf32>
    %158 = math.exp %157 : vector<8x256xf32>
    %cst_135 = arith.constant 1.000000e+00 : f32
    %159 = vector.broadcast %cst_135 : f32 to vector<8x256xf32>
    %160 = arith.addf %159, %158 : vector<8x256xf32>
    %161 = arith.divf %159, %160 : vector<8x256xf32>
    %162 = vector.extract_strided_slice %143 {offsets = [24, 0], sizes = [8, 256], strides = [1, 1]} : vector<32x256xf32> to vector<8x256xf32>
    %163 = math.tanh %162 : vector<8x256xf32>
    %c0_136 = arith.constant 0 : index
    %c0_137 = arith.constant 0 : index
    %c0_138 = arith.constant 0 : index
    %164 = vector.load %arg5[%c0_136, %c0_137, %c0_138] : memref<1x8x256xf32, #tpu.memory_space<vmem>>, vector<1x8x256xf32>
    %165 = vector.shape_cast %164 : vector<1x8x256xf32> to vector<8x256xf32>
    %166 = arith.mulf %165, %155 : vector<8x256xf32>
    %167 = arith.mulf %149, %163 : vector<8x256xf32>
    %168 = arith.addf %166, %167 : vector<8x256xf32>
    %169 = math.tanh %168 : vector<8x256xf32>
    %170 = arith.mulf %161, %169 : vector<8x256xf32>
    %c0_139 = arith.constant 0 : index
    %c0_140 = arith.constant 0 : index
    %c0_141 = arith.constant 0 : index
    %171 = vector.load %arg6[%c0_139, %c0_140, %c0_141] : memref<1x8x256xf32, #tpu.memory_space<vmem>>, vector<1x8x256xf32>
    %172 = vector.shape_cast %171 : vector<1x8x256xf32> to vector<8x256xf32>
    %173 = vector.shape_cast %170 : vector<8x256xf32> to vector<1x8x256xf32>
    tpu.vector_store %arg6[%c0_139, %c0_140, %c0_141], %173 {strides = array<i32>} : memref<1x8x256xf32, #tpu.memory_space<vmem>>, vector<1x8x256xf32>,
    %c0_142 = arith.constant 0 : index
    %c0_143 = arith.constant 0 : index
    %c0_144 = arith.constant 0 : index
    %174 = vector.load %arg7[%c0_142, %c0_143, %c0_144] : memref<1x8x256xf32, #tpu.memory_space<vmem>>, vector<1x8x256xf32>
    %175 = vector.shape_cast %174 : vector<1x8x256xf32> to vector<8x256xf32>
    %176 = vector.shape_cast %168 : vector<8x256xf32> to vector<1x8x256xf32>
    tpu.vector_store %arg7[%c0_142, %c0_143, %c0_144], %176 {strides = array<i32>} : memref<1x8x256xf32, #tpu.memory_space<vmem>>, vector<1x8x256xf32>,
    return
  }
  func.func @transform_0(%arg0: i32, %arg1: i32) -> (i32, i32, i32, i32, i32) {
    %c0_i32 = arith.constant 0 : i32
    %c0_i32_0 = arith.constant 0 : i32
    %c0_i32_1 = arith.constant 0 : i32
    %c0_i32_2 = arith.constant 0 : i32
    %c0_i32_3 = arith.constant 0 : i32
    return %arg0, %c0_i32, %c0_i32_0, %c0_i32_1, %c0_i32_2 : i32, i32, i32, i32, i32
  }
  func.func @transform_1(%arg0: i32, %arg1: i32) -> (i32, i32) {
    %c0_i32 = arith.constant 0 : i32
    %c0_i32_0 = arith.constant 0 : i32
    %c0_i32_1 = arith.constant 0 : i32
    return %c0_i32, %c0_i32_0 : i32, i32
  }
  func.func @transform_2(%arg0: i32, %arg1: i32) -> (i32, i32) {
    %c0_i32 = arith.constant 0 : i32
    %c0_i32_0 = arith.constant 0 : i32
    %c0_i32_1 = arith.constant 0 : i32
    return %c0_i32, %c0_i32_0 : i32, i32
  }
  func.func @transform_3(%arg0: i32, %arg1: i32) -> (i32, i32, i32) {
    %c0_i32 = arith.constant 0 : i32
    %c0_i32_0 = arith.constant 0 : i32
    return %arg0, %c0_i32, %arg1 : i32, i32, i32
  }
  func.func @transform_4(%arg0: i32, %arg1: i32) -> (i32, i32, i32) {
    %c0_i32 = arith.constant 0 : i32
    %c0_i32_0 = arith.constant 0 : i32
    return %arg0, %c0_i32, %arg1 : i32, i32, i32
  }
  func.func @transform_5(%arg0: i32, %arg1: i32) -> (i32, i32, i32) {
    %c0_i32 = arith.constant 0 : i32
    %c0_i32_0 = arith.constant 0 : i32
    return %arg0, %c0_i32, %arg1 : i32, i32, i32
  }
}

</mosaic_0001>

<bundles_post_ra>
// kernel: clstm_cell_forward.1
= control target key start
LH: loop header
LB: loop body
LE: loop exit
PB: predicated region body
PF: predicated region fallthrough
CT: control target
= control target key end

     0   :  { %s9393_s18 = smov 0   ;;  %s9395_s19 = smov 0   ;;  %s14459_s0 = inlined_call_operand.vmem [shape: f32[2,10,10,10,12], index: 0, kind: input, shape index: {}]   ;;  %s14460_s1 = inlined_call_operand.vmem [shape: f32[32,324], index: 1, kind: input, shape index: {}]   ;;  %s14461_s2 = inlined_call_operand.vmem [shape: f32[32,1], index: 2, kind: input, shape index: {}]   ;;  %s14462_s3 = inlined_call_operand.vmem [shape: f32[2,8,512], index: 3, kind: input, shape index: {}]   ;;  %s14463_s4 = inlined_call_operand.vmem [shape: f32[2,8,512], index: 4, kind: output, shape index: {0}]   ;;  %s14464_s5 = inlined_call_operand.vmem [shape: f32[2,8,512], index: 5, kind: output, shape index: {1}]  }
   0x1   :  { %s9397_s20 = smov 0   ;;  %s9399_s21 = smov 0  }
   0x2   :  { %s9401_s22 = smov 0  }
   0x3 LB: > { %s25_s23 = sadd.s32 1, %s9336_s20  ;;  %s28_s24 = sadd.s32 1, %s9340_s21  ;;  %s9344_s22 = sphi %s9401_s22, %s16_s22   ;;  %s9340_s21 = sphi %s9399_s21, %s15439_s21   ;;  %s9336_s20 = sphi %s9397_s20, %s15438_s20   ;;  %s9332_s19 = sphi %s9395_s19, %s15437_s19   ;;  %s9328_s18 = sphi %s9393_s18, %s15436_s18  }
   0x4   : > { %p26_p0 = scmp.ge.s32.totalorder %s25_s23, 2  ;;  %p5998_p1 = scmp.ge.s32.totalorder %s9344_s22, 1 }
   0x5   : > { %p223_p2 = scmp.lt.s32.totalorder %s9344_s22, 5 }
   0x6   : > { %s15441_s23 = smov (%p26_p0, %s25_s23), 0  ;;  %s15443_s24 = smov (!%p26_p0, %s28_s24), %s9340_s21 }
   0x7   : > { %p224_p3 = pnand %p5998_p1, %p223_p2  ;;  %p30_p4 = scmp.ge.s32.totalorder %s15443_s24, 2 }
   0x9   : > { %s15445_s24 = smov (%p30_p4, %s15443_s24), 0  ;;  %227 = sbr.rel (%p224_p3) target bundleno = 1396 (0x574), region = 36 }
  0x10   : > { %p273_p5 = scmp.lt.s32.totalorder %s9332_s19, 1  ;;  %s6010_s25 = smul.u32 640, %s9328_s18  ;;  %vm3443_vm0 = vcmask 31744   ;;  %vm3476_vm1 = vcmask 130048   ;;  %vm3509_vm2 = vcmask 228352   ;;  %vm3542_vm3 = vcmask 326656  }
  0x11   : > { %s9346_s6 = smov 12   ;;  %s9347_s7 = smov 24   ;;  %vm3575_vm4 = vcmask 424960   ;;  %vm3113_vm5 = vcmask 97280   ;;  %vm3146_vm6 = vcmask 195584   ;;  %vm3179_vm7 = vcmask 293888  }
  0x12   : > { %s15447_s19 = smov (!%p273_p5, %s9332_s19), 1  ;;  %s9348_s8 = smov 36   ;;  %vm3212_vm8 = vcmask 392192   ;;  %vm3245_vm9 = vcmask 490496   ;;  %vm3278_vm10 = vcmask 588800   ;;  %vm3311_vm11 = vcmask 687104  }
  0x13   : > { %s7003_s26 = smul.u32 1600, %s15447_s19  ;;  %s9349_s9 = smov 48   ;;  %vm3344_vm12 = vcmask 785408   ;;  %vm3377_vm13 = vcmask 883712   ;;  %vm3410_vm14 = vcmask 982016   ;;  %vm5368_vm15 = vcmask 523264  }
  0x14   : > { %s9350_s10 = smov 60   ;;  %s9351_s11 = smov 72  }
  0x15   : > { %s277_s29 = scalar_lea.vmem %s14459_s0, %s7003_s26  ;;  %s9352_s12 = smov 84  }
  0x16   : > { %s9432_s30 = scalar_lea.vmem %s277_s29, %s6010_s25  ;;  %s9353_s13 = smov 96  }
  0x17   : > { %v9435_v0 = vld [vmem:[%s9432_s30 + $0x41] sm:$0xff]  ;;  %v9438_v1 = vld [vmem:[%s9432_s30 + $0x51] sm:$0xff]  ;;  %s9354_s14 = smov 108   ;;  %s9355_s15 = smov 120  }
  0x18   : > { %v343_v2 = vld [vmem:[%s9432_s30 + $0x1] sm:$0xff]  ;;  %v7071_v3 = vpack.i.bf16 %v9438_v1, %v9435_v0  ;;  %v9444_v4 = vld [vmem:[%s9432_s30 + $0x11] sm:$0xff]  ;;  %s9356_s16 = smov 4   ;;  %s9357_s17 = smov 16  }
  0x19   : > { %v9447_v5 = vld [vmem:[%s9432_s30 + $0x61] sm:$0xff]  ;;  %v9450_v6 = vld [vmem:[%s9432_s30 + $0x71] sm:$0xff]  ;;  %v7061_v7 = vpack.i.bf16 %v9444_v4, %v343_v2  ;;  %s9358_s25 = smov 28   ;;  %s9359_s26 = smov 40  }
  0x1a   : > { %v9454_v8 = vld [vmem:[%s9432_s30 + $0x21] sm:$0xff]  ;;  %v9457_v9 = vld [vmem:[%s9432_s30 + $0x31] sm:$0xff]  ;;  %7072 = vrot.lane.b32.xlu1 %v7071_v3, %s9346_s6  ;;  %v7076_v11 = vpack.i.bf16 %v9450_v6, %v9447_v5  ;;  %s9360_s27 = smov 52   ;;  %s9361_s28 = smov 64  }
  0x1b   : > { %v9465_v12 = vld [vmem:[%s9432_s30 + $0xc1] sm:$0xff]  ;;  %v9468_v13 = vld [vmem:[%s9432_s30 + $0xb1] sm:$0xff]  ;;  %7062 = vrot.lane.b32.xlu0 %v7061_v7, %s9346_s6  ;;  %v7066_v16 = vpack.i.bf16 %v9457_v9, %v9454_v8 }
  0x1c   : > { %v9478_v17 = vld [vmem:[%s9432_s30 + $0xd1] sm:$0xff]  ;;  %v9481_v18 = vld [vmem:[%s9432_s30 + $0xe1] sm:$0xff] }
  0x1d   : > { %v351_v20 = vld [vmem:[%s9432_s30 + $0xa1] sm:$0xff]  ;;  %v9490_v22 = vld [vmem:[%s9432_s30 + $0xf1] sm:$0xff]  ;;  %v7086_v28 = vpack.i.bf16 %v9478_v17, %v9465_v12 }
  0x1e   : > { %v9487_v21 = vld [vmem:[%s9432_s30 + $0x101] sm:$0xff]  ;;  %v9498_v25 = vld [vmem:[%s9432_s30 + $0x171] sm:$0xff]  ;;  %7077 = vrot.lane.b32.xlu1 %v7076_v11, %s9346_s6  ;;  %v7081_v33 = vpack.i.bf16 %v9468_v13, %v351_v20  ;;  %v7091_v49 = vpack.i.bf16 %v9490_v22, %v9481_v18 }
  0x1f   : > { %v9495_v24 = vld [vmem:[%s9432_s30 + $0x161] sm:$0xff]  ;;  %v9501_v26 = vld [vmem:[%s9432_s30 + $0x151] sm:$0xff]  ;;  %7067 = vrot.lane.b32.xlu0 %v7066_v16, %s9346_s6 }
  0x20   : > { %v9509_v29 = vld [vmem:[%s9432_s30 + $0x1a1] sm:$0xff]  ;;  %v9515_v31 = vld [vmem:[%s9432_s30 + $0x191] sm:$0xff]  ;;  %v7106_v61 = vpack.i.bf16 %v9498_v25, %v9495_v24 }
  0x21   : > { %v9512_v30 = vld [vmem:[%s9432_s30 + $0x181] sm:$0xff]  ;;  %v9522_v34 = vld [vmem:[%s9432_s30 + $0x111] sm:$0xff] }
  0x22   : > { %v9529_v37 = vld [vmem:[%s9432_s30 + $0x201] sm:$0xff]  ;;  %v9532_v38 = vld [vmem:[%s9432_s30 + $0x211] sm:$0xff]  ;;  %7087 = vrot.lane.b32.xlu1 %v7086_v28, %s9346_s6  ;;  %v7096_v44 = vpack.i.bf16 %v9522_v34, %v9487_v21  ;;  %v7111_v16 = vpack.i.bf16 %v9515_v31, %v9512_v30 }
  0x23   : > { %v9535_v39 = vld [vmem:[%s9432_s30 + $0x1f1] sm:$0xff]  ;;  %v9538_v40 = vld [vmem:[%s9432_s30 + $0x241] sm:$0xff]  ;;  %7082 = vrot.lane.b32.xlu0 %v7081_v33, %s9346_s6  ;;  %v7126_v3 = vpack.i.bf16 %v9532_v38, %v9529_v37 }
  0x24   : > { %v9541_v41 = vld [vmem:[%s9432_s30 + $0x221] sm:$0xff]  ;;  %v9544_v42 = vld [vmem:[%s9432_s30 + $0x231] sm:$0xff] }
  0x25   : > { %v9552_v45 = vld [vmem:[%s9432_s30 + $0x22] sm:$0xff]  ;;  %v9555_v46 = vld [vmem:[%s9432_s30 + $0x12] sm:$0xff] }
  0x26   : > { %v9565_v50 = vld [vmem:[%s9432_s30 + $0x32] sm:$0xff]  ;;  %v9568_v51 = vld [vmem:[%s9432_s30 + $0x42] sm:$0xff]  ;;  %7097 = vrot.lane.b32.xlu1 %v7096_v44, %s9346_s6 }
  0x27   : > { %v359_v53 = vld [vmem:[%s9432_s30 + $0x141] sm:$0xff]  ;;  %v9577_v55 = vld [vmem:[%s9432_s30 + $0x52] sm:$0xff]  ;;  %7092 = vrot.lane.b32.xlu0 %v7091_v49, %s9346_s6 }
  0x28   : > { %v9574_v54 = vld [vmem:[%s9432_s30 + $0x62] sm:$0xff]  ;;  %v9585_v58 = vld [vmem:[%s9432_s30 + $0xd2] sm:$0xff]  ;;  %v7101_v7 = vpack.i.bf16 %v9501_v26, %v359_v53 }
  0x29   : > { %v9582_v57 = vld [vmem:[%s9432_s30 + $0xc2] sm:$0xff]  ;;  %v9588_v59 = vld [vmem:[%s9432_s30 + $0xb2] sm:$0xff] }
  0x2a   : > { %v9596_v62 = vld [vmem:[%s9432_s30 + $0x102] sm:$0xff]  ;;  %v9602_v2 = vld [vmem:[%s9432_s30 + $0xf2] sm:$0xff]  ;;  %7107 = vrot.lane.b32.xlu1 %v7106_v61, %s9346_s6 }
  0x2b   : > { %v9599_v63 = vld [vmem:[%s9432_s30 + $0xe2] sm:$0xff]  ;;  %v9609_v11 = vld [vmem:[%s9432_s30 + $0x1b1] sm:$0xff]  ;;  %7102 = vrot.lane.b32.xlu0 %v7101_v7, %s9346_s6 }
  0x2c   : > { %v9616_v28 = vld [vmem:[%s9432_s30 + $0x162] sm:$0xff]  ;;  %v9619_v33 = vld [vmem:[%s9432_s30 + $0x152] sm:$0xff]  ;;  %v7116_v20 = vpack.i.bf16 %v9609_v11, %v9509_v29 }
  0x2d   : > { %v9622_v44 = vld [vmem:[%s9432_s30 + $0x172] sm:$0xff]  ;;  %v9625_v49 = vld [vmem:[%s9432_s30 + $0x182] sm:$0xff] }
  0x2e   : > { %v367_v60 = vld [vmem:[%s9432_s30 + $0x1e1] sm:$0xff]  ;;  %v9642_v53 = vld [vmem:[%s9432_s30 + $0x192] sm:$0xff]  ;;  %7117 = vrot.lane.b32.xlu1 %v7116_v20, %s9346_s6 }
  0x2f   : > { %v9639_v52 = vld [vmem:[%s9432_s30 + $0x1a2] sm:$0xff]  ;;  %7112 = vrot.lane.b32.xlu0 %v7111_v16, %s9346_s6  ;;  %v7121_v7 = vpack.i.bf16 %v9535_v39, %v367_v60  ;;  %v9652_v56 = vld [vmem:[%s9432_s30 + $0x251] sm:$0xff]  ;;  %v7131_v16 = vpack.i.bf16 %v9544_v42, %v9541_v41 }
  0x30   : > { %v9655_v48 = vld [vmem:[%s9432_s30 + $0x202] sm:$0xff]  ;;  %v9658_v43 = vld [vmem:[%s9432_s30 + $0x212] sm:$0xff]  ;;  %v7136_v60 = vpack.i.bf16 %v9652_v56, %v9538_v40 }
  0x31   : > { %14751 = vst [vmem:[#allocation2_spill] sm:$0xff] %v9655_v48  ;;  %v9661_v47 = vld [vmem:[%s9432_s30 + $0x1f2] sm:$0xff]  ;;  %v9664_v61 = vld [vmem:[%s9432_s30 + $0x222] sm:$0xff] }
  0x32   : > { %14752 = vst [vmem:[#allocation3_spill] sm:$0xff] %v9661_v47  ;;  %7127 = vrot.lane.b32.xlu1 %v7126_v3, %s9346_s6  ;;  %v375_v32 = vld [vmem:[%s9432_s30 + $0x2] sm:$0xff]  ;;  %v9681_v27 = vld [vmem:[%s9432_s30 + $0x232] sm:$0xff]  ;;  %v7146_v3 = vpack.i.bf16 %v9565_v50, %v9552_v45 }
  0x33   : > { %7122 = vrot.lane.b32.xlu0 %v7121_v7, %s9346_s6  ;;  %v9678_v35 = vld [vmem:[%s9432_s30 + $0x242] sm:$0xff]  ;;  %14754 = vst [vmem:[#allocation5_spill] sm:$0xff] %v9681_v27  ;;  %v7141_v7 = vpack.i.bf16 %v9555_v46, %v375_v32  ;;  %v9691_v36 = vld [vmem:[%s9432_s30 + $0x72] sm:$0xff]  ;;  %v7166_v32 = vpack.i.bf16 %v9585_v58, %v9582_v57 }
  0x34   : > { %14753 = vst [vmem:[#allocation4_spill] sm:$0xff] %v9678_v35  ;;  %v7156_v19 = vpack.i.bf16 %v9691_v36, %v9574_v54  ;;  %v383_v20 = vld [vmem:[%s9432_s30 + $0xa2] sm:$0xff]  ;;  %v9745_v15 = vld [vmem:[%s9432_s30 + $0x30] sm:$0xff] }
  0x35   : > { %v391_v23 = vld [vmem:[%s9432_s30 + $0x142] sm:$0xff]  ;;  %14755 = vst [vmem:[#allocation6_spill] sm:$0xff] %v9745_v15 }
  0x36   : > { %7137 = vrot.lane.b32.xlu1 %v7136_v60, %s9346_s6  ;;  %v7151_v60 = vpack.i.bf16 %v9577_v55, %v9568_v51  ;;  %v399_v10 = vld [vmem:[%s9432_s30 + $0x1e2] sm:$0xff] }
  0x37   : > { %7132 = vrot.lane.b32.xlu0 %v7131_v16, %s9346_s6  ;;  %v7161_v16 = vpack.i.bf16 %v9588_v59, %v383_v20  ;;  %v7186_v20 = vpack.i.bf16 %v9622_v44, %v9616_v28  ;;  %v9752_v14 = vld [vmem:[%s9432_s30 + $0x20] sm:$0xff] }
  0x38   : > { %14757 = vst [vmem:[#allocation8_spill] sm:$0xff] %v9752_v14 }
  0x3a   : > { %7147 = vrot.lane.b32.xlu1 %v7146_v3, %s9347_s7  ;;  %v9706_v3 = vld [vmem:[%s9432_s30 + $0x112] sm:$0xff] }
  0x3b   : > { %7142 = vrot.lane.b32.xlu0 %v7141_v7, %s9347_s7  ;;  %v7176_v7 = vpack.i.bf16 %v9706_v3, %v9596_v62 }
  0x3e   : > { %7157 = vrot.lane.b32.xlu1 %v7156_v19, %s9347_s7  ;;  %v7171_v19 = vpack.i.bf16 %v9602_v2, %v9599_v63 }
  0x3f   : > { %7152 = vrot.lane.b32.xlu0 %v7151_v60, %s9347_s7  ;;  %v7181_v60 = vpack.i.bf16 %v9619_v33, %v391_v23  ;;  %v7206_v23 = vpack.i.bf16 %v9658_v43, %v9655_v48  ;;  %v9769_v48 = vld [vmem:[%s9432_s30 + $0x60] sm:$0xff] }
  0x40   : > { %14761 = vst [vmem:[#allocation12_spill] sm:$0xff] %v9769_v48 }
  0x42   : > { %7167 = vrot.lane.b32.xlu1 %v7166_v32, %s9347_s7  ;;  %v9721_v32 = vld [vmem:[%s9432_s30 + $0x1b2] sm:$0xff] }
  0x43   : > { %7162 = vrot.lane.b32.xlu0 %v7161_v16, %s9347_s7  ;;  %v7196_v16 = vpack.i.bf16 %v9721_v32, %v9639_v52 }
  0x46   : > { %7177 = vrot.lane.b32.xlu1 %v7176_v7, %s9347_s7  ;;  %v7191_v7 = vpack.i.bf16 %v9642_v53, %v9625_v49 }
  0x47   : > { %7172 = vrot.lane.b32.xlu0 %v7171_v19, %s9347_s7  ;;  %v7201_v19 = vpack.i.bf16 %v9661_v47, %v399_v10  ;;  %v6011_v10 = vld [vmem:[%s9432_s30 + $0x10] sm:$0xff] }
  0x48   : > { %v9766_v47 = vld [vmem:[%s9432_s30 + $0x50] sm:$0xff] }
  0x49   : > { %14760 = vst [vmem:[#allocation11_spill] sm:$0xff] %v9766_v47 }
  0x4a   : > { %7187 = vrot.lane.b32.xlu1 %v7186_v20, %s9347_s7  ;;  %v9736_v20 = vld [vmem:[%s9432_s30 + $0x252] sm:$0xff] }
  0x4b   : > { %7182 = vrot.lane.b32.xlu0 %v7181_v60, %s9347_s7  ;;  %v7216_v60 = vpack.i.bf16 %v9736_v20, %v9678_v35  ;;  %v9763_v35 = vld [vmem:[%s9432_s30 + $0x80] sm:$0xff] }
  0x4c   : > { %14759 = vst [vmem:[#allocation10_spill] sm:$0xff] %v9763_v35 }
  0x4e   : > { %7197 = vrot.lane.b32.xlu1 %v7196_v16, %s9347_s7  ;;  %v7211_v16 = vpack.i.bf16 %v9681_v27, %v9664_v61  ;;  %v9760_v27 = vld [vmem:[%s9432_s30 + $0x70] sm:$0xff] }
  0x4f   : > { %7192 = vrot.lane.b32.xlu0 %v7191_v7, %s9347_s7  ;;  %v9748_v7 = vld [vmem:[%s9432_s30 + $0x40] sm:$0xff]  ;;  %14758 = vst [vmem:[#allocation9_spill] sm:$0xff] %v9760_v27 }
  0x50   : > { %14756 = vst [vmem:[#allocation7_spill] sm:$0xff] %v9748_v7 }
  0x52   : > { %7207 = vrot.lane.b32.xlu1 %v7206_v23, %s9347_s7  ;;  %v7226_v23 = vpack.i.bf16 %v9748_v7, %v9745_v15  ;;  %v9781_v15 = vld [vmem:[%s9432_s30 + $0xe0] sm:$0xff] }
  0x53   : > { %7202 = vrot.lane.b32.xlu0 %v7201_v19, %s9347_s7  ;;  %v7221_v19 = vpack.i.bf16 %v9752_v14, %v6011_v10  ;;  %v9778_v10 = vld [vmem:[%s9432_s30 + $0xd0] sm:$0xff]  ;;  %14763 = vst [vmem:[#allocation14_spill] sm:$0xff] %v9781_v15  ;;  %v9785_v7 = vld [vmem:[%s9432_s30 + $0xc0] sm:$0xff] }
  0x54   : > { %14762 = vst [vmem:[#allocation13_spill] sm:$0xff] %v9778_v10  ;;  %v6019_v14 = vld [vmem:[%s9432_s30 + $0xb0] sm:$0xff]  ;;  %14764 = vst [vmem:[#allocation15_spill] sm:$0xff] %v9785_v7 }
  0x56   : > { %7217 = vrot.lane.b32.xlu1 %v7216_v60, %s9347_s7  ;;  %v7236_v60 = vpack.i.bf16 %v9763_v35, %v9760_v27  ;;  %v9793_v27 = vld [vmem:[%s9432_s30 + $0x110] sm:$0xff] }
  0x57   : > { %7212 = vrot.lane.b32.xlu0 %v7211_v16, %s9347_s7  ;;  %v7231_v16 = vpack.i.bf16 %v9769_v48, %v9766_v47  ;;  %14765 = vst [vmem:[#allocation16_spill] sm:$0xff] %v9793_v27  ;;  %v9796_v48 = vld [vmem:[%s9432_s30 + $0x120] sm:$0xff]  ;;  %v9799_v35 = vld [vmem:[%s9432_s30 + $0xf0] sm:$0xff] }
  0x58   : > { %14766 = vst [vmem:[#allocation17_spill] sm:$0xff] %v9796_v48  ;;  %14767 = vst [vmem:[#allocation18_spill] sm:$0xff] %v9799_v35  ;;  %v9802_v47 = vld [vmem:[%s9432_s30 + $0x100] sm:$0xff] }
  0x59   : > { %14768 = vst [vmem:[#allocation19_spill] sm:$0xff] %v9802_v47 }
  0x5a   : > { %7227 = vrot.lane.b32.xlu1 %v7226_v23, %s9348_s8  ;;  %v7246_v23 = vpack.i.bf16 %v9781_v15, %v9778_v10  ;;  %v9814_v10 = vld [vmem:[%s9432_s30 + $0x180] sm:$0xff] }
  0x5b   : > { %7222 = vrot.lane.b32.xlu0 %v7221_v19, %s9348_s8  ;;  %v7241_v19 = vpack.i.bf16 %v9785_v7, %v6019_v14  ;;  %v7251_v14 = vpack.i.bf16 %v9802_v47, %v9799_v35  ;;  %14770 = vst [vmem:[#allocation21_spill] sm:$0xff] %v9814_v10  ;;  %v6027_v7 = vld [vmem:[%s9432_s30 + $0x150] sm:$0xff]  ;;  %v9818_v15 = vld [vmem:[%s9432_s30 + $0x160] sm:$0xff] }
  0x5c   : > { %14771 = vst [vmem:[#allocation22_spill] sm:$0xff] %v9818_v15  ;;  %v9829_v47 = vld [vmem:[%s9432_s30 + $0x1c0] sm:$0xff] }
  0x5d   : > { %14773 = vst [vmem:[#allocation24_spill] sm:$0xff] %v9829_v47  ;;  %v9835_v35 = vld [vmem:[%s9432_s30 + $0x1a0] sm:$0xff] }
  0x5e   : > { %7237 = vrot.lane.b32.xlu1 %v7236_v60, %s9348_s8  ;;  %v7256_v60 = vpack.i.bf16 %v9796_v48, %v9793_v27  ;;  %v9826_v27 = vld [vmem:[%s9432_s30 + $0x1b0] sm:$0xff]  ;;  %14775 = vst [vmem:[#allocation26_spill] sm:$0xff] %v9835_v35 }
  0x5f   : > { %7232 = vrot.lane.b32.xlu0 %v7231_v16, %s9348_s8  ;;  %v9811_v16 = vld [vmem:[%s9432_s30 + $0x170] sm:$0xff]  ;;  %14772 = vst [vmem:[#allocation23_spill] sm:$0xff] %v9826_v27 }
  0x60   : > { %14769 = vst [vmem:[#allocation20_spill] sm:$0xff] %v9811_v16  ;;  %v9832_v48 = vld [vmem:[%s9432_s30 + $0x190] sm:$0xff] }
  0x61   : > { %14774 = vst [vmem:[#allocation25_spill] sm:$0xff] %v9832_v48 }
  0x62   : > { %7247 = vrot.lane.b32.xlu1 %v7246_v23, %s9348_s8  ;;  %v7266_v23 = vpack.i.bf16 %v9814_v10, %v9811_v16  ;;  %v9847_v16 = vld [vmem:[%s9432_s30 + $0x220] sm:$0xff] }
  0x63   : > { %7242 = vrot.lane.b32.xlu0 %v7241_v19, %s9348_s8  ;;  %v7261_v19 = vpack.i.bf16 %v9818_v15, %v6027_v7  ;;  %v7271_v7 = vpack.i.bf16 %v9835_v35, %v9832_v48  ;;  %v6035_v15 = vld [vmem:[%s9432_s30 + $0x1f0] sm:$0xff]  ;;  %v9851_v10 = vld [vmem:[%s9432_s30 + $0x200] sm:$0xff] }
  0x64   : > { %v9862_v35 = vld [vmem:[%s9432_s30 + $0x260] sm:$0xff] }
  0x65   : > { %v9868_v48 = vld [vmem:[%s9432_s30 + $0x240] sm:$0xff] }
  0x66   : > { %7257 = vrot.lane.b32.xlu1 %v7256_v60, %s9348_s8  ;;  %v7276_v60 = vpack.i.bf16 %v9829_v47, %v9826_v27  ;;  %v9859_v27 = vld [vmem:[%s9432_s30 + $0x250] sm:$0xff] }
  0x67   : > { %7252 = vrot.lane.b32.xlu0 %v7251_v14, %s9348_s8  ;;  %v9844_v14 = vld [vmem:[%s9432_s30 + $0x210] sm:$0xff]  ;;  %14776 = vst [vmem:[#allocation27_spill] sm:$0xff] %v9859_v27 }
  0x68   : > { %v9865_v47 = vld [vmem:[%s9432_s30 + $0x230] sm:$0xff] }
  0x6a   : > { %7267 = vrot.lane.b32.xlu1 %v7266_v23, %s9348_s8  ;;  %v7286_v23 = vpack.i.bf16 %v9847_v16, %v9844_v14 }
  0x6b   : > { %7262 = vrot.lane.b32.xlu0 %v7261_v19, %s9348_s8  ;;  %v7281_v19 = vpack.i.bf16 %v9851_v10, %v6035_v15  ;;  %v9879_v15 = vld [vmem:[%s9432_s30 + $0x81] sm:$0xff] }
  0x6e   : > { %7277 = vrot.lane.b32.xlu1 %v7276_v60, %s9348_s8  ;;  %v7296_v60 = vpack.i.bf16 %v9862_v35, %v9859_v27  ;;  %v7316_v27 = vpack.i.bf16 %v9879_v15, %v9450_v6 }
  0x6f   : > { %7272 = vrot.lane.b32.xlu0 %v7271_v7, %s9348_s8  ;;  %v7291_v7 = vpack.i.bf16 %v9868_v48, %v9865_v47 }
  0x72   : > { %7287 = vrot.lane.b32.xlu1 %v7286_v23, %s9348_s8  ;;  %v14777_v23 = vpack.i.bf16 %v9435_v0, %v9457_v9  ;;  %v14780_v0 = vpack.i.bf16 %v9481_v18, %v9478_v17  ;;  %v14787_v18 = vpack.i.bf16 %v9509_v29, %v9515_v31  ;;  %v14794_v31 = vpack.i.bf16 %v9538_v40, %v9544_v42 }
  0x73   : > { %7282 = vrot.lane.b32.xlu0 %v7281_v19, %s9348_s8  ;;  %v14778_v19 = vpack.i.bf16 %v9454_v8, %v9444_v4  ;;  %v14781_v4 = vpack.i.bf16 %v9465_v12, %v9468_v13  ;;  %v14783_v8 = vpack.i.bf16 %v9512_v30, %v9498_v25  ;;  %v14784_v12 = vpack.i.bf16 %v9495_v24, %v9501_v26 }
  0x74   : > { %v14790_v24 = vpack.i.bf16 %v9541_v41, %v9532_v38  ;;  %v14798_v40 = vpack.i.bf16 %v9552_v45, %v9555_v46  ;;  %v14804_v45 = vpack.i.bf16 %v9599_v63, %v9585_v58  ;;  %v14808_v58 = vpack.i.bf16 %v9596_v62, %v9602_v2  ;;  %v10015_v63 = vld [vmem:[%s9432_s30 + $0x1c2] sm:$0xff] }
  0x76   : > { %7297 = vrot.lane.b32.xlu1 %v7296_v60, %s9348_s8  ;;  %v14779_v60 = vpack.i.bf16 %v9447_v5, %v9438_v1  ;;  %v14782_v1 = vpack.i.bf16 %v9487_v21, %v9490_v22  ;;  %v9915_v5 = vld [vmem:[%s9432_s30 + $0x1c1] sm:$0xff] }
  0x77   : > { %7292 = vrot.lane.b32.xlu0 %v7291_v7, %s9348_s8  ;;  %v9897_v7 = vld [vmem:[%s9432_s30 + $0x121] sm:$0xff]  ;;  %v7356_v9 = vpack.i.bf16 %v9915_v5, %v9609_v11 }
  0x78   : > { %v7336_v6 = vpack.i.bf16 %v9897_v7, %v9522_v34  ;;  %v9937_v21 = vld [vmem:[%s9432_s30 + $0x261] sm:$0xff] }
  0x79   : > { %v7376_v26 = vpack.i.bf16 %v9937_v21, %v9652_v56  ;;  %v9963_v34 = vld [vmem:[%s9432_s30 + $0x82] sm:$0xff] }
  0x7a   : > { %7307 = vrot.lane.b32.xlu1 %v14777_v23, %s9349_s9  ;;  %v14805_v23 = vpack.i.bf16 %v9582_v57, %v9588_v59  ;;  %v14811_v57 = vpack.i.bf16 %v9625_v49, %v9622_v44  ;;  %v7436_v59 = vpack.i.bf16 %v10015_v63, %v9721_v32  ;;  %v14815_v44 = vpack.i.bf16 %v9639_v52, %v9642_v53  ;;  %v10041_v49 = vld [vmem:[%s9432_s30 + $0x262] sm:$0xff] }
  0x7b   : > { %7302 = vrot.lane.b32.xlu0 %v14778_v19, %s9349_s9 }
  0x7e   : > { %7317 = vrot.lane.b32.xlu1 %v7316_v27, %s9349_s9  ;;  %v14791_v27 = vpack.i.bf16 %v9529_v37, %v9535_v39  ;;  %v14797_v37 = vpack.i.bf16 %v9568_v51, %v9565_v50  ;;  %v7396_v39 = vpack.i.bf16 %v9963_v34, %v9691_v36  ;;  %v14801_v50 = vpack.i.bf16 %v9574_v54, %v9577_v55  ;;  %v9989_v51 = vld [vmem:[%s9432_s30 + $0x122] sm:$0xff] }
  0x7f   : > { %7312 = vrot.lane.b32.xlu0 %v14779_v60, %s9349_s9  ;;  %v7416_v46 = vpack.i.bf16 %v9989_v51, %v9706_v3  ;;  %v14812_v60 = vpack.i.bf16 %v9616_v28, %v9619_v33  ;;  %v14818_v28 = vpack.i.bf16 %v9664_v61, %v9658_v43  ;;  %v7456_v33 = vpack.i.bf16 %v10041_v49, %v9736_v20  ;;  %v14826_v43 = vld [vmem:[#allocation4_spill] sm:$0xff]  ;;  %v14827_v61 = vld [vmem:[#allocation5_spill] sm:$0xff] }
  0x80   : > { %v14829_v20 = vld [vmem:[#allocation8_spill] sm:$0xff] }
  0x82   : > { %7327 = vrot.lane.b32.xlu1 %v14780_v0, %s9349_s9 }
  0x83   : > { %7322 = vrot.lane.b32.xlu0 %v14781_v4, %s9349_s9  ;;  %v14820_v4 = vld [vmem:[#allocation3_spill] sm:$0xff] }
  0x86   : > { %7337 = vrot.lane.b32.xlu1 %v7336_v6, %s9349_s9  ;;  %v14819_v6 = vld [vmem:[#allocation2_spill] sm:$0xff] }
  0x87   : > { %7332 = vrot.lane.b32.xlu0 %v14782_v1, %s9349_s9  ;;  %v14821_v1 = vpack.i.bf16 %v14819_v6, %v14820_v4  ;;  %v6122_v6 = vld [vmem:[%s9432_s30 + $0x130] sm:$0xff] }
  0x8a   : > { %7347 = vrot.lane.b32.xlu1 %v14783_v8, %s9349_s9  ;;  %v14824_v8 = vld [vmem:[#allocation7_spill] sm:$0xff] }
  0x8b   : > { %7342 = vrot.lane.b32.xlu0 %v14784_v12, %s9349_s9 }
  0x8c   : > { %v9927_v13 = vpop.permute.xlu1 %7072 }
  0x8d   : > { %14785 = vst [vmem:[#allocation28_spill] sm:$0xff] %v9927_v13  ;;  %v9929_v17 = vpop.permute.xlu0 %7062  ;;  %v6430_v13 = vld [vmem:[%s9432_s30 + $0x2f0] sm:$0xff] }
  0x8e   : > { %14786 = vst [vmem:[#allocation29_spill] sm:$0xff] %v9929_v17  ;;  %7357 = vrot.lane.b32.xlu1 %v7356_v9, %s9349_s9  ;;  %v14825_v9 = vld [vmem:[#allocation11_spill] sm:$0xff]  ;;  %v6429_v17 = vld [vmem:[%s9432_s30 + $0x2e0] sm:$0xff] }
  0x8f   : > { %7352 = vrot.lane.b32.xlu0 %v14787_v18, %s9349_s9  ;;  %v7466_v12 = vpack.i.bf16 %v14825_v9, %v14824_v8  ;;  %v14828_v18 = vpack.i.bf16 %v14826_v43, %v14827_v61  ;;  %v14844_v8 = vld [vmem:[#allocation17_spill] sm:$0xff]  ;;  %v14846_v43 = vld [vmem:[#allocation16_spill] sm:$0xff] }
  0x90   : > { %v9939_v22 = vpop.permute.xlu1 %7077  ;;  %v7496_v9 = vpack.i.bf16 %v6122_v6, %v14844_v8 }
  0x91   : > { %14788 = vst [vmem:[#allocation30_spill] sm:$0xff] %v9939_v22  ;;  %v9941_v25 = vpop.permute.xlu0 %7067 }
  0x92   : > { %14789 = vst [vmem:[#allocation31_spill] sm:$0xff] %v9941_v25  ;;  %7367 = vrot.lane.b32.xlu1 %v14790_v24, %s9349_s9  ;;  %v14830_v24 = vld [vmem:[#allocation6_spill] sm:$0xff]  ;;  %v6432_v25 = vld [vmem:[%s9432_s30 + $0x310] sm:$0xff] }
  0x93   : > { %7362 = vrot.lane.b32.xlu0 %v14791_v27, %s9349_s9  ;;  %v6114_v27 = vld [vmem:[%s9432_s30 + $0x90] sm:$0xff] }
  0x94   : > { %v9953_v29 = vpop.permute.xlu1 %7087 }
  0x95   : > { %14792 = vst [vmem:[#allocation32_spill] sm:$0xff] %v9953_v29  ;;  %v9955_v30 = vpop.permute.xlu0 %7082  ;;  %v6426_v29 = vld [vmem:[%s9432_s30 + $0x2b0] sm:$0xff] }
  0x96   : > { %14793 = vst [vmem:[#allocation33_spill] sm:$0xff] %v9955_v30  ;;  %7377 = vrot.lane.b32.xlu1 %v7376_v26, %s9349_s9  ;;  %v7461_v26 = vpack.i.bf16 %v14830_v24, %v14829_v20  ;;  %v14849_v24 = vld [vmem:[#allocation21_spill] sm:$0xff] }
  0x97   : > { %7372 = vrot.lane.b32.xlu0 %v14794_v31, %s9349_s9 }
  0x98   : > { %v9965_v38 = vpop.permute.xlu1 %7097 }
  0x99   : > { %14795 = vst [vmem:[#allocation34_spill] sm:$0xff] %v9965_v38  ;;  %v9967_v41 = vpop.permute.xlu0 %7092  ;;  %v6422_v38 = vld [vmem:[%s9432_s30 + $0x250] sm:$0xff] }
  0x9a   : > { %14796 = vst [vmem:[#allocation35_spill] sm:$0xff] %v9967_v41  ;;  %7387 = vrot.lane.b32.xlu1 %v14797_v37, %s9350_s10  ;;  %v10736_v41 = vld [vmem:[%s9432_s30 + $0xd2] sm:$0xff] }
  0x9b   : > { %7382 = vrot.lane.b32.xlu0 %v14798_v40, %s9350_s10 }
  0x9c   : > { %v9979_v42 = vpop.permute.xlu1 %7107 }
  0x9d   : > { %14799 = vst [vmem:[#allocation36_spill] sm:$0xff] %v9979_v42  ;;  %v9981_v56 = vpop.permute.xlu0 %7102  ;;  %v6199_v42 = vld [vmem:[%s9432_s30 + $0x242] sm:$0xff] }
  0x9e   : > { %14800 = vst [vmem:[#allocation37_spill] sm:$0xff] %v9981_v56  ;;  %7397 = vrot.lane.b32.xlu1 %v7396_v39, %s9350_s10  ;;  %v14833_v39 = vld [vmem:[#allocation10_spill] sm:$0xff]  ;;  %v10363_v56 = vld [vmem:[%s9432_s30 + $0xb0] sm:$0xff] }
  0x9f   : > { %7392 = vrot.lane.b32.xlu0 %v14801_v50, %s9350_s10  ;;  %v7476_v40 = vpack.i.bf16 %v6114_v27, %v14833_v39  ;;  %v14834_v50 = vld [vmem:[#allocation12_spill] sm:$0xff]  ;;  %v14851_v39 = vld [vmem:[#allocation22_spill] sm:$0xff] }
  0xa0   : > { %v9991_v36 = vpop.permute.xlu1 %7117 }
  0xa1   : > { %14802 = vst [vmem:[#allocation38_spill] sm:$0xff] %v9991_v36  ;;  %v9993_v11 = vpop.permute.xlu0 %7112 }
  0xa2   : > { %14803 = vst [vmem:[#allocation39_spill] sm:$0xff] %v9993_v11  ;;  %7407 = vrot.lane.b32.xlu1 %v14804_v45, %s9350_s10  ;;  %v14835_v45 = vld [vmem:[#allocation9_spill] sm:$0xff] }
  0xa3   : > { %7402 = vrot.lane.b32.xlu0 %v14805_v23, %s9350_s10  ;;  %v6192_v11 = vld [vmem:[%s9432_s30 + $0x1b2] sm:$0xff] }
  0xa4   : > { %v10005_v54 = vpop.permute.xlu1 %7127 }
  0xa5   : > { %14806 = vst [vmem:[#allocation40_spill] sm:$0xff] %v10005_v54  ;;  %v10007_v55 = vpop.permute.xlu0 %7122 }
  0xa6   : > { %14807 = vst [vmem:[#allocation41_spill] sm:$0xff] %v10007_v55  ;;  %7417 = vrot.lane.b32.xlu1 %v7416_v46, %s9350_s10  ;;  %v7471_v46 = vpack.i.bf16 %v14835_v45, %v14834_v50  ;;  %v6130_v45 = vld [vmem:[%s9432_s30 + $0x1d0] sm:$0xff] }
  0xa7   : > { %7412 = vrot.lane.b32.xlu0 %v14808_v58, %s9350_s10 }
  0xa8   : > { %v10017_v3 = vpop.permute.xlu1 %7137 }
  0xa9   : > { %14809 = vst [vmem:[#allocation42_spill] sm:$0xff] %v10017_v3  ;;  %v10019_v19 = vpop.permute.xlu0 %7132  ;;  %v6160_v3 = vld [vmem:[%s9432_s30 + $0x1b1] sm:$0xff] }
  0xaa   : > { %14810 = vst [vmem:[#allocation43_spill] sm:$0xff] %v10019_v19  ;;  %7427 = vrot.lane.b32.xlu1 %v14811_v57, %s9350_s10  ;;  %v14838_v57 = vld [vmem:[#allocation14_spill] sm:$0xff] }
  0xab   : > { %7422 = vrot.lane.b32.xlu0 %v14812_v60, %s9350_s10  ;;  %v6167_v19 = vld [vmem:[%s9432_s30 + $0x241] sm:$0xff] }
  0xac   : > { %v10031_v62 = vpop.permute.xlu1 %7147 }
  0xad   : > { %14813 = vst [vmem:[#allocation44_spill] sm:$0xff] %v10031_v62  ;;  %v10033_v2 = vpop.permute.xlu0 %7142 }
  0xae   : > { %14814 = vst [vmem:[#allocation45_spill] sm:$0xff] %v10033_v2  ;;  %7437 = vrot.lane.b32.xlu1 %v7436_v59, %s9350_s10  ;;  %v14839_v59 = vld [vmem:[#allocation18_spill] sm:$0xff] }
  0xaf   : > { %7432 = vrot.lane.b32.xlu0 %v14815_v44, %s9350_s10  ;;  %v7486_v60 = vpack.i.bf16 %v14839_v59, %v14838_v57  ;;  %v14840_v44 = vld [vmem:[#allocation15_spill] sm:$0xff]  ;;  %v14855_v59 = vld [vmem:[#allocation24_spill] sm:$0xff] }
  0xb0   : > { %v10043_v32 = vpop.permute.xlu1 %7157 }
  0xb1   : > { %14816 = vst [vmem:[#allocation46_spill] sm:$0xff] %v10043_v32  ;;  %v10045_v0 = vpop.permute.xlu0 %7152  ;;  %v10522_v32 = vld [vmem:[%s9432_s30 + $0xb1] sm:$0xff] }
  0xb2   : > { %14817 = vst [vmem:[#allocation47_spill] sm:$0xff] %v10045_v0  ;;  %7447 = vrot.lane.b32.xlu1 %v14818_v28, %s9350_s10  ;;  %v14841_v28 = vld [vmem:[#allocation13_spill] sm:$0xff] }
  0xb3   : > { %7442 = vrot.lane.b32.xlu0 %v14821_v1, %s9350_s10 }
  0xb4   : > { %v10057_v52 = vpop.permute.xlu1 %7167 }
  0xb5   : > { %14822 = vst [vmem:[#allocation2_spill] sm:$0xff] %v10057_v52  ;;  %v10059_v53 = vpop.permute.xlu0 %7162  ;;  %v10505_v52 = vld [vmem:[%s9432_s30 + $0x2c0] sm:$0xff] }
  0xb6   : > { %14823 = vst [vmem:[#allocation3_spill] sm:$0xff] %v10059_v53  ;;  %7457 = vrot.lane.b32.xlu1 %v7456_v33, %s9350_s10  ;;  %v7481_v33 = vpack.i.bf16 %v14841_v28, %v14840_v44  ;;  %v14856_v44 = vld [vmem:[#allocation26_spill] sm:$0xff]  ;;  %v14857_v28 = vld [vmem:[#allocation23_spill] sm:$0xff]  ;;  %v10500_v53 = vld [vmem:[%s9432_s30 + $0x2f0] sm:$0xff] }
  0xb7   : > { %7452 = vrot.lane.b32.xlu0 %v14828_v18, %s9350_s10 }
  0xb8   : > { %v10071_v31 = vpop.permute.xlu1 %7177 }
  0xb9   : > { %14831 = vst [vmem:[#allocation7_spill] sm:$0xff] %v10071_v31  ;;  %v10073_v37 = vpop.permute.xlu0 %7172  ;;  %v10497_v31 = vld [vmem:[%s9432_s30 + $0x2e0] sm:$0xff] }
  0xba   : > { %14832 = vst [vmem:[#allocation11_spill] sm:$0xff] %v10073_v37  ;;  %7467 = vrot.lane.b32.xlu1 %v7466_v12, %s9351_s11  ;;  %v14845_v12 = vld [vmem:[#allocation19_spill] sm:$0xff] }
  0xbb   : > { %7462 = vrot.lane.b32.xlu0 %v7461_v26, %s9351_s11  ;;  %v7491_v61 = vpack.i.bf16 %v14846_v43, %v14845_v12  ;;  %v14850_v26 = vld [vmem:[#allocation25_spill] sm:$0xff]  ;;  %v7521_v12 = vpack.i.bf16 %v9844_v14, %v9851_v10  ;;  %v6138_v43 = vld [vmem:[%s9432_s30 + $0x270] sm:$0xff]  ;;  %v6139_v14 = vld [vmem:[%s9432_s30 + $0x21] sm:$0xff] }
  0xbc   : > { %v10080_v23 = vpop.permute.xlu1 %7187  ;;  %v7506_v27 = vpack.i.bf16 %v14850_v26, %v14849_v24  ;;  %v7536_v26 = vpack.i.bf16 %v6138_v43, %v9862_v35  ;;  %v6150_v43 = vld [vmem:[%s9432_s30 + $0xf1] sm:$0xff] }
  0xbd   : > { %14836 = vst [vmem:[#allocation4_spill] sm:$0xff] %v10080_v23  ;;  %v10082_v58 = vpop.permute.xlu0 %7182 }
  0xbe   : > { %14837 = vst [vmem:[#allocation5_spill] sm:$0xff] %v10082_v58  ;;  %7477 = vrot.lane.b32.xlu1 %v7476_v40, %s9351_s11  ;;  %v14852_v40 = vld [vmem:[#allocation20_spill] sm:$0xff]  ;;  %v6205_v58 = vld [vmem:[%s9432_s30 + $0xa0] sm:$0xff] }
  0xbf   : > { %7472 = vrot.lane.b32.xlu0 %v7471_v46, %s9351_s11  ;;  %v7501_v50 = vpack.i.bf16 %v14852_v40, %v14851_v39  ;;  %v6142_v39 = vld [vmem:[%s9432_s30 + $0x51] sm:$0xff] }
  0xc0   : > { %v10091_v4 = vpop.permute.xlu1 %7197  ;;  %v6140_v40 = vld [vmem:[%s9432_s30 + $0x31] sm:$0xff] }
  0xc1   : > { %14842 = vst [vmem:[#allocation8_spill] sm:$0xff] %v10091_v4  ;;  %v10093_v1 = vpop.permute.xlu0 %7192  ;;  %v7541_v35 = vpack.i.bf16 %v6140_v40, %v6139_v14  ;;  %v6154_v14 = vld [vmem:[%s9432_s30 + $0x131] sm:$0xff] }
  0xc2   : > { %14843 = vst [vmem:[#allocation6_spill] sm:$0xff] %v10093_v1  ;;  %7487 = vrot.lane.b32.xlu1 %v7486_v60, %s9351_s11  ;;  %v7516_v60 = vpack.i.bf16 %v6130_v45, %v14855_v59  ;;  %v6146_v59 = vld [vmem:[%s9432_s30 + $0x91] sm:$0xff] }
  0xc3   : > { %7482 = vrot.lane.b32.xlu0 %v7481_v33, %s9351_s11  ;;  %v7511_v33 = vpack.i.bf16 %v14857_v28, %v14856_v44  ;;  %v6144_v44 = vld [vmem:[%s9432_s30 + $0x71] sm:$0xff] }
  0xc4   : > { %v10100_v18 = vpop.permute.xlu1 %7207  ;;  %v6176_v4 = vld [vmem:[%s9432_s30 + $0x72] sm:$0xff] }
  0xc5   : > { %14847 = vst [vmem:[#allocation10_spill] sm:$0xff] %v10100_v18  ;;  %v10102_v20 = vpop.permute.xlu0 %7202  ;;  %v6168_v18 = vld [vmem:[%s9432_s30 + $0x251] sm:$0xff] }
  0xc6   : > { %14848 = vst [vmem:[#allocation12_spill] sm:$0xff] %v10102_v20  ;;  %7497 = vrot.lane.b32.xlu1 %v7496_v9, %s9351_s11  ;;  %v7526_v9 = vpack.i.bf16 %v9865_v47, %v9847_v16  ;;  %v14862_v47 = vld [vmem:[#allocation27_spill] sm:$0xff]  ;;  %v6172_v20 = vld [vmem:[%s9432_s30 + $0x32] sm:$0xff] }
  0xc7   : > { %7492 = vrot.lane.b32.xlu0 %v7491_v61, %s9351_s11  ;;  %v7531_v16 = vpack.i.bf16 %v14862_v47, %v9868_v48  ;;  %v6147_v47 = vld [vmem:[%s9432_s30 + $0xc1] sm:$0xff]  ;;  %v6180_v1 = vld [vmem:[%s9432_s30 + $0xd2] sm:$0xff] }
  0xc8   : > { %v10111_v46 = vpop.permute.xlu1 %7217 }
  0xc9   : > { %14853 = vst [vmem:[#allocation9_spill] sm:$0xff] %v10111_v46  ;;  %v10113_v57 = vpop.permute.xlu0 %7212  ;;  %v6159_v46 = vld [vmem:[%s9432_s30 + $0x1a1] sm:$0xff] }
  0xca   : > { %14854 = vst [vmem:[#allocation14_spill] sm:$0xff] %v10113_v57  ;;  %7507 = vrot.lane.b32.xlu1 %v7506_v27, %s9351_s11  ;;  %v6141_v27 = vld [vmem:[%s9432_s30 + $0x41] sm:$0xff] }
  0xcb   : > { %7502 = vrot.lane.b32.xlu0 %v7501_v50, %s9351_s11  ;;  %v7546_v45 = vpack.i.bf16 %v6142_v39, %v6141_v27 }
  0xcc   : > { %v10120_v6 = vpop.permute.xlu1 %7227 }
  0xcd   : > { %14858 = vst [vmem:[#allocation18_spill] sm:$0xff] %v10120_v6  ;;  %v10122_v8 = vpop.permute.xlu0 %7222  ;;  %v10487_v6 = vld [vmem:[%s9432_s30 + $0x290] sm:$0xff] }
  0xce   : > { %14859 = vst [vmem:[#allocation15_spill] sm:$0xff] %v10122_v8  ;;  %7517 = vrot.lane.b32.xlu1 %v7516_v60, %s9351_s11  ;;  %v6143_v60 = vld [vmem:[%s9432_s30 + $0x61] sm:$0xff] }
  0xcf   : > { %7512 = vrot.lane.b32.xlu0 %v7511_v33, %s9351_s11  ;;  %v7556_v33 = vpack.i.bf16 %v6146_v59, %v9879_v15 }
  0xd0   : > { %v10131_v61 = vpop.permute.xlu1 %7237 }
  0xd1   : > { %14860 = vst [vmem:[#allocation13_spill] sm:$0xff] %v10131_v61  ;;  %v10133_v24 = vpop.permute.xlu0 %7232  ;;  %v10481_v61 = vld [vmem:[%s9432_s30 + $0x2b0] sm:$0xff] }
  0xd2   : > { %14861 = vst [vmem:[#allocation17_spill] sm:$0xff] %v10133_v24  ;;  %7527 = vrot.lane.b32.xlu1 %v7526_v9, %s9351_s11  ;;  %v7551_v9 = vpack.i.bf16 %v6144_v44, %v6143_v60  ;;  %v7576_v60 = vpack.i.bf16 %v6154_v14, %v9897_v7  ;;  %v10464_v24 = vld [vmem:[%s9432_s30 + $0x220] sm:$0xff] }
  0xd3   : > { %7522 = vrot.lane.b32.xlu0 %v7521_v12, %s9351_s11  ;;  %v6149_v12 = vld [vmem:[%s9432_s30 + $0xe1] sm:$0xff] }
  0xd4   : > { %v10142_v10 = vpop.permute.xlu1 %7247  ;;  %v10169_v39 = vpack.i.bf16 %v6150_v43, %v6149_v12  ;;  %v6155_v43 = vld [vmem:[%s9432_s30 + $0x161] sm:$0xff] }
  0xd5   : > { %14863 = vst [vmem:[#allocation19_spill] sm:$0xff] %v10142_v10  ;;  %v10146_v50 = vpop.permute.xlu0 %7242 }
  0xd6   : > { %14864 = vst [vmem:[#allocation16_spill] sm:$0xff] %v10146_v50  ;;  %7537 = vrot.lane.b32.xlu1 %v7536_v26, %s9351_s11  ;;  %v10456_v50 = vld [vmem:[%s9432_s30 + $0x240] sm:$0xff] }
  0xd7   : > { %7532 = vrot.lane.b32.xlu0 %v7531_v16, %s9351_s11  ;;  %v6148_v16 = vld [vmem:[%s9432_s30 + $0xd1] sm:$0xff] }
  0xd8   : > { %v10151_v48 = vpop.permute.xlu1 %7257  ;;  %v10172_v15 = vpack.i.bf16 %v6148_v16, %v6147_v47  ;;  %v6156_v47 = vld [vmem:[%s9432_s30 + $0x171] sm:$0xff] }
  0xd9   : > { %14865 = vst [vmem:[#allocation21_spill] sm:$0xff] %v10151_v48  ;;  %v10155_v28 = vpop.permute.xlu0 %7252  ;;  %v10201_v14 = vpack.i.bf16 %v6156_v47, %v6155_v43  ;;  %v6166_v43 = vld [vmem:[%s9432_s30 + $0x231] sm:$0xff] }
  0xda   : > { %14866 = vst [vmem:[#allocation25_spill] sm:$0xff] %v10155_v28  ;;  %7547 = vrot.lane.b32.xlu1 %v7546_v45, %s9352_s12  ;;  %v6151_v45 = vld [vmem:[%s9432_s30 + $0x101] sm:$0xff]  ;;  %v10446_v28 = vld [vmem:[%s9432_s30 + $0x1f0] sm:$0xff] }
  0xdb   : > { %7542 = vrot.lane.b32.xlu0 %v7541_v35, %s9352_s12  ;;  %v6152_v35 = vld [vmem:[%s9432_s30 + $0x111] sm:$0xff] }
  0xdc   : > { %v10162_v26 = vpop.permute.xlu1 %7267  ;;  %v10186_v44 = vpack.i.bf16 %v6152_v35, %v6151_v45  ;;  %v6162_v45 = vld [vmem:[%s9432_s30 + $0x1d1] sm:$0xff] }
  0xdd   : > { %14867 = vst [vmem:[#allocation22_spill] sm:$0xff] %v10162_v26  ;;  %v10166_v27 = vpop.permute.xlu0 %7262 }
  0xde   : > { %14868 = vst [vmem:[#allocation20_spill] sm:$0xff] %v10166_v27  ;;  %7557 = vrot.lane.b32.xlu1 %v7556_v33, %s9352_s12  ;;  %v6157_v33 = vld [vmem:[%s9432_s30 + $0x181] sm:$0xff] }
  0xdf   : > { %7552 = vrot.lane.b32.xlu0 %v7551_v9, %s9352_s12  ;;  %v6158_v9 = vld [vmem:[%s9432_s30 + $0x191] sm:$0xff] }
  0xe0   : > { %v10175_v40 = vpop.permute.xlu1 %7277  ;;  %v10197_v7 = vpack.i.bf16 %v6158_v9, %v6157_v33  ;;  %v10215_v33 = vpack.i.bf16 %v6160_v3, %v6159_v46  ;;  %v6165_v9 = vld [vmem:[%s9432_s30 + $0x221] sm:$0xff]  ;;  %v6170_v46 = vld [vmem:[%s9432_s30 + $0x271] sm:$0xff] }
  0xe1   : > { %14869 = vst [vmem:[#allocation24_spill] sm:$0xff] %v10175_v40  ;;  %v10179_v59 = vpop.permute.xlu0 %7272 }
  0xe2   : > { %14870 = vst [vmem:[#allocation26_spill] sm:$0xff] %v10179_v59  ;;  %7567 = vrot.lane.b32.xlu1 %v10169_v39, %s9352_s12  ;;  %v6179_v59 = vld [vmem:[%s9432_s30 + $0xc2] sm:$0xff] }
  0xe3   : > { %7562 = vrot.lane.b32.xlu0 %v10172_v15, %s9352_s12 }
  0xe4   : > { %v10190_v12 = vpop.permute.xlu1 %7287 }
  0xe5   : > { %14871 = vst [vmem:[#allocation23_spill] sm:$0xff] %v10190_v12  ;;  %v10194_v16 = vpop.permute.xlu0 %7282  ;;  %v6164_v12 = vld [vmem:[%s9432_s30 + $0x211] sm:$0xff] }
  0xe6   : > { %14872 = vst [vmem:[#allocation27_spill] sm:$0xff] %v10194_v16  ;;  %7577 = vrot.lane.b32.xlu1 %v7576_v60, %s9352_s12  ;;  %v7596_v60 = vpack.i.bf16 %v6162_v45, %v9915_v5  ;;  %v10226_v5 = vpack.i.bf16 %v6166_v43, %v6165_v9  ;;  %v6174_v9 = vld [vmem:[%s9432_s30 + $0x52] sm:$0xff]  ;;  %v6171_v16 = vld [vmem:[%s9432_s30 + $0x22] sm:$0xff] }
  0xe7   : > { %7572 = vrot.lane.b32.xlu0 %v10186_v44, %s9352_s12 }
  0xe8   : > { %v10204_v35 = vpop.permute.xlu1 %7297 }
  0xe9   : > { %14873 = vst [vmem:[#allocation48_spill] sm:$0xff] %v10204_v35  ;;  %v10208_v57 = vpop.permute.xlu0 %7292  ;;  %v6163_v35 = vld [vmem:[%s9432_s30 + $0x201] sm:$0xff] }
  0xea   : > { %14874 = vst [vmem:[#allocation49_spill] sm:$0xff] %v10208_v57  ;;  %7587 = vrot.lane.b32.xlu1 %v10197_v7, %s9352_s12  ;;  %v10230_v3 = vpack.i.bf16 %v6164_v12, %v6163_v35  ;;  %v10244_v12 = vpack.i.bf16 %v6168_v18, %v6167_v19  ;;  %v6173_v35 = vld [vmem:[%s9432_s30 + $0x42] sm:$0xff]  ;;  %v6178_v19 = vld [vmem:[%s9432_s30 + $0x92] sm:$0xff] }
  0xeb   : > { %7582 = vrot.lane.b32.xlu0 %v10201_v14, %s9352_s12  ;;  %v7626_v55 = vpack.i.bf16 %v6174_v9, %v6173_v35  ;;  %v6181_v9 = vld [vmem:[%s9432_s30 + $0xe2] sm:$0xff] }
  0xec   : > { %v10219_v47 = vpop.permute.xlu1 %7307 }
  0xed   : > { %14875 = vst [vmem:[#allocation50_spill] sm:$0xff] %v10219_v47  ;;  %v10223_v57 = vpop.permute.xlu0 %7302 }
  0xee   : > { %14876 = vst [vmem:[#allocation51_spill] sm:$0xff] %v10223_v57  ;;  %7597 = vrot.lane.b32.xlu1 %v7596_v60, %s9352_s12  ;;  %v7616_v60 = vpack.i.bf16 %v6170_v46, %v9937_v21  ;;  %v7621_v21 = vpack.i.bf16 %v6172_v20, %v6171_v16  ;;  %v6175_v46 = vld [vmem:[%s9432_s30 + $0x62] sm:$0xff]  ;;  %v6182_v20 = vld [vmem:[%s9432_s30 + $0xf2] sm:$0xff] }
  0xef   : > { %7592 = vrot.lane.b32.xlu0 %v10215_v33, %s9352_s12  ;;  %v7631_v35 = vpack.i.bf16 %v6176_v4, %v6175_v46  ;;  %v6186_v4 = vld [vmem:[%s9432_s30 + $0x132] sm:$0xff] }
  0xf0   : > { %v10233_v45 = vpop.permute.xlu1 %7317  ;;  %v6184_v46 = vld [vmem:[%s9432_s30 + $0x112] sm:$0xff] }
  0xf1   : > { %14877 = vst [vmem:[#allocation52_spill] sm:$0xff] %v10233_v45  ;;  %v10237_v54 = vpop.permute.xlu0 %7312  ;;  %v10423_v45 = vld [vmem:[%s9432_s30 + $0x180] sm:$0xff]  ;;  %v10440_v57 = vld [vmem:[%s9432_s30 + $0x210] sm:$0xff] }
  0xf2   : > { %14878 = vst [vmem:[#allocation53_spill] sm:$0xff] %v10237_v54  ;;  %7607 = vrot.lane.b32.xlu1 %v10226_v5, %s9352_s12 }
  0xf3   : > { %7602 = vrot.lane.b32.xlu0 %v10230_v3, %s9352_s12 }
  0xf4   : > { %v10248_v43 = vpop.permute.xlu1 %7327 }
  0xf5   : > { %14879 = vst [vmem:[#allocation54_spill] sm:$0xff] %v10248_v43  ;;  %v10252_v40 = vpop.permute.xlu0 %7322  ;;  %v10415_v43 = vld [vmem:[%s9432_s30 + $0x1a0] sm:$0xff] }
  0xf6   : > { %14880 = vst [vmem:[#allocation55_spill] sm:$0xff] %v10252_v40  ;;  %7617 = vrot.lane.b32.xlu1 %v7616_v60, %s9352_s12  ;;  %v7636_v60 = vpack.i.bf16 %v6178_v19, %v9963_v34  ;;  %v10279_v34 = vpack.i.bf16 %v6180_v1, %v6179_v59  ;;  %v6183_v19 = vld [vmem:[%s9432_s30 + $0x102] sm:$0xff] }
  0xf7   : > { %7612 = vrot.lane.b32.xlu0 %v10244_v12, %s9352_s12  ;;  %v10293_v1 = vpack.i.bf16 %v6184_v46, %v6183_v19  ;;  %v6189_v59 = vld [vmem:[%s9432_s30 + $0x182] sm:$0xff]  ;;  %v6194_v19 = vld [vmem:[%s9432_s30 + $0x1d2] sm:$0xff] }
  0xf8   : > { %v10258_v18 = vpop.permute.xlu1 %7337 }
  0xf9   : > { %14881 = vst [vmem:[#allocation56_spill] sm:$0xff] %v10258_v18  ;;  %v10262_v36 = vpop.permute.xlu0 %7332  ;;  %v10405_v18 = vld [vmem:[%s9432_s30 + $0x150] sm:$0xff] }
  0xfa   : > { %14882 = vst [vmem:[#allocation57_spill] sm:$0xff] %v10262_v36  ;;  %7627 = vrot.lane.b32.xlu1 %v7626_v55, %s9353_s13  ;;  %v10276_v55 = vpack.i.bf16 %v6182_v20, %v6181_v9  ;;  %v6187_v20 = vld [vmem:[%s9432_s30 + $0x162] sm:$0xff] }
  0xfb   : > { %7622 = vrot.lane.b32.xlu0 %v7621_v21, %s9353_s13  ;;  %v6213_v36 = vld [vmem:[%s9432_s30 + $0x140] sm:$0xff] }
  0xfc   : > { %v10269_v16 = vpop.permute.xlu1 %7347  ;;  %v7721_v40 = vpack.i.bf16 %v10405_v18, %v6213_v36 }
  0xfd   : > { %14883 = vst [vmem:[#allocation58_spill] sm:$0xff] %v10269_v16  ;;  %v10273_v26 = vpop.permute.xlu0 %7342 }
  0xfe   : > { %14884 = vst [vmem:[#allocation59_spill] sm:$0xff] %v10273_v26  ;;  %7637 = vrot.lane.b32.xlu1 %v7636_v60, %s9353_s13  ;;  %v7656_v60 = vpack.i.bf16 %v6186_v4, %v9989_v51  ;;  %v6200_v26 = vld [vmem:[%s9432_s30 + $0x252] sm:$0xff] }
  0xff   : > { %7632 = vrot.lane.b32.xlu0 %v7631_v35, %s9353_s13  ;;  %v6190_v35 = vld [vmem:[%s9432_s30 + $0x192] sm:$0xff] }
 0x100   : > { %v10282_v21 = vpop.permute.xlu1 %7357  ;;  %v10304_v51 = vpack.i.bf16 %v6190_v35, %v6189_v59  ;;  %v6197_v59 = vld [vmem:[%s9432_s30 + $0x222] sm:$0xff]  ;;  %v6198_v35 = vld [vmem:[%s9432_s30 + $0x232] sm:$0xff] }
 0x101   : > { %14885 = vst [vmem:[#allocation60_spill] sm:$0xff] %v10282_v21  ;;  %v10286_v16 = vpop.permute.xlu0 %7352  ;;  %v6188_v21 = vld [vmem:[%s9432_s30 + $0x172] sm:$0xff] }
 0x102   : > { %14886 = vst [vmem:[#allocation61_spill] sm:$0xff] %v10286_v16  ;;  %7647 = vrot.lane.b32.xlu1 %v10276_v55, %s9353_s13  ;;  %v10308_v4 = vpack.i.bf16 %v6188_v21, %v6187_v20 }
 0x103   : > { %7642 = vrot.lane.b32.xlu0 %v10279_v34, %s9353_s13 }
 0x104   : > { %v10297_v9 = vpop.permute.xlu1 %7367 }
 0x105   : > { %14887 = vst [vmem:[#allocation62_spill] sm:$0xff] %v10297_v9  ;;  %v10301_v16 = vpop.permute.xlu0 %7362  ;;  %v6191_v9 = vld [vmem:[%s9432_s30 + $0x1a2] sm:$0xff] }
 0x106   : > { %14888 = vst [vmem:[#allocation63_spill] sm:$0xff] %v10301_v16  ;;  %7657 = vrot.lane.b32.xlu1 %v7656_v60, %s9353_s13  ;;  %v7676_v60 = vpack.i.bf16 %v6194_v19, %v10015_v63  ;;  %v10322_v21 = vpack.i.bf16 %v6192_v11, %v6191_v9  ;;  %v6196_v16 = vld [vmem:[%s9432_s30 + $0x212] sm:$0xff]  ;;  %v10333_v63 = vpack.i.bf16 %v6198_v35, %v6197_v59 }
 0x107   : > { %7652 = vrot.lane.b32.xlu0 %v10293_v1, %s9353_s13  ;;  %v6202_v9 = vld [vmem:[%s9432_s30 + $0x272] sm:$0xff] }
 0x108   : > { %v10311_v46 = vpop.permute.xlu1 %7377  ;;  %v10357_v59 = vld [vmem:[%s9432_s30 + $0xd0] sm:$0xff] }
 0x109   : > { %14889 = vst [vmem:[#allocation64_spill] sm:$0xff] %v10311_v46  ;;  %v10315_v23 = vpop.permute.xlu0 %7372  ;;  %v6195_v46 = vld [vmem:[%s9432_s30 + $0x202] sm:$0xff] }
 0x10a   : > { %14890 = vst [vmem:[#allocation65_spill] sm:$0xff] %v10315_v23  ;;  %7667 = vrot.lane.b32.xlu1 %v10304_v51, %s9353_s13  ;;  %v10337_v11 = vpack.i.bf16 %v6196_v16, %v6195_v46  ;;  %v10351_v16 = vpack.i.bf16 %v6200_v26, %v6199_v42  ;;  %v10354_v46 = vld [vmem:[%s9432_s30 + $0xc0] sm:$0xff]  ;;  %v7701_v42 = vpack.i.bf16 %v10363_v56, %v6205_v58 }
 0x10b   : > { %7662 = vrot.lane.b32.xlu0 %v10308_v4, %s9353_s13  ;;  %v10374_v26 = vld [vmem:[%s9432_s30 + $0x100] sm:$0xff] }
 0x10c   : > { %v10326_v20 = vpop.permute.xlu1 %7387 }
 0x10d   : > { %14891 = vst [vmem:[#allocation66_spill] sm:$0xff] %v10326_v20  ;;  %v10330_v23 = vpop.permute.xlu0 %7382  ;;  %v10399_v20 = vld [vmem:[%s9432_s30 + $0x170] sm:$0xff] }
 0x10e   : > { %14892 = vst [vmem:[#allocation67_spill] sm:$0xff] %v10330_v23  ;;  %7677 = vrot.lane.b32.xlu1 %v7676_v60, %s9353_s13  ;;  %v7696_v60 = vpack.i.bf16 %v6202_v9, %v10041_v49  ;;  %v7706_v49 = vpack.i.bf16 %v10357_v59, %v10354_v46  ;;  %v10377_v9 = vld [vmem:[%s9432_s30 + $0x110] sm:$0xff]  ;;  %v10396_v23 = vld [vmem:[%s9432_s30 + $0x160] sm:$0xff] }
 0x10f   : > { %7672 = vrot.lane.b32.xlu0 %v10322_v21, %s9353_s13  ;;  %v7716_v58 = vpack.i.bf16 %v10377_v9, %v10374_v26 }
 0x110   : > { %v10340_v19 = vpop.permute.xlu1 %7397 }
 0x111   : > { %14893 = vst [vmem:[#allocation68_spill] sm:$0xff] %v10340_v19  ;;  %v10344_v27 = vpop.permute.xlu0 %7392 }
 0x112   : > { %14894 = vst [vmem:[#allocation69_spill] sm:$0xff] %v10344_v27  ;;  %7687 = vrot.lane.b32.xlu1 %v10333_v63, %s9353_s13 }
 0x113   : > { %7682 = vrot.lane.b32.xlu0 %v10337_v11, %s9353_s13 }
 0x114   : > { %v10359_v35 = vpop.permute.xlu1 %7407 }
 0x115   : > { %14895 = vst [vmem:[#allocation70_spill] sm:$0xff] %v10359_v35  ;;  %v10365_v27 = vpop.permute.xlu0 %7402 }
 0x116   : > { %14896 = vst [vmem:[#allocation71_spill] sm:$0xff] %v10365_v27  ;;  %7697 = vrot.lane.b32.xlu1 %v7696_v60, %s9353_s13  ;;  %v10382_v27 = vld [vmem:[%s9432_s30 + $0xe0] sm:$0xff]  ;;  %v10385_v60 = vld [vmem:[%s9432_s30 + $0xf0] sm:$0xff] }
 0x117   : > { %7692 = vrot.lane.b32.xlu0 %v10351_v16, %s9353_s13 }
 0x118   : > { %v10379_v35 = vpop.permute.xlu1 %7417 }
 0x119   : > { %14897 = vst [vmem:[#allocation72_spill] sm:$0xff] %v10379_v35  ;;  %v10387_v19 = vpop.permute.xlu0 %7412  ;;  %v7711_v35 = vpack.i.bf16 %v10385_v60, %v10382_v27 }
 0x11a   : > { %14898 = vst [vmem:[#allocation73_spill] sm:$0xff] %v10387_v19  ;;  %7707 = vrot.lane.b32.xlu1 %v7706_v49, %s9354_s14 }
 0x11b   : > { %7702 = vrot.lane.b32.xlu0 %v7701_v42, %s9354_s14  ;;  %v7726_v42 = vpack.i.bf16 %v10399_v20, %v10396_v23 }
 0x11c   : > { %v10401_v19 = vpop.permute.xlu1 %7427 }
 0x11d   : > { %14899 = vst [vmem:[#allocation74_spill] sm:$0xff] %v10401_v19  ;;  %v10407_v49 = vpop.permute.xlu0 %7422  ;;  %v10418_v19 = vld [vmem:[%s9432_s30 + $0x1b0] sm:$0xff] }
 0x11e   : > { %14900 = vst [vmem:[#allocation75_spill] sm:$0xff] %v10407_v49  ;;  %7717 = vrot.lane.b32.xlu1 %v7716_v58, %s9354_s14  ;;  %v10426_v49 = vld [vmem:[%s9432_s30 + $0x190] sm:$0xff] }
 0x11f   : > { %7712 = vrot.lane.b32.xlu0 %v7711_v35, %s9354_s14  ;;  %v7736_v35 = vpack.i.bf16 %v10418_v19, %v10415_v43  ;;  %v7731_v36 = vpack.i.bf16 %v10426_v49, %v10423_v45 }
 0x120   : > { %v10420_v54 = vpop.permute.xlu1 %7437 }
 0x121   : > { %14901 = vst [vmem:[#allocation76_spill] sm:$0xff] %v10420_v54  ;;  %v10428_v58 = vpop.permute.xlu0 %7432  ;;  %v10437_v54 = vld [vmem:[%s9432_s30 + $0x200] sm:$0xff] }
 0x122   : > { %14902 = vst [vmem:[#allocation77_spill] sm:$0xff] %v10428_v58  ;;  %7727 = vrot.lane.b32.xlu1 %v7726_v42, %s9354_s14  ;;  %v6221_v58 = vld [vmem:[%s9432_s30 + $0x1e0] sm:$0xff] }
 0x123   : > { %7722 = vrot.lane.b32.xlu0 %v7721_v40, %s9354_s14  ;;  %v7746_v40 = vpack.i.bf16 %v10440_v57, %v10437_v54  ;;  %v7741_v48 = vpack.i.bf16 %v10446_v28, %v6221_v58 }
 0x124   : > { %v10442_v47 = vpop.permute.xlu1 %7447 }
 0x125   : > { %14903 = vst [vmem:[#allocation78_spill] sm:$0xff] %v10442_v47  ;;  %v10448_v42 = vpop.permute.xlu0 %7442  ;;  %v10459_v47 = vld [vmem:[%s9432_s30 + $0x250] sm:$0xff] }
 0x126   : > { %14904 = vst [vmem:[#allocation79_spill] sm:$0xff] %v10448_v42  ;;  %7737 = vrot.lane.b32.xlu1 %v7736_v35, %s9354_s14  ;;  %v10467_v42 = vld [vmem:[%s9432_s30 + $0x230] sm:$0xff] }
 0x127   : > { %7732 = vrot.lane.b32.xlu0 %v7731_v36, %s9354_s14  ;;  %v7756_v36 = vpack.i.bf16 %v10459_v47, %v10456_v50  ;;  %v7751_v58 = vpack.i.bf16 %v10467_v42, %v10464_v24 }
 0x128   : > { %v10461_v10 = vpop.permute.xlu1 %7457 }
 0x129   : > { %14905 = vst [vmem:[#allocation80_spill] sm:$0xff] %v10461_v10  ;;  %v10469_v35 = vpop.permute.xlu0 %7452  ;;  %v10478_v10 = vld [vmem:[%s9432_s30 + $0x2a0] sm:$0xff] }
 0x12a   : > { %14906 = vst [vmem:[#allocation81_spill] sm:$0xff] %v10469_v35  ;;  %7747 = vrot.lane.b32.xlu1 %v7746_v40, %s9354_s14  ;;  %v6229_v35 = vld [vmem:[%s9432_s30 + $0x280] sm:$0xff] }
 0x12b   : > { %7742 = vrot.lane.b32.xlu0 %v7741_v48, %s9354_s14  ;;  %v7766_v48 = vpack.i.bf16 %v10481_v61, %v10478_v10  ;;  %v7761_v37 = vpack.i.bf16 %v10487_v6, %v6229_v35 }
 0x12c   : > { %v10483_v8 = vpop.permute.xlu1 %7467 }
 0x12d   : > { %14907 = vst [vmem:[#allocation82_spill] sm:$0xff] %v10483_v8  ;;  %v10489_v40 = vpop.permute.xlu0 %7462 }
 0x12e   : > { %14908 = vst [vmem:[#allocation83_spill] sm:$0xff] %v10489_v40  ;;  %7757 = vrot.lane.b32.xlu1 %v7756_v36, %s9354_s14  ;;  %v10508_v40 = vld [vmem:[%s9432_s30 + $0x2d0] sm:$0xff]  ;;  %v7776_v36 = vpack.i.bf16 %v10500_v53, %v10497_v31 }
 0x12f   : > { %7752 = vrot.lane.b32.xlu0 %v7751_v58, %s9354_s14  ;;  %v7771_v35 = vpack.i.bf16 %v10508_v40, %v10505_v52 }
 0x130   : > { %v10502_v8 = vpop.permute.xlu1 %7477 }
 0x131   : > { %14909 = vst [vmem:[#allocation84_spill] sm:$0xff] %v10502_v8  ;;  %v10510_v0 = vpop.permute.xlu0 %7472  ;;  %v6237_v8 = vld [vmem:[%s9432_s30 + $0xa1] sm:$0xff] }
 0x132   : > { %14910 = vst [vmem:[#allocation85_spill] sm:$0xff] %v10510_v0  ;;  %7767 = vrot.lane.b32.xlu1 %v7766_v48, %s9354_s14  ;;  %v7781_v48 = vpack.i.bf16 %v10522_v32, %v6237_v8 }
 0x133   : > { %7762 = vrot.lane.b32.xlu0 %v7761_v37, %s9354_s14 }
 0x134   : > { %v10518_v58 = vpop.permute.xlu1 %7487 }
 0x135   : > { %14911 = vst [vmem:[#allocation86_spill] sm:$0xff] %v10518_v58  ;;  %v10524_v2 = vpop.permute.xlu0 %7482 }
 0x136   : > { %14912 = vst [vmem:[#allocation87_spill] sm:$0xff] %v10524_v2  ;;  %7777 = vrot.lane.b32.xlu1 %v7776_v36, %s9354_s14  ;;  %v6245_v2 = vld [vmem:[%s9432_s30 + $0x141] sm:$0xff]  ;;  %v10540_v36 = vld [vmem:[%s9432_s30 + $0x151] sm:$0xff] }
 0x137   : > { %7772 = vrot.lane.b32.xlu0 %v7771_v35, %s9354_s14  ;;  %v7801_v8 = vpack.i.bf16 %v10540_v36, %v6245_v2 }
 0x138   : > { %v10529_v0 = vpop.permute.xlu1 %7497 }
 0x139   : > { %14913 = vst [vmem:[#allocation88_spill] sm:$0xff] %v10529_v0  ;;  %v10531_v37 = vpop.permute.xlu0 %7492  ;;  %v10623_v0 = vld [vmem:[%s9432_s30 + $0xb2] sm:$0xff] }
 0x13a   : > { %14914 = vst [vmem:[#allocation89_spill] sm:$0xff] %v10531_v37  ;;  %7787 = vrot.lane.b32.xlu1 %v10172_v15, %s9355_s15 }
 0x13b   : > { %7782 = vrot.lane.b32.xlu0 %v7781_v48, %s9355_s15 }
 0x13c   : > { %v10536_v58 = vpop.permute.xlu1 %7507 }
 0x13d   : > { %14915 = vst [vmem:[#allocation90_spill] sm:$0xff] %v10536_v58  ;;  %v10542_v35 = vpop.permute.xlu0 %7502  ;;  %v10560_v58 = vld [vmem:[%s9432_s30 + $0x1f1] sm:$0xff] }
 0x13e   : > { %14916 = vst [vmem:[#allocation91_spill] sm:$0xff] %v10542_v35  ;;  %7797 = vrot.lane.b32.xlu1 %v10186_v44, %s9355_s15  ;;  %v6253_v44 = vld [vmem:[%s9432_s30 + $0x1e1] sm:$0xff] }
 0x13f   : > { %7792 = vrot.lane.b32.xlu0 %v10169_v39, %s9355_s15  ;;  %v7821_v2 = vpack.i.bf16 %v10560_v58, %v6253_v44  ;;  %v10586_v44 = vld [vmem:[%s9432_s30 + $0x291] sm:$0xff]  ;;  %v10606_v35 = vld [vmem:[%s9432_s30 + $0x2c1] sm:$0xff] }
 0x140   : > { %v10549_v37 = vpop.permute.xlu1 %7517 }
 0x141   : > { %14917 = vst [vmem:[#allocation92_spill] sm:$0xff] %v10549_v37  ;;  %v10551_v15 = vpop.permute.xlu0 %7512 }
 0x142   : > { %14918 = vst [vmem:[#allocation93_spill] sm:$0xff] %v10551_v15  ;;  %7807 = vrot.lane.b32.xlu1 %v10201_v14, %s9355_s15 }
 0x143   : > { %7802 = vrot.lane.b32.xlu0 %v7801_v8, %s9355_s15 }
 0x144   : > { %v10556_v48 = vpop.permute.xlu1 %7527 }
 0x145   : > { %14919 = vst [vmem:[#allocation94_spill] sm:$0xff] %v10556_v48  ;;  %v10562_v39 = vpop.permute.xlu0 %7522  ;;  %v10577_v48 = vld [vmem:[%s9432_s30 + $0x2a1] sm:$0xff] }
 0x146   : > { %14920 = vst [vmem:[#allocation95_spill] sm:$0xff] %v10562_v39  ;;  %7817 = vrot.lane.b32.xlu1 %v10215_v33, %s9355_s15  ;;  %v10580_v33 = vld [vmem:[%s9432_s30 + $0x2b1] sm:$0xff]  ;;  %v6261_v39 = vld [vmem:[%s9432_s30 + $0x281] sm:$0xff] }
 0x147   : > { %7812 = vrot.lane.b32.xlu0 %v10197_v7, %s9355_s15 }
 0x148   : > { %v10569_v14 = vpop.permute.xlu1 %7537 }
 0x149   : > { %14921 = vst [vmem:[#allocation96_spill] sm:$0xff] %v10569_v14  ;;  %v10571_v8 = vpop.permute.xlu0 %7532  ;;  %v10598_v14 = vld [vmem:[%s9432_s30 + $0x2e1] sm:$0xff] }
 0x14a   : > { %14922 = vst [vmem:[#allocation97_spill] sm:$0xff] %v10571_v8  ;;  %7827 = vrot.lane.b32.xlu1 %v10230_v3, %s9355_s15  ;;  %v7846_v3 = vpack.i.bf16 %v10580_v33, %v10577_v48  ;;  %v10601_v8 = vld [vmem:[%s9432_s30 + $0x2f1] sm:$0xff] }
 0x14b   : > { %7822 = vrot.lane.b32.xlu0 %v7821_v2, %s9355_s15  ;;  %v7841_v2 = vpack.i.bf16 %v10586_v44, %v6261_v39 }
 0x14c   : > { %v10582_v7 = vpop.permute.xlu1 %7547 }
 0x14d   : > { %14923 = vst [vmem:[#allocation98_spill] sm:$0xff] %v10582_v7  ;;  %v10588_v37 = vpop.permute.xlu0 %7542  ;;  %v7856_v7 = vpack.i.bf16 %v10601_v8, %v10598_v14 }
 0x14e   : > { %14924 = vst [vmem:[#allocation99_spill] sm:$0xff] %v10588_v37  ;;  %7837 = vrot.lane.b32.xlu1 %v10244_v12, %s9355_s15  ;;  %v10609_v37 = vld [vmem:[%s9432_s30 + $0x2d1] sm:$0xff] }
 0x14f   : > { %7832 = vrot.lane.b32.xlu0 %v10226_v5, %s9355_s15  ;;  %v7851_v5 = vpack.i.bf16 %v10609_v37, %v10606_v35 }
 0x150   : > { %v10603_v15 = vpop.permute.xlu1 %7557 }
 0x151   : > { %14925 = vst [vmem:[#allocation100_spill] sm:$0xff] %v10603_v15  ;;  %v10611_v12 = vpop.permute.xlu0 %7552  ;;  %v6269_v15 = vld [vmem:[%s9432_s30 + $0xa2] sm:$0xff] }
 0x152   : > { %14926 = vst [vmem:[#allocation101_spill] sm:$0xff] %v10611_v12  ;;  %7847 = vrot.lane.b32.xlu1 %v7846_v3, %s9355_s15  ;;  %v7861_v3 = vpack.i.bf16 %v10623_v0, %v6269_v15 }
 0x153   : > { %7842 = vrot.lane.b32.xlu0 %v7841_v2, %s9355_s15 }
 0x154   : > { %v10619_v39 = vpop.permute.xlu1 %7567 }
 0x155   : > { %14927 = vst [vmem:[#allocation102_spill] sm:$0xff] %v10619_v39  ;;  %v10625_v62 = vpop.permute.xlu0 %7562 }
 0x156   : > { %14928 = vst [vmem:[#allocation103_spill] sm:$0xff] %v10625_v62  ;;  %7857 = vrot.lane.b32.xlu1 %v7856_v7, %s9355_s15  ;;  %v6277_v62 = vld [vmem:[%s9432_s30 + $0x142] sm:$0xff]  ;;  %v10641_v7 = vld [vmem:[%s9432_s30 + $0x152] sm:$0xff] }
 0x157   : > { %7852 = vrot.lane.b32.xlu0 %v7851_v5, %s9355_s15  ;;  %v7881_v15 = vpack.i.bf16 %v10641_v7, %v6277_v62 }
 0x158   : > { %v10630_v12 = vpop.permute.xlu1 %7577 }
 0x159   : > { %14929 = vst [vmem:[#allocation104_spill] sm:$0xff] %v10630_v12  ;;  %v10632_v2 = vpop.permute.xlu0 %7572 }
 0x15a   : > { %14930 = vst [vmem:[#allocation105_spill] sm:$0xff] %v10632_v2  ;;  %7867 = vrot.lane.b32.xlu1 %v10279_v34, %s9356_s16 }
 0x15b   : > { %7862 = vrot.lane.b32.xlu0 %v7861_v3, %s9356_s16 }
 0x15c   : > { %v10637_v39 = vpop.permute.xlu1 %7587 }
 0x15d   : > { %14931 = vst [vmem:[#allocation106_spill] sm:$0xff] %v10637_v39  ;;  %v10643_v5 = vpop.permute.xlu0 %7582  ;;  %v10661_v39 = vld [vmem:[%s9432_s30 + $0x1f2] sm:$0xff] }
 0x15e   : > { %14932 = vst [vmem:[#allocation107_spill] sm:$0xff] %v10643_v5  ;;  %7877 = vrot.lane.b32.xlu1 %v10293_v1, %s9356_s16  ;;  %v6285_v1 = vld [vmem:[%s9432_s30 + $0x1e2] sm:$0xff] }
 0x15f   : > { %7872 = vrot.lane.b32.xlu0 %v10276_v55, %s9356_s16  ;;  %v7901_v62 = vpack.i.bf16 %v10661_v39, %v6285_v1  ;;  %v10687_v1 = vld [vmem:[%s9432_s30 + $0x292] sm:$0xff]  ;;  %v10707_v5 = vld [vmem:[%s9432_s30 + $0x2c2] sm:$0xff] }
 0x160   : > { %v10650_v2 = vpop.permute.xlu1 %7597 }
 0x161   : > { %14933 = vst [vmem:[#allocation108_spill] sm:$0xff] %v10650_v2  ;;  %v10652_v34 = vpop.permute.xlu0 %7592 }
 0x162   : > { %14934 = vst [vmem:[#allocation109_spill] sm:$0xff] %v10652_v34  ;;  %7887 = vrot.lane.b32.xlu1 %v10308_v4, %s9356_s16 }
 0x163   : > { %7882 = vrot.lane.b32.xlu0 %v7881_v15, %s9356_s16 }
 0x164   : > { %v10657_v3 = vpop.permute.xlu1 %7607 }
 0x165   : > { %14935 = vst [vmem:[#allocation110_spill] sm:$0xff] %v10657_v3  ;;  %v10663_v55 = vpop.permute.xlu0 %7602  ;;  %v10678_v3 = vld [vmem:[%s9432_s30 + $0x2a2] sm:$0xff] }
 0x166   : > { %14936 = vst [vmem:[#allocation111_spill] sm:$0xff] %v10663_v55  ;;  %7897 = vrot.lane.b32.xlu1 %v10322_v21, %s9356_s16  ;;  %v10681_v21 = vld [vmem:[%s9432_s30 + $0x2b2] sm:$0xff]  ;;  %v6293_v55 = vld [vmem:[%s9432_s30 + $0x282] sm:$0xff] }
 0x167   : > { %7892 = vrot.lane.b32.xlu0 %v10304_v51, %s9356_s16 }
 0x168   : > { %v10670_v4 = vpop.permute.xlu1 %7617 }
 0x169   : > { %14937 = vst [vmem:[#allocation112_spill] sm:$0xff] %v10670_v4  ;;  %v10672_v15 = vpop.permute.xlu0 %7612  ;;  %v10699_v4 = vld [vmem:[%s9432_s30 + $0x2e2] sm:$0xff] }
 0x16a   : > { %14938 = vst [vmem:[#allocation113_spill] sm:$0xff] %v10672_v15  ;;  %7907 = vrot.lane.b32.xlu1 %v10337_v11, %s9356_s16  ;;  %v7926_v11 = vpack.i.bf16 %v10681_v21, %v10678_v3  ;;  %v10702_v15 = vld [vmem:[%s9432_s30 + $0x2f2] sm:$0xff] }
 0x16b   : > { %7902 = vrot.lane.b32.xlu0 %v7901_v62, %s9356_s16  ;;  %v7921_v62 = vpack.i.bf16 %v10687_v1, %v6293_v55 }
 0x16c   : > { %v10683_v51 = vpop.permute.xlu1 %7627 }
 0x16d   : > { %14939 = vst [vmem:[#allocation114_spill] sm:$0xff] %v10683_v51  ;;  %v10689_v2 = vpop.permute.xlu0 %7622 }
 0x16e   : > { %14940 = vst [vmem:[#allocation115_spill] sm:$0xff] %v10689_v2  ;;  %7917 = vrot.lane.b32.xlu1 %v10351_v16, %s9356_s16  ;;  %v10710_v16 = vld [vmem:[%s9432_s30 + $0x2d2] sm:$0xff] }
 0x16f   : > { %7912 = vrot.lane.b32.xlu0 %v10333_v63, %s9356_s16  ;;  %v7936_v63 = vpack.i.bf16 %v10702_v15, %v10699_v4  ;;  %v7931_v55 = vpack.i.bf16 %v10710_v16, %v10707_v5 }
 0x170   : > { %v10704_v34 = vpop.permute.xlu1 %7637 }
 0x171   : > { %14941 = vst [vmem:[#allocation116_spill] sm:$0xff] %v10704_v34  ;;  %v10712_v2 = vpop.permute.xlu0 %7632 }
 0x172   : > { %14942 = vst [vmem:[#allocation117_spill] sm:$0xff] %v10712_v2  ;;  %7927 = vrot.lane.b32.xlu1 %v7926_v11, %s9356_s16  ;;  %v7946_v2 = vpack.i.bf16 %v10382_v27, %v10357_v59  ;;  %v7941_v11 = vpack.i.bf16 %v10354_v46, %v10363_v56  ;;  %v7951_v46 = vpack.i.bf16 %v10374_v26, %v10385_v60  ;;  %v10770_v60 = vld [vmem:[%s9432_s30 + $0x1c0] sm:$0xff] }
 0x173   : > { %7922 = vrot.lane.b32.xlu0 %v7921_v62, %s9356_s16  ;;  %v10731_v62 = vld [vmem:[%s9432_s30 + $0x120] sm:$0xff]  ;;  %v7961_v26 = vpack.i.bf16 %v10396_v23, %v10405_v18  ;;  %v7976_v23 = vpack.i.bf16 %v10770_v60, %v10418_v19  ;;  %v7986_v19 = vpack.i.bf16 %v10464_v24, %v10440_v57 }
 0x174   : > { %v10720_v51 = vpop.permute.xlu1 %7647  ;;  %v7956_v56 = vpack.i.bf16 %v10731_v62, %v10377_v9  ;;  %v7966_v9 = vpack.i.bf16 %v10423_v45, %v10399_v20  ;;  %v7971_v45 = vpack.i.bf16 %v10415_v43, %v10426_v49  ;;  %v10793_v20 = vld [vmem:[%s9432_s30 + $0x1b2] sm:$0xff]  ;;  %v7981_v43 = vpack.i.bf16 %v10437_v54, %v10446_v28  ;;  %v10809_v49 = vld [vmem:[%s9432_s30 + $0x260] sm:$0xff] }
 0x175   : > { %14943 = vst [vmem:[#allocation118_spill] sm:$0xff] %v10720_v51  ;;  %v10722_v34 = vpop.permute.xlu0 %7642  ;;  %v10739_v51 = vld [vmem:[%s9432_s30 + $0xc2] sm:$0xff]  ;;  %v7996_v57 = vpack.i.bf16 %v10809_v49, %v10459_v47  ;;  %v7991_v54 = vpack.i.bf16 %v10456_v50, %v10467_v42  ;;  %v10832_v28 = vld [vmem:[%s9432_s30 + $0x252] sm:$0xff]  ;;  %v8006_v47 = vpack.i.bf16 %v10505_v52, %v10481_v61  ;;  %v8001_v50 = vpack.i.bf16 %v10478_v10, %v10487_v6 }
 0x176   : > { %14944 = vst [vmem:[#allocation119_spill] sm:$0xff] %v10722_v34  ;;  %7937 = vrot.lane.b32.xlu1 %v7936_v63, %s9356_s16  ;;  %v10754_v63 = vld [vmem:[%s9432_s30 + $0x112] sm:$0xff]  ;;  %v10848_v42 = vld [vmem:[%s9432_s30 + $0x300] sm:$0xff]  ;;  %v8011_v52 = vpack.i.bf16 %v10497_v31, %v10508_v40 }
 0x177   : > { %7932 = vrot.lane.b32.xlu0 %v7931_v55, %s9356_s16  ;;  %v10757_v55 = vld [vmem:[%s9432_s30 + $0x102] sm:$0xff]  ;;  %v6337_v6 = vld [vmem:[%s9432_s30 + $0xd1] sm:$0xff] }
 0x178   : > { %v10733_v12 = vpop.permute.xlu1 %7657  ;;  %v6338_v61 = vld [vmem:[%s9432_s30 + $0xe1] sm:$0xff]  ;;  %v6339_v40 = vld [vmem:[%s9432_s30 + $0xf1] sm:$0xff] }
 0x179   : > { %14945 = vst [vmem:[#allocation120_spill] sm:$0xff] %v10733_v12  ;;  %v10741_v34 = vpop.permute.xlu0 %7652  ;;  %v6421_v12 = vld [vmem:[%s9432_s30 + $0x240] sm:$0xff] }
 0x17a   : > { %14946 = vst [vmem:[#allocation121_spill] sm:$0xff] %v10741_v34  ;;  %7947 = vrot.lane.b32.xlu1 %v7946_v2, %s9357_s17 }
 0x17b   : > { %7942 = vrot.lane.b32.xlu0 %v7941_v11, %s9357_s17 }
 0x17c   : > { %v10751_v59 = vpop.permute.xlu1 %7667 }
 0x17d   : > { %14947 = vst [vmem:[#allocation122_spill] sm:$0xff] %v10751_v59  ;;  %v10759_v27 = vpop.permute.xlu0 %7662  ;;  %v10775_v59 = vld [vmem:[%s9432_s30 + $0x172] sm:$0xff] }
 0x17e   : > { %14948 = vst [vmem:[#allocation123_spill] sm:$0xff] %v10759_v27  ;;  %7957 = vrot.lane.b32.xlu1 %v7956_v56, %s9357_s17  ;;  %v10778_v27 = vld [vmem:[%s9432_s30 + $0x162] sm:$0xff]  ;;  %v10814_v56 = vld [vmem:[%s9432_s30 + $0x212] sm:$0xff] }
 0x17f   : > { %7952 = vrot.lane.b32.xlu0 %v7951_v46, %s9357_s17  ;;  %v10796_v46 = vld [vmem:[%s9432_s30 + $0x1a2] sm:$0xff] }
 0x180   : > { %v10772_v11 = vpop.permute.xlu1 %7677 }
 0x181   : > { %14949 = vst [vmem:[#allocation124_spill] sm:$0xff] %v10772_v11  ;;  %v10780_v2 = vpop.permute.xlu0 %7672 }
 0x182   : > { %14950 = vst [vmem:[#allocation125_spill] sm:$0xff] %v10780_v2  ;;  %7967 = vrot.lane.b32.xlu1 %v7966_v9, %s9357_s17 }
 0x183   : > { %7962 = vrot.lane.b32.xlu0 %v7961_v26, %s9357_s17 }
 0x184   : > { %v10790_v18 = vpop.permute.xlu1 %7687 }
 0x185   : > { %14951 = vst [vmem:[#allocation126_spill] sm:$0xff] %v10790_v18  ;;  %v10798_v11 = vpop.permute.xlu0 %7682  ;;  %v10817_v18 = vld [vmem:[%s9432_s30 + $0x202] sm:$0xff] }
 0x186   : > { %14952 = vst [vmem:[#allocation127_spill] sm:$0xff] %v10798_v11  ;;  %7977 = vrot.lane.b32.xlu1 %v7976_v23, %s9357_s17  ;;  %v6340_v11 = vld [vmem:[%s9432_s30 + $0x101] sm:$0xff] }
 0x187   : > { %7972 = vrot.lane.b32.xlu0 %v7971_v45, %s9357_s17  ;;  %v10835_v45 = vld [vmem:[%s9432_s30 + $0x242] sm:$0xff] }
 0x188   : > { %v10811_v26 = vpop.permute.xlu1 %7697 }
 0x189   : > { %14953 = vst [vmem:[#allocation128_spill] sm:$0xff] %v10811_v26  ;;  %v10819_v9 = vpop.permute.xlu0 %7692 }
 0x18a   : > { %14954 = vst [vmem:[#allocation129_spill] sm:$0xff] %v10819_v9  ;;  %7987 = vrot.lane.b32.xlu1 %v7986_v19, %s9357_s17  ;;  %v6342_v9 = vld [vmem:[%s9432_s30 + $0x121] sm:$0xff] }
 0x18b   : > { %7982 = vrot.lane.b32.xlu0 %v7981_v43, %s9357_s17 }
 0x18c   : > { %v10829_v24 = vpop.permute.xlu1 %7707 }
 0x18d   : > { %14955 = vst [vmem:[#allocation130_spill] sm:$0xff] %v10829_v24  ;;  %v10837_v26 = vpop.permute.xlu0 %7702  ;;  %v6418_v24 = vld [vmem:[%s9432_s30 + $0x210] sm:$0xff] }
 0x18e   : > { %14956 = vst [vmem:[#allocation131_spill] sm:$0xff] %v10837_v26  ;;  %7997 = vrot.lane.b32.xlu1 %v7996_v57, %s9357_s17  ;;  %v8016_v57 = vpack.i.bf16 %v10848_v42, %v10500_v53 }
 0x18f   : > { %7992 = vrot.lane.b32.xlu0 %v7991_v54, %s9357_s17  ;;  %v6336_v54 = vld [vmem:[%s9432_s30 + $0xc1] sm:$0xff] }
 0x190   : > { %v10850_v43 = vpop.permute.xlu1 %7717  ;;  %v8021_v53 = vpack.i.bf16 %v6336_v54, %v10522_v32  ;;  %v6345_v32 = vld [vmem:[%s9432_s30 + $0x171] sm:$0xff]  ;;  %v6344_v54 = vld [vmem:[%s9432_s30 + $0x161] sm:$0xff] }
 0x191   : > { %14957 = vst [vmem:[#allocation132_spill] sm:$0xff] %v10850_v43  ;;  %v10852_v23 = vpop.permute.xlu0 %7712 }
 0x192   : > { %14958 = vst [vmem:[#allocation133_spill] sm:$0xff] %v10852_v23  ;;  %8007 = vrot.lane.b32.xlu1 %v8006_v47, %s9357_s17  ;;  %v8026_v47 = vpack.i.bf16 %v6338_v61, %v6337_v6  ;;  %v6346_v6 = vld [vmem:[%s9432_s30 + $0x181] sm:$0xff] }
 0x193   : > { %8002 = vrot.lane.b32.xlu0 %v8001_v50, %s9357_s17  ;;  %v6341_v50 = vld [vmem:[%s9432_s30 + $0x111] sm:$0xff] }
 0x194   : > { %v10862_v10 = vpop.permute.xlu1 %7727 }
 0x195   : > { %14959 = vst [vmem:[#allocation134_spill] sm:$0xff] %v10862_v10  ;;  %v10865_v19 = vpop.permute.xlu0 %7722  ;;  %v11038_v10 = vld [vmem:[%s9432_s30 + $0x302] sm:$0xff] }
 0x196   : > { %14960 = vst [vmem:[#allocation135_spill] sm:$0xff] %v10865_v19  ;;  %8017 = vrot.lane.b32.xlu1 %v8016_v57, %s9357_s17  ;;  %v8036_v57 = vpack.i.bf16 %v6342_v9, %v6341_v50  ;;  %v8041_v9 = vpack.i.bf16 %v6344_v54, %v10540_v36  ;;  %v6347_v50 = vld [vmem:[%s9432_s30 + $0x191] sm:$0xff]  ;;  %v6354_v36 = vld [vmem:[%s9432_s30 + $0x221] sm:$0xff] }
 0x197   : > { %8012 = vrot.lane.b32.xlu0 %v8011_v52, %s9357_s17  ;;  %v8031_v52 = vpack.i.bf16 %v6340_v11, %v6339_v40  ;;  %v6348_v40 = vld [vmem:[%s9432_s30 + $0x1a1] sm:$0xff] }
 0x198   : > { %v10872_v31 = vpop.permute.xlu1 %7737  ;;  %v6352_v54 = vld [vmem:[%s9432_s30 + $0x201] sm:$0xff] }
 0x199   : > { %14961 = vst [vmem:[#allocation136_spill] sm:$0xff] %v10872_v31  ;;  %v10876_v2 = vpop.permute.xlu0 %7732 }
 0x19a   : > { %14962 = vst [vmem:[#allocation137_spill] sm:$0xff] %v10876_v2  ;;  %8027 = vrot.lane.b32.xlu1 %v8026_v47, %s9358_s25  ;;  %v8046_v2 = vpack.i.bf16 %v6346_v6, %v6345_v32  ;;  %v6349_v47 = vld [vmem:[%s9432_s30 + $0x1b1] sm:$0xff] }
 0x19b   : > { %8022 = vrot.lane.b32.xlu0 %v8021_v53, %s9358_s25  ;;  %v6350_v53 = vld [vmem:[%s9432_s30 + $0x1c1] sm:$0xff]  ;;  %v6353_v32 = vld [vmem:[%s9432_s30 + $0x211] sm:$0xff] }
 0x19c   : > { %v10882_v61 = vpop.permute.xlu1 %7747 }
 0x19d   : > { %14963 = vst [vmem:[#allocation138_spill] sm:$0xff] %v10882_v61  ;;  %v10885_v31 = vpop.permute.xlu0 %7742 }
 0x19e   : > { %14964 = vst [vmem:[#allocation139_spill] sm:$0xff] %v10885_v31  ;;  %8037 = vrot.lane.b32.xlu1 %v8036_v57, %s9358_s25  ;;  %v8056_v57 = vpack.i.bf16 %v6350_v53, %v6349_v47  ;;  %v8066_v31 = vpack.i.bf16 %v6354_v36, %v6353_v32  ;;  %v6358_v47 = vld [vmem:[%s9432_s30 + $0x261] sm:$0xff] }
 0x19f   : > { %8032 = vrot.lane.b32.xlu0 %v8031_v52, %s9358_s25  ;;  %v8051_v52 = vpack.i.bf16 %v6348_v40, %v6347_v50  ;;  %v6356_v50 = vld [vmem:[%s9432_s30 + $0x241] sm:$0xff] }
 0x1a0   : > { %v10892_v11 = vpop.permute.xlu1 %7757 }
 0x1a1   : > { %14965 = vst [vmem:[#allocation140_spill] sm:$0xff] %v10892_v11  ;;  %v10896_v61 = vpop.permute.xlu0 %7752 }
 0x1a2   : > { %14966 = vst [vmem:[#allocation141_spill] sm:$0xff] %v10896_v61  ;;  %8047 = vrot.lane.b32.xlu1 %v8046_v2, %s9358_s25  ;;  %v8061_v2 = vpack.i.bf16 %v6352_v54, %v10560_v58  ;;  %v6357_v61 = vld [vmem:[%s9432_s30 + $0x251] sm:$0xff]  ;;  %v8086_v58 = vpack.i.bf16 %v10606_v35, %v10580_v33  ;;  %v8091_v35 = vpack.i.bf16 %v10598_v14, %v10609_v37  ;;  %v10941_v33 = vld [vmem:[%s9432_s30 + $0xe2] sm:$0xff] }
 0x1a3   : > { %8042 = vrot.lane.b32.xlu0 %v8041_v9, %s9358_s25  ;;  %v6355_v9 = vld [vmem:[%s9432_s30 + $0x231] sm:$0xff] }
 0x1a4   : > { %v10902_v6 = vpop.permute.xlu1 %7767  ;;  %v10959_v14 = vld [vmem:[%s9432_s30 + $0xf2] sm:$0xff] }
 0x1a5   : > { %14967 = vst [vmem:[#allocation142_spill] sm:$0xff] %v10902_v6  ;;  %v10905_v11 = vpop.permute.xlu0 %7762  ;;  %v8076_v6 = vpack.i.bf16 %v6358_v47, %v6357_v61  ;;  %v6366_v61 = vld [vmem:[%s9432_s30 + $0x301] sm:$0xff] }
 0x1a6   : > { %14968 = vst [vmem:[#allocation143_spill] sm:$0xff] %v10905_v11  ;;  %8057 = vrot.lane.b32.xlu1 %v8056_v57, %s9358_s25  ;;  %v8071_v57 = vpack.i.bf16 %v6356_v50, %v6355_v9  ;;  %v10954_v47 = vld [vmem:[%s9432_s30 + $0x122] sm:$0xff] }
 0x1a7   : > { %8052 = vrot.lane.b32.xlu0 %v8051_v52, %s9358_s25  ;;  %v8116_v50 = vpack.i.bf16 %v10954_v47, %v10754_v63 }
 0x1a8   : > { %v10912_v53 = vpop.permute.xlu1 %7777 }
 0x1a9   : > { %14969 = vst [vmem:[#allocation144_spill] sm:$0xff] %v10912_v53  ;;  %v10916_v40 = vpop.permute.xlu0 %7772 }
 0x1aa   : > { %14970 = vst [vmem:[#allocation145_spill] sm:$0xff] %v10916_v40  ;;  %8067 = vrot.lane.b32.xlu1 %v8066_v31, %s9358_s25  ;;  %v8081_v31 = vpack.i.bf16 %v10577_v48, %v10586_v44  ;;  %v8106_v44 = vpack.i.bf16 %v10941_v33, %v10736_v41 }
 0x1ab   : > { %8062 = vrot.lane.b32.xlu0 %v8061_v2, %s9358_s25  ;;  %v8096_v2 = vpack.i.bf16 %v6366_v61, %v10601_v8  ;;  %v8101_v8 = vpack.i.bf16 %v10739_v51, %v10623_v0  ;;  %v8111_v0 = vpack.i.bf16 %v10757_v55, %v10959_v14 }
 0x1ac   : > { %v10920_v32 = vpop.permute.xlu1 %7787 }
 0x1ad   : > { %14971 = vst [vmem:[#allocation146_spill] sm:$0xff] %v10920_v32  ;;  %v10922_v52 = vpop.permute.xlu0 %7782 }
 0x1ae   : > { %14972 = vst [vmem:[#allocation147_spill] sm:$0xff] %v10922_v52  ;;  %8077 = vrot.lane.b32.xlu1 %v8076_v6, %s9358_s25 }
 0x1af   : > { %8072 = vrot.lane.b32.xlu0 %v8071_v57, %s9358_s25  ;;  %v10970_v57 = vld [vmem:[%s9432_s30 + $0x182] sm:$0xff] }
 0x1b0   : > { %v10931_v36 = vpop.permute.xlu1 %7797  ;;  %v8126_v61 = vpack.i.bf16 %v10970_v57, %v10775_v59 }
 0x1b1   : > { %14973 = vst [vmem:[#allocation148_spill] sm:$0xff] %v10931_v36  ;;  %v10933_v54 = vpop.permute.xlu0 %7792  ;;  %v11017_v36 = vld [vmem:[%s9432_s30 + $0x232] sm:$0xff] }
 0x1b2   : > { %14974 = vst [vmem:[#allocation149_spill] sm:$0xff] %v10933_v54  ;;  %8087 = vrot.lane.b32.xlu1 %v8086_v58, %s9358_s25 }
 0x1b3   : > { %8082 = vrot.lane.b32.xlu0 %v8081_v31, %s9358_s25 }
 0x1b4   : > { %v10943_v6 = vpop.permute.xlu1 %7807 }
 0x1b5   : > { %14975 = vst [vmem:[#allocation150_spill] sm:$0xff] %v10943_v6  ;;  %v10945_v48 = vpop.permute.xlu0 %7802 }
 0x1b6   : > { %14976 = vst [vmem:[#allocation151_spill] sm:$0xff] %v10945_v48  ;;  %8097 = vrot.lane.b32.xlu1 %v8096_v2, %s9358_s25  ;;  %v8121_v2 = vpack.i.bf16 %v10778_v27, %v10641_v7 }
 0x1b7   : > { %8092 = vrot.lane.b32.xlu0 %v8091_v35, %s9358_s25  ;;  %v10983_v35 = vld [vmem:[%s9432_s30 + $0x1c2] sm:$0xff] }
 0x1b8   : > { %v10956_v37 = vpop.permute.xlu1 %7817 }
 0x1b9   : > { %14977 = vst [vmem:[#allocation152_spill] sm:$0xff] %v10956_v37  ;;  %v10961_v9 = vpop.permute.xlu0 %7812 }
 0x1ba   : > { %14978 = vst [vmem:[#allocation153_spill] sm:$0xff] %v10961_v9  ;;  %8107 = vrot.lane.b32.xlu1 %v8106_v44, %s9359_s26 }
 0x1bb   : > { %8102 = vrot.lane.b32.xlu0 %v8101_v8, %s9359_s26  ;;  %v10988_v8 = vld [vmem:[%s9432_s30 + $0x192] sm:$0xff] }
 0x1bc   : > { %v10972_v58 = vpop.permute.xlu1 %7827  ;;  %v8131_v7 = vpack.i.bf16 %v10796_v46, %v10988_v8 }
 0x1bd   : > { %14979 = vst [vmem:[#allocation154_spill] sm:$0xff] %v10972_v58  ;;  %v10974_v31 = vpop.permute.xlu0 %7822 }
 0x1be   : > { %14980 = vst [vmem:[#allocation155_spill] sm:$0xff] %v10974_v31  ;;  %8117 = vrot.lane.b32.xlu1 %v8116_v50, %s9359_s26  ;;  %v8136_v50 = vpack.i.bf16 %v10983_v35, %v10793_v20 }
 0x1bf   : > { %8112 = vrot.lane.b32.xlu0 %v8111_v0, %s9359_s26  ;;  %v10999_v0 = vld [vmem:[%s9432_s30 + $0x222] sm:$0xff] }
 0x1c0   : > { %v10985_v44 = vpop.permute.xlu1 %7837  ;;  %v8146_v48 = vpack.i.bf16 %v10999_v0, %v10814_v56 }
 0x1c1   : > { %14981 = vst [vmem:[#allocation156_spill] sm:$0xff] %v10985_v44  ;;  %v10990_v53 = vpop.permute.xlu0 %7832 }
 0x1c2   : > { %14982 = vst [vmem:[#allocation157_spill] sm:$0xff] %v10990_v53  ;;  %8127 = vrot.lane.b32.xlu1 %v8126_v61, %s9359_s26  ;;  %v8141_v61 = vpack.i.bf16 %v10817_v18, %v10661_v39  ;;  %v8151_v39 = vpack.i.bf16 %v10835_v45, %v11017_v36 }
 0x1c3   : > { %8122 = vrot.lane.b32.xlu0 %v8121_v2, %s9359_s26  ;;  %v11012_v2 = vld [vmem:[%s9432_s30 + $0x262] sm:$0xff] }
 0x1c4   : > { %v11001_v40 = vpop.permute.xlu1 %7847 }
 0x1c5   : > { %14983 = vst [vmem:[#allocation158_spill] sm:$0xff] %v11001_v40  ;;  %v11003_v11 = vpop.permute.xlu0 %7842 }
 0x1c6   : > { %14984 = vst [vmem:[#allocation159_spill] sm:$0xff] %v11003_v11  ;;  %8137 = vrot.lane.b32.xlu1 %v8136_v50, %s9359_s26  ;;  %v8156_v50 = vpack.i.bf16 %v11012_v2, %v10832_v28 }
 0x1c7   : > { %8132 = vrot.lane.b32.xlu0 %v8131_v7, %s9359_s26 }
 0x1c8   : > { %v11014_v54 = vpop.permute.xlu1 %7857 }
 0x1c9   : > { %14985 = vst [vmem:[#allocation160_spill] sm:$0xff] %v11014_v54  ;;  %v11019_v52 = vpop.permute.xlu0 %7852 }
 0x1ca   : > { %14986 = vst [vmem:[#allocation161_spill] sm:$0xff] %v11019_v52  ;;  %8147 = vrot.lane.b32.xlu1 %v8146_v48, %s9359_s26  ;;  %v8166_v48 = vpack.i.bf16 %v10707_v5, %v10681_v21  ;;  %v8171_v5 = vpack.i.bf16 %v10699_v4, %v10710_v16  ;;  %v6404_v21 = vld [vmem:[%s9432_s30 + $0xf0] sm:$0xff]  ;;  %v6405_v16 = vld [vmem:[%s9432_s30 + $0x100] sm:$0xff] }
 0x1cb   : > { %8142 = vrot.lane.b32.xlu0 %v8141_v61, %s9359_s26  ;;  %v8161_v61 = vpack.i.bf16 %v10678_v3, %v10687_v1  ;;  %v6403_v3 = vld [vmem:[%s9432_s30 + $0xe0] sm:$0xff] }
 0x1cc   : > { %v11027_v7 = vpop.permute.xlu1 %7867 }
 0x1cd   : > { %14987 = vst [vmem:[#allocation162_spill] sm:$0xff] %v11027_v7  ;;  %v11029_v19 = vpop.permute.xlu0 %7862 }
 0x1ce   : > { %14988 = vst [vmem:[#allocation163_spill] sm:$0xff] %v11029_v19  ;;  %8157 = vrot.lane.b32.xlu1 %v8156_v50, %s9359_s26  ;;  %v8176_v50 = vpack.i.bf16 %v11038_v10, %v10702_v15  ;;  %v6406_v19 = vld [vmem:[%s9432_s30 + $0x110] sm:$0xff] }
 0x1cf   : > { %8152 = vrot.lane.b32.xlu0 %v8151_v39, %s9359_s26  ;;  %v6401_v39 = vld [vmem:[%s9432_s30 + $0xc0] sm:$0xff] }
 0x1d0   : > { %v11040_v32 = vpop.permute.xlu1 %7877 }
 0x1d1   : > { %14989 = vst [vmem:[#allocation164_spill] sm:$0xff] %v11040_v32  ;;  %v11042_v7 = vpop.permute.xlu0 %7872  ;;  %v6402_v32 = vld [vmem:[%s9432_s30 + $0xd0] sm:$0xff] }
 0x1d2   : > { %14990 = vst [vmem:[#allocation165_spill] sm:$0xff] %v11042_v7  ;;  %8167 = vrot.lane.b32.xlu1 %v8166_v48, %s9359_s26  ;;  %v8186_v48 = vpack.i.bf16 %v6404_v21, %v6403_v3  ;;  %v8181_v15 = vpack.i.bf16 %v6402_v32, %v6401_v39  ;;  %v6411_v3 = vld [vmem:[%s9432_s30 + $0x180] sm:$0xff]  ;;  %v6412_v32 = vld [vmem:[%s9432_s30 + $0x190] sm:$0xff] }
 0x1d3   : > { %8162 = vrot.lane.b32.xlu0 %v8161_v61, %s9359_s26  ;;  %v6408_v61 = vld [vmem:[%s9432_s30 + $0x130] sm:$0xff]  ;;  %v6409_v39 = vld [vmem:[%s9432_s30 + $0x160] sm:$0xff] }
 0x1d4   : > { %v11052_v1 = vpop.permute.xlu1 %7887 }
 0x1d5   : > { %v11056_v7 = vpop.permute.xlu0 %7882 }
 0x1d6   : > { %14991 = vst [vmem:[#allocation166_spill] sm:$0xff] %v11056_v7  ;;  %8177 = vrot.lane.b32.xlu1 %v8176_v50, %s9359_s26  ;;  %v8196_v50 = vpack.i.bf16 %v6408_v61, %v10731_v62  ;;  %v6410_v7 = vld [vmem:[%s9432_s30 + $0x170] sm:$0xff]  ;;  %v6413_v61 = vld [vmem:[%s9432_s30 + $0x1a0] sm:$0xff] }
 0x1d7   : > { %8172 = vrot.lane.b32.xlu0 %v8171_v5, %s9359_s26  ;;  %v8191_v5 = vpack.i.bf16 %v6406_v19, %v6405_v16  ;;  %v11082_v62 = vpack.i.bf16 %v6410_v7, %v6409_v39  ;;  %v6416_v19 = vld [vmem:[%s9432_s30 + $0x1d0] sm:$0xff]  ;;  %v6417_v39 = vld [vmem:[%s9432_s30 + $0x200] sm:$0xff] }
 0x1d8   : > { %v11061_v4 = vpop.permute.xlu1 %7897  ;;  %v6414_v16 = vld [vmem:[%s9432_s30 + $0x1b0] sm:$0xff] }
 0x1d9   : > { %v11065_v23 = vpop.permute.xlu0 %7892  ;;  %14993 = vst [vmem:[#allocation168_spill] sm:$0xff] %v11082_v62  ;;  %v11096_v7 = vpack.i.bf16 %v6414_v16, %v6413_v61  ;;  %v6424_v61 = vld [vmem:[%s9432_s30 + $0x270] sm:$0xff] }
 0x1da   : > { %8187 = vrot.lane.b32.xlu1 %v8186_v48, %s9360_s27  ;;  %v11079_v48 = vpack.i.bf16 %v6412_v32, %v6411_v3  ;;  %v6420_v3 = vld [vmem:[%s9432_s30 + $0x230] sm:$0xff] }
 0x1db   : > { %8182 = vrot.lane.b32.xlu0 %v8181_v15, %s9360_s27  ;;  %14994 = vst [vmem:[#allocation169_spill] sm:$0xff] %v11096_v7 }
 0x1dc   : > { %v11072_v21 = vpop.permute.xlu1 %7907  ;;  %14992 = vst [vmem:[#allocation167_spill] sm:$0xff] %v11079_v48 }
 0x1dd   : > { %v11076_v43 = vpop.permute.xlu0 %7902 }
 0x1de   : > { %8197 = vrot.lane.b32.xlu1 %v8196_v50, %s9360_s27  ;;  %v8216_v50 = vpack.i.bf16 %v6416_v19, %v10770_v60  ;;  %v11111_v19 = vpack.i.bf16 %v6418_v24, %v6417_v39  ;;  %v6428_v24 = vld [vmem:[%s9432_s30 + $0x2d0] sm:$0xff]  ;;  %v6425_v39 = vld [vmem:[%s9432_s30 + $0x2a0] sm:$0xff] }
 0x1df   : > { %8192 = vrot.lane.b32.xlu0 %v8191_v5, %s9360_s27  ;;  %v6419_v5 = vld [vmem:[%s9432_s30 + $0x220] sm:$0xff] }
 0x1e0   : > { %v11085_v15 = vpop.permute.xlu1 %7917  ;;  %v11107_v60 = vpack.i.bf16 %v6420_v3, %v6419_v5  ;;  %14996 = vst [vmem:[#allocation171_spill] sm:$0xff] %v11111_v19  ;;  %v6427_v5 = vld [vmem:[%s9432_s30 + $0x2c0] sm:$0xff]  ;;  %v11127_v3 = vpack.i.bf16 %v6422_v38, %v6421_v12  ;;  %v11150_v12 = vpack.i.bf16 %v6426_v29, %v6425_v39  ;;  %v7890_v29 = vunpack.i.h.bf16 %v11052_v1 }
 0x1e1   : > { %v11089_v26 = vpop.permute.xlu0 %7912  ;;  %v11148_v38 = vpack.i.bf16 %v6428_v24, %v6427_v5  ;;  %v7889_v5 = vunpack.i.l.bf16 %v11052_v1  ;;  %v15007_v24 = vunpack.i.h.bf16 %v10943_v6  ;;  %v7900_v1 = vunpack.i.h.bf16 %v11061_v4 }
 0x1e2   : > { %8207 = vrot.lane.b32.xlu1 %v11079_v48, %s9360_s27  ;;  %14995 = vst [vmem:[#allocation170_spill] sm:$0xff] %v11107_v60  ;;  %14997 = vst [vmem:[#allocation172_spill] sm:$0xff] %v11127_v3  ;;  %v11137_v48 = vld [vmem:[%s9432_s30 + $0x132] sm:$0xff] }
 0x1e3   : > { %8202 = vrot.lane.b32.xlu0 %v11082_v62, %s9360_s27  ;;  %15000 = vst [vmem:[#allocation175_spill] sm:$0xff] %v11148_v38  ;;  %15001 = vst [vmem:[#allocation176_spill] sm:$0xff] %v11150_v12  ;;  %v3455_v39 = vsel %vm3443_vm0, %v15007_v24, %v7890_v29  ;;  %v15009_v29 = vunpack.i.h.bf16 %v10956_v37 }
 0x1e4   : > { %v11100_v32 = vpop.permute.xlu1 %7927 }
 0x1e5   : > { %v11104_v34 = vpop.permute.xlu0 %7922 }
 0x1e6   : > { %8217 = vrot.lane.b32.xlu1 %v8216_v50, %s9360_s27  ;;  %v8236_v50 = vpack.i.bf16 %v6424_v61, %v10809_v49  ;;  %v11145_v49 = vld [vmem:[%s9432_s30 + $0x272] sm:$0xff]  ;;  %v8256_v61 = vpack.i.bf16 %v6432_v25, %v10848_v42  ;;  %v15006_v42 = vunpack.i.l.bf16 %v10943_v6 }
 0x1e7   : > { %8212 = vrot.lane.b32.xlu0 %v11096_v7, %s9360_s27 }
 0x1e8   : > { %v11114_v16 = vpop.permute.xlu1 %7937 }
 0x1e9   : > { %v11118_v30 = vpop.permute.xlu0 %7932 }
 0x1ea   : > { %8227 = vrot.lane.b32.xlu1 %v11107_v60, %s9360_s27  ;;  %v11142_v60 = vld [vmem:[%s9432_s30 + $0x1d2] sm:$0xff] }
 0x1eb   : > { %8222 = vrot.lane.b32.xlu0 %v11111_v19, %s9360_s27 }
 0x1ec   : > { %v11132_v22 = vpop.permute.xlu1 %7947 }
 0x1ed   : > { %14998 = vst [vmem:[#allocation173_spill] sm:$0xff] %v11132_v22  ;;  %v11139_v7 = vpop.permute.xlu0 %7942  ;;  %v11155_v22 = vpack.i.bf16 %v6430_v13, %v6429_v17  ;;  %v7895_v13 = vunpack.i.h.bf16 %v11065_v23 }
 0x1ee   : > { %14999 = vst [vmem:[#allocation174_spill] sm:$0xff] %v11139_v7  ;;  %8237 = vrot.lane.b32.xlu1 %v8236_v50, %s9360_s27  ;;  %v8266_v7 = vpack.i.bf16 %v10959_v14, %v10941_v33  ;;  %v7899_v33 = vunpack.i.l.bf16 %v11061_v4  ;;  %v7910_v4 = vunpack.i.h.bf16 %v11072_v21 }
 0x1ef   : > { %8232 = vrot.lane.b32.xlu0 %v11127_v3, %s9360_s27  ;;  %15002 = vst [vmem:[#allocation177_spill] sm:$0xff] %v11155_v22 }
 0x1f0   : > { %v11161_v62 = vpop.permute.xlu1 %7957 }
 0x1f1   : > { %15003 = vst [vmem:[#allocation178_spill] sm:$0xff] %v11161_v62  ;;  %v11175_v14 = vpop.permute.xlu0 %7952  ;;  %v3454_v62 = vsel %vm3443_vm0, %v15006_v42, %v7889_v5  ;;  %v3459_v5 = vsel %vm3443_vm0, %v15009_v29, %v7900_v1  ;;  %v15012_v1 = vpack.i.bf16 %v10736_v41, %v10739_v51  ;;  %v15016_v51 = vunpack.i.h.bf16 %v10974_v31 }
 0x1f2   : > { %15004 = vst [vmem:[#allocation179_spill] sm:$0xff] %v11175_v14  ;;  %8247 = vrot.lane.b32.xlu1 %v11148_v38, %s9360_s27 }
 0x1f3   : > { %8242 = vrot.lane.b32.xlu0 %v11150_v12, %s9360_s27 }
 0x1f4   : > { %v7968_v17 = vpop.permute.xlu1 %7967 }
 0x1f5   : > { %v7970_v25 = vunpack.i.h.bf16 %v7968_v17  ;;  %v7969_v19 = vunpack.i.l.bf16 %v7968_v17  ;;  %v11195_v14 = vpop.permute.xlu0 %7962  ;;  %v7894_v17 = vunpack.i.l.bf16 %v11065_v23  ;;  %v7905_v23 = vunpack.i.h.bf16 %v11076_v43 }
 0x1f6   : > { %15005 = vst [vmem:[#allocation180_spill] sm:$0xff] %v11195_v14  ;;  %8257 = vrot.lane.b32.xlu1 %v8256_v61, %s9360_s27  ;;  %v7909_v61 = vunpack.i.l.bf16 %v11072_v21  ;;  %v15010_v21 = vunpack.i.l.bf16 %v10961_v9 }
 0x1f7   : > { %v11209_v50 = vsel %vm3476_vm1, %v3454_v62, %v7969_v19  ;;  %v11212_v14 = vsel %vm3476_vm1, %v3455_v39, %v7970_v25  ;;  %8252 = vrot.lane.b32.xlu0 %v11155_v22, %s9360_s27  ;;  %v7904_v62 = vunpack.i.l.bf16 %v11076_v43  ;;  %v15008_v39 = vunpack.i.l.bf16 %v10956_v37  ;;  %s6000_s27 = sshll.u32 %s9328_s18, 1  ;;  %s6001_s18 = sshll.u32 %s15447_s19, 2 }
 0x1f8   : > { %v7978_v42 = vpop.permute.xlu1 %7977  ;;  %v3456_v12 = vsel %vm3443_vm0, %v15010_v21, %v7894_v17  ;;  %v15011_v43 = vunpack.i.h.bf16 %v10961_v9  ;;  %v15014_v17 = vunpack.i.h.bf16 %v10972_v58  ;;  %p281_p6 = scmp.lt.s32.totalorder %s6000_s27, 3 }
 0x1f9   : > { %v7980_v19 = vunpack.i.h.bf16 %v7978_v42  ;;  %v7979_v24 = vunpack.i.l.bf16 %v7978_v42  ;;  %v7973_v25 = vpop.permute.xlu0 %7972  ;;  %v3458_v6 = vsel %vm3443_vm0, %v15008_v39, %v7899_v33 }
 0x1fa   : > { %v7975_v38 = vunpack.i.h.bf16 %v7973_v25  ;;  %v7974_v22 = vunpack.i.l.bf16 %v7973_v25  ;;  %8267 = vrot.lane.b32.xlu1 %v8266_v7, %s9346_s6  ;;  %v3457_v42 = vsel %vm3443_vm0, %v15011_v43, %v7895_v13  ;;  %v15013_v7 = vunpack.i.l.bf16 %v10972_v58  ;;  %s15449_s27 = smov (!%p281_p6, %s6000_s27), 3 }
 0x1fb   : > { %v11236_v3 = vsel %vm3476_vm1, %v3458_v6, %v7979_v24  ;;  %v11239_v33 = vsel %vm3476_vm1, %v3459_v5, %v7980_v19  ;;  %8262 = vrot.lane.b32.xlu0 %v15012_v1, %s9346_s6  ;;  %v3463_v25 = vsel %vm3443_vm0, %v15014_v17, %v7910_v4  ;;  %v15015_v19 = vunpack.i.l.bf16 %v10974_v31 }
 0x1fc   : > { %v3462_v29 = vsel %vm3443_vm0, %v15013_v7, %v7909_v61  ;;  %v11252_v13 = vsel %vm3476_vm1, %v3456_v12, %v7974_v22  ;;  %v11255_v6 = vsel %vm3476_vm1, %v3457_v42, %v7975_v38  ;;  %v7988_v5 = vpop.permute.xlu1 %7987  ;;  %v3461_v24 = vsel %vm3443_vm0, %v15016_v51, %v7905_v23 }
 0x1fd   : > { %v3460_v41 = vsel %vm3443_vm0, %v15015_v19, %v7904_v62  ;;  %v7990_v61 = vunpack.i.h.bf16 %v7988_v5  ;;  %v7989_v39 = vunpack.i.l.bf16 %v7988_v5  ;;  %v7983_v21 = vpop.permute.xlu0 %7982  ;;  %v7920_v4 = vunpack.i.h.bf16 %v11085_v15 }
 0x1fe   : > { %v7919_v22 = vunpack.i.l.bf16 %v11085_v15  ;;  %v7985_v12 = vunpack.i.h.bf16 %v7983_v21  ;;  %v7984_v43 = vunpack.i.l.bf16 %v7983_v21  ;;  %v15017_v38 = vpack.i.bf16 %v11137_v48, %v10954_v47 }
 0x1ff   : > { %v7915_v62 = vunpack.i.h.bf16 %v11089_v26  ;;  %v7914_v42 = vunpack.i.l.bf16 %v11089_v26  ;;  %v11272_v23 = vsel %vm3476_vm1, %v3462_v29, %v7989_v39  ;;  %v11275_v1 = vsel %vm3476_vm1, %v3463_v25, %v7990_v61 }
 0x200   : > { %8277 = vrot.lane.b32.xlu1 %v15017_v38, %s9346_s6  ;;  %v15018_v15 = vpack.i.bf16 %v10754_v63, %v10757_v55  ;;  %v7930_v7 = vunpack.i.h.bf16 %v11100_v32  ;;  %v7929_v47 = vunpack.i.l.bf16 %v11100_v32  ;;  %v11284_v48 = vsel %vm3476_vm1, %v3460_v41, %v7984_v43  ;;  %v7998_v29 = vpop.permute.xlu1 %7997 }
 0x201   : > { %v11287_v26 = vsel %vm3476_vm1, %v3461_v24, %v7985_v12  ;;  %v7925_v17 = vunpack.i.h.bf16 %v11104_v34  ;;  %v7924_v25 = vunpack.i.l.bf16 %v11104_v34  ;;  %v8000_v5 = vunpack.i.h.bf16 %v7998_v29  ;;  %v7993_v51 = vpop.permute.xlu0 %7992 }
 0x202   : > { %8272 = vrot.lane.b32.xlu0 %v15018_v15, %s9346_s6  ;;  %v7999_v19 = vunpack.i.l.bf16 %v7998_v29  ;;  %v15019_v63 = vunpack.i.l.bf16 %v10985_v44  ;;  %v15020_v32 = vunpack.i.h.bf16 %v10985_v44  ;;  %v7995_v61 = vunpack.i.h.bf16 %v7993_v51 }
 0x203   : > { %v7994_v39 = vunpack.i.l.bf16 %v7993_v51  ;;  %v15021_v24 = vpack.i.bf16 %v10988_v8, %v10970_v57  ;;  %v15022_v34 = vunpack.i.l.bf16 %v10990_v53  ;;  %v15023_v12 = vunpack.i.h.bf16 %v10990_v53 }
 0x204   : > { %v3466_v55 = vsel %vm3443_vm0, %v15019_v63, %v7919_v22  ;;  %v3467_v41 = vsel %vm3443_vm0, %v15020_v32, %v7920_v4  ;;  %v15024_v38 = vpack.i.bf16 %v10775_v59, %v10778_v27  ;;  %v15025_v57 = vunpack.i.l.bf16 %v11001_v40 }
 0x205   : > { %8287 = vrot.lane.b32.xlu1 %v15021_v24, %s9346_s6  ;;  %v3464_v21 = vsel %vm3443_vm0, %v15022_v34, %v7914_v42  ;;  %v3465_v43 = vsel %vm3443_vm0, %v15023_v12, %v7915_v62  ;;  %v11308_v22 = vsel %vm3476_vm1, %v3466_v55, %v7999_v19  ;;  %v11311_v4 = vsel %vm3476_vm1, %v3467_v41, %v8000_v5  ;;  %v8008_v5 = vpop.permute.xlu1 %8007  ;;  %v8003_v55 = vpop.permute.xlu0 %8002 }
 0x206   : > { %8282 = vrot.lane.b32.xlu0 %v15024_v38, %s9346_s6  ;;  %v3470_v8 = vsel %vm3443_vm0, %v15025_v57, %v7929_v47  ;;  %v15026_v42 = vunpack.i.h.bf16 %v11001_v40  ;;  %v11324_v62 = vsel %vm3476_vm1, %v3464_v21, %v7994_v39  ;;  %v11327_v29 = vsel %vm3476_vm1, %v3465_v43, %v7995_v61 }
 0x207   : > { %v15027_v19 = vunpack.i.l.bf16 %v11003_v11  ;;  %v15028_v59 = vunpack.i.h.bf16 %v11003_v11  ;;  %v8010_v47 = vunpack.i.h.bf16 %v8008_v5  ;;  %v8009_v63 = vunpack.i.l.bf16 %v8008_v5 }
 0x208   : > { %v3471_v15 = vsel %vm3443_vm0, %v15026_v42, %v7930_v7  ;;  %v7940_v7 = vunpack.i.h.bf16 %v11114_v16  ;;  %v7939_v32 = vunpack.i.l.bf16 %v11114_v16  ;;  %v8005_v41 = vunpack.i.h.bf16 %v8003_v55 }
 0x209   : > { %v3468_v27 = vsel %vm3443_vm0, %v15027_v19, %v7924_v25  ;;  %v3469_v51 = vsel %vm3443_vm0, %v15028_v59, %v7925_v17  ;;  %v8004_v39 = vunpack.i.l.bf16 %v8003_v55  ;;  %v15029_v61 = vpack.i.bf16 %v11142_v60, %v10983_v35  ;;  %v8018_v12 = vpop.permute.xlu1 %8017 }
 0x20a   : > { %v7935_v25 = vunpack.i.h.bf16 %v11118_v30  ;;  %v7934_v24 = vunpack.i.l.bf16 %v11118_v30  ;;  %v11344_v17 = vsel %vm3476_vm1, %v3470_v8, %v8009_v63  ;;  %v11347_v34 = vsel %vm3476_vm1, %v3471_v15, %v8010_v47  ;;  %v6492_v63 = vld [vmem:[%s9432_s30 + $0x2d2] sm:$0xff] }
 0x20b   : > { %8297 = vrot.lane.b32.xlu1 %v15029_v61, %s9346_s6  ;;  %v15030_v16 = vpack.i.bf16 %v10793_v20, %v10796_v46  ;;  %v14661_v21 = vunpack.i.h.bf16 %v11014_v54  ;;  %v14662_v35 = vunpack.i.l.bf16 %v11014_v54  ;;  %v11356_v60 = vsel %vm3476_vm1, %v3468_v27, %v8004_v39  ;;  %v8013_v46 = vpop.permute.xlu0 %8012  ;;  %v6490_v39 = vld [vmem:[%s9432_s30 + $0x2b2] sm:$0xff] }
 0x20c   : > { %v11359_v30 = vsel %vm3476_vm1, %v3469_v51, %v8005_v41  ;;  %v14663_v43 = vunpack.i.h.bf16 %v11019_v52  ;;  %v14664_v38 = vunpack.i.l.bf16 %v11019_v52  ;;  %v8020_v57 = vunpack.i.h.bf16 %v8018_v12  ;;  %v6489_v41 = vld [vmem:[%s9432_s30 + $0x2a2] sm:$0xff]  ;;  %v6542_v54 = vld [vmem:[%s9432_s30 + $0x211] sm:$0xff] }
 0x20d   : > { %8292 = vrot.lane.b32.xlu0 %v15030_v16, %s9346_s6  ;;  %v8019_v20 = vunpack.i.l.bf16 %v8018_v12  ;;  %v3474_v8 = vsel %vm3443_vm0, %v14662_v35, %v7939_v32  ;;  %v3475_v42 = vsel %vm3443_vm0, %v14661_v21, %v7940_v7  ;;  %v8015_v15 = vunpack.i.h.bf16 %v8013_v46  ;;  %v11397_v32 = vpop.permute.xlu1 %8027  ;;  %v6496_v16 = vld [vmem:[%s9432_s30 + $0x312] sm:$0xff] }
 0x20e   : > { %v8014_v5 = vunpack.i.l.bf16 %v8013_v46  ;;  %v15031_v19 = vpack.i.bf16 %v11017_v36, %v10999_v0  ;;  %v3472_v27 = vsel %vm3443_vm0, %v14664_v38, %v7934_v24  ;;  %v3473_v59 = vsel %vm3443_vm0, %v14663_v43, %v7935_v25  ;;  %v6491_v0 = vld [vmem:[%s9432_s30 + $0x2c2] sm:$0xff]  ;;  %15033 = vst [vmem:[#allocation181_spill] sm:$0xff] %v11397_v32  ;;  %v11607_v35 = vld [vmem:[%s9432_s30 + $0x191] sm:$0xff] }
 0x20f   : > { %v11380_v51 = vsel %vm3476_vm1, %v3474_v8, %v8019_v20  ;;  %v11383_v47 = vsel %vm3476_vm1, %v3475_v42, %v8020_v57  ;;  %v15032_v36 = vpack.i.bf16 %v10814_v56, %v10817_v18  ;;  %v11395_v7 = vsel %vm3476_vm1, %v3473_v59, %v8015_v15  ;;  %v11401_v61 = vpop.permute.xlu0 %8022  ;;  %v6493_v57 = vld [vmem:[%s9432_s30 + $0x2e2] sm:$0xff]  ;;  %v6494_v20 = vld [vmem:[%s9432_s30 + $0x2f2] sm:$0xff] }
 0x210   : > { %8307 = vrot.lane.b32.xlu1 %v15031_v19, %s9346_s6  ;;  %v11392_v55 = vsel %vm3476_vm1, %v3472_v27, %v8014_v5  ;;  %15034 = vst [vmem:[#allocation182_spill] sm:$0xff] %v11401_v61  ;;  %v15035_v56 = vpack.i.bf16 %v11145_v49, %v11012_v2  ;;  %v11407_v18 = vpack.i.bf16 %v6492_v63, %v6491_v0  ;;  %v11431_v8 = vld [vmem:[%s9432_s30 + $0x150] sm:$0xff] }
 0x211   : > { %8302 = vrot.lane.b32.xlu0 %v15032_v36, %s9346_s6  ;;  %v15036_v25 = vpack.i.bf16 %v10832_v28, %v10835_v45  ;;  %v11413_v24 = vpack.i.bf16 %v6490_v39, %v6489_v41  ;;  %v11416_v12 = vpop.permute.xlu1 %8037  ;;  %v8336_v2 = vpack.i.bf16 %v6496_v16, %v11038_v10  ;;  %v11427_v49 = vpack.i.bf16 %v6494_v20, %v6493_v57  ;;  %v6499_v45 = vld [vmem:[%s9432_s30 + $0x140] sm:$0xff] }
 0x212   : > { %15037 = vst [vmem:[#allocation183_spill] sm:$0xff] %v11416_v12  ;;  %v8341_v27 = vpack.i.bf16 %v11431_v8, %v6499_v45  ;;  %v6507_v20 = vld [vmem:[%s9432_s30 + $0x1e0] sm:$0xff] }
 0x213   : > { %v11420_v46 = vpop.permute.xlu0 %8032 }
 0x214   : > { %8317 = vrot.lane.b32.xlu1 %v15035_v56, %s9346_s6  ;;  %15038 = vst [vmem:[#allocation184_spill] sm:$0xff] %v11420_v46 }
 0x215   : > { %8312 = vrot.lane.b32.xlu0 %v15036_v25, %s9346_s6  ;;  %v8048_v28 = vpop.permute.xlu1 %8047 }
 0x216   : > { %v8050_v42 = vunpack.i.h.bf16 %v8048_v28  ;;  %v8049_v15 = vunpack.i.l.bf16 %v8048_v28 }
 0x217   : > { %v11433_v5 = vpop.permute.xlu0 %8042 }
 0x218   : > { %8327 = vrot.lane.b32.xlu1 %v11407_v18, %s9346_s6  ;;  %15039 = vst [vmem:[#allocation185_spill] sm:$0xff] %v11433_v5  ;;  %v11438_v19 = vsel %vm3509_vm2, %v11209_v50, %v8049_v15  ;;  %v11442_v10 = vsel %vm3509_vm2, %v11212_v14, %v8050_v42  ;;  %v15040_v50 = vld [vmem:[#allocation168_spill] sm:$0xff] }
 0x219   : > { %8322 = vrot.lane.b32.xlu0 %v11413_v24, %s9346_s6  ;;  %v8058_v59 = vpop.permute.xlu1 %8057 }
 0x21a   : > { %v8060_v36 = vunpack.i.h.bf16 %v8058_v59  ;;  %v8059_v0 = vunpack.i.l.bf16 %v8058_v59 }
 0x21b   : > { %v8053_v63 = vpop.permute.xlu0 %8052 }
 0x21c   : > { %8337 = vrot.lane.b32.xlu1 %v8336_v2, %s9346_s6  ;;  %v8055_v41 = vunpack.i.h.bf16 %v8053_v63  ;;  %v8054_v39 = vunpack.i.l.bf16 %v8053_v63  ;;  %v11451_v14 = vsel %vm3509_vm2, %v11236_v3, %v8059_v0  ;;  %v11455_v56 = vsel %vm3509_vm2, %v11239_v33, %v8060_v36  ;;  %v6508_v2 = vld [vmem:[%s9432_s30 + $0x1f0] sm:$0xff]  ;;  %v15041_v33 = vld [vmem:[#allocation169_spill] sm:$0xff] }
 0x21d   : > { %8332 = vrot.lane.b32.xlu0 %v11427_v49, %s9346_s6  ;;  %v8068_v57 = vpop.permute.xlu1 %8067  ;;  %v8361_v59 = vpack.i.bf16 %v6508_v2, %v6507_v20 }
 0x21e   : > { %v11460_v25 = vsel %vm3509_vm2, %v11252_v13, %v8054_v39  ;;  %v11464_v16 = vsel %vm3509_vm2, %v11255_v6, %v8055_v41  ;;  %v8070_v28 = vunpack.i.h.bf16 %v8068_v57  ;;  %v8069_v3 = vunpack.i.l.bf16 %v8068_v57  ;;  %v15042_v6 = vld [vmem:[#allocation167_spill] sm:$0xff] }
 0x21f   : > { %v8063_v45 = vpop.permute.xlu0 %8062  ;;  %v15043_v57 = vld [vmem:[#allocation171_spill] sm:$0xff] }
 0x220   : > { %8347 = vrot.lane.b32.xlu1 %v15040_v50, %s9347_s7  ;;  %v8065_v42 = vunpack.i.h.bf16 %v8063_v45  ;;  %v8064_v15 = vunpack.i.l.bf16 %v8063_v45  ;;  %v11476_v13 = vsel %vm3509_vm2, %v11275_v1, %v8070_v28  ;;  %v6516_v45 = vld [vmem:[%s9432_s30 + $0x290] sm:$0xff] }
 0x221   : > { %8342 = vrot.lane.b32.xlu0 %v8341_v27, %s9347_s7  ;;  %v11472_v27 = vsel %vm3509_vm2, %v11272_v23, %v8069_v3  ;;  %v8078_v23 = vpop.permute.xlu1 %8077  ;;  %v6515_v3 = vld [vmem:[%s9432_s30 + $0x280] sm:$0xff] }
 0x222   : > { %v11482_v36 = vsel %vm3509_vm2, %v11284_v48, %v8064_v15  ;;  %v11486_v0 = vsel %vm3509_vm2, %v11287_v26, %v8065_v42  ;;  %v8080_v63 = vunpack.i.h.bf16 %v8078_v23  ;;  %v8079_v41 = vunpack.i.l.bf16 %v8078_v23 }
 0x223   : > { %v8073_v39 = vpop.permute.xlu0 %8072  ;;  %v8381_v23 = vpack.i.bf16 %v6516_v45, %v6515_v3  ;;  %v6525_v3 = vld [vmem:[%s9432_s30 + $0x340] sm:$0xff]  ;;  %v6526_v45 = vld [vmem:[%s9432_s30 + $0x350] sm:$0xff] }
 0x224   : > { %8357 = vrot.lane.b32.xlu1 %v15041_v33, %s9347_s7  ;;  %v8075_v1 = vunpack.i.h.bf16 %v8073_v39  ;;  %v8074_v50 = vunpack.i.l.bf16 %v8073_v39  ;;  %v11492_v20 = vsel %vm3509_vm2, %v11308_v22, %v8079_v41  ;;  %v11496_v48 = vsel %vm3509_vm2, %v11311_v4, %v8080_v63  ;;  %v15044_v4 = vld [vmem:[#allocation172_spill] sm:$0xff] }
 0x225   : > { %8352 = vrot.lane.b32.xlu0 %v15042_v6, %s9347_s7  ;;  %v8088_v28 = vpop.permute.xlu1 %8087 }
 0x226   : > { %v11501_v26 = vsel %vm3509_vm2, %v11324_v62, %v8074_v50  ;;  %v11505_v2 = vsel %vm3509_vm2, %v11327_v29, %v8075_v1  ;;  %v8090_v42 = vunpack.i.h.bf16 %v8088_v28  ;;  %v8089_v22 = vunpack.i.l.bf16 %v8088_v28  ;;  %v15045_v29 = vld [vmem:[#allocation170_spill] sm:$0xff]  ;;  %v15046_v28 = vld [vmem:[#allocation176_spill] sm:$0xff] }
 0x227   : > { %v8083_v15 = vpop.permute.xlu0 %8082 }
 0x228   : > { %8367 = vrot.lane.b32.xlu1 %v15043_v57, %s9347_s7  ;;  %v8085_v33 = vunpack.i.h.bf16 %v8083_v15  ;;  %v8084_v6 = vunpack.i.l.bf16 %v8083_v15  ;;  %v11517_v62 = vsel %vm3509_vm2, %v11347_v34, %v8090_v42  ;;  %v6523_v15 = vld [vmem:[%s9432_s30 + $0x320] sm:$0xff] }
 0x229   : > { %8362 = vrot.lane.b32.xlu0 %v8361_v59, %s9347_s7  ;;  %v11513_v59 = vsel %vm3509_vm2, %v11344_v17, %v8089_v22  ;;  %v8098_v17 = vpop.permute.xlu1 %8097 }
 0x22a   : > { %v11523_v63 = vsel %vm3509_vm2, %v11356_v60, %v8084_v6  ;;  %v11527_v41 = vsel %vm3509_vm2, %v11359_v30, %v8085_v33  ;;  %v8100_v39 = vunpack.i.h.bf16 %v8098_v17  ;;  %v8099_v1 = vunpack.i.l.bf16 %v8098_v17  ;;  %v6524_v33 = vld [vmem:[%s9432_s30 + $0x330] sm:$0xff]  ;;  %v15049_v6 = vld [vmem:[#allocation177_spill] sm:$0xff] }
 0x22b   : > { %v8093_v34 = vpop.permute.xlu0 %8092 }
 0x22c   : > { %8377 = vrot.lane.b32.xlu1 %v15044_v4, %s9347_s7  ;;  %v8095_v50 = vunpack.i.h.bf16 %v8093_v34  ;;  %v8094_v57 = vunpack.i.l.bf16 %v8093_v34  ;;  %v11533_v60 = vsel %vm3509_vm2, %v11380_v51, %v8099_v1  ;;  %v11537_v30 = vsel %vm3509_vm2, %v11383_v47, %v8100_v39  ;;  %v6527_v39 = vld [vmem:[%s9432_s30 + $0x360] sm:$0xff]  ;;  %v6528_v1 = vld [vmem:[%s9432_s30 + $0x370] sm:$0xff] }
 0x22d   : > { %8372 = vrot.lane.b32.xlu0 %v15045_v29, %s9347_s7  ;;  %v11550_v51 = vpop.permute.xlu1 %8107  ;;  %v8406_v4 = vpack.i.bf16 %v6526_v45, %v6525_v3  ;;  %v15050_v29 = vld [vmem:[#allocation175_spill] sm:$0xff]  ;;  %v11574_v3 = vld [vmem:[%s9432_s30 + $0x171] sm:$0xff] }
 0x22e   : > { %v11544_v42 = vsel %vm3509_vm2, %v11392_v55, %v8094_v57  ;;  %v11548_v22 = vsel %vm3509_vm2, %v11395_v7, %v8095_v50  ;;  %15047 = vst [vmem:[#allocation168_spill] sm:$0xff] %v11550_v51  ;;  %v8401_v55 = vpack.i.bf16 %v6524_v33, %v6523_v15  ;;  %v6529_v7 = vld [vmem:[%s9432_s30 + $0x380] sm:$0xff]  ;;  %v8411_v57 = vpack.i.bf16 %v6528_v1, %v6527_v39  ;;  %v11578_v33 = vld [vmem:[%s9432_s30 + $0x151] sm:$0xff] }
 0x22f   : > { %v11554_v47 = vpop.permute.xlu0 %8102  ;;  %v6531_v15 = vld [vmem:[%s9432_s30 + $0x141] sm:$0xff]  ;;  %v11601_v1 = vld [vmem:[%s9432_s30 + $0x1b1] sm:$0xff] }
 0x230   : > { %8387 = vrot.lane.b32.xlu1 %v15046_v28, %s9347_s7  ;;  %15048 = vst [vmem:[#allocation169_spill] sm:$0xff] %v11554_v47  ;;  %v11571_v28 = vld [vmem:[%s9432_s30 + $0x161] sm:$0xff] }
 0x231   : > { %8382 = vrot.lane.b32.xlu0 %v8381_v23, %s9347_s7  ;;  %v6530_v23 = vld [vmem:[%s9432_s30 + $0x390] sm:$0xff]  ;;  %v11562_v17 = vpop.permute.xlu1 %8117  ;;  %v11598_v39 = vld [vmem:[%s9432_s30 + $0x1a1] sm:$0xff] }
 0x232   : > { %15051 = vst [vmem:[#allocation167_spill] sm:$0xff] %v11562_v17  ;;  %v8416_v50 = vpack.i.bf16 %v6530_v23, %v6529_v7  ;;  %v8421_v23 = vpack.i.bf16 %v11578_v33, %v6531_v15  ;;  %v11613_v15 = vpack.i.bf16 %v11601_v1, %v11598_v39 }
 0x233   : > { %v11566_v34 = vpop.permute.xlu0 %8112 }
 0x234   : > { %8397 = vrot.lane.b32.xlu1 %v15049_v6, %s9347_s7  ;;  %15052 = vst [vmem:[#allocation171_spill] sm:$0xff] %v11566_v34  ;;  %v6553_v34 = vld [vmem:[%s9432_s30 + $0x2e1] sm:$0xff] }
 0x235   : > { %8392 = vrot.lane.b32.xlu0 %v15050_v29, %s9347_s7  ;;  %v8128_v45 = vpop.permute.xlu1 %8127 }
 0x236   : > { %v8130_v6 = vunpack.i.h.bf16 %v8128_v45  ;;  %v8129_v29 = vunpack.i.l.bf16 %v8128_v45  ;;  %v11604_v45 = vld [vmem:[%s9432_s30 + $0x181] sm:$0xff] }
 0x237   : > { %v11580_v21 = vpop.permute.xlu0 %8122 }
 0x238   : > { %8407 = vrot.lane.b32.xlu1 %v8406_v4, %s9347_s7  ;;  %15053 = vst [vmem:[#allocation172_spill] sm:$0xff] %v11580_v21  ;;  %v11585_v4 = vpack.i.bf16 %v11574_v3, %v11571_v28  ;;  %v11593_v7 = vsel %vm3542_vm3, %v11442_v10, %v8130_v6  ;;  %v6550_v21 = vld [vmem:[%s9432_s30 + $0x2b1] sm:$0xff] }
 0x239   : > { %8402 = vrot.lane.b32.xlu0 %v8401_v55, %s9347_s7  ;;  %v11589_v55 = vsel %vm3542_vm3, %v11438_v19, %v8129_v29 }
 0x23b   : > { %v8133_v10 = vpop.permute.xlu0 %8132 }
 0x23c   : > { %8417 = vrot.lane.b32.xlu1 %v8416_v50, %s9347_s7  ;;  %v8138_v50 = vpop.permute.xlu1 %8137  ;;  %v8135_v6 = vunpack.i.h.bf16 %v8133_v10 }
 0x23d   : > { %8412 = vrot.lane.b32.xlu0 %v8411_v57, %s9347_s7  ;;  %v8140_v19 = vunpack.i.h.bf16 %v8138_v50  ;;  %v8139_v29 = vunpack.i.l.bf16 %v8138_v50  ;;  %v8134_v57 = vunpack.i.l.bf16 %v8133_v10  ;;  %v11626_v50 = vpack.i.bf16 %v11607_v35, %v11604_v45  ;;  %v11629_v10 = vld [vmem:[%s9432_s30 + $0x201] sm:$0xff] }
 0x23f   : > { %v11617_v43 = vsel %vm3542_vm3, %v11451_v14, %v8139_v29  ;;  %v11621_v38 = vsel %vm3542_vm3, %v11455_v56, %v8140_v19  ;;  %v11634_v52 = vsel %vm3542_vm3, %v11460_v25, %v8134_v57  ;;  %v11638_v14 = vsel %vm3542_vm3, %v11464_v16, %v8135_v6  ;;  %v6539_v19 = vld [vmem:[%s9432_s30 + $0x1e1] sm:$0xff]  ;;  %v8143_v11 = vpop.permute.xlu0 %8142 }
 0x240   : > { %8427 = vrot.lane.b32.xlu1 %v11585_v4, %s9348_s8  ;;  %v8148_v56 = vpop.permute.xlu1 %8147  ;;  %v8145_v44 = vunpack.i.h.bf16 %v8143_v11  ;;  %v8144_v53 = vunpack.i.l.bf16 %v8143_v11  ;;  %v11647_v25 = vpack.i.bf16 %v6542_v54, %v11629_v10  ;;  %v6545_v11 = vld [vmem:[%s9432_s30 + $0x241] sm:$0xff] }
 0x241   : > { %8422 = vrot.lane.b32.xlu0 %v8421_v23, %s9348_s8  ;;  %v11642_v23 = vld [vmem:[%s9432_s30 + $0x1f1] sm:$0xff]  ;;  %v8150_v29 = vunpack.i.h.bf16 %v8148_v56  ;;  %v8149_v40 = vunpack.i.l.bf16 %v8148_v56 }
 0x242   : > { %v8441_v57 = vpack.i.bf16 %v11642_v23, %v6539_v19  ;;  %v6546_v56 = vld [vmem:[%s9432_s30 + $0x251] sm:$0xff]  ;;  %v11664_v58 = vsel %vm3542_vm3, %v11482_v36, %v8144_v53 }
 0x243   : > { %v11651_v16 = vsel %vm3542_vm3, %v11472_v27, %v8149_v40  ;;  %v11655_v6 = vsel %vm3542_vm3, %v11476_v13, %v8150_v29  ;;  %v11668_v40 = vsel %vm3542_vm3, %v11486_v0, %v8145_v44  ;;  %v11671_v27 = vld [vmem:[%s9432_s30 + $0x221] sm:$0xff]  ;;  %v6544_v13 = vld [vmem:[%s9432_s30 + $0x231] sm:$0xff]  ;;  %v8153_v19 = vpop.permute.xlu0 %8152  ;;  %v8456_v53 = vpack.i.bf16 %v6546_v56, %v6545_v11 }
 0x244   : > { %8437 = vrot.lane.b32.xlu1 %v11613_v15, %s9348_s8  ;;  %v8158_v54 = vpop.permute.xlu1 %8157  ;;  %v8155_v37 = vunpack.i.h.bf16 %v8153_v19  ;;  %v8154_v9 = vunpack.i.l.bf16 %v8153_v19  ;;  %v8451_v0 = vpack.i.bf16 %v6544_v13, %v11671_v27 }
 0x245   : > { %8432 = vrot.lane.b32.xlu0 %v11626_v50, %s9348_s8  ;;  %v8160_v29 = vunpack.i.h.bf16 %v8158_v54  ;;  %v8159_v31 = vunpack.i.l.bf16 %v8158_v54  ;;  %v6549_v54 = vld [vmem:[%s9432_s30 + $0x2a1] sm:$0xff] }
 0x246   : > { %v11690_v19 = vsel %vm3542_vm3, %v11501_v26, %v8154_v9  ;;  %v11694_v11 = vsel %vm3542_vm3, %v11505_v2, %v8155_v37  ;;  %v8466_v9 = vpack.i.bf16 %v6550_v21, %v6549_v54  ;;  %v6552_v54 = vld [vmem:[%s9432_s30 + $0x2d1] sm:$0xff] }
 0x247   : > { %v11678_v44 = vsel %vm3542_vm3, %v11492_v20, %v8159_v31  ;;  %v11682_v36 = vsel %vm3542_vm3, %v11496_v48, %v8160_v29  ;;  %v6547_v20 = vld [vmem:[%s9432_s30 + $0x281] sm:$0xff]  ;;  %v6548_v48 = vld [vmem:[%s9432_s30 + $0x291] sm:$0xff]  ;;  %v8163_v13 = vpop.permute.xlu0 %8162 }
 0x248   : > { %8447 = vrot.lane.b32.xlu1 %v11647_v25, %s9348_s8  ;;  %v8168_v31 = vpop.permute.xlu1 %8167  ;;  %v8165_v29 = vunpack.i.h.bf16 %v8163_v13  ;;  %v8164_v5 = vunpack.i.l.bf16 %v8163_v13  ;;  %v8461_v2 = vpack.i.bf16 %v6548_v48, %v6547_v20  ;;  %v6557_v13 = vld [vmem:[%s9432_s30 + $0x341] sm:$0xff] }
 0x249   : > { %8442 = vrot.lane.b32.xlu0 %v8441_v57, %s9348_s8  ;;  %v8170_v56 = vunpack.i.h.bf16 %v8168_v31  ;;  %v8169_v57 = vunpack.i.l.bf16 %v8168_v31  ;;  %v6554_v31 = vld [vmem:[%s9432_s30 + $0x2f1] sm:$0xff] }
 0x24a   : > { %v11712_v17 = vsel %vm3542_vm3, %v11523_v63, %v8164_v5  ;;  %v11716_v21 = vsel %vm3542_vm3, %v11527_v41, %v8165_v29  ;;  %v8476_v5 = vpack.i.bf16 %v6554_v31, %v6553_v34  ;;  %v6558_v29 = vld [vmem:[%s9432_s30 + $0x351] sm:$0xff] }
 0x24b   : > { %v11701_v26 = vsel %vm3542_vm3, %v11513_v59, %v8169_v57  ;;  %v11705_v37 = vsel %vm3542_vm3, %v11517_v62, %v8170_v56  ;;  %v6556_v31 = vld [vmem:[%s9432_s30 + $0x331] sm:$0xff] }
 0x24c   : > { %8457 = vrot.lane.b32.xlu1 %v8456_v53, %s9348_s8  ;;  %v8178_v59 = vpop.permute.xlu1 %8177  ;;  %v6551_v53 = vld [vmem:[%s9432_s30 + $0x2c1] sm:$0xff] }
 0x24d   : > { %8452 = vrot.lane.b32.xlu0 %v8451_v0, %s9348_s8  ;;  %v8180_v62 = vunpack.i.h.bf16 %v8178_v59  ;;  %v8179_v56 = vunpack.i.l.bf16 %v8178_v59  ;;  %v8173_v0 = vpop.permute.xlu0 %8172  ;;  %v8471_v57 = vpack.i.bf16 %v6552_v54, %v6551_v53  ;;  %v6561_v53 = vld [vmem:[%s9432_s30 + $0x381] sm:$0xff]  ;;  %v6562_v54 = vld [vmem:[%s9432_s30 + $0x391] sm:$0xff] }
 0x24e   : > { %v8175_v20 = vunpack.i.h.bf16 %v8173_v0  ;;  %v8174_v48 = vunpack.i.l.bf16 %v8173_v0 }
 0x24f   : > { %v11723_v63 = vsel %vm3542_vm3, %v11533_v60, %v8179_v56  ;;  %v11727_v41 = vsel %vm3542_vm3, %v11537_v30, %v8180_v62  ;;  %v6555_v30 = vld [vmem:[%s9432_s30 + $0x321] sm:$0xff]  ;;  %v6560_v56 = vld [vmem:[%s9432_s30 + $0x371] sm:$0xff] }
 0x250   : > { %8467 = vrot.lane.b32.xlu1 %v8466_v9, %s9348_s8  ;;  %v11734_v34 = vsel %vm3542_vm3, %v11544_v42, %v8174_v48  ;;  %v11738_v60 = vsel %vm3542_vm3, %v11548_v22, %v8175_v20  ;;  %v11740_v9 = vpop.permute.xlu1 %8187  ;;  %v8481_v42 = vpack.i.bf16 %v6556_v31, %v6555_v30  ;;  %v6559_v62 = vld [vmem:[%s9432_s30 + $0x361] sm:$0xff]  ;;  %v8496_v20 = vpack.i.bf16 %v6562_v54, %v6561_v53  ;;  %v11766_v30 = vld [vmem:[%s9432_s30 + $0x152] sm:$0xff] }
 0x251   : > { %8462 = vrot.lane.b32.xlu0 %v8461_v2, %s9348_s8  ;;  %15054 = vst [vmem:[#allocation170_spill] sm:$0xff] %v11740_v9  ;;  %v11744_v59 = vpop.permute.xlu0 %8182  ;;  %v8486_v2 = vpack.i.bf16 %v6558_v29, %v6557_v13  ;;  %v8491_v48 = vpack.i.bf16 %v6560_v56, %v6559_v62  ;;  %v6563_v29 = vld [vmem:[%s9432_s30 + $0x142] sm:$0xff]  ;;  %v11781_v54 = vld [vmem:[%s9432_s30 + $0x1b2] sm:$0xff] }
 0x252   : > { %15055 = vst [vmem:[#allocation176_spill] sm:$0xff] %v11744_v59  ;;  %v11778_v53 = vld [vmem:[%s9432_s30 + $0x1a2] sm:$0xff] }
 0x254   : > { %8477 = vrot.lane.b32.xlu1 %v8476_v5, %s9348_s8  ;;  %v11750_v22 = vpop.permute.xlu1 %8197  ;;  %v11759_v5 = vld [vmem:[%s9432_s30 + $0x162] sm:$0xff] }
 0x255   : > { %8472 = vrot.lane.b32.xlu0 %v8471_v57, %s9348_s8  ;;  %15056 = vst [vmem:[#allocation177_spill] sm:$0xff] %v11750_v22  ;;  %v11754_v0 = vpop.permute.xlu0 %8192  ;;  %v11762_v57 = vld [vmem:[%s9432_s30 + $0x172] sm:$0xff] }
 0x256   : > { %15057 = vst [vmem:[#allocation175_spill] sm:$0xff] %v11754_v0 }
 0x258   : > { %8487 = vrot.lane.b32.xlu1 %v8486_v2, %s9348_s8  ;;  %v8208_v13 = vpop.permute.xlu1 %8207  ;;  %v11773_v2 = vpack.i.bf16 %v11762_v57, %v11759_v5 }
 0x259   : > { %8482 = vrot.lane.b32.xlu0 %v8481_v42, %s9348_s8  ;;  %v8210_v31 = vunpack.i.h.bf16 %v8208_v13  ;;  %v8209_v22 = vunpack.i.l.bf16 %v8208_v13  ;;  %v11768_v0 = vpop.permute.xlu0 %8202  ;;  %v8501_v42 = vpack.i.bf16 %v11766_v30, %v6563_v29  ;;  %v11792_v13 = vld [vmem:[%s9432_s30 + $0x182] sm:$0xff] }
 0x25a   : > { %15058 = vst [vmem:[#allocation186_spill] sm:$0xff] %v11768_v0 }
 0x25b   : > { %v11785_v62 = vsel %vm3575_vm4, %v11589_v55, %v8209_v22  ;;  %v11789_v56 = vsel %vm3575_vm4, %v11593_v7, %v8210_v31  ;;  %v11801_v55 = vpack.i.bf16 %v11781_v54, %v11778_v53  ;;  %v11809_v22 = vld [vmem:[%s9432_s30 + $0x202] sm:$0xff]  ;;  %v11812_v31 = vld [vmem:[%s9432_s30 + $0x212] sm:$0xff] }
 0x25c   : > { %8497 = vrot.lane.b32.xlu1 %v8496_v20, %s9348_s8  ;;  %15059 = vst [vmem:[#allocation187_spill] sm:$0xff] %v11785_v62  ;;  %15060 = vst [vmem:[#allocation188_spill] sm:$0xff] %v11789_v56  ;;  %v8218_v20 = vpop.permute.xlu1 %8217  ;;  %v11824_v62 = vld [vmem:[%s9432_s30 + $0x1f2] sm:$0xff] }
 0x25d   : > { %8492 = vrot.lane.b32.xlu0 %v8491_v48, %s9348_s8  ;;  %v11795_v48 = vld [vmem:[%s9432_s30 + $0x192] sm:$0xff]  ;;  %v8220_v29 = vunpack.i.h.bf16 %v8218_v20  ;;  %v8219_v0 = vunpack.i.l.bf16 %v8218_v20  ;;  %v8213_v9 = vpop.permute.xlu0 %8212 }
 0x25e   : > { %v8215_v51 = vunpack.i.h.bf16 %v8213_v9  ;;  %v8214_v46 = vunpack.i.l.bf16 %v8213_v9  ;;  %v11806_v7 = vpack.i.bf16 %v11795_v48, %v11792_v13 }
 0x25f   : > { %v11816_v9 = vsel %vm3575_vm4, %v11617_v43, %v8219_v0  ;;  %v11820_v20 = vsel %vm3575_vm4, %v11621_v38, %v8220_v29 }
 0x260   : > { %8507 = vrot.lane.b32.xlu1 %v11773_v2, %s9349_s9  ;;  %15061 = vst [vmem:[#allocation189_spill] sm:$0xff] %v11816_v9  ;;  %15062 = vst [vmem:[#allocation190_spill] sm:$0xff] %v11820_v20  ;;  %v8228_v56 = vpop.permute.xlu1 %8227  ;;  %v11828_v12 = vsel %vm3575_vm4, %v11634_v52, %v8214_v46  ;;  %v11832_v59 = vsel %vm3575_vm4, %v11638_v14, %v8215_v51  ;;  %v11838_v20 = vpack.i.bf16 %v11812_v31, %v11809_v22  ;;  %v11844_v46 = vld [vmem:[%s9432_s30 + $0x242] sm:$0xff]  ;;  %v6578_v51 = vld [vmem:[%s9432_s30 + $0x252] sm:$0xff] }
 0x261   : > { %8502 = vrot.lane.b32.xlu0 %v8501_v42, %s9349_s9  ;;  %v6571_v42 = vld [vmem:[%s9432_s30 + $0x1e2] sm:$0xff]  ;;  %15063 = vst [vmem:[#allocation191_spill] sm:$0xff] %v11828_v12  ;;  %15064 = vst [vmem:[#allocation192_spill] sm:$0xff] %v11832_v59  ;;  %v8230_v43 = vunpack.i.h.bf16 %v8228_v56  ;;  %v8229_v0 = vunpack.i.l.bf16 %v8228_v56  ;;  %v8223_v9 = vpop.permute.xlu0 %8222  ;;  %v11859_v12 = vld [vmem:[%s9432_s30 + $0x232] sm:$0xff] }
 0x262   : > { %v8225_v38 = vunpack.i.h.bf16 %v8223_v9  ;;  %v8224_v29 = vunpack.i.l.bf16 %v8223_v9  ;;  %v8521_v52 = vpack.i.bf16 %v11824_v62, %v6571_v42  ;;  %v11856_v59 = vld [vmem:[%s9432_s30 + $0x222] sm:$0xff] }
 0x263   : > { %v11849_v14 = vsel %vm3575_vm4, %v11651_v16, %v8229_v0  ;;  %v11853_v56 = vsel %vm3575_vm4, %v11655_v6, %v8230_v43 }
 0x264   : > { %8517 = vrot.lane.b32.xlu1 %v11801_v55, %s9349_s9  ;;  %15065 = vst [vmem:[#allocation193_spill] sm:$0xff] %v11849_v14  ;;  %15066 = vst [vmem:[#allocation194_spill] sm:$0xff] %v11853_v56  ;;  %v8238_v9 = vpop.permute.xlu1 %8237  ;;  %v11863_v42 = vsel %vm3575_vm4, %v11664_v58, %v8224_v29  ;;  %v11867_v47 = vsel %vm3575_vm4, %v11668_v40, %v8225_v38  ;;  %v11872_v56 = vpack.i.bf16 %v6578_v51, %v11844_v46 }
 0x265   : > { %8512 = vrot.lane.b32.xlu0 %v11806_v7, %s9349_s9  ;;  %15067 = vst [vmem:[#allocation195_spill] sm:$0xff] %v11863_v42  ;;  %15068 = vst [vmem:[#allocation196_spill] sm:$0xff] %v11867_v47  ;;  %v8240_v16 = vunpack.i.h.bf16 %v8238_v9  ;;  %v8239_v0 = vunpack.i.l.bf16 %v8238_v9  ;;  %v8233_v14 = vpop.permute.xlu0 %8232  ;;  %v11877_v58 = vpack.i.bf16 %v11859_v12, %v11856_v59  ;;  %v6580_v9 = vld [vmem:[%s9432_s30 + $0x292] sm:$0xff] }
 0x266   : > { %v8235_v6 = vunpack.i.h.bf16 %v8233_v14  ;;  %v8234_v43 = vunpack.i.l.bf16 %v8233_v14  ;;  %v6579_v14 = vld [vmem:[%s9432_s30 + $0x282] sm:$0xff] }
 0x267   : > { %v11881_v40 = vsel %vm3575_vm4, %v11678_v44, %v8239_v0  ;;  %v11885_v38 = vsel %vm3575_vm4, %v11682_v36, %v8240_v16  ;;  %v8541_v36 = vpack.i.bf16 %v6580_v9, %v6579_v14 }
 0x268   : > { %8527 = vrot.lane.b32.xlu1 %v11838_v20, %s9349_s9  ;;  %15069 = vst [vmem:[#allocation197_spill] sm:$0xff] %v11881_v40  ;;  %15070 = vst [vmem:[#allocation198_spill] sm:$0xff] %v11885_v38  ;;  %v8248_v29 = vpop.permute.xlu1 %8247  ;;  %v11891_v51 = vsel %vm3575_vm4, %v11690_v19, %v8234_v43  ;;  %v9255_v40 = vld [vmem:[%s9432_s30 + $0x40] sm:$0xff] }
 0x269   : > { %8522 = vrot.lane.b32.xlu0 %v8521_v52, %s9349_s9  ;;  %15071 = vst [vmem:[#allocation199_spill] sm:$0xff] %v11891_v51  ;;  %v11895_v52 = vsel %vm3575_vm4, %v11694_v11, %v8235_v6  ;;  %v8250_v47 = vunpack.i.h.bf16 %v8248_v29  ;;  %v8249_v42 = vunpack.i.l.bf16 %v8248_v29  ;;  %v8243_v61 = vpop.permute.xlu0 %8242  ;;  %v12113_v51 = vld [vmem:[%s9432_s30 + $0x230] sm:$0xff] }
 0x26a   : > { %15072 = vst [vmem:[#allocation200_spill] sm:$0xff] %v11895_v52  ;;  %v8245_v44 = vunpack.i.h.bf16 %v8243_v61  ;;  %v8244_v0 = vunpack.i.l.bf16 %v8243_v61 }
 0x26b   : > { %v11903_v19 = vsel %vm3575_vm4, %v11701_v26, %v8249_v42  ;;  %v11907_v11 = vsel %vm3575_vm4, %v11705_v37, %v8250_v47  ;;  %v6589_v47 = vld [vmem:[%s9432_s30 + $0x342] sm:$0xff]  ;;  %v6590_v37 = vld [vmem:[%s9432_s30 + $0x352] sm:$0xff] }
 0x26c   : > { %8537 = vrot.lane.b32.xlu1 %v11872_v56, %s9349_s9  ;;  %15073 = vst [vmem:[#allocation201_spill] sm:$0xff] %v11903_v19  ;;  %15074 = vst [vmem:[#allocation202_spill] sm:$0xff] %v11907_v11  ;;  %v8258_v16 = vpop.permute.xlu1 %8257  ;;  %v11911_v61 = vsel %vm3575_vm4, %v11712_v17, %v8244_v0  ;;  %v11915_v6 = vsel %vm3575_vm4, %v11716_v21, %v8245_v44  ;;  %v6587_v44 = vld [vmem:[%s9432_s30 + $0x322] sm:$0xff] }
 0x26d   : > { %8532 = vrot.lane.b32.xlu0 %v11877_v58, %s9349_s9  ;;  %15075 = vst [vmem:[#allocation203_spill] sm:$0xff] %v11911_v61  ;;  %15076 = vst [vmem:[#allocation204_spill] sm:$0xff] %v11915_v6  ;;  %v8260_v43 = vunpack.i.h.bf16 %v8258_v16  ;;  %v8259_v29 = vunpack.i.l.bf16 %v8258_v16  ;;  %v8253_v14 = vpop.permute.xlu0 %8252  ;;  %v311_v19 = vld [vmem:[%s9432_s30] sm:$0xff] }
 0x26e   : > { %v8255_v26 = vunpack.i.h.bf16 %v8253_v14  ;;  %v8254_v42 = vunpack.i.l.bf16 %v8253_v14  ;;  %v6591_v14 = vld [vmem:[%s9432_s30 + $0x362] sm:$0xff] }
 0x26f   : > { %v11924_v17 = vsel %vm3575_vm4, %v11723_v63, %v8259_v29  ;;  %v11928_v21 = vsel %vm3575_vm4, %v11727_v41, %v8260_v43  ;;  %v8566_v41 = vpack.i.bf16 %v6590_v37, %v6589_v47  ;;  %v6593_v43 = vld [vmem:[%s9432_s30 + $0x382] sm:$0xff]  ;;  %v6599_v47 = vld [vmem:[%s9432_s30 + $0x170] sm:$0xff] }
 0x270   : > { %8547 = vrot.lane.b32.xlu1 %v11413_v24, %s9349_s9  ;;  %15077 = vst [vmem:[#allocation205_spill] sm:$0xff] %v11924_v17  ;;  %15078 = vst [vmem:[#allocation206_spill] sm:$0xff] %v11928_v21  ;;  %v11930_v9 = vpop.permute.xlu1 %8267  ;;  %v6588_v24 = vld [vmem:[%s9432_s30 + $0x332] sm:$0xff]  ;;  %v11936_v0 = vsel %vm3575_vm4, %v11734_v34, %v8254_v42  ;;  %v6600_v37 = vld [vmem:[%s9432_s30 + $0x180] sm:$0xff] }
 0x271   : > { %8542 = vrot.lane.b32.xlu0 %v8541_v36, %s9349_s9  ;;  %15079 = vst [vmem:[#allocation207_spill] sm:$0xff] %v11936_v0  ;;  %v11940_v36 = vsel %vm3575_vm4, %v11738_v60, %v8255_v26  ;;  %v11942_v63 = vpop.permute.xlu0 %8262  ;;  %v8561_v16 = vpack.i.bf16 %v6588_v24, %v6587_v44  ;;  %v6594_v34 = vld [vmem:[%s9432_s30 + $0x392] sm:$0xff]  ;;  %v6598_v44 = vld [vmem:[%s9432_s30 + $0x160] sm:$0xff]  ;;  %v8586_v21 = vpack.i.bf16 %v6600_v37, %v6599_v47 }
 0x272   : > { %15080 = vst [vmem:[#allocation208_spill] sm:$0xff] %v11940_v36  ;;  %v6592_v60 = vld [vmem:[%s9432_s30 + $0x372] sm:$0xff]  ;;  %v8576_v42 = vpack.i.bf16 %v6594_v34, %v6593_v43  ;;  %v8581_v17 = vpack.i.bf16 %v6598_v44, %v11431_v8  ;;  %v6602_v43 = vld [vmem:[%s9432_s30 + $0x1a0] sm:$0xff]  ;;  %v8596_v34 = vpack.i.bf16 %v11571_v28, %v11578_v33  ;;  %v8606_v8 = vpack.i.bf16 %v6599_v47, %v6598_v44 }
 0x274   : > { %8557 = vrot.lane.b32.xlu1 %v11427_v49, %s9349_s9  ;;  %v11950_v29 = vpop.permute.xlu1 %8277  ;;  %v8571_v49 = vpack.i.bf16 %v6592_v60, %v6591_v14 }
 0x275   : > { %8552 = vrot.lane.b32.xlu0 %v11407_v18, %s9349_s9  ;;  %v11954_v26 = vpop.permute.xlu0 %8272 }
 0x278   : > { %8567 = vrot.lane.b32.xlu1 %v8566_v41, %s9349_s9  ;;  %v11960_v18 = vpop.permute.xlu1 %8287  ;;  %v6601_v41 = vld [vmem:[%s9432_s30 + $0x190] sm:$0xff] }
 0x279   : > { %8562 = vrot.lane.b32.xlu0 %v8561_v16, %s9349_s9  ;;  %15081 = vst [vmem:[#allocation209_spill] sm:$0xff] %v11960_v18  ;;  %v11963_v24 = vpop.permute.xlu0 %8282  ;;  %v8591_v14 = vpack.i.bf16 %v6602_v43, %v6601_v41  ;;  %v8631_v44 = vpack.i.bf16 %v6601_v41, %v6600_v37  ;;  %v6604_v41 = vld [vmem:[%s9432_s30 + $0x1c0] sm:$0xff] }
 0x27a   : > { %v12433_v18 = vld [vmem:[%s9432_s30 + $0x2a2] sm:$0xff] }
 0x27c   : > { %8577 = vrot.lane.b32.xlu1 %v8576_v42, %s9349_s9 }
 0x27d   : > { %8572 = vrot.lane.b32.xlu0 %v8571_v49, %s9349_s9  ;;  %v11968_v36 = vpop.permute.xlu1 %8297  ;;  %v8601_v49 = vpack.i.bf16 %v11759_v5, %v11766_v30  ;;  %v8621_v5 = vpack.i.bf16 %v11604_v45, %v11574_v3  ;;  %v8646_v3 = vpack.i.bf16 %v11598_v39, %v11607_v35 }
 0x27e   : > { %15082 = vst [vmem:[#allocation210_spill] sm:$0xff] %v11968_v36 }
 0x27f   : > { %v11972_v16 = vpop.permute.xlu0 %8292 }
 0x280   : > { %15083 = vst [vmem:[#allocation211_spill] sm:$0xff] %v11972_v16  ;;  %8587 = vrot.lane.b32.xlu1 %v8586_v21, %s9350_s10 }
 0x281   : > { %8582 = vrot.lane.b32.xlu0 %v8581_v17, %s9350_s10  ;;  %v8626_v17 = vpack.i.bf16 %v11792_v13, %v11762_v57 }
 0x282   : > { %v11978_v60 = vpop.permute.xlu1 %8307 }
 0x283   : > { %15084 = vst [vmem:[#allocation212_spill] sm:$0xff] %v11978_v60  ;;  %v11980_v42 = vpop.permute.xlu0 %8302  ;;  %v9264_v60 = vld [vmem:[%s9432_s30 + $0xb0] sm:$0xff] }
 0x284   : > { %15085 = vst [vmem:[#allocation213_spill] sm:$0xff] %v11980_v42  ;;  %8597 = vrot.lane.b32.xlu1 %v8596_v34, %s9351_s11  ;;  %v15116_v42 = vld [vmem:[#allocation46_spill] sm:$0xff] }
 0x285   : > { %8592 = vrot.lane.b32.xlu0 %v8591_v14, %s9350_s10  ;;  %v7160_v32 = vunpack.i.h.bf16 %v15116_v42 }
 0x286   : > { %v11986_v0 = vpop.permute.xlu1 %8317 }
 0x287   : > { %15086 = vst [vmem:[#allocation214_spill] sm:$0xff] %v11986_v0  ;;  %v11988_v21 = vpop.permute.xlu0 %8312 }
 0x288   : > { %15087 = vst [vmem:[#allocation215_spill] sm:$0xff] %v11988_v21  ;;  %8607 = vrot.lane.b32.xlu1 %v8606_v8, %s9353_s13  ;;  %v9262_v21 = vld [vmem:[%s9432_s30 + $0xc0] sm:$0xff] }
 0x289   : > { %8602 = vrot.lane.b32.xlu0 %v8601_v49, %s9352_s12  ;;  %v6668_v49 = vld [vmem:[%s9432_s30 + $0x1c2] sm:$0xff] }
 0x28a   : > { %v11992_v28 = vpop.permute.xlu1 %8327 }
 0x28b   : > { %15088 = vst [vmem:[#allocation216_spill] sm:$0xff] %v11992_v28  ;;  %v11994_v33 = vpop.permute.xlu0 %8322 }
 0x28c   : > { %15089 = vst [vmem:[#allocation217_spill] sm:$0xff] %v11994_v33  ;;  %8617 = vrot.lane.b32.xlu1 %v11773_v2, %s9355_s15  ;;  %v15111_v33 = vld [vmem:[#allocation35_spill] sm:$0xff] }
 0x28d   : > { %8612 = vrot.lane.b32.xlu0 %v11585_v4, %s9354_s14  ;;  %v6700_v4 = vld [vmem:[%s9432_s30 + $0x1b0] sm:$0xff] }
 0x28e   : > { %v12004_v30 = vpop.permute.xlu1 %8337  ;;  %v8656_v13 = vpack.i.bf16 %v6700_v4, %v6602_v43  ;;  %v6447_v43 = vld [vmem:[%s9432_s30 + $0x1c1] sm:$0xff] }
 0x28f   : > { %15090 = vst [vmem:[#allocation218_spill] sm:$0xff] %v12004_v30  ;;  %v12006_v47 = vpop.permute.xlu0 %8332 }
 0x290   : > { %15091 = vst [vmem:[#allocation219_spill] sm:$0xff] %v12006_v47  ;;  %8627 = vrot.lane.b32.xlu1 %v8626_v17, %s9352_s12 }
 0x291   : > { %8622 = vrot.lane.b32.xlu0 %v8621_v5, %s9351_s11 }
 0x292   : > { %v12010_v34 = vpop.permute.xlu1 %8347 }
 0x293   : > { %v12012_v2 = vpop.permute.xlu0 %8342 }
 0x294   : > { %8637 = vrot.lane.b32.xlu1 %v11626_v50, %s9354_s14  ;;  %v8651_v50 = vpack.i.bf16 %v11778_v53, %v11795_v48  ;;  %v8676_v53 = vpack.i.bf16 %v6447_v43, %v11601_v1  ;;  %v8671_v48 = vpack.i.bf16 %v6604_v41, %v6700_v4  ;;  %v6766_v1 = vld [vmem:[%s9432_s30 + $0x1d2] sm:$0xff] }
 0x295   : > { %8632 = vrot.lane.b32.xlu0 %v8631_v44, %s9353_s13  ;;  %v8696_v4 = vpack.i.bf16 %v6766_v1, %v6668_v49  ;;  %v8711_v1 = vpack.i.bf16 %v11809_v22, %v11824_v62  ;;  %v15105_v62 = vld [vmem:[#allocation30_spill] sm:$0xff] }
 0x296   : > { %v12020_v45 = vpop.permute.xlu1 %8357  ;;  %v7079_v22 = vunpack.i.l.bf16 %v15105_v62  ;;  %v7080_v6 = vunpack.i.h.bf16 %v15105_v62 }
 0x297   : > { %v12022_v57 = vpop.permute.xlu0 %8352 }
 0x298   : > { %8647 = vrot.lane.b32.xlu1 %v8646_v3, %s9351_s11  ;;  %v6448_v3 = vld [vmem:[%s9432_s30 + $0x1d1] sm:$0xff] }
 0x299   : > { %8642 = vrot.lane.b32.xlu0 %v11806_v7, %s9355_s15  ;;  %v6702_v7 = vld [vmem:[%s9432_s30 + $0x1d0] sm:$0xff] }
 0x29a   : > { %v12029_v37 = vpop.permute.xlu1 %8367  ;;  %v8686_v5 = vpack.i.bf16 %v6702_v7, %v6604_v41  ;;  %v6605_v41 = vld [vmem:[%s9432_s30 + $0x1f0] sm:$0xff] }
 0x29b   : > { %15092 = vst [vmem:[#allocation220_spill] sm:$0xff] %v12029_v37  ;;  %v12031_v35 = vpop.permute.xlu0 %8362 }
 0x29c   : > { %8657 = vrot.lane.b32.xlu1 %v8656_v13, %s9353_s13  ;;  %v8691_v13 = vpack.i.bf16 %v6448_v3, %v6447_v43  ;;  %v15103_v3 = vld [vmem:[#allocation28_spill] sm:$0xff] }
 0x29d   : > { %8652 = vrot.lane.b32.xlu0 %v8651_v50, %s9352_s12 }
 0x29e   : > { %v12035_v39 = vpop.permute.xlu1 %8377 }
 0x29f   : > { %15093 = vst [vmem:[#allocation221_spill] sm:$0xff] %v12035_v39  ;;  %v12039_v14 = vpop.permute.xlu0 %8372 }
 0x2a0   : > { %15094 = vst [vmem:[#allocation222_spill] sm:$0xff] %v12039_v14  ;;  %8667 = vrot.lane.b32.xlu1 %v11801_v55, %s9355_s15  ;;  %v8681_v55 = vpack.i.bf16 %v6668_v49, %v11781_v54  ;;  %v8706_v54 = vpack.i.bf16 %v11629_v10, %v11642_v23 }
 0x2a1   : > { %8662 = vrot.lane.b32.xlu0 %v11613_v15, %s9354_s14 }
 0x2a2   : > { %v12047_v8 = vpop.permute.xlu1 %8387 }
 0x2a3   : > { %15095 = vst [vmem:[#allocation223_spill] sm:$0xff] %v12047_v8  ;;  %v12050_v17 = vpop.permute.xlu0 %8382  ;;  %v9263_v8 = vld [vmem:[%s9432_s30 + $0xd0] sm:$0xff] }
 0x2a4   : > { %15096 = vst [vmem:[#allocation224_spill] sm:$0xff] %v12050_v17  ;;  %8677 = vrot.lane.b32.xlu1 %v8676_v53, %s9351_s11  ;;  %v6606_v53 = vld [vmem:[%s9432_s30 + $0x200] sm:$0xff] }
 0x2a5   : > { %8672 = vrot.lane.b32.xlu0 %v8671_v48, %s9350_s10  ;;  %v8701_v7 = vpack.i.bf16 %v6606_v53, %v6605_v41  ;;  %v7075_v41 = vunpack.i.h.bf16 %v15103_v3 }
 0x2a6   : > { %v12056_v44 = vpop.permute.xlu1 %8397 }
 0x2a7   : > { %15097 = vst [vmem:[#allocation225_spill] sm:$0xff] %v12056_v44  ;;  %v12058_v15 = vpop.permute.xlu0 %8392  ;;  %v15113_v44 = vld [vmem:[#allocation45_spill] sm:$0xff] }
 0x2a8   : > { %15098 = vst [vmem:[#allocation226_spill] sm:$0xff] %v12058_v15  ;;  %8687 = vrot.lane.b32.xlu1 %v8686_v5, %s9353_s13  ;;  %v6704_v5 = vld [vmem:[%s9432_s30 + $0x210] sm:$0xff]  ;;  %v6737_v15 = vld [vmem:[%s9432_s30 + $0x221] sm:$0xff] }
 0x2a9   : > { %8682 = vrot.lane.b32.xlu0 %v8681_v55, %s9352_s12  ;;  %v8716_v43 = vpack.i.bf16 %v6704_v5, %v6606_v53  ;;  %v15104_v53 = vld [vmem:[#allocation29_spill] sm:$0xff] }
 0x2aa   : > { %v12063_v50 = vpop.permute.xlu1 %8407 }
 0x2ab   : > { %15099 = vst [vmem:[#allocation227_spill] sm:$0xff] %v12063_v50  ;;  %v12067_v48 = vpop.permute.xlu0 %8402 }
 0x2ac   : > { %15100 = vst [vmem:[#allocation228_spill] sm:$0xff] %v12067_v48  ;;  %8697 = vrot.lane.b32.xlu1 %v8696_v4, %s9355_s15  ;;  %v7074_v4 = vunpack.i.l.bf16 %v15103_v3 }
 0x2ad   : > { %8692 = vrot.lane.b32.xlu0 %v8691_v13, %s9354_s14  ;;  %v6639_v13 = vld [vmem:[%s9432_s30 + $0x211] sm:$0xff] }
 0x2ae   : > { %v12074_v49 = vpop.permute.xlu1 %8417  ;;  %v12108_v52 = vsel %vm3113_vm5, %v9255_v40, %v7074_v4  ;;  %v9258_v4 = vld [vmem:[%s9432_s30 + $0x60] sm:$0xff] }
 0x2af   : > { %15101 = vst [vmem:[#allocation229_spill] sm:$0xff] %v12074_v49  ;;  %v12076_v55 = vpop.permute.xlu0 %8412  ;;  %v9256_v49 = vld [vmem:[%s9432_s30 + $0x50] sm:$0xff] }
 0x2b0   : > { %15102 = vst [vmem:[#allocation230_spill] sm:$0xff] %v12076_v55  ;;  %8707 = vrot.lane.b32.xlu1 %v8706_v54, %s9351_s11  ;;  %v7065_v54 = vunpack.i.h.bf16 %v15104_v53  ;;  %v15108_v55 = vld [vmem:[#allocation32_spill] sm:$0xff] }
 0x2b1   : > { %8702 = vrot.lane.b32.xlu0 %v8701_v7, %s9350_s10  ;;  %v7064_v7 = vunpack.i.l.bf16 %v15104_v53  ;;  %v8736_v53 = vpack.i.bf16 %v11671_v27, %v6639_v13  ;;  %v9257_v27 = vld [vmem:[%s9432_s30 + $0x10] sm:$0xff]  ;;  %v12124_v13 = vsel %vm3113_vm5, %v9258_v4, %v7079_v22  ;;  %v7090_v47 = vunpack.i.h.bf16 %v15108_v55 }
 0x2b2   : > { %v12082_v10 = vpop.permute.xlu1 %8427  ;;  %v3115_v40 = vsel %vm3113_vm5, %v9257_v27, %v7065_v54  ;;  %v9261_v27 = vld [vmem:[%s9432_s30 + $0x30] sm:$0xff] }
 0x2b3   : > { %v12084_v23 = vpop.permute.xlu0 %8422 }
 0x2b4   : > { %8717 = vrot.lane.b32.xlu1 %v8716_v43, %s9353_s13  ;;  %v6608_v43 = vld [vmem:[%s9432_s30 + $0x220] sm:$0xff] }
 0x2b5   : > { %8712 = vrot.lane.b32.xlu0 %v8711_v1, %s9352_s12  ;;  %v15106_v1 = vld [vmem:[#allocation31_spill] sm:$0xff]  ;;  %v8731_v62 = vpack.i.bf16 %v6608_v43, %v6704_v5  ;;  %v9259_v5 = vld [vmem:[%s9432_s30 + $0x70] sm:$0xff] }
 0x2b6   : > { %v12094_v11 = vpop.permute.xlu1 %8437  ;;  %v7070_v3 = vunpack.i.h.bf16 %v15106_v1  ;;  %v7069_v38 = vunpack.i.l.bf16 %v15106_v1  ;;  %v12117_v1 = vsel %vm3113_vm5, %v9256_v49, %v7075_v41  ;;  %v3121_v30 = vsel %vm3113_vm5, %v9259_v5, %v7080_v6  ;;  %v15109_v41 = vld [vmem:[#allocation33_spill] sm:$0xff]  ;;  %v319_v6 = vld [vmem:[%s9432_s30 + $0xa0] sm:$0xff] }
 0x2b7   : > { %v12099_v61 = vpop.permute.xlu0 %8432  ;;  %v7089_v49 = vunpack.i.l.bf16 %v15108_v55  ;;  %v7084_v50 = vunpack.i.l.bf16 %v15109_v41  ;;  %v7085_v4 = vunpack.i.h.bf16 %v15109_v41  ;;  %v8746_v55 = vpack.i.bf16 %v12113_v51, %v6608_v43  ;;  %v15110_v5 = vld [vmem:[#allocation34_spill] sm:$0xff] }
 0x2b8   : > { %8727 = vrot.lane.b32.xlu1 %v11838_v20, %s9355_s15  ;;  %v3114_v20 = vsel %vm3113_vm5, %v311_v19, %v7064_v7  ;;  %v9260_v7 = vld [vmem:[%s9432_s30 + $0x20] sm:$0xff]  ;;  %v3117_v22 = vsel %vm3113_vm5, %v9261_v27, %v7070_v3  ;;  %v7100_v28 = vunpack.i.h.bf16 %v15110_v5  ;;  %v7099_v48 = vunpack.i.l.bf16 %v15110_v5  ;;  %v6738_v5 = vld [vmem:[%s9432_s30 + $0x231] sm:$0xff] }
 0x2b9   : > { %8722 = vrot.lane.b32.xlu0 %v11647_v25, %s9354_s14  ;;  %v3116_v54 = vsel %vm3113_vm5, %v9260_v7, %v7069_v38  ;;  %v7094_v38 = vunpack.i.l.bf16 %v15111_v33  ;;  %v8741_v3 = vpack.i.bf16 %v11856_v59, %v11812_v31  ;;  %v7095_v41 = vunpack.i.h.bf16 %v15111_v33  ;;  %v15112_v7 = vld [vmem:[#allocation44_spill] sm:$0xff] }
 0x2ba   : > { %v12126_v25 = vpop.permute.xlu1 %8447  ;;  %v7150_v27 = vunpack.i.h.bf16 %v15112_v7  ;;  %v7144_v43 = vunpack.i.l.bf16 %v15113_v44  ;;  %v3125_v59 = vsel %vm3113_vm5, %v9263_v8, %v7090_v47  ;;  %v3122_v31 = vsel %vm3113_vm5, %v319_v6, %v7084_v50  ;;  %v9265_v47 = vld [vmem:[%s9432_s30 + $0x100] sm:$0xff] }
 0x2bb   : > { %15107 = vst [vmem:[#allocation28_spill] sm:$0xff] %v12126_v25  ;;  %v12133_v19 = vpop.permute.xlu0 %8442  ;;  %v7145_v33 = vunpack.i.h.bf16 %v15113_v44  ;;  %v3123_v17 = vsel %vm3113_vm5, %v9264_v60, %v7085_v4  ;;  %v3128_v8 = vsel %vm3113_vm5, %v9265_v47, %v7099_v48  ;;  %v9266_v44 = vld [vmem:[%s9432_s30 + $0x110] sm:$0xff]  ;;  %v9267_v6 = vld [vmem:[%s9432_s30 + $0xe0] sm:$0xff]  ;;  %v8751_v60 = vpack.i.bf16 %v6738_v5, %v6737_v15 }
 0x2bc   : > { %8737 = vrot.lane.b32.xlu1 %v8736_v53, %s9351_s11  ;;  %v7149_v53 = vunpack.i.l.bf16 %v15112_v7  ;;  %v3129_v50 = vsel %vm3113_vm5, %v9266_v44, %v7100_v28  ;;  %v3126_v39 = vsel %vm3113_vm5, %v9267_v6, %v7094_v38  ;;  %v12179_v4 = vld [vmem:[%s9432_s30 + $0x241] sm:$0xff]  ;;  %v3150_v14 = vsel %vm3146_vm6, %v3117_v22, %v7150_v27 }
 0x2bd   : > { %8732 = vrot.lane.b32.xlu0 %v8731_v62, %s9350_s10  ;;  %v3124_v62 = vsel %vm3113_vm5, %v9262_v21, %v7089_v49  ;;  %v7159_v21 = vunpack.i.l.bf16 %v15116_v42  ;;  %v15117_v49 = vld [vmem:[#allocation47_spill] sm:$0xff]  ;;  %v9268_v42 = vld [vmem:[%s9432_s30 + $0xf0] sm:$0xff]  ;;  %v3147_v48 = vsel %vm3146_vm6, %v3114_v20, %v7144_v43  ;;  %v6610_v28 = vld [vmem:[%s9432_s30 + $0x240] sm:$0xff]  ;;  %v3148_v38 = vsel %vm3146_vm6, %v3115_v40, %v7145_v33 }
 0x2be   : > { %v12153_v0 = vpop.permute.xlu1 %8457  ;;  %v15119_v15 = vld [vmem:[#allocation2_spill] sm:$0xff]  ;;  %v3154_v22 = vsel %vm3146_vm6, %v3121_v30, %v7160_v32  ;;  %v8766_v40 = vpack.i.bf16 %v12179_v4, %v6738_v5  ;;  %v15122_v43 = vld [vmem:[#allocation7_spill] sm:$0xff] }
 0x2bf   : > { %15114 = vst [vmem:[#allocation29_spill] sm:$0xff] %v12153_v0  ;;  %v12163_v7 = vpop.permute.xlu0 %8452  ;;  %v7154_v0 = vunpack.i.l.bf16 %v15117_v49  ;;  %v7170_v44 = vunpack.i.h.bf16 %v15119_v15  ;;  %v7169_v6 = vunpack.i.l.bf16 %v15119_v15  ;;  %v7179_v33 = vunpack.i.l.bf16 %v15122_v43  ;;  %v15124_v30 = vld [vmem:[#allocation18_spill] sm:$0xff] }
 0x2c0   : > { %15115 = vst [vmem:[#allocation30_spill] sm:$0xff] %v12163_v7  ;;  %8747 = vrot.lane.b32.xlu1 %v8746_v55, %s9353_s13  ;;  %v3127_v7 = vsel %vm3113_vm5, %v9268_v42, %v7095_v41  ;;  %v3149_v55 = vsel %vm3146_vm6, %v3116_v54, %v7149_v53  ;;  %v3153_v54 = vsel %vm3146_vm6, %v12124_v13, %v7159_v21  ;;  %v15121_v41 = vld [vmem:[#allocation3_spill] sm:$0xff]  ;;  %v12209_v21 = vld [vmem:[%s9432_s30 + $0x250] sm:$0xff]  ;;  %v7180_v32 = vunpack.i.h.bf16 %v15122_v43 }
 0x2c1   : > { %8742 = vrot.lane.b32.xlu0 %v8741_v3, %s9352_s12  ;;  %v7155_v3 = vunpack.i.h.bf16 %v15117_v49  ;;  %v3151_v20 = vsel %vm3146_vm6, %v12108_v52, %v7154_v0  ;;  %v7165_v27 = vunpack.i.h.bf16 %v15121_v41  ;;  %v7164_v53 = vunpack.i.l.bf16 %v15121_v41  ;;  %v15123_v52 = vld [vmem:[#allocation11_spill] sm:$0xff] }
 0x2c2   : > { %v12186_v47 = vpop.permute.xlu1 %8467  ;;  %v8761_v13 = vpack.i.bf16 %v6610_v28, %v12113_v51  ;;  %v7175_v0 = vunpack.i.h.bf16 %v15123_v52  ;;  %v7229_v5 = vunpack.i.l.bf16 %v15124_v30  ;;  %v3157_v15 = vsel %vm3146_vm6, %v3124_v62, %v7169_v6  ;;  %v15127_v43 = vld [vmem:[#allocation15_spill] sm:$0xff] }
 0x2c3   : > { %15118 = vst [vmem:[#allocation31_spill] sm:$0xff] %v12186_v47  ;;  %v12193_v36 = vpop.permute.xlu0 %8462  ;;  %v3152_v42 = vsel %vm3146_vm6, %v12117_v1, %v7155_v3  ;;  %v7230_v51 = vunpack.i.h.bf16 %v15124_v30  ;;  %v7225_v47 = vunpack.i.h.bf16 %v15127_v43  ;;  %v8776_v1 = vpack.i.bf16 %v12209_v21, %v6610_v28 }
 0x2c4   : > { %15120 = vst [vmem:[#allocation32_spill] sm:$0xff] %v12193_v36  ;;  %8757 = vrot.lane.b32.xlu1 %v11877_v58, %s9355_s15  ;;  %v7174_v58 = vunpack.i.l.bf16 %v15123_v52  ;;  %v7224_v52 = vunpack.i.l.bf16 %v15127_v43  ;;  %v15128_v36 = vld [vmem:[#allocation13_spill] sm:$0xff]  ;;  %v3155_v62 = vsel %vm3146_vm6, %v3122_v31, %v7164_v53  ;;  %v3161_v3 = vsel %vm3146_vm6, %v3128_v8, %v7179_v33 }
 0x2c5   : > { %8752 = vrot.lane.b32.xlu0 %v8751_v60, %s9354_s14  ;;  %v3158_v60 = vsel %vm3146_vm6, %v3125_v59, %v7170_v44  ;;  %v7239_v16 = vunpack.i.l.bf16 %v15128_v36  ;;  %v3156_v59 = vsel %vm3146_vm6, %v3123_v17, %v7165_v27  ;;  %v8771_v44 = vpack.i.bf16 %v11844_v46, %v11859_v12  ;;  %v6740_v31 = vld [vmem:[%s9432_s30 + $0x251] sm:$0xff] }
 0x2c6   : > { %v12215_v49 = vpop.permute.xlu1 %8477  ;;  %v3162_v6 = vsel %vm3146_vm6, %v3129_v50, %v7180_v32  ;;  %v3159_v30 = vsel %vm3146_vm6, %v3126_v39, %v7174_v58  ;;  %v3160_v43 = vsel %vm3146_vm6, %v3127_v7, %v7175_v0  ;;  %v3183_v17 = vsel %vm3179_vm7, %v3150_v14, %v7230_v51  ;;  %v15130_v27 = vld [vmem:[#allocation17_spill] sm:$0xff]  ;;  %v15132_v50 = vld [vmem:[#allocation19_spill] sm:$0xff]  ;;  %v15133_v14 = vld [vmem:[#allocation16_spill] sm:$0xff] }
 0x2c7   : > { %15125 = vst [vmem:[#allocation33_spill] sm:$0xff] %v12215_v49  ;;  %v12222_v41 = vpop.permute.xlu0 %8472  ;;  %v7240_v8 = vunpack.i.h.bf16 %v15128_v36  ;;  %v7235_v53 = vunpack.i.h.bf16 %v15130_v27  ;;  %v7234_v33 = vunpack.i.l.bf16 %v15130_v27  ;;  %v3180_v46 = vsel %vm3179_vm7, %v3147_v48, %v7224_v52  ;;  %v15134_v48 = vld [vmem:[#allocation21_spill] sm:$0xff]  ;;  %v6612_v51 = vld [vmem:[%s9432_s30 + $0x260] sm:$0xff] }
 0x2c8   : > { %15126 = vst [vmem:[#allocation34_spill] sm:$0xff] %v12222_v41  ;;  %8767 = vrot.lane.b32.xlu1 %v8766_v40, %s9351_s11  ;;  %v3182_v40 = vsel %vm3179_vm7, %v3149_v55, %v7229_v5  ;;  %v3181_v39 = vsel %vm3179_vm7, %v3148_v38, %v7225_v47  ;;  %v3186_v7 = vsel %vm3179_vm7, %v3153_v54, %v7239_v16  ;;  %v7249_v55 = vunpack.i.l.bf16 %v15132_v50  ;;  %v15135_v16 = vld [vmem:[#allocation25_spill] sm:$0xff]  ;;  %v15137_v27 = vld [vmem:[#allocation50_spill] sm:$0xff] }
 0x2c9   : > { %8762 = vrot.lane.b32.xlu0 %v8761_v13, %s9350_s10  ;;  %v7250_v36 = vunpack.i.h.bf16 %v15132_v50  ;;  %v7245_v13 = vunpack.i.h.bf16 %v15133_v14  ;;  %v7244_v32 = vunpack.i.l.bf16 %v15133_v14  ;;  %v8781_v0 = vpack.i.bf16 %v6740_v31, %v12179_v4  ;;  %v12270_v50 = vld [vmem:[%s9432_s30 + $0x261] sm:$0xff]  ;;  %v6456_v41 = vld [vmem:[%s9432_s30 + $0x271] sm:$0xff] }
 0x2ca   : > { %v12239_v28 = vpop.permute.xlu1 %8487  ;;  %v7260_v58 = vunpack.i.h.bf16 %v15134_v48  ;;  %v7259_v47 = vunpack.i.l.bf16 %v15134_v48  ;;  %v7255_v38 = vunpack.i.h.bf16 %v15135_v16  ;;  %v7254_v54 = vunpack.i.l.bf16 %v15135_v16  ;;  %v15146_v49 = vld [vmem:[#allocation66_spill] sm:$0xff] }
 0x2cb   : > { %15129 = vst [vmem:[#allocation35_spill] sm:$0xff] %v12239_v28  ;;  %v12246_v12 = vpop.permute.xlu0 %8482  ;;  %v3187_v52 = vsel %vm3179_vm7, %v3154_v22, %v7240_v8  ;;  %v7309_v4 = vunpack.i.l.bf16 %v15137_v27  ;;  %v3190_v48 = vsel %vm3179_vm7, %v3157_v15, %v7249_v55  ;;  %v7310_v16 = vunpack.i.h.bf16 %v15137_v27  ;;  %v15139_v28 = vld [vmem:[#allocation51_spill] sm:$0xff] }
 0x2cc   : > { %15131 = vst [vmem:[#allocation44_spill] sm:$0xff] %v12246_v12  ;;  %8777 = vrot.lane.b32.xlu1 %v8776_v1, %s9353_s13  ;;  %v3184_v1 = vsel %vm3179_vm7, %v3151_v20, %v7234_v33  ;;  %v8796_v22 = vpack.i.bf16 %v12270_v50, %v6740_v31  ;;  %v3191_v20 = vsel %vm3179_vm7, %v3158_v60, %v7250_v36  ;;  %v6675_v60 = vld [vmem:[%s9432_s30 + $0x252] sm:$0xff]  ;;  %v7305_v36 = vunpack.i.h.bf16 %v15139_v28 }
 0x2cd   : > { %8772 = vrot.lane.b32.xlu0 %v8771_v44, %s9352_s12  ;;  %v3185_v44 = vsel %vm3179_vm7, %v3152_v42, %v7235_v53  ;;  %v3188_v42 = vsel %vm3179_vm7, %v3155_v62, %v7244_v32  ;;  %v3189_v8 = vsel %vm3179_vm7, %v3156_v59, %v7245_v13  ;;  %v8791_v15 = vpack.i.bf16 %v6612_v51, %v12209_v21  ;;  %v6710_v53 = vld [vmem:[%s9432_s30 + $0x270] sm:$0xff]  ;;  %v6676_v62 = vld [vmem:[%s9432_s30 + $0x262] sm:$0xff] }
 0x2ce   : > { %v12262_v5 = vpop.permute.xlu1 %8497  ;;  %v3194_v33 = vsel %vm3179_vm7, %v3161_v3, %v7259_v47  ;;  %v3195_v55 = vsel %vm3179_vm7, %v3162_v6, %v7260_v58  ;;  %v3193_v31 = vsel %vm3179_vm7, %v3160_v43, %v7255_v38  ;;  %v3215_v59 = vsel %vm3212_vm8, %v3182_v40, %v7309_v4  ;;  %v15140_v13 = vld [vmem:[#allocation52_spill] sm:$0xff]  ;;  %v15141_v43 = vld [vmem:[#allocation53_spill] sm:$0xff]  ;;  %v15143_v4 = vld [vmem:[#allocation55_spill] sm:$0xff] }
 0x2cf   : > { %15136 = vst [vmem:[#allocation45_spill] sm:$0xff] %v12262_v5  ;;  %v12272_v14 = vpop.permute.xlu0 %8492  ;;  %v7304_v5 = vunpack.i.l.bf16 %v15139_v28  ;;  %v7320_v21 = vunpack.i.h.bf16 %v15140_v13  ;;  %v7319_v32 = vunpack.i.l.bf16 %v15140_v13  ;;  %v12301_v6 = vsel %vm3212_vm8, %v3183_v17, %v7310_v16  ;;  %v15142_v28 = vld [vmem:[#allocation54_spill] sm:$0xff]  ;;  %v6774_v17 = vld [vmem:[%s9432_s30 + $0x272] sm:$0xff] }
 0x2d0   : > { %15138 = vst [vmem:[#allocation46_spill] sm:$0xff] %v12272_v14  ;;  %8787 = vrot.lane.b32.xlu1 %v11872_v56, %s9355_s15  ;;  %v3192_v56 = vsel %vm3179_vm7, %v3159_v30, %v7254_v54  ;;  %v8806_v58 = vpack.i.bf16 %v6710_v53, %v6612_v51  ;;  %v7315_v40 = vunpack.i.h.bf16 %v15141_v43  ;;  %v7330_v47 = vunpack.i.h.bf16 %v15142_v28 }
 0x2d1   : > { %8782 = vrot.lane.b32.xlu0 %v8781_v0, %s9354_s14  ;;  %v12304_v30 = vsel %vm3212_vm8, %v3180_v46, %v7304_v5  ;;  %v7314_v0 = vunpack.i.l.bf16 %v15141_v43  ;;  %v7329_v38 = vunpack.i.l.bf16 %v15142_v28  ;;  %v8801_v54 = vpack.i.bf16 %v6676_v62, %v6675_v60  ;;  %v15144_v5 = vld [vmem:[#allocation56_spill] sm:$0xff] }
 0x2d2   : > { %v12290_v27 = vpop.permute.xlu1 %8507  ;;  %v7325_v16 = vunpack.i.h.bf16 %v15143_v4  ;;  %v7324_v46 = vunpack.i.l.bf16 %v15143_v4  ;;  %v7340_v13 = vunpack.i.h.bf16 %v15144_v5  ;;  %v3214_v53 = vsel %vm3212_vm8, %v3181_v39, %v7305_v36 }
 0x2d3   : > { %v12298_v3 = vpop.permute.xlu0 %8502  ;;  %v3219_v43 = vsel %vm3212_vm8, %v3186_v7, %v7319_v32  ;;  %v3220_v28 = vsel %vm3212_vm8, %v3187_v52, %v7320_v21  ;;  %v3217_v12 = vsel %vm3212_vm8, %v3184_v1, %v7314_v0  ;;  %v8816_v39 = vpack.i.bf16 %v6774_v17, %v6676_v62  ;;  %v6613_v62 = vld [vmem:[%s9432_s30 + $0x290] sm:$0xff] }
 0x2d4   : > { %8797 = vrot.lane.b32.xlu1 %v8796_v22, %s9351_s11  ;;  %v7339_v22 = vunpack.i.l.bf16 %v15144_v5  ;;  %v7389_v5 = vunpack.i.l.bf16 %v15146_v49  ;;  %v3218_v7 = vsel %vm3212_vm8, %v3185_v44, %v7315_v40  ;;  %v3223_v52 = vsel %vm3212_vm8, %v3190_v48, %v7329_v38  ;;  %v12343_v44 = vld [vmem:[%s9432_s30 + $0x2a0] sm:$0xff]  ;;  %v15148_v40 = vld [vmem:[#allocation67_spill] sm:$0xff] }
 0x2d5   : > { %8792 = vrot.lane.b32.xlu0 %v8791_v15, %s9350_s10  ;;  %v15145_v15 = vld [vmem:[#allocation57_spill] sm:$0xff]  ;;  %v3224_v36 = vsel %vm3212_vm8, %v3191_v20, %v7330_v47  ;;  %v8811_v1 = vpack.i.bf16 %v6456_v41, %v12270_v50  ;;  %v3221_v21 = vsel %vm3212_vm8, %v3188_v42, %v7324_v46  ;;  %v3222_v32 = vsel %vm3212_vm8, %v3189_v8, %v7325_v16  ;;  %v15152_v16 = vld [vmem:[#allocation71_spill] sm:$0xff] }
 0x2d6   : > { %v12317_v51 = vpop.permute.xlu1 %8517  ;;  %v7334_v14 = vunpack.i.l.bf16 %v15145_v15  ;;  %v7335_v4 = vunpack.i.h.bf16 %v15145_v15  ;;  %v3227_v0 = vsel %vm3212_vm8, %v3194_v33, %v7339_v22  ;;  %v3228_v15 = vsel %vm3212_vm8, %v3195_v55, %v7340_v13  ;;  %v15149_v33 = vld [vmem:[#allocation68_spill] sm:$0xff] }
 0x2d7   : > { %v12323_v60 = vpop.permute.xlu0 %8512  ;;  %v7390_v20 = vunpack.i.h.bf16 %v15146_v49  ;;  %v7385_v47 = vunpack.i.h.bf16 %v15148_v40  ;;  %v7384_v41 = vunpack.i.l.bf16 %v15148_v40  ;;  %v3248_v8 = vsel %vm3245_vm9, %v3215_v59, %v7389_v5  ;;  %v15150_v49 = vld [vmem:[#allocation69_spill] sm:$0xff]  ;;  %v15153_v22 = vld [vmem:[#allocation72_spill] sm:$0xff]  ;;  %v12369_v40 = vld [vmem:[%s9432_s30 + $0x2a1] sm:$0xff] }
 0x2d8   : > { %8807 = vrot.lane.b32.xlu1 %v8806_v58, %s9353_s13  ;;  %v3225_v48 = vsel %vm3212_vm8, %v3192_v56, %v7334_v14  ;;  %v3226_v42 = vsel %vm3212_vm8, %v3193_v31, %v7335_v4  ;;  %v7400_v55 = vunpack.i.h.bf16 %v15149_v33  ;;  %v7399_v38 = vunpack.i.l.bf16 %v15149_v33 }
 0x2d9   : > { %8802 = vrot.lane.b32.xlu0 %v8801_v54, %s9352_s12  ;;  %v7395_v14 = vunpack.i.h.bf16 %v15150_v49  ;;  %v7394_v56 = vunpack.i.l.bf16 %v15150_v49  ;;  %v15151_v54 = vld [vmem:[#allocation70_spill] sm:$0xff]  ;;  %v8821_v31 = vpack.i.bf16 %v12343_v44, %v6613_v62  ;;  %v7405_v46 = vunpack.i.h.bf16 %v15152_v16 }
 0x2da   : > { %v12339_v58 = vpop.permute.xlu1 %8527  ;;  %v7409_v17 = vunpack.i.l.bf16 %v15151_v54  ;;  %v7410_v59 = vunpack.i.h.bf16 %v15151_v54  ;;  %v7404_v13 = vunpack.i.l.bf16 %v15152_v16  ;;  %v7419_v4 = vunpack.i.l.bf16 %v15153_v22 }
 0x2db   : > { %15147 = vst [vmem:[#allocation47_spill] sm:$0xff] %v12339_v58  ;;  %v12349_v50 = vpop.permute.xlu0 %8522  ;;  %v3249_v33 = vsel %vm3245_vm9, %v12301_v6, %v7390_v20  ;;  %v3247_v62 = vsel %vm3245_vm9, %v3214_v53, %v7385_v47  ;;  %v7420_v49 = vunpack.i.h.bf16 %v15153_v22  ;;  %v3252_v16 = vsel %vm3245_vm9, %v3219_v43, %v7399_v38  ;;  %v15156_v58 = vld [vmem:[#allocation73_spill] sm:$0xff] }
 0x2dc   : > { %8817 = vrot.lane.b32.xlu1 %v8816_v39, %s9355_s15  ;;  %v6645_v39 = vld [vmem:[%s9432_s30 + $0x291] sm:$0xff]  ;;  %v7415_v25 = vunpack.i.h.bf16 %v15156_v58  ;;  %v7414_v37 = vunpack.i.l.bf16 %v15156_v58  ;;  %v3250_v6 = vsel %vm3245_vm9, %v3217_v12, %v7394_v56  ;;  %v3251_v20 = vsel %vm3245_vm9, %v3218_v7, %v7395_v14  ;;  %v15158_v7 = vld [vmem:[#allocation82_spill] sm:$0xff]  ;;  %v15159_v14 = vld [vmem:[#allocation83_spill] sm:$0xff] }
 0x2dd   : > { %8812 = vrot.lane.b32.xlu0 %v8811_v1, %s9354_s14  ;;  %v3246_v1 = vsel %vm3245_vm9, %v12304_v30, %v7384_v41  ;;  %v3256_v30 = vsel %vm3245_vm9, %v3223_v52, %v7409_v17  ;;  %v8831_v53 = vpack.i.bf16 %v12369_v40, %v6645_v39  ;;  %v3257_v47 = vsel %vm3245_vm9, %v3224_v36, %v7410_v59  ;;  %v12395_v58 = vld [vmem:[%s9432_s30 + $0x2b0] sm:$0xff]  ;;  %v15162_v59 = vld [vmem:[#allocation85_spill] sm:$0xff] }
 0x2de   : > { %v12365_v5 = vpop.permute.xlu1 %8537  ;;  %v3254_v43 = vsel %vm3245_vm9, %v3221_v21, %v7404_v13  ;;  %v3260_v41 = vsel %vm3245_vm9, %v3227_v0, %v7419_v4  ;;  %v3261_v12 = vsel %vm3245_vm9, %v3228_v15, %v7420_v49  ;;  %v7470_v52 = vunpack.i.h.bf16 %v15158_v7  ;;  %v15161_v0 = vld [vmem:[#allocation84_spill] sm:$0xff]  ;;  %v15163_v4 = vld [vmem:[#allocation86_spill] sm:$0xff] }
 0x2df   : > { %15154 = vst [vmem:[#allocation2_spill] sm:$0xff] %v12365_v5  ;;  %v12377_v54 = vpop.permute.xlu0 %8532  ;;  %v3253_v5 = vsel %vm3245_vm9, %v3220_v28, %v7400_v55  ;;  %v3255_v28 = vsel %vm3245_vm9, %v3222_v32, %v7405_v46  ;;  %v7469_v38 = vunpack.i.l.bf16 %v15158_v7  ;;  %v7464_v56 = vunpack.i.l.bf16 %v15159_v14  ;;  %v12420_v7 = vld [vmem:[%s9432_s30 + $0x2b2] sm:$0xff] }
 0x2e0   : > { %15155 = vst [vmem:[#allocation3_spill] sm:$0xff] %v12377_v54  ;;  %v3258_v36 = vsel %vm3245_vm9, %v3225_v48, %v7414_v37  ;;  %v3259_v21 = vsel %vm3245_vm9, %v3226_v42, %v7415_v25  ;;  %v7465_v32 = vunpack.i.h.bf16 %v15159_v14  ;;  %v7480_v15 = vunpack.i.h.bf16 %v15161_v0  ;;  %v15164_v48 = vld [vmem:[#allocation87_spill] sm:$0xff]  ;;  %v15167_v54 = vld [vmem:[#allocation89_spill] sm:$0xff] }
 0x2e1   : > { %8822 = vrot.lane.b32.xlu0 %v8821_v31, %s9350_s10  ;;  %v7479_v31 = vunpack.i.l.bf16 %v15161_v0  ;;  %v7475_v46 = vunpack.i.h.bf16 %v15162_v59  ;;  %v7474_v13 = vunpack.i.l.bf16 %v15162_v59  ;;  %v8841_v22 = vpack.i.bf16 %v12395_v58, %v12343_v44  ;;  %v15166_v44 = vld [vmem:[#allocation88_spill] sm:$0xff] }
 0x2e2   : > { %v12392_v55 = vpop.permute.xlu1 %8547  ;;  %v7490_v37 = vunpack.i.h.bf16 %v15163_v4  ;;  %v7489_v25 = vunpack.i.l.bf16 %v15163_v4  ;;  %v7485_v42 = vunpack.i.h.bf16 %v15164_v48  ;;  %v7484_v39 = vunpack.i.l.bf16 %v15164_v48 }
 0x2e3   : > { %15157 = vst [vmem:[#allocation7_spill] sm:$0xff] %v12392_v55  ;;  %v12401_v17 = vpop.permute.xlu0 %8542  ;;  %v3281_v14 = vsel %vm3278_vm10, %v3248_v8, %v7469_v38  ;;  %v3279_v0 = vsel %vm3278_vm10, %v3246_v1, %v7464_v56  ;;  %v7499_v59 = vunpack.i.l.bf16 %v15166_v44  ;;  %v3280_v4 = vsel %vm3278_vm10, %v3247_v62, %v7465_v32 }
 0x2e4   : > { %15160 = vst [vmem:[#allocation11_spill] sm:$0xff] %v12401_v17  ;;  %v3285_v17 = vsel %vm3278_vm10, %v3252_v16, %v7479_v31  ;;  %v7500_v48 = vunpack.i.h.bf16 %v15166_v44  ;;  %v3286_v8 = vsel %vm3278_vm10, %v3253_v5, %v7480_v15  ;;  %v3284_v1 = vsel %vm3278_vm10, %v3251_v20, %v7475_v46  ;;  %v15169_v20 = vld [vmem:[#allocation98_spill] sm:$0xff] }
 0x2e5   : > { %8832 = vrot.lane.b32.xlu0 %v8831_v53, %s9351_s11  ;;  %v3282_v53 = vsel %vm3278_vm10, %v3249_v33, %v7470_v52  ;;  %v3283_v33 = vsel %vm3278_vm10, %v3250_v6, %v7474_v13  ;;  %v8851_v52 = vpack.i.bf16 %v12420_v7, %v12433_v18  ;;  %v3289_v62 = vsel %vm3278_vm10, %v3256_v30, %v7489_v25 }
 0x2e6   : > { %v12417_v49 = vpop.permute.xlu1 %8557  ;;  %v3290_v16 = vsel %vm3278_vm10, %v3257_v47, %v7490_v37  ;;  %v3287_v38 = vsel %vm3278_vm10, %v3254_v43, %v7484_v39  ;;  %v3288_v56 = vsel %vm3278_vm10, %v3255_v28, %v7485_v42  ;;  %v3293_v5 = vsel %vm3278_vm10, %v3260_v41, %v7499_v59  ;;  %v15171_v43 = vld [vmem:[#allocation99_spill] sm:$0xff]  ;;  %v15174_v39 = vld [vmem:[#allocation102_spill] sm:$0xff] }
 0x2e7   : > { %15165 = vst [vmem:[#allocation18_spill] sm:$0xff] %v12417_v49  ;;  %v12426_v55 = vpop.permute.xlu0 %8552  ;;  %v7494_v49 = vunpack.i.l.bf16 %v15167_v54  ;;  %v7495_v6 = vunpack.i.h.bf16 %v15167_v54  ;;  %v7550_v31 = vunpack.i.h.bf16 %v15169_v20  ;;  %v7549_v15 = vunpack.i.l.bf16 %v15169_v20  ;;  %v15173_v54 = vld [vmem:[#allocation101_spill] sm:$0xff]  ;;  %v15175_v59 = vld [vmem:[#allocation103_spill] sm:$0xff] }
 0x2e8   : > { %v12454_v30 = vsel %vm3278_vm10, %v3261_v12, %v7500_v48  ;;  %v7545_v13 = vunpack.i.h.bf16 %v15171_v43  ;;  %v7544_v28 = vunpack.i.l.bf16 %v15171_v43  ;;  %v7555_v25 = vunpack.i.h.bf16 %v15173_v54 }
 0x2e9   : > { %8842 = vrot.lane.b32.xlu0 %v8841_v22, %s9353_s13  ;;  %15170 = vst [vmem:[#allocation13_spill] sm:$0xff] %v12454_v30  ;;  %v3291_v47 = vsel %vm3278_vm10, %v3258_v36, %v7494_v49  ;;  %v15172_v22 = vld [vmem:[#allocation100_spill] sm:$0xff]  ;;  %v7554_v42 = vunpack.i.l.bf16 %v15173_v54  ;;  %v7570_v44 = vunpack.i.h.bf16 %v15174_v39  ;;  %v7569_v12 = vunpack.i.l.bf16 %v15174_v39 }
 0x2ea   : > { %v12445_v32 = vpop.permute.xlu1 %8567  ;;  %v7560_v37 = vunpack.i.h.bf16 %v15172_v22  ;;  %v7559_v41 = vunpack.i.l.bf16 %v15172_v22  ;;  %v7565_v36 = vunpack.i.h.bf16 %v15175_v59  ;;  %v7564_v49 = vunpack.i.l.bf16 %v15175_v59  ;;  %v15177_v54 = vld [vmem:[#allocation104_spill] sm:$0xff]  ;;  %v15179_v59 = vld [vmem:[#allocation105_spill] sm:$0xff] }
 0x2eb   : > { %15168 = vst [vmem:[#allocation15_spill] sm:$0xff] %v12445_v32  ;;  %v12451_v46 = vpop.permute.xlu0 %8562  ;;  %v3292_v20 = vsel %vm3278_vm10, %v3259_v21, %v7495_v6  ;;  %v12472_v43 = vsel %vm3311_vm11, %v3281_v14, %v7549_v15  ;;  %v12475_v22 = vsel %vm3311_vm11, %v3282_v53, %v7550_v31  ;;  %v12481_v39 = vsel %vm3311_vm11, %v3279_v0, %v7544_v28 }
 0x2ec   : > { %v12484_v32 = vsel %vm3311_vm11, %v3280_v4, %v7545_v13  ;;  %v7574_v21 = vunpack.i.l.bf16 %v15179_v59  ;;  %v12489_v14 = vsel %vm3311_vm11, %v3285_v17, %v7559_v41  ;;  %v12492_v53 = vsel %vm3311_vm11, %v3286_v8, %v7560_v37  ;;  %v6436_v37 = vld [vmem:[%s9432_s30 + $0xf1] sm:$0xff] }
 0x2ed   : > { %8852 = vrot.lane.b32.xlu0 %v8851_v52, %s9355_s15  ;;  %v7579_v52 = vunpack.i.l.bf16 %v15177_v54  ;;  %v12495_v6 = vsel %vm3311_vm11, %v3283_v33, %v7554_v42  ;;  %v12498_v0 = vsel %vm3311_vm11, %v3284_v1, %v7555_v25  ;;  %v12501_v4 = vsel %vm3311_vm11, %v3289_v62, %v7569_v12  ;;  %v15182_v42 = vld [vmem:[#allocation114_spill] sm:$0xff] }
 0x2ee   : > { %v12468_v48 = vpop.permute.xlu1 %8577  ;;  %v12504_v31 = vsel %vm3311_vm11, %v3290_v16, %v7570_v44  ;;  %v12507_v17 = vsel %vm3311_vm11, %v3287_v38, %v7564_v49  ;;  %v12510_v8 = vsel %vm3311_vm11, %v3288_v56, %v7565_v36  ;;  %v8270_v62 = vunpack.i.h.bf16 %v11930_v9  ;;  %v6435_v56 = vld [vmem:[%s9432_s30 + $0xe1] sm:$0xff]  ;;  %v6434_v36 = vld [vmem:[%s9432_s30 + $0xd1] sm:$0xff] }
 0x2ef   : > { %15176 = vst [vmem:[#allocation17_spill] sm:$0xff] %v12468_v48  ;;  %v12478_v30 = vpop.permute.xlu0 %8572  ;;  %v7575_v48 = vunpack.i.h.bf16 %v15179_v59  ;;  %v12516_v1 = vsel %vm3311_vm11, %v3293_v5, %v7579_v52  ;;  %v8269_v16 = vunpack.i.l.bf16 %v11930_v9  ;;  %v12521_v38 = vsel %vm3311_vm11, %v3291_v47, %v7574_v21  ;;  %v6433_v12 = vld [vmem:[%s9432_s30 + $0xc1] sm:$0xff] }
 0x2f0   : > { %15178 = vst [vmem:[#allocation19_spill] sm:$0xff] %v12478_v30  ;;  %15180 = vst [vmem:[#allocation16_spill] sm:$0xff] %v12516_v1  ;;  %v8265_v41 = vunpack.i.h.bf16 %v11942_v63  ;;  %v8264_v25 = vunpack.i.l.bf16 %v11942_v63  ;;  %v8345_v9 = vunpack.i.h.bf16 %v12012_v2  ;;  %v8344_v47 = vunpack.i.l.bf16 %v12012_v2  ;;  %v15183_v49 = vld [vmem:[#allocation115_spill] sm:$0xff] }
 0x2f1   : > { %v12524_v28 = vsel %vm3311_vm11, %v3292_v20, %v7575_v48  ;;  %v8425_v20 = vunpack.i.h.bf16 %v12084_v23  ;;  %v8424_v59 = vunpack.i.l.bf16 %v12084_v23  ;;  %v4891_v63 = vsel %vm3113_vm5, %v6436_v37, %v8270_v62 }
 0x2f2   : > { %v12512_v15 = vpop.permute.xlu1 %8587  ;;  %15181 = vst [vmem:[#allocation21_spill] sm:$0xff] %v12524_v28  ;;  %v4890_v33 = vsel %vm3113_vm5, %v6435_v56, %v8269_v16  ;;  %v8505_v5 = vunpack.i.h.bf16 %v12298_v3  ;;  %v8504_v44 = vunpack.i.l.bf16 %v12298_v3  ;;  %v4889_v2 = vsel %vm3113_vm5, %v6434_v36, %v8265_v41 }
 0x2f3   : > { %v8583_v13 = vpop.permute.xlu0 %8582  ;;  %v4888_v52 = vsel %vm3113_vm5, %v6433_v12, %v8264_v25  ;;  %v4921_v54 = vsel %vm3146_vm6, %v4889_v2, %v8345_v9  ;;  %v8275_v16 = vunpack.i.h.bf16 %v11954_v26  ;;  %v8349_v3 = vunpack.i.l.bf16 %v12010_v34 }
 0x2f4   : > { %v8585_v48 = vunpack.i.h.bf16 %v8583_v13  ;;  %v8584_v1 = vunpack.i.l.bf16 %v8583_v13  ;;  %v4920_v23 = vsel %vm3146_vm6, %v4888_v52, %v8344_v47  ;;  %v4953_v28 = vsel %vm3179_vm7, %v4921_v54, %v8425_v20 }
 0x2f5   : > { %v4952_v56 = vsel %vm3179_vm7, %v4920_v23, %v8424_v59  ;;  %v8350_v13 = vunpack.i.h.bf16 %v12010_v34  ;;  %v4985_v36 = vsel %vm3212_vm8, %v4953_v28, %v8505_v5  ;;  %v4922_v25 = vsel %vm3146_vm6, %v4890_v33, %v8349_v3 }
 0x2f6   : > { %v8598_v21 = vpop.permute.xlu1 %8597  ;;  %v4984_v12 = vsel %vm3212_vm8, %v4952_v56, %v8504_v44  ;;  %v5017_v52 = vsel %vm3245_vm9, %v4985_v36, %v8585_v48  ;;  %v8429_v34 = vunpack.i.l.bf16 %v12082_v10  ;;  %v8509_v48 = vunpack.i.l.bf16 %v12290_v27 }
 0x2f7   : > { %v12544_v30 = vpop.permute.xlu0 %8592  ;;  %v8600_v62 = vunpack.i.h.bf16 %v8598_v21  ;;  %v8599_v37 = vunpack.i.l.bf16 %v8598_v21  ;;  %v5016_v47 = vsel %vm3245_vm9, %v4984_v12, %v8584_v1  ;;  %v8430_v1 = vunpack.i.h.bf16 %v12082_v10 }
 0x2f8   : > { %v8590_v33 = vunpack.i.h.bf16 %v12512_v15  ;;  %v8589_v36 = vunpack.i.l.bf16 %v12512_v15 }
 0x2f9   : > { %v5048_v59 = vsel %vm3278_vm10, %v5016_v47, %v8599_v37  ;;  %v5049_v54 = vsel %vm3278_vm10, %v5017_v52, %v8600_v62  ;;  %v4923_v47 = vsel %vm3146_vm6, %v4891_v63, %v8350_v13  ;;  %v4954_v52 = vsel %vm3179_vm7, %v4922_v25, %v8429_v34  ;;  %v6437_v34 = vld [vmem:[%s9432_s30 + $0x101] sm:$0xff] }
 0x2fa   : > { %v8608_v41 = vpop.permute.xlu1 %8607 }
 0x2fb   : > { %v8603_v9 = vpop.permute.xlu0 %8602  ;;  %v8610_v20 = vunpack.i.h.bf16 %v8608_v41  ;;  %v8609_v23 = vunpack.i.l.bf16 %v8608_v41  ;;  %v8510_v41 = vunpack.i.h.bf16 %v12290_v27 }
 0x2fc   : > { %v8605_v21 = vunpack.i.h.bf16 %v8603_v9  ;;  %v8604_v2 = vunpack.i.l.bf16 %v8603_v9 }
 0x2fe   : > { %v5080_v44 = vsel %vm3311_vm11, %v5048_v59, %v8604_v2  ;;  %v5081_v28 = vsel %vm3311_vm11, %v5049_v54, %v8605_v21  ;;  %v12566_v5 = vpop.permute.xlu1 %8617  ;;  %v4955_v59 = vsel %vm3179_vm7, %v4923_v47, %v8430_v1  ;;  %v4986_v54 = vsel %vm3212_vm8, %v4954_v52, %v8509_v48 }
 0x2ff   : > { %v8620_v37 = vunpack.i.h.bf16 %v12566_v5  ;;  %v8619_v62 = vunpack.i.l.bf16 %v12566_v5  ;;  %v8613_v56 = vpop.permute.xlu0 %8612  ;;  %v5112_v9 = vsel %vm3344_vm12, %v5080_v44, %v8609_v23  ;;  %v5113_v10 = vsel %vm3344_vm12, %v5081_v28, %v8610_v20  ;;  %v6677_v44 = vld [vmem:[%s9432_s30 + $0x292] sm:$0xff] }
 0x300   : > { %v8615_v3 = vunpack.i.h.bf16 %v8613_v56  ;;  %v8614_v12 = vunpack.i.l.bf16 %v8613_v56  ;;  %v4987_v63 = vsel %vm3212_vm8, %v4955_v59, %v8510_v41  ;;  %v6438_v56 = vld [vmem:[%s9432_s30 + $0x111] sm:$0xff]  ;;  %v8279_v52 = vunpack.i.l.bf16 %v11950_v29 }
 0x301   : > { %v5019_v1 = vsel %vm3245_vm9, %v4987_v63, %v8590_v33  ;;  %v15185_v33 = vunpack.i.h.bf16 %v15182_v42  ;;  %v15186_v59 = vunpack.i.l.bf16 %v15183_v49 }
 0x302   : > { %v5144_v21 = vsel %vm3377_vm13, %v5112_v9, %v8614_v12  ;;  %v5145_v27 = vsel %vm3377_vm13, %v5113_v10, %v8615_v3  ;;  %v8628_v2 = vpop.permute.xlu1 %8627  ;;  %v5018_v3 = vsel %vm3245_vm9, %v4986_v54, %v8589_v36  ;;  %v8836_v10 = vpack.i.bf16 %v12433_v18, %v6677_v44 }
 0x303   : > { %v8623_v15 = vpop.permute.xlu0 %8622  ;;  %v5176_v23 = vsel %vm3410_vm14, %v5144_v21, %v8619_v62  ;;  %v5177_v20 = vsel %vm3410_vm14, %v5145_v27, %v8620_v37  ;;  %v8630_v48 = vunpack.i.h.bf16 %v8628_v2  ;;  %v8629_v12 = vunpack.i.l.bf16 %v8628_v2  ;;  %v12610_v27 = vld [vmem:[%s9432_s30 + $0x2b1] sm:$0xff]  ;;  %v12613_v2 = vld [vmem:[%s9432_s30 + $0x2c0] sm:$0xff] }
 0x304   : > { %v8625_v13 = vunpack.i.h.bf16 %v8623_v15  ;;  %v8624_v28 = vunpack.i.l.bf16 %v8623_v15  ;;  %v8826_v25 = vpack.i.bf16 %v5177_v20, %v5176_v23  ;;  %v15184_v62 = vunpack.i.l.bf16 %v15182_v42  ;;  %v12628_v20 = vld [vmem:[%s9432_s30 + $0x2c2] sm:$0xff] }
 0x305   : > { %v12605_v47 = vsel %vm3344_vm12, %v12475_v22, %v15185_v33  ;;  %v12619_v18 = vsel %vm3344_vm12, %v12481_v39, %v15186_v59  ;;  %v4893_v22 = vsel %vm3113_vm5, %v6438_v56, %v8275_v16  ;;  %v15187_v42 = vunpack.i.l.bf16 %v11954_v26  ;;  %v6648_v59 = vld [vmem:[%s9432_s30 + $0x2c1] sm:$0xff] }
 0x306   : > { %v12595_v37 = vsel %vm3344_vm12, %v12472_v43, %v15184_v62  ;;  %v5051_v41 = vsel %vm3278_vm10, %v5019_v1, %v8625_v13  ;;  %v5050_v9 = vsel %vm3278_vm10, %v5018_v3, %v8624_v28  ;;  %8827 = vrot.lane.b32.xlu1 %v8826_v25, %s9361_s28  ;;  %v8638_v36 = vpop.permute.xlu1 %8637  ;;  %v8280_v43 = vunpack.i.h.bf16 %v11950_v29 }
 0x307   : > { %v8633_v21 = vpop.permute.xlu0 %8632  ;;  %v4892_v54 = vsel %vm3113_vm5, %v6437_v34, %v15187_v42  ;;  %v8640_v44 = vunpack.i.h.bf16 %v8638_v36  ;;  %v8639_v63 = vunpack.i.l.bf16 %v8638_v36  ;;  %v5082_v13 = vsel %vm3311_vm11, %v5050_v9, %v8629_v12 }
 0x308   : > { %v8635_v15 = vunpack.i.h.bf16 %v8633_v21  ;;  %v8634_v23 = vunpack.i.l.bf16 %v8633_v21  ;;  %v5083_v28 = vsel %vm3311_vm11, %v5051_v41, %v8630_v48  ;;  %v8846_v26 = vpack.i.bf16 %v12610_v27, %v12369_v40 }
 0x309   : > { %v8856_v34 = vpack.i.bf16 %v12613_v2, %v12395_v58  ;;  %v8355_v56 = vunpack.i.h.bf16 %v12022_v57  ;;  %v8354_v3 = vunpack.i.l.bf16 %v12022_v57  ;;  %v8435_v1 = vunpack.i.h.bf16 %v12099_v61 }
 0x30a   : > { %v5114_v39 = vsel %vm3344_vm12, %v5082_v13, %v8634_v23  ;;  %v5115_v25 = vsel %vm3344_vm12, %v5083_v28, %v8635_v15  ;;  %8837 = vrot.lane.b32.xlu1 %v8836_v10, %s9352_s12  ;;  %v8648_v16 = vpop.permute.xlu1 %8647  ;;  %v8871_v12 = vpack.i.bf16 %v12628_v20, %v12420_v7  ;;  %v8434_v62 = vunpack.i.l.bf16 %v12099_v61 }
 0x30b   : > { %v12642_v48 = vpop.permute.xlu0 %8642  ;;  %v8515_v41 = vunpack.i.h.bf16 %v12323_v60  ;;  %v8514_v9 = vunpack.i.l.bf16 %v12323_v60  ;;  %v8595_v57 = vunpack.i.h.bf16 %v12544_v30  ;;  %v5146_v36 = vsel %vm3377_vm13, %v5114_v39, %v8639_v63 }
 0x30c   : > { %v8645_v40 = vunpack.i.h.bf16 %v12642_v48  ;;  %v8644_v58 = vunpack.i.l.bf16 %v12642_v48  ;;  %v5147_v10 = vsel %vm3377_vm13, %v5115_v25, %v8640_v44  ;;  %v8594_v33 = vunpack.i.l.bf16 %v12544_v30 }
 0x30d   : > { %v4924_v42 = vsel %vm3146_vm6, %v4892_v54, %v8354_v3  ;;  %v4925_v60 = vsel %vm3146_vm6, %v4893_v22, %v8355_v56  ;;  %v8649_v15 = vunpack.i.l.bf16 %v8648_v16  ;;  %v8650_v63 = vunpack.i.h.bf16 %v8648_v16 }
 0x30e   : > { %v5178_v7 = vsel %vm3410_vm14, %v5146_v36, %v8644_v58  ;;  %v5179_v61 = vsel %vm3410_vm14, %v5147_v10, %v8645_v40  ;;  %8847 = vrot.lane.b32.xlu1 %v8846_v26, %s9354_s14  ;;  %v8658_v21 = vpop.permute.xlu1 %8657  ;;  %v4956_v44 = vsel %vm3179_vm7, %v4924_v42, %v8434_v62  ;;  %v4957_v30 = vsel %vm3179_vm7, %v4925_v60, %v8435_v1  ;;  %v12675_v62 = vld [vmem:[%s9432_s30 + $0x2d1] sm:$0xff]  ;;  %v6439_v10 = vld [vmem:[%s9432_s30 + $0x121] sm:$0xff] }
 0x30f   : > { %v8653_v23 = vpop.permute.xlu0 %8652  ;;  %v8861_v13 = vpack.i.bf16 %v5179_v61, %v5178_v7  ;;  %v4988_v39 = vsel %vm3212_vm8, %v4956_v44, %v8514_v9  ;;  %v4989_v25 = vsel %vm3212_vm8, %v4957_v30, %v8515_v41  ;;  %v8866_v22 = vpack.i.bf16 %v6648_v59, %v12610_v27  ;;  %v6440_v41 = vld [vmem:[%s9432_s30 + $0x131] sm:$0xff]  ;;  %v12696_v30 = vld [vmem:[%s9432_s30 + $0x2e0] sm:$0xff] }
 0x310   : > { %v8654_v28 = vunpack.i.l.bf16 %v8653_v23  ;;  %v8655_v26 = vunpack.i.h.bf16 %v8653_v23  ;;  %v8360_v54 = vunpack.i.h.bf16 %v12020_v45  ;;  %v8359_v56 = vunpack.i.l.bf16 %v12020_v45  ;;  %v6714_v45 = vld [vmem:[%s9432_s30 + $0x2d0] sm:$0xff] }
 0x311   : > { %8862 = vrot.lane.b32.xlu0 %v8861_v13, %s9361_s28  ;;  %v5020_v3 = vsel %vm3245_vm9, %v4988_v39, %v8594_v33  ;;  %v5021_v16 = vsel %vm3245_vm9, %v4989_v25, %v8595_v57  ;;  %v8659_v58 = vunpack.i.l.bf16 %v8658_v21  ;;  %v8660_v33 = vunpack.i.h.bf16 %v8658_v21 }
 0x312   : > { %8857 = vrot.lane.b32.xlu1 %v8856_v34, %s9350_s10  ;;  %v12672_v1 = vpop.permute.xlu1 %8667  ;;  %v5052_v40 = vsel %vm3278_vm10, %v5020_v3, %v8649_v15  ;;  %v5053_v57 = vsel %vm3278_vm10, %v5021_v16, %v8650_v63  ;;  %v8881_v60 = vpack.i.bf16 %v12675_v62, %v6648_v59  ;;  %v4895_v15 = vsel %vm3113_vm5, %v6440_v41, %v8280_v43 }
 0x313   : > { %v8663_v9 = vpop.permute.xlu0 %8662  ;;  %v8670_v27 = vunpack.i.h.bf16 %v12672_v1  ;;  %v8669_v36 = vunpack.i.l.bf16 %v12672_v1  ;;  %v5084_v34 = vsel %vm3311_vm11, %v5052_v40, %v8654_v28  ;;  %v5085_v61 = vsel %vm3311_vm11, %v5053_v57, %v8655_v26  ;;  %v12720_v40 = vld [vmem:[%s9432_s30 + $0x2e1] sm:$0xff] }
 0x314   : > { %v8664_v7 = vunpack.i.l.bf16 %v8663_v9  ;;  %v8665_v42 = vunpack.i.h.bf16 %v8663_v9  ;;  %v8440_v23 = vunpack.i.h.bf16 %v12094_v11  ;;  %v8439_v13 = vunpack.i.l.bf16 %v12094_v11  ;;  %v12705_v11 = vld [vmem:[%s9432_s30 + $0x2d2] sm:$0xff] }
 0x315   : > { %8872 = vrot.lane.b32.xlu0 %v8871_v12, %s9352_s12  ;;  %v8876_v44 = vpack.i.bf16 %v6714_v45, %v12613_v2  ;;  %v4894_v12 = vsel %vm3113_vm5, %v6439_v10, %v8279_v52  ;;  %v8520_v59 = vunpack.i.h.bf16 %v12317_v51  ;;  %v8519_v63 = vunpack.i.l.bf16 %v12317_v51 }
 0x316   : > { %8867 = vrot.lane.b32.xlu1 %v8866_v22, %s9351_s11  ;;  %v8678_v21 = vpop.permute.xlu1 %8677  ;;  %v5116_v43 = vsel %vm3344_vm12, %v5084_v34, %v8659_v58  ;;  %v4926_v39 = vsel %vm3146_vm6, %v4894_v12, %v8359_v56  ;;  %v5117_v2 = vsel %vm3344_vm12, %v5085_v61, %v8660_v33  ;;  %v4927_v29 = vsel %vm3146_vm6, %v4895_v15, %v8360_v54  ;;  %v12732_v33 = vld [vmem:[%s9432_s30 + $0x2f0] sm:$0xff] }
 0x317   : > { %v8673_v28 = vpop.permute.xlu0 %8672  ;;  %v5148_v25 = vsel %vm3377_vm13, %v5116_v43, %v8664_v7  ;;  %v5149_v52 = vsel %vm3377_vm13, %v5117_v2, %v8665_v42  ;;  %v8891_v51 = vpack.i.bf16 %v12696_v30, %v6714_v45  ;;  %v4958_v3 = vsel %vm3179_vm7, %v4926_v39, %v8439_v13  ;;  %v15189_v42 = vld [vmem:[#allocation116_spill] sm:$0xff]  ;;  %v15190_v13 = vld [vmem:[#allocation117_spill] sm:$0xff]  ;;  %v6682_v39 = vld [vmem:[%s9432_s30 + $0x2e2] sm:$0xff] }
 0x318   : > { %v8674_v26 = vunpack.i.l.bf16 %v8673_v28  ;;  %v8675_v22 = vunpack.i.h.bf16 %v8673_v28  ;;  %v4959_v16 = vsel %vm3179_vm7, %v4927_v29, %v8440_v23  ;;  %v8886_v41 = vpack.i.bf16 %v12705_v11, %v12628_v20 }
 0x319   : > { %8882 = vrot.lane.b32.xlu0 %v8881_v60, %s9354_s14  ;;  %v15188_v54 = vunpack.i.h.bf16 %v15183_v49  ;;  %v4990_v9 = vsel %vm3212_vm8, %v4958_v3, %v8519_v63  ;;  %v4991_v45 = vsel %vm3212_vm8, %v4959_v16, %v8520_v59  ;;  %v5180_v10 = vsel %vm3410_vm14, %v5148_v25, %v8669_v36 }
 0x31a   : > { %8877 = vrot.lane.b32.xlu1 %v8876_v44, %s9353_s13  ;;  %v8688_v56 = vpop.permute.xlu1 %8687  ;;  %v8679_v57 = vunpack.i.l.bf16 %v8678_v21  ;;  %v5181_v20 = vsel %vm3410_vm14, %v5149_v52, %v8670_v27  ;;  %v5022_v7 = vsel %vm3245_vm9, %v4990_v9, %v8674_v26  ;;  %v8680_v61 = vunpack.i.h.bf16 %v8678_v21 }
 0x31b   : > { %v12726_v58 = vsel %vm3344_vm12, %v12484_v32, %v15188_v54  ;;  %v8683_v34 = vpop.permute.xlu0 %8682  ;;  %v7640_v60 = vunpack.i.h.bf16 %v15189_v42  ;;  %v5023_v32 = vsel %vm3245_vm9, %v4991_v45, %v8675_v22  ;;  %v8901_v36 = vpack.i.bf16 %v12720_v40, %v12675_v62  ;;  %v12771_v54 = vld [vmem:[%s9432_s30 + $0x2f2] sm:$0xff] }
 0x31c   : > { %v8684_v49 = vunpack.i.l.bf16 %v8683_v34  ;;  %v8685_v15 = vunpack.i.h.bf16 %v8683_v34  ;;  %v7639_v23 = vunpack.i.l.bf16 %v15189_v42  ;;  %v7635_v44 = vunpack.i.h.bf16 %v15190_v13  ;;  %v15191_v34 = vld [vmem:[#allocation118_spill] sm:$0xff] }
 0x31d   : > { %8892 = vrot.lane.b32.xlu0 %v8891_v51, %s9350_s10  ;;  %v7634_v27 = vunpack.i.l.bf16 %v15190_v13  ;;  %v8911_v12 = vpack.i.bf16 %v12732_v33, %v12696_v30  ;;  %v5054_v59 = vsel %vm3278_vm10, %v5022_v7, %v8679_v57  ;;  %v8896_v28 = vpack.i.bf16 %v5181_v20, %v5180_v10  ;;  %v12784_v57 = vld [vmem:[%s9432_s30 + $0x2f1] sm:$0xff]  ;;  %v9269_v42 = vld [vmem:[%s9432_s30 + $0x161] sm:$0xff] }
 0x31e   : > { %8887 = vrot.lane.b32.xlu1 %v8886_v41, %s9355_s15  ;;  %v12745_v21 = vpop.permute.xlu1 %8697  ;;  %v5055_v2 = vsel %vm3278_vm10, %v5023_v32, %v8680_v61  ;;  %v5086_v25 = vsel %vm3311_vm11, %v5054_v59, %v8684_v49  ;;  %v8690_v26 = vunpack.i.h.bf16 %v8688_v56  ;;  %v8689_v29 = vunpack.i.l.bf16 %v8688_v56  ;;  %v15192_v13 = vld [vmem:[#allocation119_spill] sm:$0xff] }
 0x31f   : > { %v8693_v63 = vpop.permute.xlu0 %8692  ;;  %v8700_v43 = vunpack.i.h.bf16 %v12745_v21  ;;  %v8699_v62 = vunpack.i.l.bf16 %v12745_v21  ;;  %v5087_v52 = vsel %vm3311_vm11, %v5055_v2, %v8685_v15  ;;  %v12759_v51 = vsel %vm3344_vm12, %v12489_v14, %v7639_v23 }
 0x320   : > { %v8695_v30 = vunpack.i.h.bf16 %v8693_v63  ;;  %v8694_v22 = vunpack.i.l.bf16 %v8693_v63  ;;  %v12763_v3 = vsel %vm3344_vm12, %v12492_v53, %v7640_v60  ;;  %v8284_v16 = vunpack.i.l.bf16 %v11963_v24 }
 0x321   : > { %8902 = vrot.lane.b32.xlu0 %v8901_v36, %s9351_s11  ;;  %v8906_v41 = vpack.i.bf16 %v6682_v39, %v12705_v11  ;;  %v12775_v9 = vsel %vm3344_vm12, %v12495_v6, %v7634_v27  ;;  %v12779_v14 = vsel %vm3344_vm12, %v12498_v0, %v7635_v44  ;;  %v8285_v53 = vunpack.i.h.bf16 %v11963_v24  ;;  %v9270_v27 = vld [vmem:[%s9432_s30 + $0x171] sm:$0xff] }
 0x322   : > { %8897 = vrot.lane.b32.xlu1 %v8896_v28, %s9361_s28  ;;  %v12767_v56 = vpop.permute.xlu1 %8707  ;;  %v8364_v45 = vunpack.i.l.bf16 %v12031_v35  ;;  %v7649_v11 = vunpack.i.l.bf16 %v15191_v34  ;;  %v8365_v20 = vunpack.i.h.bf16 %v12031_v35  ;;  %v5118_v7 = vsel %vm3344_vm12, %v5086_v25, %v8689_v29 }
 0x323   : > { %v8703_v10 = vpop.permute.xlu0 %8702  ;;  %v5119_v6 = vsel %vm3344_vm12, %v5087_v52, %v8690_v26  ;;  %v8444_v61 = vunpack.i.l.bf16 %v12133_v19  ;;  %v5150_v0 = vsel %vm3377_vm13, %v5118_v7, %v8694_v22  ;;  %v8921_v49 = vpack.i.bf16 %v12771_v54, %v6682_v39 }
 0x324   : > { %v5151_v24 = vsel %vm3377_vm13, %v5119_v6, %v8695_v30  ;;  %v4896_v60 = vsel %vm3113_vm5, %v9269_v42, %v8284_v16  ;;  %v8445_v35 = vunpack.i.h.bf16 %v12133_v19  ;;  %v8524_v32 = vunpack.i.l.bf16 %v12349_v50  ;;  %v12810_v19 = vld [vmem:[%s9432_s30 + $0x300] sm:$0xff] }
 0x325   : > { %8912 = vrot.lane.b32.xlu0 %v8911_v12, %s9353_s13  ;;  %v8916_v36 = vpack.i.bf16 %v12784_v57, %v12720_v40  ;;  %v7650_v23 = vunpack.i.h.bf16 %v15191_v34  ;;  %v7645_v44 = vunpack.i.h.bf16 %v15192_v13  ;;  %v4897_v12 = vsel %vm3113_vm5, %v9270_v27, %v8285_v53  ;;  %v12831_v16 = vld [vmem:[%s9432_s30 + $0x302] sm:$0xff] }
 0x326   : > { %8907 = vrot.lane.b32.xlu1 %v8906_v41, %s9352_s12  ;;  %v12800_v15 = vpop.permute.xlu1 %8717  ;;  %v4928_v59 = vsel %vm3146_vm6, %v4896_v60, %v8364_v45  ;;  %v8525_v28 = vunpack.i.h.bf16 %v12349_v50  ;;  %v5182_v39 = vsel %vm3410_vm14, %v5150_v0, %v8699_v62  ;;  %v5183_v2 = vsel %vm3410_vm14, %v5151_v24, %v8700_v43  ;;  %v6652_v34 = vld [vmem:[%s9432_s30 + $0x301] sm:$0xff] }
 0x327   : > { %v8713_v63 = vpop.permute.xlu0 %8712  ;;  %v8704_v40 = vunpack.i.l.bf16 %v8703_v10  ;;  %v7644_v25 = vunpack.i.l.bf16 %v15192_v13  ;;  %v4929_v26 = vsel %vm3146_vm6, %v4897_v12, %v8365_v20  ;;  %v4960_v29 = vsel %vm3179_vm7, %v4928_v59, %v8444_v61  ;;  %v6718_v59 = vld [vmem:[%s9432_s30 + $0x310] sm:$0xff] }
 0x328   : > { %v8705_v52 = vunpack.i.h.bf16 %v8703_v10  ;;  %v12821_v30 = vsel %vm3344_vm12, %v12501_v4, %v7649_v11  ;;  %v4961_v50 = vsel %vm3179_vm7, %v4929_v26, %v8445_v35  ;;  %v4992_v62 = vsel %vm3212_vm8, %v4960_v29, %v8524_v32  ;;  %v6750_v32 = vld [vmem:[%s9432_s30 + $0x311] sm:$0xff] }
 0x329   : > { %8922 = vrot.lane.b32.xlu0 %v8921_v49, %s9355_s15  ;;  %v8926_v22 = vpack.i.bf16 %v12810_v19, %v12732_v33  ;;  %v8709_v41 = vunpack.i.l.bf16 %v12767_v56  ;;  %v8931_v10 = vpack.i.bf16 %v5183_v2, %v5182_v39  ;;  %v4993_v11 = vsel %vm3212_vm8, %v4961_v50, %v8525_v28  ;;  %v15193_v49 = vld [vmem:[#allocation209_spill] sm:$0xff]  ;;  %v15195_v2 = vld [vmem:[#allocation28_spill] sm:$0xff]  ;;  %v9271_v50 = vld [vmem:[%s9432_s30 + $0x181] sm:$0xff] }
 0x32a   : > { %8917 = vrot.lane.b32.xlu1 %v8916_v36, %s9354_s14  ;;  %v12826_v43 = vpop.permute.xlu1 %8727  ;;  %v5024_v20 = vsel %vm3245_vm9, %v4992_v62, %v8704_v40  ;;  %v8710_v7 = vunpack.i.h.bf16 %v12767_v56  ;;  %v8714_v6 = vunpack.i.l.bf16 %v8713_v63  ;;  %v5025_v33 = vsel %vm3245_vm9, %v4993_v11, %v8705_v52  ;;  %v15194_v36 = vld [vmem:[#allocation220_spill] sm:$0xff] }
 0x32b   : > { %v8723_v53 = vpop.permute.xlu0 %8722  ;;  %v8730_v45 = vunpack.i.h.bf16 %v12826_v43  ;;  %v8729_v4 = vunpack.i.l.bf16 %v12826_v43  ;;  %v8715_v61 = vunpack.i.h.bf16 %v8713_v63  ;;  %v8941_v0 = vpack.i.bf16 %v12831_v16, %v12771_v54 }
 0x32c   : > { %v12846_v24 = vsel %vm3344_vm12, %v12504_v31, %v7650_v23  ;;  %v8290_v42 = vunpack.i.h.bf16 %v15193_v49  ;;  %v8289_v60 = vunpack.i.l.bf16 %v15193_v49  ;;  %v8936_v35 = vpack.i.bf16 %v6652_v34, %v12784_v57  ;;  %v6782_v49 = vld [vmem:[%s9432_s30 + $0x312] sm:$0xff] }
 0x32d   : > { %8932 = vrot.lane.b32.xlu0 %v8931_v10, %s9361_s28  ;;  %v8370_v27 = vunpack.i.h.bf16 %v15194_v36  ;;  %v8369_v54 = vunpack.i.l.bf16 %v15194_v36  ;;  %v5056_v12 = vsel %vm3278_vm10, %v5024_v20, %v8709_v41  ;;  %v8719_v31 = vunpack.i.l.bf16 %v12800_v15  ;;  %v15196_v41 = vld [vmem:[#allocation47_spill] sm:$0xff]  ;;  %v12876_v20 = vld [vmem:[%s9432_s30 + $0x340] sm:$0xff] }
 0x32e   : > { %8927 = vrot.lane.b32.xlu1 %v8926_v22, %s9350_s10  ;;  %v12851_v56 = vpop.permute.xlu1 %8737  ;;  %v5057_v63 = vsel %vm3278_vm10, %v5025_v33, %v8710_v7  ;;  %v5088_v28 = vsel %vm3311_vm11, %v5056_v12, %v8714_v6  ;;  %v8720_v57 = vunpack.i.h.bf16 %v12800_v15  ;;  %v8724_v39 = vunpack.i.l.bf16 %v8723_v53 }
 0x32f   : > { %v8733_v23 = vpop.permute.xlu0 %8732  ;;  %v8449_v40 = vunpack.i.l.bf16 %v15195_v2  ;;  %v5089_v26 = vsel %vm3311_vm11, %v5057_v63, %v8715_v61  ;;  %v8725_v29 = vunpack.i.h.bf16 %v8723_v53  ;;  %v8951_v52 = vpack.i.bf16 %v6750_v32, %v6652_v34  ;;  %v6621_v53 = vld [vmem:[%s9432_s30 + $0x330] sm:$0xff] }
 0x330   : > { %v4898_v62 = vsel %vm3113_vm5, %v9271_v50, %v8289_v60  ;;  %v8450_v22 = vunpack.i.h.bf16 %v15195_v2  ;;  %v8529_v15 = vunpack.i.l.bf16 %v15196_v41  ;;  %v8946_v11 = vpack.i.bf16 %v6718_v59, %v12810_v19  ;;  %v9272_v34 = vld [vmem:[%s9432_s30 + $0x191] sm:$0xff] }
 0x331   : > { %8942 = vrot.lane.b32.xlu0 %v8941_v0, %s9352_s12  ;;  %v4899_v7 = vsel %vm3113_vm5, %v9272_v34, %v8290_v42  ;;  %v4930_v6 = vsel %vm3146_vm6, %v4898_v62, %v8369_v54  ;;  %v8530_v33 = vunpack.i.h.bf16 %v15196_v41  ;;  %v5120_v61 = vsel %vm3344_vm12, %v5088_v28, %v8719_v31  ;;  %v6653_v60 = vld [vmem:[%s9432_s30 + $0x331] sm:$0xff] }
 0x332   : > { %8937 = vrot.lane.b32.xlu1 %v8936_v35, %s9351_s11  ;;  %v12871_v10 = vpop.permute.xlu1 %8747  ;;  %v12886_v35 = vld [vmem:[%s9432_s30 + $0x341] sm:$0xff]  ;;  %v4931_v32 = vsel %vm3146_vm6, %v4899_v7, %v8370_v27  ;;  %v5121_v19 = vsel %vm3344_vm12, %v5089_v26, %v8720_v57  ;;  %v5152_v36 = vsel %vm3377_vm13, %v5120_v61, %v8724_v39  ;;  %v8735_v12 = vunpack.i.h.bf16 %v8733_v23  ;;  %v15199_v34 = vld [vmem:[#allocation121_spill] sm:$0xff] }
 0x333   : > { %v8743_v0 = vpop.permute.xlu0 %8742  ;;  %v4962_v42 = vsel %vm3179_vm7, %v4930_v6, %v8449_v40  ;;  %v5153_v54 = vsel %vm3377_vm13, %v5121_v19, %v8725_v29  ;;  %v8734_v59 = vunpack.i.l.bf16 %v8733_v23  ;;  %v8961_v31 = vpack.i.bf16 %v12876_v20, %v6621_v53  ;;  %v15200_v61 = vld [vmem:[#allocation130_spill] sm:$0xff] }
 0x334   : > { %v4963_v63 = vsel %vm3179_vm7, %v4931_v32, %v8450_v22  ;;  %v4994_v28 = vsel %vm3212_vm8, %v4962_v42, %v8529_v15  ;;  %v8956_v57 = vpack.i.bf16 %v6782_v49, %v12831_v16  ;;  %v8971_v39 = vpack.i.bf16 %v12886_v35, %v6653_v60  ;;  %v12915_v22 = vld [vmem:[%s9432_s30 + $0x350] sm:$0xff] }
 0x335   : > { %8952 = vrot.lane.b32.xlu0 %v8951_v52, %s9354_s14  ;;  %v4995_v2 = vsel %vm3212_vm8, %v4963_v63, %v8530_v33  ;;  %v5184_v23 = vsel %vm3410_vm14, %v5152_v36, %v8729_v4  ;;  %v5185_v52 = vsel %vm3410_vm14, %v5153_v54, %v8730_v45  ;;  %v8740_v16 = vunpack.i.h.bf16 %v12851_v56 }
 0x336   : > { %8947 = vrot.lane.b32.xlu1 %v8946_v11, %s9353_s13  ;;  %v12898_v27 = vpop.permute.xlu1 %8757  ;;  %v5027_v50 = vsel %vm3245_vm9, %v4995_v2, %v8735_v12  ;;  %v8739_v62 = vunpack.i.l.bf16 %v12851_v56  ;;  %v5026_v4 = vsel %vm3245_vm9, %v4994_v28, %v8734_v59  ;;  %v8745_v41 = vunpack.i.h.bf16 %v8743_v0 }
 0x337   : > { %15197 = vst [vmem:[#allocation25_spill] sm:$0xff] %v12898_v27  ;;  %v8753_v40 = vpop.permute.xlu0 %8752  ;;  %v8760_v26 = vunpack.i.h.bf16 %v12898_v27  ;;  %v8759_v29 = vunpack.i.l.bf16 %v12898_v27  ;;  %v8744_v15 = vunpack.i.l.bf16 %v8743_v0  ;;  %v12923_v45 = vsel %vm3344_vm12, %v12507_v17, %v7644_v25 }
 0x338   : > { %v12929_v56 = vsel %vm3344_vm12, %v12510_v8, %v7645_v44  ;;  %v7654_v7 = vunpack.i.l.bf16 %v15199_v34  ;;  %v7709_v0 = vunpack.i.l.bf16 %v15200_v61  ;;  %v8966_v25 = vpack.i.bf16 %v5185_v52, %v5184_v23  ;;  %v6685_v8 = vld [vmem:[%s9432_s30 + $0x332] sm:$0xff]  ;;  %v6686_v44 = vld [vmem:[%s9432_s30 + $0x342] sm:$0xff] }
 0x339   : > { %8962 = vrot.lane.b32.xlu0 %v8961_v31, %s9350_s10  ;;  %v8981_v13 = vpack.i.bf16 %v12915_v22, %v12876_v20  ;;  %v5058_v49 = vsel %vm3278_vm10, %v5026_v4, %v8739_v62  ;;  %v5059_v60 = vsel %vm3278_vm10, %v5027_v50, %v8740_v16  ;;  %v8750_v32 = vunpack.i.h.bf16 %v12871_v10  ;;  %v15202_v31 = vld [vmem:[#allocation211_spill] sm:$0xff]  ;;  %v15204_v16 = vld [vmem:[#allocation210_spill] sm:$0xff] }
 0x33a   : > { %8957 = vrot.lane.b32.xlu1 %v8956_v57, %s9355_s15  ;;  %v12934_v6 = vpop.permute.xlu1 %8767  ;;  %v8749_v19 = vunpack.i.l.bf16 %v12871_v10  ;;  %v5090_v36 = vsel %vm3311_vm11, %v5058_v49, %v8744_v15  ;;  %v5091_v12 = vsel %vm3311_vm11, %v5059_v60, %v8745_v41  ;;  %v8755_v42 = vunpack.i.h.bf16 %v8753_v40  ;;  %v12961_v57 = vld [vmem:[%s9432_s30 + $0x352] sm:$0xff]  ;;  %v15203_v23 = vld [vmem:[#allocation131_spill] sm:$0xff] }
 0x33b   : > { %v12938_v17 = vpop.permute.xlu0 %8762  ;;  %v8754_v54 = vunpack.i.l.bf16 %v8753_v40  ;;  %v12954_v59 = vsel %vm3344_vm12, %v12521_v38, %v7654_v7  ;;  %v8294_v63 = vunpack.i.l.bf16 %v15202_v31  ;;  %v8976_v28 = vpack.i.bf16 %v6686_v44, %v6685_v8  ;;  %v12969_v38 = vld [vmem:[%s9432_s30 + $0x351] sm:$0xff]  ;;  %v15205_v7 = vld [vmem:[#allocation222_spill] sm:$0xff] }
 0x33c   : > { %15201 = vst [vmem:[#allocation50_spill] sm:$0xff] %v12954_v59  ;;  %v7710_v2 = vunpack.i.h.bf16 %v15200_v61  ;;  %v7704_v40 = vunpack.i.l.bf16 %v15203_v23  ;;  %v12973_v50 = vsel %vm3377_vm13, %v12595_v37, %v7709_v0  ;;  %v8300_v62 = vunpack.i.h.bf16 %v15204_v16  ;;  %v9273_v0 = vld [vmem:[%s9432_s30 + $0x1a1] sm:$0xff]  ;;  %v15246_v59 = vld [vmem:[#allocation212_spill] sm:$0xff] }
 0x33d   : > { %8972 = vrot.lane.b32.xlu0 %v8971_v39, %s9351_s11  ;;  %v7705_v39 = vunpack.i.h.bf16 %v15203_v23  ;;  %v8295_v4 = vunpack.i.h.bf16 %v15202_v31  ;;  %v5122_v41 = vsel %vm3344_vm12, %v5090_v36, %v8749_v19  ;;  %v5123_v15 = vsel %vm3344_vm12, %v5091_v12, %v8750_v32  ;;  %v15206_v19 = vld [vmem:[#allocation30_spill] sm:$0xff] }
 0x33e   : > { %8967 = vrot.lane.b32.xlu1 %v8966_v25, %s9361_s28  ;;  %v12958_v10 = vpop.permute.xlu1 %8777  ;;  %v8374_v25 = vunpack.i.l.bf16 %v15205_v7  ;;  %v5154_v8 = vsel %vm3377_vm13, %v5122_v41, %v8754_v54  ;;  %v5155_v49 = vsel %vm3377_vm13, %v5123_v15, %v8755_v42  ;;  %v8991_v37 = vpack.i.bf16 %v12961_v57, %v6686_v44  ;;  %v12998_v41 = vld [vmem:[%s9432_s30 + $0x360] sm:$0xff] }
 0x33f   : > { %v12966_v52 = vpop.permute.xlu0 %8772  ;;  %v4900_v60 = vsel %vm3113_vm5, %v9273_v0, %v8294_v63  ;;  %v8375_v31 = vunpack.i.h.bf16 %v15205_v7  ;;  %v8454_v36 = vunpack.i.l.bf16 %v15206_v19  ;;  %v8986_v12 = vpack.i.bf16 %v12969_v38, %v12886_v35 }
 0x340   : > { %v8455_v42 = vunpack.i.h.bf16 %v15206_v19  ;;  %v5187_v35 = vsel %vm3410_vm14, %v5155_v49, %v8760_v26  ;;  %v8764_v7 = vunpack.i.l.bf16 %v12938_v17  ;;  %v9274_v19 = vld [vmem:[%s9432_s30 + $0x1b1] sm:$0xff]  ;;  %v4932_v33 = vsel %vm3146_vm6, %v4900_v60, %v8374_v25 }
 0x341   : > { %8982 = vrot.lane.b32.xlu0 %v8981_v13, %s9353_s13  ;;  %v15208_v13 = vld [vmem:[#allocation3_spill] sm:$0xff]  ;;  %v4901_v53 = vsel %vm3113_vm5, %v9274_v19, %v8295_v4  ;;  %v4964_v26 = vsel %vm3179_vm7, %v4932_v33, %v8454_v36  ;;  %v8996_v20 = vpack.i.bf16 %v12998_v41, %v12915_v22  ;;  %v8774_v22 = vunpack.i.l.bf16 %v12966_v52  ;;  %v15209_v36 = vld [vmem:[#allocation221_spill] sm:$0xff] }
 0x342   : > { %8977 = vrot.lane.b32.xlu1 %v8976_v28, %s9352_s12  ;;  %v12989_v32 = vpop.permute.xlu1 %8787  ;;  %v8534_v54 = vunpack.i.l.bf16 %v15208_v13  ;;  %v8535_v15 = vunpack.i.h.bf16 %v15208_v13  ;;  %v5186_v28 = vsel %vm3410_vm14, %v5154_v8, %v8759_v29  ;;  %v8765_v13 = vunpack.i.h.bf16 %v12938_v17  ;;  %v13024_v4 = vld [vmem:[%s9432_s30 + $0x362] sm:$0xff] }
 0x343   : > { %15207 = vst [vmem:[#allocation51_spill] sm:$0xff] %v12989_v32  ;;  %v8790_v44 = vunpack.i.h.bf16 %v12989_v32  ;;  %v8789_v63 = vunpack.i.l.bf16 %v12989_v32  ;;  %v13008_v0 = vpop.permute.xlu0 %8782  ;;  %v8299_v29 = vunpack.i.l.bf16 %v15204_v16  ;;  %v4933_v8 = vsel %vm3146_vm6, %v4901_v53, %v8375_v31  ;;  %v6656_v53 = vld [vmem:[%s9432_s30 + $0x361] sm:$0xff] }
 0x344   : > { %v4965_v17 = vsel %vm3179_vm7, %v4933_v8, %v8455_v42  ;;  %v4996_v25 = vsel %vm3212_vm8, %v4964_v26, %v8534_v54  ;;  %v8769_v16 = vunpack.i.l.bf16 %v12934_v6  ;;  %v8770_v31 = vunpack.i.h.bf16 %v12934_v6  ;;  %v13047_v8 = vld [vmem:[%s9432_s30 + $0x371] sm:$0xff] }
 0x345   : > { %8992 = vrot.lane.b32.xlu0 %v8991_v37, %s9355_s15  ;;  %v9001_v37 = vpack.i.bf16 %v5187_v35, %v5186_v28  ;;  %v4997_v33 = vsel %vm3212_vm8, %v4965_v17, %v8535_v15  ;;  %v5028_v60 = vsel %vm3245_vm9, %v4996_v25, %v8764_v7  ;;  %v8775_v54 = vunpack.i.h.bf16 %v12966_v52  ;;  %v9275_v15 = vld [vmem:[%s9432_s30 + $0x1d1] sm:$0xff] }
 0x346   : > { %8987 = vrot.lane.b32.xlu1 %v8986_v12, %s9354_s14  ;;  %v13019_v49 = vpop.permute.xlu1 %8797  ;;  %v8379_v12 = vunpack.i.l.bf16 %v15209_v36  ;;  %v5029_v42 = vsel %vm3245_vm9, %v4997_v33, %v8765_v13  ;;  %v9011_v28 = vpack.i.bf16 %v13024_v4, %v12961_v57  ;;  %v4903_v35 = vsel %vm3113_vm5, %v9275_v15, %v8300_v62  ;;  %v6722_v17 = vld [vmem:[%s9432_s30 + $0x370] sm:$0xff]  ;;  %v15210_v33 = vld [vmem:[#allocation29_spill] sm:$0xff] }
 0x347   : > { %v8793_v7 = vpop.permute.xlu0 %8792  ;;  %v9006_v19 = vpack.i.bf16 %v6656_v53, %v12969_v38  ;;  %v13053_v52 = vsel %vm3377_vm13, %v12619_v18, %v7704_v40  ;;  %v13059_v57 = vsel %vm3377_vm13, %v12605_v47, %v7710_v2  ;;  %v8380_v38 = vunpack.i.h.bf16 %v15209_v36 }
 0x348   : > { %v5060_v13 = vsel %vm3278_vm10, %v5028_v60, %v8769_v16  ;;  %v8779_v26 = vunpack.i.l.bf16 %v12958_v10  ;;  %v5061_v18 = vsel %vm3278_vm10, %v5029_v42, %v8770_v31  ;;  %v8780_v61 = vunpack.i.h.bf16 %v12958_v10  ;;  %v13077_v16 = vld [vmem:[%s9432_s30 + $0x380] sm:$0xff] }
 0x349   : > { %9002 = vrot.lane.b32.xlu0 %v9001_v37, %s9361_s28  ;;  %v5092_v40 = vsel %vm3311_vm11, %v5060_v13, %v8774_v22  ;;  %v8784_v47 = vunpack.i.l.bf16 %v13008_v0  ;;  %v8785_v25 = vunpack.i.h.bf16 %v13008_v0  ;;  %v9021_v37 = vpack.i.bf16 %v13047_v8, %v6656_v53  ;;  %v15211_v31 = vld [vmem:[#allocation2_spill] sm:$0xff] }
 0x34a   : > { %8997 = vrot.lane.b32.xlu1 %v8996_v20, %s9350_s10  ;;  %v13043_v6 = vpop.permute.xlu1 %8807  ;;  %v9276_v20 = vld [vmem:[%s9432_s30 + $0x1c1] sm:$0xff]  ;;  %v8460_v60 = vunpack.i.h.bf16 %v15210_v33  ;;  %v8459_v10 = vunpack.i.l.bf16 %v15210_v33  ;;  %v8540_v22 = vunpack.i.h.bf16 %v15211_v31  ;;  %v8539_v0 = vunpack.i.l.bf16 %v15211_v31  ;;  %v15213_v33 = vld [vmem:[#allocation132_spill] sm:$0xff] }
 0x34b   : > { %v4902_v62 = vsel %vm3113_vm5, %v9276_v20, %v8299_v29  ;;  %v5093_v29 = vsel %vm3311_vm11, %v5061_v18, %v8775_v54  ;;  %v5124_v42 = vsel %vm3344_vm12, %v5092_v40, %v8779_v26  ;;  %v4935_v15 = vsel %vm3146_vm6, %v4903_v35, %v8380_v38 }
 0x34c   : > { %v4934_v2 = vsel %vm3146_vm6, %v4902_v62, %v8379_v12  ;;  %v9016_v12 = vpack.i.bf16 %v6722_v17, %v12998_v41  ;;  %v5125_v20 = vsel %vm3344_vm12, %v5093_v29, %v8780_v61  ;;  %v8803_v62 = vpop.permute.xlu0 %8802  ;;  %v9031_v13 = vpack.i.bf16 %v13077_v16, %v6722_v17  ;;  %v13098_v41 = vld [vmem:[%s9432_s30 + $0x381] sm:$0xff] }
 0x34d   : > { %9012 = vrot.lane.b32.xlu0 %v9011_v28, %s9352_s12  ;;  %v13091_v28 = vld [vmem:[%s9432_s30 + $0x372] sm:$0xff]  ;;  %v5157_v18 = vsel %vm3377_vm13, %v5125_v20, %v8785_v25  ;;  %v8795_v26 = vunpack.i.h.bf16 %v8793_v7  ;;  %v8794_v40 = vunpack.i.l.bf16 %v8793_v7  ;;  %v7719_v31 = vunpack.i.l.bf16 %v15213_v33  ;;  %v15215_v20 = vld [vmem:[#allocation146_spill] sm:$0xff] }
 0x34e   : > { %9007 = vrot.lane.b32.xlu1 %v9006_v19, %s9351_s11  ;;  %v13083_v36 = vpop.permute.xlu1 %8817  ;;  %v5156_v19 = vsel %vm3377_vm13, %v5124_v42, %v8784_v47  ;;  %v4966_v35 = vsel %vm3179_vm7, %v4934_v2, %v8459_v10  ;;  %v4967_v38 = vsel %vm3179_vm7, %v4935_v15, %v8460_v60  ;;  %v9026_v17 = vpack.i.bf16 %v13091_v28, %v13024_v4  ;;  %v13122_v60 = vld [vmem:[%s9432_s30 + $0x390] sm:$0xff] }
 0x34f   : > { %15212 = vst [vmem:[#allocation52_spill] sm:$0xff] %v13083_v36  ;;  %v8820_v53 = vunpack.i.h.bf16 %v13083_v36  ;;  %v8819_v54 = vunpack.i.l.bf16 %v13083_v36  ;;  %v7720_v61 = vunpack.i.h.bf16 %v15213_v33  ;;  %v4998_v47 = vsel %vm3212_vm8, %v4966_v35, %v8539_v0  ;;  %v15216_v35 = vld [vmem:[#allocation134_spill] sm:$0xff] }
 0x350   : > { %v4999_v29 = vsel %vm3212_vm8, %v4967_v38, %v8540_v22  ;;  %v9041_v7 = vpack.i.bf16 %v13098_v41, %v13047_v8  ;;  %v5188_v2 = vsel %vm3410_vm14, %v5156_v19, %v8789_v63  ;;  %v5189_v25 = vsel %vm3410_vm14, %v5157_v18, %v8790_v44  ;;  %v15214_v63 = vld [vmem:[#allocation133_spill] sm:$0xff]  ;;  %v8813_v44 = vpop.permute.xlu0 %8812  ;;  %v6690_v18 = vld [vmem:[%s9432_s30 + $0x382] sm:$0xff] }
 0x351   : > { %9022 = vrot.lane.b32.xlu0 %v9021_v37, %s9354_s14  ;;  %v8800_v37 = vunpack.i.h.bf16 %v13019_v49  ;;  %v8799_v4 = vunpack.i.l.bf16 %v13019_v49  ;;  %v5031_v10 = vsel %vm3245_vm9, %v4999_v29, %v8795_v26  ;;  %v5030_v22 = vsel %vm3245_vm9, %v4998_v47, %v8794_v40  ;;  %v15217_v47 = vld [vmem:[#allocation135_spill] sm:$0xff] }
 0x352   : > { %9017 = vrot.lane.b32.xlu1 %v9016_v12, %s9353_s13  ;;  %v8805_v8 = vunpack.i.h.bf16 %v8803_v62  ;;  %v8804_v12 = vunpack.i.l.bf16 %v8803_v62  ;;  %v7715_v0 = vunpack.i.h.bf16 %v15214_v63  ;;  %v7714_v42 = vunpack.i.l.bf16 %v15214_v63 }
 0x353   : > { %v3379_v49 = vsel %vm3377_vm13, %v12726_v58, %v7705_v39  ;;  %v3384_v15 = vsel %vm3377_vm13, %v12759_v51, %v7719_v31  ;;  %v7789_v19 = vunpack.i.l.bf16 %v15215_v20  ;;  %v9036_v62 = vpack.i.bf16 %v5189_v25, %v5188_v2  ;;  %v15218_v25 = vld [vmem:[#allocation147_spill] sm:$0xff] }
 0x354   : > { %v3385_v26 = vsel %vm3377_vm13, %v12763_v3, %v7720_v61  ;;  %v5062_v40 = vsel %vm3278_vm10, %v5030_v22, %v8799_v4  ;;  %v5063_v23 = vsel %vm3278_vm10, %v5031_v10, %v8800_v37  ;;  %v8810_v58 = vunpack.i.h.bf16 %v13043_v6  ;;  %v13154_v61 = vld [vmem:[%s9432_s30 + $0x392] sm:$0xff] }
 0x355   : > { %9032 = vrot.lane.b32.xlu0 %v9031_v13, %s9350_s10  ;;  %v9051_v13 = vpack.i.bf16 %v13122_v60, %v13077_v16  ;;  %v8809_v39 = vunpack.i.l.bf16 %v13043_v6  ;;  %v5094_v51 = vsel %vm3311_vm11, %v5062_v40, %v8804_v12  ;;  %v5095_v33 = vsel %vm3311_vm11, %v5063_v23, %v8805_v8  ;;  %v13163_v4 = vld [vmem:[%s9432_s30 + $0x391] sm:$0xff] }
 0x356   : > { %9027 = vrot.lane.b32.xlu1 %v9026_v17, %s9355_s15  ;;  %v8815_v31 = vunpack.i.h.bf16 %v8813_v44  ;;  %v8814_v16 = vunpack.i.l.bf16 %v8813_v44  ;;  %v7729_v38 = vunpack.i.l.bf16 %v15216_v35  ;;  %v7790_v3 = vunpack.i.h.bf16 %v15215_v20  ;;  %v15219_v10 = vld [vmem:[#allocation148_spill] sm:$0xff]  ;;  %v13177_v44 = vpop.permute.xlu0 %8822  ;;  %v15220_v40 = vld [vmem:[#allocation149_spill] sm:$0xff] }
 0x357   : > { %v9046_v17 = vpack.i.bf16 %v6690_v18, %v13091_v28  ;;  %v3382_v6 = vsel %vm3377_vm13, %v12775_v9, %v7714_v42  ;;  %v7725_v29 = vunpack.i.h.bf16 %v15217_v47  ;;  %v7724_v2 = vunpack.i.l.bf16 %v15217_v47 }
 0x358   : > { %v7785_v37 = vunpack.i.h.bf16 %v15218_v25  ;;  %v14744_v22 = vunpack.i.h.bf16 %v15219_v10  ;;  %v5126_v28 = vsel %vm3344_vm12, %v5094_v51, %v8809_v39  ;;  %v5127_v8 = vsel %vm3344_vm12, %v5095_v33, %v8810_v58 }
 0x359   : > { %9042 = vrot.lane.b32.xlu0 %v9041_v7, %s9351_s11  ;;  %v7784_v7 = vunpack.i.l.bf16 %v15218_v25  ;;  %v13172_v9 = vsel %vm3410_vm14, %v12973_v50, %v7789_v19  ;;  %v7799_v12 = vunpack.i.l.bf16 %v15219_v10  ;;  %v5158_v63 = vsel %vm3377_vm13, %v5126_v28, %v8814_v16  ;;  %v13241_v16 = vld [vmem:[%s9432_s30 + $0x3a2] sm:$0xff] }
 0x35a   : > { %9037 = vrot.lane.b32.xlu1 %v9036_v62, %s9361_s28  ;;  %v5159_v42 = vsel %vm3377_vm13, %v5127_v8, %v8815_v31  ;;  %v9061_v62 = vpack.i.bf16 %v13154_v61, %v6690_v18  ;;  %v14743_v23 = vunpack.i.h.bf16 %v15220_v40  ;;  %v7794_v58 = vunpack.i.l.bf16 %v15220_v40  ;;  %v13254_v28 = vpop.permute.xlu0 %8832  ;;  %v15223_v8 = vld [vmem:[#allocation163_spill] sm:$0xff] }
 0x35b   : > { %v9056_v50 = vpack.i.bf16 %v13163_v4, %v13098_v41  ;;  %v13190_v39 = vsel %vm3410_vm14, %v13059_v57, %v7790_v3  ;;  %v3383_v18 = vsel %vm3377_vm13, %v12779_v14, %v7715_v0  ;;  %v3386_v33 = vsel %vm3377_vm13, %v12923_v45, %v7724_v2 }
 0x35c   : > { %v13202_v41 = vsel %vm3377_vm13, %v12821_v30, %v7729_v38  ;;  %v5190_v57 = vsel %vm3410_vm14, %v5158_v63, %v8819_v54  ;;  %v5191_v31 = vsel %vm3410_vm14, %v5159_v42, %v8820_v53  ;;  %v13214_v14 = vsel %vm3410_vm14, %v13053_v52, %v7784_v7  ;;  %v15221_v52 = vld [vmem:[#allocation151_spill] sm:$0xff]  ;;  %v15226_v53 = vld [vmem:[#allocation166_spill] sm:$0xff] }
 0x35d   : > { %9052 = vrot.lane.b32.xlu0 %v9051_v13, %s9353_s13  ;;  %v13194_v13 = vld [vmem:[%s9432_s30 + $0x3a0] sm:$0xff]  ;;  %v3387_v45 = vsel %vm3377_vm13, %v12929_v56, %v7725_v29  ;;  %v13222_v30 = vsel %vm3410_vm14, %v3379_v49, %v7785_v37  ;;  %v13229_v54 = vsel %vm3410_vm14, %v3384_v15, %v7799_v12  ;;  %v13234_v56 = vsel %vm3410_vm14, %v3385_v26, %v14744_v22 }
 0x35e   : > { %9047 = vrot.lane.b32.xlu1 %v9046_v17, %s9352_s12  ;;  %v7805_v0 = vunpack.i.h.bf16 %v15221_v52  ;;  %v9066_v49 = vpack.i.bf16 %v13194_v13, %v13122_v60  ;;  %v13244_v38 = vsel %vm3410_vm14, %v3382_v6, %v7794_v58  ;;  %v13249_v15 = vsel %vm3410_vm14, %v3383_v18, %v14743_v23  ;;  %v15222_v17 = vld [vmem:[#allocation162_spill] sm:$0xff]  ;;  %v6758_v23 = vld [vmem:[%s9432_s30 + $0x3b1] sm:$0xff] }
 0x35f   : > { %v7804_v26 = vunpack.i.l.bf16 %v15221_v52  ;;  %v7870_v47 = vunpack.i.h.bf16 %v15222_v17  ;;  %v7869_v29 = vunpack.i.l.bf16 %v15222_v17  ;;  %v9071_v2 = vpack.i.bf16 %v5191_v31, %v5190_v57  ;;  %v6660_v60 = vld [vmem:[%s9432_s30 + $0x3a1] sm:$0xff]  ;;  %v15225_v17 = vld [vmem:[#allocation165_spill] sm:$0xff]  ;;  %v13283_v31 = vpop.permute.xlu0 %8842 }
 0x360   : > { %v7865_v63 = vunpack.i.h.bf16 %v15223_v8  ;;  %v7864_v6 = vunpack.i.l.bf16 %v15223_v8  ;;  %v9081_v57 = vpack.i.bf16 %v13241_v16, %v13154_v61  ;;  %v7875_v8 = vunpack.i.h.bf16 %v15225_v17 }
 0x361   : > { %9062 = vrot.lane.b32.xlu0 %v9061_v62, %s9355_s15  ;;  %v7874_v51 = vunpack.i.l.bf16 %v15225_v17  ;;  %v7884_v42 = vunpack.i.l.bf16 %v15226_v53  ;;  %v9076_v62 = vpack.i.bf16 %v6660_v60, %v13163_v4  ;;  %v3447_v61 = vsel %vm3443_vm0, %v7790_v3, %v7870_v47  ;;  %v15227_v3 = vld [vmem:[#allocation173_spill] sm:$0xff] }
 0x362   : > { %9057 = vrot.lane.b32.xlu1 %v9056_v50, %s9354_s14  ;;  %v15224_v50 = vld [vmem:[#allocation164_spill] sm:$0xff]  ;;  %v13286_v17 = vsel %vm3410_vm14, %v3386_v33, %v7804_v26  ;;  %v13289_v22 = vsel %vm3410_vm14, %v3387_v45, %v7805_v0  ;;  %v3444_v4 = vsel %vm3443_vm0, %v7784_v7, %v7864_v6  ;;  %v7885_v20 = vunpack.i.h.bf16 %v15226_v53 }
 0x363   : > { %v7880_v18 = vunpack.i.h.bf16 %v15224_v50  ;;  %v7879_v52 = vunpack.i.l.bf16 %v15224_v50  ;;  %v6726_v50 = vld [vmem:[%s9432_s30 + $0x3b0] sm:$0xff]  ;;  %v15228_v45 = vunpack.i.h.bf16 %v15219_v10  ;;  %v9091_v25 = vpack.i.bf16 %v6758_v23, %v6660_v60 }
 0x364   : > { %v15229_v7 = vunpack.i.h.bf16 %v15220_v40  ;;  %v9086_v10 = vpack.i.bf16 %v6726_v50, %v13194_v13  ;;  %v13322_v40 = vsel %vm3443_vm0, %v7805_v0, %v7885_v20 }
 0x365   : > { %9072 = vrot.lane.b32.xlu0 %v9071_v2, %s9361_s28  ;;  %v3446_v2 = vsel %vm3443_vm0, %v7789_v19, %v7869_v29  ;;  %v3445_v19 = vsel %vm3443_vm0, %v7785_v37, %v7865_v63  ;;  %v3450_v33 = vsel %vm3443_vm0, %v7799_v12, %v7879_v52  ;;  %v3451_v47 = vsel %vm3443_vm0, %v15228_v45, %v7880_v18  ;;  %v15230_v12 = vld [vmem:[#allocation174_spill] sm:$0xff] }
 0x366   : > { %9067 = vrot.lane.b32.xlu1 %v9066_v49, %s9350_s10  ;;  %v7949_v49 = vunpack.i.l.bf16 %v15227_v3  ;;  %v7950_v29 = vunpack.i.h.bf16 %v15227_v3  ;;  %v3448_v37 = vsel %vm3443_vm0, %v7794_v58, %v7874_v51  ;;  %v3449_v53 = vsel %vm3443_vm0, %v15229_v7, %v7875_v8  ;;  %v15231_v52 = vld [vmem:[#allocation178_spill] sm:$0xff]  ;;  %v6790_v58 = vld [vmem:[%s9432_s30 + $0x3b2] sm:$0xff]  ;;  %v13332_v7 = vpop.permute.xlu0 %8852 }
 0x367   : > { %v13312_v63 = vsel %vm3443_vm0, %v7804_v26, %v7884_v42  ;;  %v7945_v6 = vunpack.i.h.bf16 %v15230_v12  ;;  %v7944_v18 = vunpack.i.l.bf16 %v15230_v12  ;;  %v7959_v23 = vunpack.i.l.bf16 %v15231_v52  ;;  %v15232_v26 = vld [vmem:[#allocation179_spill] sm:$0xff]  ;;  %v15234_v3 = vld [vmem:[#allocation182_spill] sm:$0xff] }
 0x368   : > { %v3479_v51 = vsel %vm3476_vm1, %v3446_v2, %v7949_v49  ;;  %v7955_v60 = vunpack.i.h.bf16 %v15232_v26  ;;  %v7954_v42 = vunpack.i.l.bf16 %v15232_v26  ;;  %v3480_v13 = vsel %vm3476_vm1, %v3447_v61, %v7950_v29  ;;  %v15243_v26 = vld [vmem:[#allocation224_spill] sm:$0xff] }
 0x369   : > { %9082 = vrot.lane.b32.xlu0 %v9081_v57, %s9352_s12  ;;  %v7960_v57 = vunpack.i.h.bf16 %v15231_v52  ;;  %v8025_v45 = vunpack.i.h.bf16 %v15234_v3  ;;  %v8024_v0 = vunpack.i.l.bf16 %v15234_v3  ;;  %v9096_v2 = vpack.i.bf16 %v6790_v58, %v13241_v16  ;;  %v15235_v16 = vld [vmem:[#allocation180_spill] sm:$0xff] }
 0x36a   : > { %9077 = vrot.lane.b32.xlu1 %v9076_v62, %s9351_s11  ;;  %v15233_v62 = vld [vmem:[#allocation181_spill] sm:$0xff]  ;;  %v3477_v49 = vsel %vm3476_vm1, %v3444_v4, %v7944_v18  ;;  %v3478_v29 = vsel %vm3476_vm1, %v3445_v19, %v7945_v6  ;;  %v13342_v12 = vsel %vm3476_vm1, %v3450_v33, %v7959_v23  ;;  %v13348_v52 = vsel %vm3476_vm1, %v3448_v37, %v7954_v42  ;;  %v15237_v18 = vld [vmem:[#allocation176_spill] sm:$0xff]  ;;  %v15238_v23 = vld [vmem:[#allocation183_spill] sm:$0xff] }
 0x36b   : > { %v8030_v8 = vunpack.i.h.bf16 %v15233_v62  ;;  %v8029_v50 = vunpack.i.l.bf16 %v15233_v62  ;;  %v15236_v33 = vld [vmem:[#allocation169_spill] sm:$0xff]  ;;  %v8184_v37 = vunpack.i.l.bf16 %v15237_v18  ;;  %v8185_v42 = vunpack.i.h.bf16 %v15237_v18  ;;  %v15244_v61 = vld [vmem:[#allocation32_spill] sm:$0xff] }
 0x36c   : > { %v8105_v6 = vunpack.i.h.bf16 %v15236_v33  ;;  %v8385_v20 = vunpack.i.h.bf16 %v15243_v26  ;;  %v8465_v36 = vunpack.i.h.bf16 %v15244_v61  ;;  %vm5501_vm0 = vcmask 556032  }
 0x36d   : > { %9092 = vrot.lane.b32.xlu0 %v9091_v25, %s9354_s14  ;;  %v13345_v25 = vsel %vm3476_vm1, %v3451_v47, %v7960_v57  ;;  %v13356_v4 = vsel %vm3509_vm2, %v3479_v51, %v8029_v50  ;;  %v13359_v19 = vsel %vm3509_vm2, %v3480_v13, %v8030_v8  ;;  %v8104_v47 = vunpack.i.l.bf16 %v15236_v33  ;;  %v15239_v13 = vld [vmem:[#allocation213_spill] sm:$0xff]  ;;  %v15240_v8 = vld [vmem:[#allocation184_spill] sm:$0xff] }
 0x36e   : > { %9087 = vrot.lane.b32.xlu1 %v9086_v10, %s9353_s13  ;;  %v13351_v10 = vsel %vm3476_vm1, %v3449_v53, %v7955_v60  ;;  %v3510_v53 = vsel %vm3509_vm2, %v3477_v49, %v8024_v0  ;;  %v3511_v57 = vsel %vm3509_vm2, %v3478_v29, %v8025_v45  ;;  %v8040_v60 = vunpack.i.h.bf16 %v15238_v23  ;;  %v15241_v33 = vld [vmem:[#allocation168_spill] sm:$0xff] }
 0x36f   : > { %v8039_v51 = vunpack.i.l.bf16 %v15238_v23  ;;  %v8305_v62 = vunpack.i.h.bf16 %v15239_v13  ;;  %v8110_v58 = vunpack.i.h.bf16 %v15241_v33  ;;  %v8304_v0 = vunpack.i.l.bf16 %v15239_v13  ;;  %v9277_v13 = vld [vmem:[%s9432_s30 + $0x211] sm:$0xff] }
 0x370   : > { %v8109_v45 = vunpack.i.l.bf16 %v15241_v33  ;;  %v3543_v29 = vsel %vm3542_vm3, %v3510_v53, %v8104_v47  ;;  %v3544_v23 = vsel %vm3542_vm3, %v3511_v57, %v8105_v6  ;;  %v8384_v50 = vunpack.i.l.bf16 %v15243_v26  ;;  %v9278_v53 = vld [vmem:[%s9432_s30 + $0x201] sm:$0xff] }
 0x371   : > { %v3576_v3 = vsel %vm3575_vm4, %v3543_v29, %v8184_v37  ;;  %v4905_v33 = vsel %vm3113_vm5, %v9277_v13, %v8305_v62  ;;  %v8464_v47 = vunpack.i.l.bf16 %v15244_v61  ;;  %v3577_v6 = vsel %vm3575_vm4, %v3544_v23, %v8185_v42 }
 0x372   : > { %9097 = vrot.lane.b32.xlu1 %v9096_v2, %s9355_s15  ;;  %v15242_v2 = vld [vmem:[#allocation170_spill] sm:$0xff]  ;;  %v4904_v57 = vsel %vm3113_vm5, %v9278_v53, %v8304_v0  ;;  %v8825_v29 = vunpack.i.h.bf16 %v13177_v44  ;;  %v8824_v62 = vunpack.i.l.bf16 %v13177_v44  ;;  %v4937_v23 = vsel %vm3146_vm6, %v4905_v33, %v8385_v20 }
 0x373   : > { %v8190_v49 = vunpack.i.h.bf16 %v15242_v2  ;;  %v8189_v18 = vunpack.i.l.bf16 %v15242_v2  ;;  %v15245_v2 = vld [vmem:[#allocation11_spill] sm:$0xff]  ;;  %v4936_v42 = vsel %vm3146_vm6, %v4904_v57, %v8384_v50  ;;  %v8835_v0 = vunpack.i.h.bf16 %v13254_v28 }
 0x374   : > { %v8545_v32 = vunpack.i.h.bf16 %v15245_v2  ;;  %v8544_v26 = vunpack.i.l.bf16 %v15245_v2  ;;  %v8834_v53 = vunpack.i.l.bf16 %v13254_v28  ;;  %v4968_v2 = vsel %vm3179_vm7, %v4936_v42, %v8464_v47 }
 0x375   : > { %v4969_v27 = vsel %vm3179_vm7, %v4937_v23, %v8465_v36  ;;  %v8310_v50 = vunpack.i.h.bf16 %v15246_v59 }
 0x376   : > { %9107 = vrot.lane.b32.xlu1 %v13332_v7, %s9361_s28  ;;  %v5000_v20 = vsel %vm3212_vm8, %v4968_v2, %v8544_v26  ;;  %v5001_v33 = vsel %vm3212_vm8, %v4969_v27, %v8545_v32  ;;  %v3545_v27 = vsel %vm3542_vm3, %v13356_v4, %v8109_v45 }
 0x377   : > { %v5032_v47 = vsel %vm3245_vm9, %v5000_v20, %v8824_v62  ;;  %v5033_v36 = vsel %vm3245_vm9, %v5001_v33, %v8825_v29  ;;  %v15247_v29 = vpack.c.bf16 %v13222_v30, %v13214_v14  ;;  %v3516_v62 = vsel %vm3509_vm2, %v13342_v12, %v8039_v51  ;;  %v15248_v30 = vld [vmem:[#allocation223_spill] sm:$0xff] }
 0x378   : > { %v13394_v37 = vpop.permute.xlu1 %8827  ;;  %v3578_v4 = vsel %vm3575_vm4, %v3545_v27, %v8189_v18  ;;  %v8390_v2 = vunpack.i.h.bf16 %v15248_v30  ;;  %v8389_v12 = vunpack.i.l.bf16 %v15248_v30  ;;  %v15249_v51 = vld [vmem:[#allocation31_spill] sm:$0xff] }
 0x379   : > { %v14750_v13 = vunpack.i.h.bf16 %v13394_v37  ;;  %v14749_v61 = vunpack.i.l.bf16 %v13394_v37  ;;  %v8470_v18 = vunpack.i.h.bf16 %v15249_v51 }
 0x37b   : > { %v5433_v44 = vsel %vm5368_vm15, %v3576_v3, %v14749_v61  ;;  %v5434_v11 = vsel %vm5368_vm15, %v3577_v6, %v14750_v13  ;;  %v5064_v3 = vsel %vm3278_vm10, %v5032_v47, %v8834_v53  ;;  %v5065_v61 = vsel %vm3278_vm10, %v5033_v36, %v8835_v0 }
 0x37c   : > { %v8838_v57 = vpop.permute.xlu1 %8837  ;;  %v6875_v28 = vpack.c.bf16 %v5434_v11, %v5433_v44  ;;  %v8845_v6 = vunpack.i.h.bf16 %v13283_v31  ;;  %v8844_v13 = vunpack.i.l.bf16 %v13283_v31  ;;  %v3546_v11 = vsel %vm3542_vm3, %v13359_v19, %v8110_v58  ;;  %v9279_v19 = vld [vmem:[%s9432_s30 + $0x231] sm:$0xff] }
 0x37d   : > { %v8840_v42 = vunpack.i.h.bf16 %v8838_v57  ;;  %v8839_v23 = vunpack.i.l.bf16 %v8838_v57  ;;  %v13434_v31 = vsel %vm3509_vm2, %v13345_v25, %v8040_v60  ;;  %v3579_v58 = vsel %vm3575_vm4, %v3546_v11, %v8190_v49 }
 0x37e   : > { %6876 = vmatprep.subr.bf16.mxu1 %v6875_v28  ;;  %v4907_v45 = vsel %vm3113_vm5, %v9279_v19, %v8310_v50  ;;  %v8469_v49 = vunpack.i.l.bf16 %v15249_v51  ;;  %v15250_v28 = vunpack.i.l.bf16 %v13332_v7  ;;  %v15251_v47 = vunpack.i.h.bf16 %v13332_v7 }
 0x37f   : > { %v5097_v32 = vsel %vm3311_vm11, %v5065_v61, %v8840_v42  ;;  %v5096_v26 = vsel %vm3311_vm11, %v5064_v3, %v8839_v23  ;;  %6878 = vmatpush1.bf16.xpose.msra.mxu1 %v15247_v29  ;;  %v8309_v61 = vunpack.i.l.bf16 %v15246_v59  ;;  %v9280_v42 = vld [vmem:[%s9432_s30 + $0x221] sm:$0xff] }
 0x380   : > { %v8848_v0 = vpop.permute.xlu1 %8847  ;;  %v5128_v25 = vsel %vm3344_vm12, %v5096_v26, %v8844_v13  ;;  %v5129_v60 = vsel %vm3344_vm12, %v5097_v32, %v8845_v6  ;;  %v15252_v3 = vld [vmem:[#allocation7_spill] sm:$0xff] }
 0x381   : > { %v8850_v53 = vunpack.i.h.bf16 %v8848_v0  ;;  %v8849_v14 = vunpack.i.l.bf16 %v8848_v0  ;;  %v4906_v23 = vsel %vm3113_vm5, %v9280_v42, %v8309_v61  ;;  %v8550_v6 = vunpack.i.h.bf16 %v15252_v3 }
 0x382   : > { %v8549_v27 = vunpack.i.l.bf16 %v15252_v3  ;;  %v15253_v0 = vunpack.i.l.bf16 %v15240_v8  ;;  %v4938_v61 = vsel %vm3146_vm6, %v4906_v23, %v8389_v12 }
 0x383   : > { %v5160_v44 = vsel %vm3377_vm13, %v5128_v25, %v8849_v14  ;;  %v5161_v50 = vsel %vm3377_vm13, %v5129_v60, %v8850_v53  ;;  %v13449_v59 = vpop.permute.xlu0 %8862  ;;  %v4939_v53 = vsel %vm3146_vm6, %v4907_v45, %v8390_v2  ;;  %v15254_v25 = vld [vmem:[#allocation167_spill] sm:$0xff] }
 0x384   : > { %v8865_v20 = vunpack.i.h.bf16 %v13449_v59  ;;  %v8864_v33 = vunpack.i.l.bf16 %v13449_v59  ;;  %v8858_v57 = vpop.permute.xlu1 %8857  ;;  %v5192_v13 = vsel %vm3410_vm14, %v5160_v44, %v15250_v28  ;;  %v5193_v36 = vsel %vm3410_vm14, %v5161_v50, %v15251_v47 }
 0x385   : > { %v9101_v11 = vpack.i.bf16 %v5193_v36, %v5192_v13  ;;  %v8860_v32 = vunpack.i.h.bf16 %v8858_v57  ;;  %v8859_v26 = vunpack.i.l.bf16 %v8858_v57  ;;  %v3514_v19 = vsel %vm3509_vm2, %v13348_v52, %v15253_v0 }
 0x386   : > { %v5435_v29 = vsel %vm5368_vm15, %v3578_v4, %v8864_v33  ;;  %v5436_v7 = vsel %vm5368_vm15, %v3579_v58, %v8865_v20  ;;  %v8119_v60 = vunpack.i.l.bf16 %v15254_v25  ;;  %v15255_v4 = vld [vmem:[#allocation171_spill] sm:$0xff]  ;;  %v4970_v44 = vsel %vm3179_vm7, %v4938_v61, %v8469_v49 }
 0x387   : > { %v8873_v14 = vpop.permute.xlu0 %8872  ;;  %9102 = vrot.lane.b32.xlu0 %v9101_v11, %s9361_s28  ;;  %v6879_v30 = vpack.c.bf16 %v5436_v7, %v5435_v29  ;;  %v8114_v51 = vunpack.i.l.bf16 %v15255_v4  ;;  %v4971_v58 = vsel %vm3179_vm7, %v4939_v53, %v8470_v18  ;;  %v5002_v57 = vsel %vm3212_vm8, %v4970_v44, %v8549_v27 }
 0x388   : > { %v8868_v50 = vpop.permute.xlu1 %8867  ;;  %v5003_v52 = vsel %vm3212_vm8, %v4971_v58, %v8550_v6  ;;  %v5034_v2 = vsel %vm3245_vm9, %v5002_v57, %v8859_v26  ;;  %v8875_v13 = vunpack.i.h.bf16 %v8873_v14  ;;  %v8874_v47 = vunpack.i.l.bf16 %v8873_v14  ;;  %v15259_v26 = vld [vmem:[#allocation215_spill] sm:$0xff] }
 0x389   : > { %v8870_v12 = vunpack.i.h.bf16 %v8868_v50  ;;  %v8869_v28 = vunpack.i.l.bf16 %v8868_v50  ;;  %6880 = vmatprep.subr.bf16.mxu1 %v6879_v30  ;;  %v5035_v45 = vsel %vm3245_vm9, %v5003_v52, %v8860_v32  ;;  %v15256_v36 = vpack.c.bf16 %v13190_v39, %v13172_v9  ;;  %v15258_v39 = vld [vmem:[#allocation175_spill] sm:$0xff]  ;;  %v15260_v30 = vld [vmem:[#allocation177_spill] sm:$0xff] }
 0x38a   : > { %v15257_v18 = vunpack.i.h.bf16 %v15240_v8  ;;  %v8115_v42 = vunpack.i.h.bf16 %v15255_v4  ;;  %v8120_v27 = vunpack.i.h.bf16 %v15254_v25  ;;  %v13498_v9 = vsel %vm3542_vm3, %v3516_v62, %v8119_v60 }
 0x38b   : > { %6882 = vmatpush1.bf16.xpose.msra.mxu1 %v15256_v36  ;;  %v5066_v23 = vsel %vm3278_vm10, %v5034_v2, %v8869_v28  ;;  %v5067_v3 = vsel %vm3278_vm10, %v5035_v45, %v8870_v12  ;;  %v8883_v6 = vpop.permute.xlu0 %8882  ;;  %9112 = vrot.lane.b32.xlu0 %v12566_v5, %s9361_s28  ;;  %v8195_v8 = vunpack.i.h.bf16 %v15258_v39  ;;  %v8194_v11 = vunpack.i.l.bf16 %v15258_v39  ;;  %v9281_v12 = vld [vmem:[%s9432_s30 + $0x251] sm:$0xff]  ;;  %v15261_v45 = vld [vmem:[#allocation226_spill] sm:$0xff] }
 0x38c   : > { %v3515_v49 = vsel %vm3509_vm2, %v13351_v10, %v15257_v18  ;;  %v8878_v10 = vpop.permute.xlu1 %8877  ;;  %v3547_v32 = vsel %vm3542_vm3, %v3514_v19, %v8114_v51  ;;  %v8315_v29 = vunpack.i.h.bf16 %v15259_v26  ;;  %v8885_v61 = vunpack.i.h.bf16 %v8883_v6  ;;  %v15262_v18 = vld [vmem:[#allocation34_spill] sm:$0xff] }
 0x38d   : > { %v8880_v7 = vunpack.i.h.bf16 %v8878_v10  ;;  %v8879_v0 = vunpack.i.l.bf16 %v8878_v10  ;;  %v8884_v53 = vunpack.i.l.bf16 %v8883_v6  ;;  %v5098_v5 = vsel %vm3311_vm11, %v5066_v23, %v8874_v47 }
 0x38e   : > { %v5099_v14 = vsel %vm3311_vm11, %v5067_v3, %v8875_v13  ;;  %v3548_v62 = vsel %vm3542_vm3, %v3515_v49, %v8115_v42  ;;  %v8200_v60 = vunpack.i.h.bf16 %v15260_v30  ;;  %v8199_v51 = vunpack.i.l.bf16 %v15260_v30 }
 0x38f   : > { %v5130_v4 = vsel %vm3344_vm12, %v5098_v5, %v8879_v0  ;;  %v5131_v44 = vsel %vm3344_vm12, %v5099_v14, %v8880_v7  ;;  %v8893_v19 = vpop.permute.xlu0 %8892  ;;  %v8314_v58 = vunpack.i.l.bf16 %v15259_v26  ;;  %v3580_v57 = vsel %vm3575_vm4, %v3547_v32, %v8194_v11  ;;  %v9282_v11 = vld [vmem:[%s9432_s30 + $0x241] sm:$0xff] }
 0x390   : > { %v8888_v50 = vpop.permute.xlu1 %8887  ;;  %v3581_v52 = vsel %vm3575_vm4, %v3548_v62, %v8195_v8  ;;  %v4909_v28 = vsel %vm3113_vm5, %v9281_v12, %v8315_v29  ;;  %v8395_v2 = vunpack.i.h.bf16 %v15261_v45  ;;  %v8394_v36 = vunpack.i.l.bf16 %v15261_v45  ;;  %v15263_v45 = vld [vmem:[#allocation214_spill] sm:$0xff] }
 0x391   : > { %v8890_v13 = vunpack.i.h.bf16 %v8888_v50  ;;  %v8889_v47 = vunpack.i.l.bf16 %v8888_v50  ;;  %v8475_v49 = vunpack.i.h.bf16 %v15262_v18  ;;  %v5162_v42 = vsel %vm3377_vm13, %v5130_v4, %v8884_v53  ;;  %9122 = vrot.lane.b32.xlu0 %v8888_v50, %s9361_s28 }
 0x392   : > { %v5163_v23 = vsel %vm3377_vm13, %v5131_v44, %v8885_v61  ;;  %v8474_v3 = vunpack.i.l.bf16 %v15262_v18  ;;  %v4908_v10 = vsel %vm3113_vm5, %v9282_v11, %v8314_v58  ;;  %v8555_v32 = vunpack.i.h.bf16 %v12426_v55 }
 0x393   : > { %v5194_v6 = vsel %vm3410_vm14, %v5162_v42, %v8889_v47  ;;  %v5195_v39 = vsel %vm3410_vm14, %v5163_v23, %v8890_v13  ;;  %v8903_v8 = vpop.permute.xlu0 %8902  ;;  %v8554_v26 = vunpack.i.l.bf16 %v12426_v55  ;;  %v8895_v0 = vunpack.i.h.bf16 %v8893_v19 }
 0x394   : > { %v9116_v29 = vpack.i.bf16 %v5195_v39, %v5194_v6  ;;  %v13528_v7 = vpop.permute.xlu1 %8897  ;;  %v8894_v53 = vunpack.i.l.bf16 %v8893_v19  ;;  %v4940_v14 = vsel %vm3146_vm6, %v4908_v10, %v8394_v36  ;;  %v4941_v62 = vsel %vm3146_vm6, %v4909_v28, %v8395_v2 }
 0x395   : > { %v8900_v61 = vunpack.i.h.bf16 %v13528_v7  ;;  %v8899_v5 = vunpack.i.l.bf16 %v13528_v7  ;;  %v8905_v4 = vunpack.i.h.bf16 %v8903_v8  ;;  %v8904_v44 = vunpack.i.l.bf16 %v8903_v8 }
 0x396   : > { %9117 = vrot.lane.b32.xlu1 %v9116_v29, %s9361_s28  ;;  %v4972_v55 = vsel %vm3179_vm7, %v4940_v14, %v8474_v3  ;;  %v4973_v58 = vsel %vm3179_vm7, %v4941_v62, %v8475_v49  ;;  %v8320_v13 = vunpack.i.h.bf16 %v15263_v45  ;;  %v3550_v39 = vsel %vm3542_vm3, %v13434_v31, %v8120_v27  ;;  %v9283_v27 = vld [vmem:[%s9432_s30 + $0x271] sm:$0xff] }
 0x397   : > { %v8913_v12 = vpop.permute.xlu0 %8912  ;;  %v5437_v19 = vsel %vm5368_vm15, %v3580_v57, %v8899_v5  ;;  %v5438_v50 = vsel %vm5368_vm15, %v3581_v52, %v8900_v61  ;;  %v5004_v28 = vsel %vm3212_vm8, %v4972_v55, %v8554_v26  ;;  %v5005_v2 = vsel %vm3212_vm8, %v4973_v58, %v8555_v32  ;;  %v15265_v14 = vld [vmem:[#allocation225_spill] sm:$0xff] }
 0x398   : > { %v8908_v47 = vpop.permute.xlu1 %8907  ;;  %v6883_v36 = vpack.c.bf16 %v5438_v50, %v5437_v19  ;;  %v5036_v18 = vsel %vm3245_vm9, %v5004_v28, %v8894_v53  ;;  %v5037_v49 = vsel %vm3245_vm9, %v5005_v2, %v8895_v0  ;;  %v8915_v52 = vunpack.i.h.bf16 %v8913_v12  ;;  %v9284_v2 = vld [vmem:[%s9432_s30 + $0x261] sm:$0xff] }
 0x399   : > { %v8910_v42 = vunpack.i.h.bf16 %v8908_v47  ;;  %v8909_v23 = vunpack.i.l.bf16 %v8908_v47  ;;  %v5068_v57 = vsel %vm3278_vm10, %v5036_v18, %v8904_v44  ;;  %v5069_v3 = vsel %vm3278_vm10, %v5037_v49, %v8905_v4  ;;  %v15266_v44 = vld [vmem:[#allocation33_spill] sm:$0xff] }
 0x39a   : > { %v8914_v6 = vunpack.i.l.bf16 %v8913_v12  ;;  %9127 = vrot.lane.b32.xlu1 %v12642_v48, %s9361_s28  ;;  %6884 = vmatprep.subr.bf16.mxu1 %v6883_v36  ;;  %v15264_v32 = vpack.c.bf16 %v13249_v15, %v13244_v38  ;;  %v3582_v26 = vsel %vm3575_vm4, %v13498_v9, %v8199_v51  ;;  %v8319_v48 = vunpack.i.l.bf16 %v15263_v45  ;;  %v15267_v36 = vld [vmem:[#allocation18_spill] sm:$0xff] }
 0x39b   : > { %v5101_v8 = vsel %vm3311_vm11, %v5069_v3, %v8910_v42  ;;  %v5100_v11 = vsel %vm3311_vm11, %v5068_v57, %v8909_v23  ;;  %v8923_v10 = vpop.permute.xlu0 %8922  ;;  %v3583_v31 = vsel %vm3575_vm4, %v3550_v39, %v8200_v60  ;;  %v4911_v53 = vsel %vm3113_vm5, %v9283_v27, %v8320_v13 }
 0x39c   : > { %6886 = vmatpush1.bf16.xpose.msra.mxu1 %v15264_v32  ;;  %v8925_v29 = vunpack.i.h.bf16 %v8923_v10  ;;  %v8924_v0 = vunpack.i.l.bf16 %v8923_v10  ;;  %v8918_v25 = vpop.permute.xlu1 %8917  ;;  %v8400_v62 = vunpack.i.h.bf16 %v15265_v14  ;;  %v8399_v15 = vunpack.i.l.bf16 %v15265_v14 }
 0x39d   : > { %v8920_v4 = vunpack.i.h.bf16 %v8918_v25  ;;  %v8919_v38 = vunpack.i.l.bf16 %v8918_v25  ;;  %v5132_v9 = vsel %vm3344_vm12, %v5100_v11, %v8914_v6  ;;  %v5133_v51 = vsel %vm3344_vm12, %v5101_v8, %v8915_v52 }
 0x39e   : > { %v8480_v55 = vunpack.i.h.bf16 %v15266_v44  ;;  %v8479_v30 = vunpack.i.l.bf16 %v15266_v44  ;;  %9137 = vrot.lane.b32.xlu1 %v8923_v10, %s9361_s28  ;;  %v4910_v47 = vsel %vm3113_vm5, %v9284_v2, %v8319_v48  ;;  %v8560_v18 = vunpack.i.h.bf16 %v15267_v36  ;;  %v15269_v48 = vld [vmem:[#allocation185_spill] sm:$0xff] }
 0x39f   : > { %v5164_v60 = vsel %vm3377_vm13, %v5132_v9, %v8919_v38  ;;  %v5165_v58 = vsel %vm3377_vm13, %v5133_v51, %v8920_v4  ;;  %v13578_v12 = vpop.permute.xlu0 %8932  ;;  %v8559_v49 = vunpack.i.l.bf16 %v15267_v36  ;;  %v15268_v6 = vunpack.i.l.bf16 %v15235_v16  ;;  %v15271_v51 = vld [vmem:[#allocation172_spill] sm:$0xff] }
 0x3a0   : > { %v8935_v19 = vunpack.i.h.bf16 %v13578_v12  ;;  %v8934_v50 = vunpack.i.l.bf16 %v13578_v12  ;;  %v8928_v45 = vpop.permute.xlu1 %8927  ;;  %v5196_v13 = vsel %vm3410_vm14, %v5164_v60, %v8924_v0  ;;  %v5197_v28 = vsel %vm3410_vm14, %v5165_v58, %v8925_v29 }
 0x3a1   : > { %v9131_v42 = vpack.i.bf16 %v5197_v28, %v5196_v13  ;;  %v8930_v23 = vunpack.i.h.bf16 %v8928_v45  ;;  %v8929_v57 = vunpack.i.l.bf16 %v8928_v45  ;;  %v3485_v39 = vsel %vm3476_vm1, %v13312_v63, %v15268_v6 }
 0x3a2   : > { %v5439_v3 = vsel %vm5368_vm15, %v3582_v26, %v8934_v50  ;;  %v5440_v52 = vsel %vm5368_vm15, %v3583_v31, %v8935_v19  ;;  %v4942_v8 = vsel %vm3146_vm6, %v4910_v47, %v8399_v15  ;;  %v4943_v11 = vsel %vm3146_vm6, %v4911_v53, %v8400_v62 }
 0x3a3   : > { %v8943_v10 = vpop.permute.xlu0 %8942  ;;  %9132 = vrot.lane.b32.xlu0 %v9131_v42, %s9361_s28  ;;  %v6887_v32 = vpack.c.bf16 %v5440_v52, %v5439_v3  ;;  %v8045_v29 = vunpack.i.h.bf16 %v15269_v48  ;;  %v8044_v26 = vunpack.i.l.bf16 %v15269_v48  ;;  %v4974_v0 = vsel %vm3179_vm7, %v4942_v8, %v8479_v30 }
 0x3a4   : > { %v4975_v25 = vsel %vm3179_vm7, %v4943_v11, %v8480_v55  ;;  %v8938_v31 = vpop.permute.xlu1 %8937  ;;  %v5006_v27 = vsel %vm3212_vm8, %v4974_v0, %v8559_v49  ;;  %v8945_v38 = vunpack.i.h.bf16 %v8943_v10  ;;  %v8944_v15 = vunpack.i.l.bf16 %v8943_v10 }
 0x3a5   : > { %v5007_v63 = vsel %vm3212_vm8, %v4975_v25, %v8560_v18  ;;  %v8940_v14 = vunpack.i.h.bf16 %v8938_v31  ;;  %v8939_v4 = vunpack.i.l.bf16 %v8938_v31  ;;  %6888 = vmatprep.subr.bf16.mxu1 %v6887_v32  ;;  %v5038_v62 = vsel %vm3245_vm9, %v5006_v27, %v8929_v57  ;;  %v15274_v18 = vld [vmem:[#allocation217_spill] sm:$0xff]  ;;  %v15275_v25 = vld [vmem:[#allocation228_spill] sm:$0xff] }
 0x3a6   : > { %v5039_v53 = vsel %vm3245_vm9, %v5007_v63, %v8930_v23  ;;  %v15270_v9 = vpack.c.bf16 %v13234_v56, %v13229_v54  ;;  %v8125_v44 = vunpack.i.h.bf16 %v15271_v51  ;;  %v8124_v55 = vunpack.i.l.bf16 %v15271_v51  ;;  %v15273_v56 = vld [vmem:[#allocation186_spill] sm:$0xff] }
 0x3a7   : > { %v5070_v30 = vsel %vm3278_vm10, %v5038_v62, %v8939_v4  ;;  %v5071_v60 = vsel %vm3278_vm10, %v5039_v53, %v8940_v14  ;;  %v8953_v58 = vpop.permute.xlu0 %8952  ;;  %9142 = vrot.lane.b32.xlu0 %v12672_v1, %s9361_s28  ;;  %v15272_v45 = vunpack.i.h.bf16 %v15235_v16  ;;  %v3518_v54 = vsel %vm3509_vm2, %v3485_v39, %v8044_v26  ;;  %v9285_v26 = vld [vmem:[%s9432_s30 + $0x2b1] sm:$0xff]  ;;  %v9286_v51 = vld [vmem:[%s9432_s30 + $0x2a1] sm:$0xff] }
 0x3a8   : > { %6890 = vmatpush1.bf16.xpose.msra.mxu1 %v15270_v9  ;;  %v8205_v28 = vunpack.i.h.bf16 %v15273_v56  ;;  %v8204_v2 = vunpack.i.l.bf16 %v15273_v56  ;;  %v8948_v47 = vpop.permute.xlu1 %8947  ;;  %v8325_v49 = vunpack.i.h.bf16 %v15274_v18  ;;  %v8955_v1 = vunpack.i.h.bf16 %v8953_v58  ;;  %v15276_v4 = vld [vmem:[#allocation44_spill] sm:$0xff] }
 0x3a9   : > { %v3486_v13 = vsel %vm3476_vm1, %v13322_v40, %v15272_v45  ;;  %v8950_v42 = vunpack.i.h.bf16 %v8948_v47  ;;  %v8949_v23 = vunpack.i.l.bf16 %v8948_v47  ;;  %v8954_v57 = vunpack.i.l.bf16 %v8953_v58  ;;  %vm13950_vm1 = vmpackc.low %vm5501_vm0, %vm5501_vm0 }
 0x3aa   : > { %v3519_v36 = vsel %vm3509_vm2, %v3486_v13, %v8045_v29  ;;  %v5102_v16 = vsel %vm3311_vm11, %v5070_v30, %v8944_v15  ;;  %v5103_v40 = vsel %vm3311_vm11, %v5071_v60, %v8945_v38  ;;  %v3551_v3 = vsel %vm3542_vm3, %v3518_v54, %v8124_v55 }
 0x3ab   : > { %v3552_v52 = vsel %vm3542_vm3, %v3519_v36, %v8125_v44  ;;  %v5134_v6 = vsel %vm3344_vm12, %v5102_v16, %v8949_v23  ;;  %v5135_v39 = vsel %vm3344_vm12, %v5103_v40, %v8950_v42  ;;  %v8963_v8 = vpop.permute.xlu0 %8962  ;;  %v8324_v11 = vunpack.i.l.bf16 %v15274_v18 }
 0x3ac   : > { %v8958_v10 = vpop.permute.xlu1 %8957  ;;  %v3584_v32 = vsel %vm3575_vm4, %v3551_v3, %v8204_v2  ;;  %v3585_v48 = vsel %vm3575_vm4, %v3552_v52, %v8205_v28  ;;  %v6893_v29 = vpack.c.bf16 %v13289_v22, %v13286_v17  ;;  %v4913_v0 = vsel %vm3113_vm5, %v9285_v26, %v8325_v49 }
 0x3ad   : > { %v8405_v31 = vunpack.i.h.bf16 %v15275_v25  ;;  %v8960_v27 = vunpack.i.h.bf16 %v8958_v10  ;;  %v8959_v63 = vunpack.i.l.bf16 %v8958_v10  ;;  %v8404_v14 = vunpack.i.l.bf16 %v15275_v25  ;;  %9152 = vrot.lane.b32.xlu0 %v8958_v10, %s9361_s28 }
 0x3ae   : > { %v8485_v53 = vunpack.i.h.bf16 %v15276_v4  ;;  %v5166_v62 = vsel %vm3377_vm13, %v5134_v6, %v8954_v57  ;;  %v5167_v38 = vsel %vm3377_vm13, %v5135_v39, %v8955_v1  ;;  %v8484_v15 = vunpack.i.l.bf16 %v15276_v4  ;;  %v15277_v1 = vld [vmem:[#allocation216_spill] sm:$0xff] }
 0x3af   : > { %v5198_v9 = vsel %vm3410_vm14, %v5166_v62, %v8959_v63  ;;  %v5199_v22 = vsel %vm3410_vm14, %v5167_v38, %v8960_v27  ;;  %v8973_v17 = vpop.permute.xlu0 %8972  ;;  %v4912_v44 = vsel %vm3113_vm5, %v9286_v51, %v8324_v11  ;;  %v8565_v55 = vunpack.i.h.bf16 %v12451_v46 }
 0x3b0   : > { %v8564_v30 = vunpack.i.l.bf16 %v12451_v46  ;;  %v9146_v60 = vpack.i.bf16 %v5199_v22, %v5198_v9  ;;  %v13653_v58 = vpop.permute.xlu1 %8967  ;;  %v8965_v45 = vunpack.i.h.bf16 %v8963_v8  ;;  %v8964_v13 = vunpack.i.l.bf16 %v8963_v8 }
 0x3b1   : > { %v8970_v54 = vunpack.i.h.bf16 %v13653_v58  ;;  %v8969_v56 = vunpack.i.l.bf16 %v13653_v58  ;;  %v4944_v28 = vsel %vm3146_vm6, %v4912_v44, %v8404_v14  ;;  %v4945_v2 = vsel %vm3146_vm6, %v4913_v0, %v8405_v31  ;;  %v15279_v14 = vld [vmem:[#allocation150_spill] sm:$0xff] }
 0x3b2   : > { %v8975_v47 = vunpack.i.h.bf16 %v8973_v17  ;;  %v8974_v36 = vunpack.i.l.bf16 %v8973_v17  ;;  %9147 = vrot.lane.b32.xlu1 %v9146_v60, %s9361_s28  ;;  %v4976_v46 = vsel %vm3179_vm7, %v4944_v28, %v8484_v15  ;;  %v4977_v18 = vsel %vm3179_vm7, %v4945_v2, %v8485_v53  ;;  %v15282_v17 = vld [vmem:[#allocation227_spill] sm:$0xff] }
 0x3b3   : > { %v8983_v49 = vpop.permute.xlu0 %8982  ;;  %v5441_v42 = vsel %vm5368_vm15, %v3584_v32, %v8969_v56  ;;  %v5442_v23 = vsel %vm5368_vm15, %v3585_v48, %v8970_v54  ;;  %v8330_v57 = vunpack.i.h.bf16 %v15277_v1  ;;  %v5008_v16 = vsel %vm3212_vm8, %v4976_v46, %v8564_v30  ;;  %v15283_v60 = vld [vmem:[#allocation35_spill] sm:$0xff] }
 0x3b4   : > { %v5009_v40 = vsel %vm3212_vm8, %v4977_v18, %v8565_v55  ;;  %v8978_v3 = vpop.permute.xlu1 %8977  ;;  %v6891_v52 = vpack.c.bf16 %v5442_v23, %v5441_v42  ;;  %v5040_v6 = vsel %vm3245_vm9, %v5008_v16, %v8964_v13  ;;  %v8985_v48 = vunpack.i.h.bf16 %v8983_v49  ;;  %v9288_v23 = vld [vmem:[%s9432_s30 + $0x2c1] sm:$0xff] }
 0x3b5   : > { %v5041_v39 = vsel %vm3245_vm9, %v5009_v40, %v8965_v45  ;;  %v8980_v8 = vunpack.i.h.bf16 %v8978_v3  ;;  %v8979_v11 = vunpack.i.l.bf16 %v8978_v3  ;;  %v5072_v10 = vsel %vm3278_vm10, %v5040_v6, %v8974_v36 }
 0x3b6   : > { %v5073_v32 = vsel %vm3278_vm10, %v5041_v39, %v8975_v47  ;;  %v8984_v26 = vunpack.i.l.bf16 %v8983_v49  ;;  %9157 = vrot.lane.b32.xlu1 %v12745_v21, %s9361_s28  ;;  %6892 = vmatprep.subr.bf16.mxu1 %v6891_v52  ;;  %v15278_v27 = vunpack.i.h.bf16 %v15216_v35  ;;  %v15280_v4 = vunpack.i.l.bf16 %v15279_v14  ;;  %v15285_v39 = vld [vmem:[#allocation187_spill] sm:$0xff] }
 0x3b7   : > { %v5105_v0 = vsel %vm3311_vm11, %v5073_v32, %v8980_v8  ;;  %v5104_v25 = vsel %vm3311_vm11, %v5072_v10, %v8979_v11  ;;  %v8993_v31 = vpop.permute.xlu0 %8992  ;;  %6894 = vmatpush1.bf16.xpose.msra.mxu1 %v6893_v29  ;;  %v8329_v62 = vunpack.i.l.bf16 %v15277_v1  ;;  %v15281_v9 = vunpack.i.h.bf16 %v15279_v14  ;;  %v9287_v29 = vld [vmem:[%s9432_s30 + $0x2d1] sm:$0xff] }
 0x3b8   : > { %v3389_v63 = vsel %vm3377_vm13, %v12846_v24, %v15278_v27  ;;  %v3421_v53 = vsel %vm3410_vm14, %v13202_v41, %v15280_v4  ;;  %v8995_v21 = vunpack.i.h.bf16 %v8993_v31  ;;  %v8994_v38 = vunpack.i.l.bf16 %v8993_v31  ;;  %v8988_v15 = vpop.permute.xlu1 %8987  ;;  %v15286_v11 = vld [vmem:[#allocation188_spill] sm:$0xff]  ;;  %v15287_v32 = vld [vmem:[#allocation137_spill] sm:$0xff] }
 0x3b9   : > { %v3422_v22 = vsel %vm3410_vm14, %v3389_v63, %v15281_v9  ;;  %v4915_v35 = vsel %vm3113_vm5, %v9287_v29, %v8330_v57  ;;  %v8410_v51 = vunpack.i.h.bf16 %v15282_v17  ;;  %v8990_v24 = vunpack.i.h.bf16 %v8988_v15  ;;  %v15284_v57 = vld [vmem:[#allocation15_spill] sm:$0xff] }
 0x3ba   : > { %v8989_v44 = vunpack.i.l.bf16 %v8988_v15  ;;  %v8409_v55 = vunpack.i.l.bf16 %v15282_v17  ;;  %v5136_v41 = vsel %vm3344_vm12, %v5104_v25, %v8984_v26  ;;  %v5137_v30 = vsel %vm3344_vm12, %v5105_v0, %v8985_v48  ;;  %9167 = vrot.lane.b32.xlu1 %v8993_v31, %s9361_s28 }
 0x3bb   : > { %v8490_v45 = vunpack.i.h.bf16 %v15283_v60  ;;  %v8489_v13 = vunpack.i.l.bf16 %v15283_v60  ;;  %v5169_v2 = vsel %vm3377_vm13, %v5137_v30, %v8990_v24  ;;  %v13702_v47 = vpop.permute.xlu0 %9002  ;;  %v4914_v1 = vsel %vm3113_vm5, %v9288_v23, %v8329_v62  ;;  %v15290_v30 = vld [vmem:[#allocation50_spill] sm:$0xff]  ;;  %v15295_v23 = vld [vmem:[#allocation153_spill] sm:$0xff] }
 0x3bc   : > { %v5168_v28 = vsel %vm3377_vm13, %v5136_v41, %v8989_v44  ;;  %v9005_v36 = vunpack.i.h.bf16 %v13702_v47  ;;  %v9004_v46 = vunpack.i.l.bf16 %v13702_v47  ;;  %v8998_v18 = vpop.permute.xlu1 %8997  ;;  %v5201_v42 = vsel %vm3410_vm14, %v5169_v2, %v8995_v21  ;;  %v15289_v44 = vld [vmem:[#allocation21_spill] sm:$0xff] }
 0x3bd   : > { %v5200_v49 = vsel %vm3410_vm14, %v5168_v28, %v8994_v38  ;;  %v8570_v16 = vunpack.i.h.bf16 %v15284_v57  ;;  %v8569_v40 = vunpack.i.l.bf16 %v15284_v57  ;;  %v9000_v52 = vunpack.i.h.bf16 %v8998_v18  ;;  %v15293_v28 = vld [vmem:[#allocation13_spill] sm:$0xff] }
 0x3be   : > { %v9161_v3 = vpack.i.bf16 %v5201_v42, %v5200_v49  ;;  %v8999_v6 = vunpack.i.l.bf16 %v8998_v18  ;;  %v5443_v8 = vsel %vm5368_vm15, %v15285_v39, %v9004_v46  ;;  %v5444_v10 = vsel %vm5368_vm15, %v15286_v11, %v9005_v36 }
 0x3bf   : > { %v7734_v48 = vunpack.i.l.bf16 %v15287_v32  ;;  %v4946_v26 = vsel %vm3146_vm6, %v4914_v1, %v8409_v55  ;;  %v4947_v0 = vsel %vm3146_vm6, %v4915_v35, %v8410_v51  ;;  %v9013_v25 = vpop.permute.xlu0 %9012  ;;  %v6895_v31 = vpack.c.bf16 %v5444_v10, %v5443_v8 }
 0x3c0   : > { %9162 = vrot.lane.b32.xlu0 %v9161_v3, %s9361_s28  ;;  %v7735_v27 = vunpack.i.h.bf16 %v15287_v32  ;;  %v4978_v63 = vsel %vm3179_vm7, %v4946_v26, %v8489_v13  ;;  %v4979_v14 = vsel %vm3179_vm7, %v4947_v0, %v8490_v45  ;;  %v9008_v4 = vpop.permute.xlu1 %9007  ;;  %v6897_v62 = vpack.c.bf16 %v3422_v22, %v3421_v53  ;;  %v15291_v45 = vld [vmem:[#allocation104_spill] sm:$0xff] }
 0x3c1   : > { %v5010_v21 = vsel %vm3212_vm8, %v4978_v63, %v8569_v40  ;;  %v5011_v38 = vsel %vm3212_vm8, %v4979_v14, %v8570_v16  ;;  %v9010_v15 = vunpack.i.h.bf16 %v9008_v4  ;;  %v9009_v9 = vunpack.i.l.bf16 %v9008_v4  ;;  %6896 = vmatprep.subr.bf16.mxu1 %v6895_v31  ;;  %v15297_v16 = vld [vmem:[#allocation219_spill] sm:$0xff]  ;;  %v15299_v32 = vld [vmem:[#allocation120_spill] sm:$0xff] }
 0x3c2   : > { %v5043_v29 = vsel %vm3245_vm9, %v5011_v38, %v9000_v52  ;;  %v5042_v35 = vsel %vm3245_vm9, %v5010_v21, %v8999_v6  ;;  %v9015_v17 = vunpack.i.h.bf16 %v9013_v25  ;;  %v9014_v51 = vunpack.i.l.bf16 %v9013_v25  ;;  %6898 = vmatpush1.bf16.xpose.msra.mxu1 %v6897_v62  ;;  %v15301_v26 = vld [vmem:[#allocation16_spill] sm:$0xff] }
 0x3c3   : > { %v15288_v24 = vunpack.i.h.bf16 %v15199_v34  ;;  %v5074_v53 = vsel %vm3278_vm10, %v5042_v35, %v9009_v9  ;;  %v5075_v22 = vsel %vm3278_vm10, %v5043_v29, %v9010_v15  ;;  %v9023_v41 = vpop.permute.xlu0 %9022  ;;  %v3390_v60 = vsel %vm3377_vm13, %v15290_v30, %v7734_v48  ;;  %v15294_v34 = vld [vmem:[#allocation136_spill] sm:$0xff]  ;;  %v15303_v35 = vld [vmem:[#allocation230_spill] sm:$0xff] }
 0x3c4   : > { %9172 = vrot.lane.b32.xlu0 %v12826_v43, %s9361_s28  ;;  %v15292_v13 = vunpack.i.h.bf16 %v15291_v45  ;;  %v7739_v18 = vunpack.i.l.bf16 %v15294_v34  ;;  %v9018_v49 = vpop.permute.xlu1 %9017  ;;  %v15296_v1 = vunpack.i.l.bf16 %v15295_v23  ;;  %v8335_v43 = vunpack.i.h.bf16 %v15297_v16  ;;  %v9289_v9 = vld [vmem:[%s9432_s30 + $0x2f1] sm:$0xff] }
 0x3c5   : > { %v3358_v55 = vsel %vm3344_vm12, %v15289_v44, %v15288_v24  ;;  %v9020_v40 = vunpack.i.h.bf16 %v9018_v49  ;;  %v9019_v3 = vunpack.i.l.bf16 %v9018_v49  ;;  %v15298_v52 = vunpack.i.h.bf16 %v15295_v23 }
 0x3c6   : > { %v3327_v2 = vsel %vm3311_vm11, %v15293_v28, %v15292_v13  ;;  %v3391_v42 = vsel %vm3377_vm13, %v3358_v55, %v7735_v27  ;;  %v13751_v57 = vsel %vm3410_vm14, %v3390_v60, %v15296_v1  ;;  %v9025_v39 = vunpack.i.h.bf16 %v9023_v41  ;;  %v15304_v55 = vld [vmem:[#allocation46_spill] sm:$0xff] }
 0x3c7   : > { %v13757_v6 = vsel %vm3410_vm14, %v3391_v42, %v15298_v52  ;;  %v9024_v8 = vunpack.i.l.bf16 %v9023_v41  ;;  %v5106_v11 = vsel %vm3311_vm11, %v5074_v53, %v9014_v51  ;;  %v5107_v10 = vsel %vm3311_vm11, %v5075_v22, %v9015_v17  ;;  %v9033_v14 = vpop.permute.xlu0 %9032  ;;  %v9290_v28 = vld [vmem:[%s9432_s30 + $0x2e1] sm:$0xff] }
 0x3c8   : > { %v15300_v48 = vunpack.i.l.bf16 %v15299_v32  ;;  %v15302_v25 = vunpack.i.h.bf16 %v15299_v32  ;;  %v5138_v27 = vsel %vm3344_vm12, %v5106_v11, %v9019_v3  ;;  %v5139_v63 = vsel %vm3344_vm12, %v5107_v10, %v9020_v40  ;;  %v9028_v21 = vpop.permute.xlu1 %9027  ;;  %v15306_v10 = vld [vmem:[#allocation191_spill] sm:$0xff] }
 0x3c9   : > { %v7740_v4 = vunpack.i.h.bf16 %v15294_v34  ;;  %v8334_v62 = vunpack.i.l.bf16 %v15297_v16  ;;  %v6901_v38 = vpack.c.bf16 %v13757_v6, %v13751_v57  ;;  %v4917_v29 = vsel %vm3113_vm5, %v9289_v9, %v8335_v43  ;;  %v15305_v34 = vld [vmem:[#allocation19_spill] sm:$0xff]  ;;  %9182 = vrot.lane.b32.xlu0 %v9028_v21, %s9361_s28 }
 0x3ca   : > { %v3359_v0 = vsel %vm3344_vm12, %v15301_v26, %v15300_v48  ;;  %v13768_v31 = vsel %vm3344_vm12, %v3327_v2, %v15302_v25  ;;  %v8415_v17 = vunpack.i.h.bf16 %v15303_v35  ;;  %v9030_v51 = vunpack.i.h.bf16 %v9028_v21  ;;  %v15307_v48 = vld [vmem:[#allocation192_spill] sm:$0xff] }
 0x3cb   : > { %v3392_v15 = vsel %vm3377_vm13, %v3359_v0, %v7739_v18  ;;  %v9029_v24 = vunpack.i.l.bf16 %v9028_v21  ;;  %v8414_v44 = vunpack.i.l.bf16 %v15303_v35  ;;  %v8495_v53 = vunpack.i.h.bf16 %v15304_v55  ;;  %v9043_v13 = vpop.permute.xlu0 %9042  ;;  %v15308_v0 = vld [vmem:[#allocation218_spill] sm:$0xff] }
 0x3cc   : > { %v5170_v22 = vsel %vm3377_vm13, %v5138_v27, %v9024_v8  ;;  %v5171_v41 = vsel %vm3377_vm13, %v5139_v63, %v9025_v39  ;;  %v8494_v30 = vunpack.i.l.bf16 %v15304_v55  ;;  %v4916_v2 = vsel %vm3113_vm5, %v9290_v28, %v8334_v62  ;;  %v13791_v23 = vpop.permute.xlu1 %9037 }
 0x3cd   : > { %v5202_v60 = vsel %vm3410_vm14, %v5170_v22, %v9029_v24  ;;  %v5203_v45 = vsel %vm3410_vm14, %v5171_v41, %v9030_v51  ;;  %v8575_v18 = vunpack.i.h.bf16 %v15305_v34  ;;  %v8574_v49 = vunpack.i.l.bf16 %v15305_v34 }
 0x3ce   : > { %v9176_v42 = vpack.i.bf16 %v5203_v45, %v5202_v60  ;;  %v9035_v1 = vunpack.i.h.bf16 %v9033_v14  ;;  %v9034_v57 = vunpack.i.l.bf16 %v9033_v14  ;;  %v9040_v16 = vunpack.i.h.bf16 %v13791_v23  ;;  %v15310_v45 = vld [vmem:[#allocation152_spill] sm:$0xff] }
 0x3cf   : > { %v9039_v43 = vunpack.i.l.bf16 %v13791_v23  ;;  %v4948_v40 = vsel %vm3146_vm6, %v4916_v2, %v8414_v44  ;;  %v4949_v3 = vsel %vm3146_vm6, %v4917_v29, %v8415_v17  ;;  %v9045_v52 = vunpack.i.h.bf16 %v9043_v13  ;;  %v9053_v11 = vpop.permute.xlu0 %9052  ;;  %v6464_v17 = vld [vmem:[%s9432_s30 + $0x311] sm:$0xff] }
 0x3d0   : > { %v9044_v6 = vunpack.i.l.bf16 %v9043_v13  ;;  %9177 = vrot.lane.b32.xlu1 %v9176_v42, %s9361_s28  ;;  %v4980_v39 = vsel %vm3179_vm7, %v4948_v40, %v8494_v30  ;;  %v4981_v8 = vsel %vm3179_vm7, %v4949_v3, %v8495_v53  ;;  %v5446_v26 = vsel %vm5368_vm15, %v15307_v48, %v9040_v16  ;;  %v9048_v14 = vpop.permute.xlu1 %9047  ;;  %v15309_v53 = vld [vmem:[#allocation25_spill] sm:$0xff] }
 0x3d1   : > { %v5445_v32 = vsel %vm5368_vm15, %v15306_v10, %v9039_v43  ;;  %v8340_v25 = vunpack.i.h.bf16 %v15308_v0  ;;  %v5012_v27 = vsel %vm3212_vm8, %v4980_v39, %v8574_v49  ;;  %v5013_v63 = vsel %vm3212_vm8, %v4981_v8, %v8575_v18  ;;  %v15313_v40 = vld [vmem:[#allocation229_spill] sm:$0xff] }
 0x3d2   : > { %v6899_v62 = vpack.c.bf16 %v5446_v26, %v5445_v32  ;;  %v5044_v21 = vsel %vm3245_vm9, %v5012_v27, %v9034_v57  ;;  %v5045_v9 = vsel %vm3245_vm9, %v5013_v63, %v9035_v1  ;;  %v9050_v29 = vunpack.i.h.bf16 %v9048_v14  ;;  %v15314_v39 = vld [vmem:[#allocation45_spill] sm:$0xff] }
 0x3d3   : > { %v9049_v35 = vunpack.i.l.bf16 %v9048_v14  ;;  %v5076_v51 = vsel %vm3278_vm10, %v5044_v21, %v9044_v6  ;;  %v5077_v24 = vsel %vm3278_vm10, %v5045_v9, %v9045_v52  ;;  %v9055_v44 = vunpack.i.h.bf16 %v9053_v11  ;;  %v9063_v30 = vpop.permute.xlu0 %9062 }
 0x3d4   : > { %v9054_v55 = vunpack.i.l.bf16 %v9053_v11  ;;  %9187 = vrot.lane.b32.xlu1 %v15309_v53, %s9361_s28  ;;  %6900 = vmatprep.subr.bf16.mxu1 %v6899_v62  ;;  %v5109_v22 = vsel %vm3311_vm11, %v5077_v24, %v9050_v29  ;;  %v3393_v60 = vsel %vm3377_vm13, %v13768_v31, %v7740_v4  ;;  %v15311_v13 = vunpack.i.l.bf16 %v15310_v45  ;;  %v9058_v49 = vpop.permute.xlu1 %9057  ;;  %v6463_v31 = vld [vmem:[%s9432_s30 + $0x301] sm:$0xff]  ;;  %v15315_v62 = vld [vmem:[#allocation17_spill] sm:$0xff] }
 0x3d5   : > { %v5108_v41 = vsel %vm3311_vm11, %v5076_v51, %v9049_v35  ;;  %6902 = vmatpush1.bf16.xpose.msra.mxu1 %v6901_v38  ;;  %v8339_v2 = vunpack.i.l.bf16 %v15308_v0  ;;  %v9065_v34 = vunpack.i.h.bf16 %v9063_v30  ;;  %v9064_v18 = vunpack.i.l.bf16 %v9063_v30  ;;  %v15316_v51 = vld [vmem:[#allocation189_spill] sm:$0xff] }
 0x3d6   : > { %v3425_v28 = vsel %vm3410_vm14, %v3392_v15, %v15311_v13  ;;  %v15312_v42 = vunpack.i.h.bf16 %v15310_v45  ;;  %v4919_v57 = vsel %vm3113_vm5, %v6464_v17, %v8340_v25  ;;  %v8420_v38 = vunpack.i.h.bf16 %v15313_v40 }
 0x3d7   : > { %v9060_v3 = vunpack.i.h.bf16 %v9058_v49  ;;  %v9059_v52 = vunpack.i.l.bf16 %v9058_v49  ;;  %v8419_v4 = vunpack.i.l.bf16 %v15313_v40  ;;  %v5140_v15 = vsel %vm3344_vm12, %v5108_v41, %v9054_v55  ;;  %v13840_v48 = vpop.permute.xlu0 %9072 }
 0x3d8   : > { %v3426_v1 = vsel %vm3410_vm14, %v3393_v60, %v15312_v42  ;;  %v5141_v6 = vsel %vm3344_vm12, %v5109_v22, %v9055_v44  ;;  %v8500_v8 = vunpack.i.h.bf16 %v15314_v39  ;;  %v8499_v11 = vunpack.i.l.bf16 %v15314_v39  ;;  %v9068_v25 = vpop.permute.xlu1 %9067  ;;  %9197 = vrot.lane.b32.xlu1 %v9063_v30, %s9361_s28  ;;  %v15317_v44 = vld [vmem:[#allocation190_spill] sm:$0xff] }
 0x3d9   : > { %v5172_v10 = vsel %vm3377_vm13, %v5140_v15, %v9059_v52  ;;  %v5173_v32 = vsel %vm3377_vm13, %v5141_v6, %v9060_v3  ;;  %v9075_v26 = vunpack.i.h.bf16 %v13840_v48  ;;  %v9074_v0 = vunpack.i.l.bf16 %v13840_v48  ;;  %v5468_v48 = vld [vmem:[%s14460_s1 + $0x18] sm:$0xff] }
 0x3da   : > { %v5204_v27 = vsel %vm3410_vm14, %v5172_v10, %v9064_v18  ;;  %v5205_v63 = vsel %vm3410_vm14, %v5173_v32, %v9065_v34  ;;  %v4918_v14 = vsel %vm3113_vm5, %v6463_v31, %v8339_v2  ;;  %v8580_v21 = vunpack.i.h.bf16 %v15315_v62 }
 0x3db   : > { %v8579_v9 = vunpack.i.l.bf16 %v15315_v62  ;;  %v9191_v29 = vpack.i.bf16 %v5205_v63, %v5204_v27  ;;  %v9070_v35 = vunpack.i.h.bf16 %v9068_v25  ;;  %v9069_v17 = vunpack.i.l.bf16 %v9068_v25  ;;  %v9083_v41 = vpop.permute.xlu0 %9082 }
 0x3dc   : > { %v5447_v24 = vsel %vm5368_vm15, %v15316_v51, %v9074_v0  ;;  %v5448_v55 = vsel %vm5368_vm15, %v15317_v44, %v9075_v26  ;;  %v4950_v53 = vsel %vm3146_vm6, %v4918_v14, %v8419_v4  ;;  %v4951_v22 = vsel %vm3146_vm6, %v4919_v57, %v8420_v38  ;;  %v9078_v13 = vpop.permute.xlu1 %9077  ;;  %v5467_v51 = vld [vmem:[%s14460_s1 + $0x10] sm:$0xff] }
 0x3dd   : > { %9192 = vrot.lane.b32.xlu0 %v9191_v29, %s9361_s28  ;;  %v6903_v30 = vpack.c.bf16 %v5448_v55, %v5447_v24  ;;  %v4982_v60 = vsel %vm3179_vm7, %v4950_v53, %v8499_v11  ;;  %v4983_v45 = vsel %vm3179_vm7, %v4951_v22, %v8500_v8  ;;  %v6905_v2 = vpack.c.bf16 %v3426_v1, %v3425_v28  ;;  %v15318_v28 = vld [vmem:[#allocation51_spill] sm:$0xff]  ;;  %v15319_v24 = vld [vmem:[#allocation37_spill] sm:$0xff]  ;;  %v15320_v53 = vld [vmem:[#allocation52_spill] sm:$0xff] }
 0x3de   : > { %v5014_v34 = vsel %vm3212_vm8, %v4982_v60, %v8579_v9  ;;  %v5015_v18 = vsel %vm3212_vm8, %v4983_v45, %v8580_v21  ;;  %v9080_v49 = vunpack.i.h.bf16 %v9078_v13  ;;  %v9079_v42 = vunpack.i.l.bf16 %v9078_v13  ;;  %v5466_v9 = vld [vmem:[%s14460_s1 + $0x8] sm:$0xff]  ;;  %6867 = vmatprep.mubr.msk.f32.mxu0 %vm5501_vm0, %v5467_v51  ;;  %v327_v22 = vld [vmem:[%s9432_s30 + $0x140] sm:$0xff]  ;;  %v15322_v45 = vld [vmem:[#allocation20_spill] sm:$0xff] }
 0x3df   : > { %6904 = vmatprep.subr.bf16.mxu1 %v6903_v30  ;;  %v5047_v40 = vsel %vm3245_vm9, %v5015_v18, %v9070_v35  ;;  %v5046_v57 = vsel %vm3245_vm9, %v5014_v34, %v9069_v17  ;;  %v9085_v38 = vunpack.i.h.bf16 %v9083_v41  ;;  %v9084_v3 = vunpack.i.l.bf16 %v9083_v41  ;;  %v9093_v1 = vpop.permute.xlu0 %9092  ;;  %5642 = vmatprep.mubr.f32.mxu1 %v5466_v9  ;;  %v15321_v41 = vld [vmem:[#allocation5_spill] sm:$0xff]  ;;  %v15323_v34 = vld [vmem:[#allocation59_spill] sm:$0xff] }
 0x3e0   : > { %6906 = vmatpush1.bf16.xpose.msra.mxu1 %v6905_v2  ;;  %v5078_v52 = vsel %vm3278_vm10, %v5046_v57, %v9079_v42  ;;  %v5079_v31 = vsel %vm3278_vm10, %v5047_v40, %v9080_v49  ;;  %v9088_v4 = vpop.permute.xlu1 %9087  ;;  %v9095_v11 = vunpack.i.h.bf16 %v9093_v1  ;;  %v9094_v10 = vunpack.i.l.bf16 %v9093_v1  ;;  %v9291_v40 = vld [vmem:[%s9432_s30 + $0x150] sm:$0xff]  ;;  %v15325_v1 = vld [vmem:[#allocation91_spill] sm:$0xff] }
 0x3e1   : > { %9202 = vrot.lane.b32.xlu0 %v15318_v28, %s9361_s28  ;;  %v9090_v15 = vunpack.i.h.bf16 %v9088_v4  ;;  %v9089_v6 = vunpack.i.l.bf16 %v9088_v4  ;;  %v5110_v39 = vsel %vm3311_vm11, %v5078_v52, %v9084_v3  ;;  %v5111_v8 = vsel %vm3311_vm11, %v5079_v31, %v9085_v38  ;;  %v15324_v38 = vld [vmem:[#allocation75_spill] sm:$0xff] }
 0x3e2   : > { %v7105_v44 = vunpack.i.h.bf16 %v15319_v24  ;;  %v7104_v55 = vunpack.i.l.bf16 %v15319_v24  ;;  %v7185_v30 = vunpack.i.h.bf16 %v15321_v41  ;;  %v7184_v60 = vunpack.i.l.bf16 %v15321_v41  ;;  %v15329_v41 = vld [vmem:[#allocation36_spill] sm:$0xff] }
 0x3e3   : > { %v5142_v32 = vsel %vm3344_vm12, %v5110_v39, %v9089_v6  ;;  %v5143_v25 = vsel %vm3344_vm12, %v5111_v8, %v9090_v15  ;;  %v7265_v13 = vunpack.i.h.bf16 %v15322_v45  ;;  %v7264_v2 = vunpack.i.l.bf16 %v15322_v45  ;;  %v15326_v8 = vld [vmem:[#allocation107_spill] sm:$0xff] }
 0x3e4   : > { %v9098_v27 = vpop.permute.xlu1 %9097  ;;  %v5174_v62 = vsel %vm3377_vm13, %v5142_v32, %v9094_v10  ;;  %v5175_v21 = vsel %vm3377_vm13, %v5143_v25, %v9095_v11  ;;  %v7345_v18 = vunpack.i.h.bf16 %v15323_v34  ;;  %v7344_v49 = vunpack.i.l.bf16 %v15323_v34  ;;  %v5478_v34 = vld [vmem:[%s14461_s2 + $0x8] sm:$0xff] }
 0x3e5   : > { %v9100_v63 = vunpack.i.h.bf16 %v9098_v27  ;;  %v9099_v14 = vunpack.i.l.bf16 %v9098_v27  ;;  %9212 = vrot.lane.b32.xlu0 %v9098_v27, %s9361_s28  ;;  %v3130_v42 = vsel %vm3113_vm5, %v327_v22, %v7104_v55  ;;  %v3131_v57 = vsel %vm3113_vm5, %v9291_v40, %v7105_v44  ;;  %v15327_v27 = vld [vmem:[#allocation123_spill] sm:$0xff] }
 0x3e6   : > { %v7425_v3 = vunpack.i.h.bf16 %v15324_v38  ;;  %v7424_v52 = vunpack.i.l.bf16 %v15324_v38  ;;  %v3163_v31 = vsel %vm3146_vm6, %v3130_v42, %v7184_v60  ;;  %v3164_v28 = vsel %vm3146_vm6, %v3131_v57, %v7185_v30 }
 0x3e7   : > { %v5206_v29 = vsel %vm3410_vm14, %v5174_v62, %v9099_v14  ;;  %v5207_v35 = vsel %vm3410_vm14, %v5175_v21, %v9100_v63  ;;  %v7505_v4 = vunpack.i.h.bf16 %v15325_v1  ;;  %v7504_v15 = vunpack.i.l.bf16 %v15325_v1 }
 0x3e8   : > { %v9206_v17 = vpack.i.bf16 %v5207_v35, %v5206_v29  ;;  %v3196_v6 = vsel %vm3179_vm7, %v3163_v31, %v7264_v2  ;;  %v3197_v39 = vsel %vm3179_vm7, %v3164_v28, %v7265_v13  ;;  %v7585_v11 = vunpack.i.h.bf16 %v15326_v8  ;;  %v9108_v62 = vpop.permute.xlu1 %9107  ;;  %v15328_v29 = vld [vmem:[#allocation139_spill] sm:$0xff]  ;;  %v5477_v2 = vld [vmem:[%s14461_s2] sm:$0xff] }
 0x3e9   : > { %v7584_v10 = vunpack.i.l.bf16 %v15326_v8  ;;  %v3229_v32 = vsel %vm3212_vm8, %v3196_v6, %v7344_v49  ;;  %v3230_v25 = vsel %vm3212_vm8, %v3197_v39, %v7345_v18  ;;  %v7665_v63 = vunpack.i.h.bf16 %v15327_v27  ;;  %v15334_v6 = vld [vmem:[#allocation196_spill] sm:$0xff] }
 0x3ea   : > { %9207 = vrot.lane.b32.xlu1 %v9206_v17, %s9361_s28  ;;  %v7664_v14 = vunpack.i.l.bf16 %v15327_v27  ;;  %v3262_v21 = vsel %vm3245_vm9, %v3229_v32, %v7424_v52  ;;  %v3263_v9 = vsel %vm3245_vm9, %v3230_v25, %v7425_v3  ;;  %v7745_v35 = vunpack.i.h.bf16 %v15328_v29  ;;  %v15330_v3 = vld [vmem:[#allocation155_spill] sm:$0xff]  ;;  %v9292_v32 = vld [vmem:[%s9432_s30 + $0x160] sm:$0xff]  ;;  %v15337_v27 = vld [vmem:[#allocation4_spill] sm:$0xff] }
 0x3eb   : > { %v7744_v17 = vunpack.i.l.bf16 %v15328_v29  ;;  %v3295_v51 = vsel %vm3278_vm10, %v3262_v21, %v7504_v15  ;;  %v3296_v24 = vsel %vm3278_vm10, %v3263_v9, %v7505_v4  ;;  %v9109_v22 = vunpack.i.l.bf16 %v9108_v62  ;;  %v15333_v4 = vld [vmem:[#allocation195_spill] sm:$0xff]  ;;  %v5479_v9 = vld [vmem:[%s14461_s2 + $0x10] sm:$0xff] }
 0x3ec   : > { %v3328_v44 = vsel %vm3311_vm11, %v3295_v51, %v7584_v10  ;;  %v3329_v55 = vsel %vm3311_vm11, %v3296_v24, %v7585_v11  ;;  %v7109_v30 = vunpack.i.l.bf16 %v15329_v41  ;;  %v9362_v57 = vmov 0   ;;  %v5480_v24 = vld [vmem:[%s14461_s2 + $0x18] sm:$0xff]  ;;  %v9305_v10 = vld [vmem:[%s14460_s1 + $0x10] sm:$0xff] }
 0x3ed   : > { %v3361_v60 = vsel %vm3344_vm12, %v3328_v44, %v7664_v14  ;;  %v3362_v45 = vsel %vm3344_vm12, %v3329_v55, %v7665_v63  ;;  %9221 = vset.pattern.permute.xlu0 %v9362_v57  ;;  %9222 = vset.pattern.permute.xlu1 %v9362_v57  ;;  %v7110_v38 = vunpack.i.h.bf16 %v15329_v41  ;;  %v15331_v52 = vunpack.i.l.bf16 %v15330_v3  ;;  %v9293_v44 = vld [vmem:[%s9432_s30 + $0x170] sm:$0xff]  ;;  %v15339_v41 = vld [vmem:[#allocation22_spill] sm:$0xff] }
 0x3ee   : > { %9217 = vrot.lane.b32.xlu1 %v15320_v53, %s9361_s28  ;;  %v9110_v53 = vunpack.i.h.bf16 %v9108_v62  ;;  %v3394_v42 = vsel %vm3377_vm13, %v3361_v60, %v7744_v17  ;;  %v3395_v40 = vsel %vm3377_vm13, %v3362_v45, %v7745_v35  ;;  %v15332_v28 = vunpack.i.h.bf16 %v15330_v3  ;;  %5483 = vperm.xlu0 %9221, %v5477_v2   ;;  %v15340_v45 = vld [vmem:[#allocation58_spill] sm:$0xff]  ;;  %s284_s28 = sadd.s32 %s6001_s18, %s15449_s27 }
 0x3ef   : > { %v3427_v31 = vsel %vm3410_vm14, %v3394_v42, %v15331_v52  ;;  %v3132_v25 = vsel %vm3113_vm5, %v9292_v32, %v7109_v30  ;;  %v7190_v63 = vunpack.i.h.bf16 %v15337_v27  ;;  %v7189_v29 = vunpack.i.l.bf16 %v15337_v27  ;;  %v15343_v57 = vld [vmem:[#allocation74_spill] sm:$0xff]  ;;  %s14430_s29 = sshll.u32 %s284_s28, 3 }
 0x3f0   : > { %v3428_v1 = vsel %vm3410_vm14, %v3395_v40, %v15332_v28  ;;  %v3133_v55 = vsel %vm3113_vm5, %v9293_v44, %v7110_v38  ;;  %v7270_v30 = vunpack.i.h.bf16 %v15339_v41  ;;  %v7269_v60 = vunpack.i.l.bf16 %v15339_v41  ;;  %v15346_v27 = vld [vmem:[#allocation122_spill] sm:$0xff]  ;;  %v9295_v41 = vld [vmem:[%s9432_s30 + $0x190] sm:$0xff]  ;;  %s286_s19 = scalar_lea.vmem %s14462_s3, %s14430_s29  ;;  %s306_s10 = scalar_lea.vmem %s14464_s5, %s14430_s29 }
 0x3f1   : > { %v6909_v51 = vpack.c.bf16 %v3428_v1, %v3427_v31  ;;  %v7349_v2 = vunpack.i.l.bf16 %v15340_v45  ;;  %v7430_v38 = vunpack.i.h.bf16 %v15343_v57  ;;  %v7429_v3 = vunpack.i.l.bf16 %v15343_v57  ;;  %v15344_v1 = vld [vmem:[#allocation90_spill] sm:$0xff]  ;;  %s296_s13 = scalar_lea.vmem %s14463_s4, %s14430_s29 }
 0x3f2   : > { %5488 = vperm.xlu1 %9222, %v5478_v34   ;;  %v15341_v34 = vunpack.i.l.bf16 %v13394_v37  ;;  %5498 = vperm.xlu0 %9221, %v5480_v24   ;;  %v3165_v31 = vsel %vm3146_vm6, %v3132_v25, %v7189_v29  ;;  %v3166_v28 = vsel %vm3146_vm6, %v3133_v55, %v7190_v63  ;;  %v7670_v63 = vunpack.i.h.bf16 %v15346_v27  ;;  %v15348_v24 = vld [vmem:[#allocation6_spill] sm:$0xff] }
 0x3f3   : > { %v7194_v44 = vunpack.i.l.bf16 %v15348_v24 }
 0x3f6   : > { %5493 = vperm.xlu1 %9222, %v5479_v9   ;;  %v15347_v9 = vld [vmem:[#allocation138_spill] sm:$0xff] }
 0x3f7   : > { %v7750_v29 = vunpack.i.h.bf16 %v15347_v9 }
 0x3f9   : > { %v9103_v13 = vpop.permute.xlu0 %9102 }
 0x3fa   : > { %v9105_v18 = vunpack.i.h.bf16 %v9103_v13  ;;  %v9104_v49 = vunpack.i.l.bf16 %v9103_v13  ;;  %v7350_v13 = vunpack.i.h.bf16 %v15340_v45 }
 0x3fc   : > { %v5449_v15 = vsel %vm5368_vm15, %v15333_v4, %v9104_v49  ;;  %v5450_v39 = vsel %vm5368_vm15, %v15334_v6, %v9105_v18  ;;  %v5385_v8 = vsel %vm5368_vm15, %v9104_v49, %v9109_v22  ;;  %v5386_v11 = vsel %vm5368_vm15, %v9105_v18, %v9110_v53  ;;  %v15338_v53 = vld [vmem:[#allocation39_spill] sm:$0xff] }
 0x3fd   : > { %v9113_v14 = vpop.permute.xlu0 %9112  ;;  %v6907_v62 = vpack.c.bf16 %v5450_v39, %v5449_v15  ;;  %v6939_v21 = vpack.c.bf16 %v5386_v11, %v5385_v8  ;;  %v7115_v22 = vunpack.i.h.bf16 %v15338_v53  ;;  %v15342_v49 = vunpack.i.h.bf16 %v13394_v37  ;;  %v15345_v39 = vld [vmem:[#allocation106_spill] sm:$0xff] }
 0x3fe   : > { %v9115_v35 = vunpack.i.h.bf16 %v9113_v14  ;;  %v9114_v17 = vunpack.i.l.bf16 %v9113_v14  ;;  %v7114_v40 = vunpack.i.l.bf16 %v15338_v53  ;;  %v7510_v4 = vunpack.i.h.bf16 %v15344_v1 }
 0x3ff   : > { %6908 = vmatprep.subr.bf16.mxu1 %v6907_v62  ;;  %6941 = vmatprep.subr.msk.bf16.mxu0 %vm13950_vm1, %v6939_v21  ;;  %v7509_v37 = vunpack.i.l.bf16 %v15344_v1  ;;  %v3198_v15 = vsel %vm3179_vm7, %v3165_v31, %v7269_v60  ;;  %v3199_v6 = vsel %vm3179_vm7, %v3166_v28, %v7270_v30  ;;  %v7590_v8 = vunpack.i.h.bf16 %v15345_v39  ;;  %v15349_v31 = vld [vmem:[#allocation26_spill] sm:$0xff] }
 0x400   : > { %6910 = vmatpush1.bf16.xpose.msra.mxu1 %v6909_v51  ;;  %v5369_v18 = vsel %vm5368_vm15, %v15341_v34, %v9114_v17  ;;  %v5370_v42 = vsel %vm5368_vm15, %v15342_v49, %v9115_v35  ;;  %v7589_v11 = vunpack.i.l.bf16 %v15345_v39  ;;  %v3231_v32 = vsel %vm3212_vm8, %v3198_v15, %v7349_v2  ;;  %v9294_v17 = vld [vmem:[%s9432_s30 + $0x180] sm:$0xff] }
 0x401   : > { %v6942_v52 = vpack.c.bf16 %v5370_v42, %v5369_v18  ;;  %v3232_v25 = vsel %vm3212_vm8, %v3199_v6, %v7350_v13  ;;  %v7669_v14 = vunpack.i.l.bf16 %v15346_v27  ;;  %v3264_v62 = vsel %vm3245_vm9, %v3231_v32, %v7429_v3  ;;  %v15350_v1 = vld [vmem:[#allocation154_spill] sm:$0xff] }
 0x402   : > { %v3265_v21 = vsel %vm3245_vm9, %v3232_v25, %v7430_v38  ;;  %v7749_v35 = vunpack.i.l.bf16 %v15347_v9  ;;  %v3134_v51 = vsel %vm3113_vm5, %v9294_v17, %v7114_v40  ;;  %v3297_v55 = vsel %vm3278_vm10, %v3264_v62, %v7509_v37  ;;  %v15354_v25 = vld [vmem:[#allocation194_spill] sm:$0xff] }
 0x403   : > { %6944 = vmatpush3.bf16.xpose.msk.msra.mxu0 %vm13950_vm1, %v6942_v52  ;;  %v3298_v53 = vsel %vm3278_vm10, %v3265_v21, %v7510_v4  ;;  %v3135_v30 = vsel %vm3113_vm5, %v9295_v41, %v7115_v22  ;;  %v7195_v60 = vunpack.i.h.bf16 %v15348_v24  ;;  %v3330_v45 = vsel %vm3311_vm11, %v3297_v55, %v7589_v11  ;;  %v9123_v2 = vpop.permute.xlu0 %9122  ;;  %v15353_v11 = vld [vmem:[#allocation193_spill] sm:$0xff] }
 0x404   : > { %v3331_v13 = vsel %vm3311_vm11, %v3298_v53, %v7590_v8  ;;  %v3363_v34 = vsel %vm3344_vm12, %v3330_v45, %v7669_v14  ;;  %v9125_v49 = vunpack.i.h.bf16 %v9123_v2  ;;  %v9124_v42 = vunpack.i.l.bf16 %v9123_v2  ;;  %v15355_v14 = vld [vmem:[#allocation61_spill] sm:$0xff] }
 0x405   : > { %v3364_v18 = vsel %vm3344_vm12, %v3331_v13, %v7670_v63  ;;  %v3396_v3 = vsel %vm3377_vm13, %v3363_v34, %v7749_v35  ;;  %v3167_v52 = vsel %vm3146_vm6, %v3134_v51, %v7194_v44  ;;  %v7274_v28 = vunpack.i.l.bf16 %v15349_v31  ;;  %v15356_v53 = vld [vmem:[#allocation77_spill] sm:$0xff] }
 0x406   : > { %v3397_v22 = vsel %vm3377_vm13, %v3364_v18, %v7750_v29  ;;  %v15351_v4 = vunpack.i.l.bf16 %v15350_v1  ;;  %v15352_v15 = vunpack.i.h.bf16 %v15350_v1  ;;  %v7275_v63 = vunpack.i.h.bf16 %v15349_v31  ;;  %v15357_v13 = vld [vmem:[#allocation93_spill] sm:$0xff] }
 0x407   : > { %v7355_v62 = vunpack.i.h.bf16 %v15355_v14  ;;  %v7354_v35 = vunpack.i.l.bf16 %v15355_v14  ;;  %v3168_v44 = vsel %vm3146_vm6, %v3135_v30, %v7195_v60  ;;  %v3200_v55 = vsel %vm3179_vm7, %v3167_v52, %v7274_v28  ;;  %v15360_v31 = vld [vmem:[#allocation141_spill] sm:$0xff] }
 0x408   : > { %v9118_v40 = vpop.permute.xlu1 %9117  ;;  %v3429_v37 = vsel %vm3410_vm14, %v3396_v3, %v15351_v4  ;;  %v3430_v6 = vsel %vm3410_vm14, %v3397_v22, %v15352_v15  ;;  %v7435_v41 = vunpack.i.h.bf16 %v15356_v53  ;;  %v7434_v45 = vunpack.i.l.bf16 %v15356_v53  ;;  %v15359_v22 = vld [vmem:[#allocation125_spill] sm:$0xff] }
 0x409   : > { %v9120_v57 = vunpack.i.h.bf16 %v9118_v40  ;;  %v9119_v38 = vunpack.i.l.bf16 %v9118_v40  ;;  %v6913_v24 = vpack.c.bf16 %v3430_v6, %v3429_v37  ;;  %v7515_v2 = vunpack.i.h.bf16 %v15357_v13 }
 0x40a   : > { %v7514_v34 = vunpack.i.l.bf16 %v15357_v13  ;;  %v3201_v60 = vsel %vm3179_vm7, %v3168_v44, %v7275_v63  ;;  %v7675_v52 = vunpack.i.h.bf16 %v15359_v22  ;;  %v7755_v28 = vunpack.i.h.bf16 %v15360_v31 }
 0x40b   : > { %v5387_v39 = vsel %vm5368_vm15, %v9119_v38, %v9124_v42  ;;  %v5388_v8 = vsel %vm5368_vm15, %v9120_v57, %v9125_v49  ;;  %v5451_v32 = vsel %vm5368_vm15, %v15353_v11, %v9119_v38  ;;  %v5452_v27 = vsel %vm5368_vm15, %v15354_v25, %v9120_v57  ;;  %v15358_v49 = vld [vmem:[#allocation109_spill] sm:$0xff] }
 0x40c   : > { %v6945_v21 = vpack.c.bf16 %v5388_v8, %v5387_v39  ;;  %v9128_v9 = vpop.permute.xlu1 %9127  ;;  %v6911_v29 = vpack.c.bf16 %v5452_v27, %v5451_v32  ;;  %v7595_v42 = vunpack.i.h.bf16 %v15358_v49  ;;  %v7594_v40 = vunpack.i.l.bf16 %v15358_v49  ;;  %v15361_v32 = vld [vmem:[#allocation38_spill] sm:$0xff] }
 0x40d   : > { %v9130_v17 = vunpack.i.h.bf16 %v9128_v9  ;;  %v9129_v51 = vunpack.i.l.bf16 %v9128_v9  ;;  %v3233_v38 = vsel %vm3212_vm8, %v3200_v55, %v7354_v35  ;;  %v3234_v3 = vsel %vm3212_vm8, %v3201_v60, %v7355_v62  ;;  %v15367_v60 = vld [vmem:[#allocation8_spill] sm:$0xff] }
 0x40e   : > { %6912 = vmatprep.subr.bf16.mxu1 %v6911_v29  ;;  %6947 = vmatprep.subr.msk.bf16.mxu0 %vm13950_vm1, %v6945_v21  ;;  %v3266_v59 = vsel %vm3245_vm9, %v3233_v38, %v7434_v45  ;;  %v7754_v1 = vunpack.i.l.bf16 %v15360_v31  ;;  %v7119_v25 = vunpack.i.l.bf16 %v15361_v32  ;;  %v7120_v35 = vunpack.i.h.bf16 %v15361_v32  ;;  %v15365_v45 = vld [vmem:[#allocation199_spill] sm:$0xff]  ;;  %v15371_v32 = vld [vmem:[#allocation76_spill] sm:$0xff] }
 0x40f   : > { %v5372_v18 = vsel %vm5368_vm15, %v8865_v20, %v9130_v17  ;;  %v5371_v30 = vsel %vm5368_vm15, %v8864_v33, %v9129_v51  ;;  %6914 = vmatpush1.bf16.xpose.msra.mxu1 %v6913_v24  ;;  %v7674_v20 = vunpack.i.l.bf16 %v15359_v22  ;;  %v3267_v33 = vsel %vm3245_vm9, %v3234_v3, %v7435_v41  ;;  %v15362_v17 = vld [vmem:[#allocation157_spill] sm:$0xff] }
 0x410   : > { %v6948_v57 = vpack.c.bf16 %v5372_v18, %v5371_v30  ;;  %v9138_v4 = vpop.permute.xlu1 %9137  ;;  %v3299_v37 = vsel %vm3278_vm10, %v3266_v59, %v7514_v34  ;;  %v3300_v15 = vsel %vm3278_vm10, %v3267_v33, %v7515_v2  ;;  %v15363_v51 = vunpack.i.l.bf16 %v15362_v17  ;;  %v15366_v2 = vld [vmem:[#allocation200_spill] sm:$0xff]  ;;  %v9296_v18 = vld [vmem:[%s9432_s30 + $0x1a0] sm:$0xff]  ;;  %v15368_v33 = vld [vmem:[#allocation41_spill] sm:$0xff] }
 0x411   : > { %v3332_v6 = vsel %vm3311_vm11, %v3299_v37, %v7594_v40  ;;  %v3333_v39 = vsel %vm3311_vm11, %v3300_v15, %v7595_v42  ;;  %v9140_v8 = vunpack.i.h.bf16 %v9138_v4  ;;  %v9139_v11 = vunpack.i.l.bf16 %v9138_v4  ;;  %v15370_v37 = vld [vmem:[#allocation60_spill] sm:$0xff] }
 0x412   : > { %6950 = vmatpush3.bf16.xpose.msk.msra.mxu0 %vm13950_vm1, %v6948_v57  ;;  %v3365_v27 = vsel %vm3344_vm12, %v3332_v6, %v7674_v20  ;;  %v3366_v63 = vsel %vm3344_vm12, %v3333_v39, %v7675_v52  ;;  %v15364_v44 = vunpack.i.h.bf16 %v15362_v17  ;;  %v3136_v30 = vsel %vm3113_vm5, %v9296_v18, %v7119_v25  ;;  %v9297_v20 = vld [vmem:[%s9432_s30 + $0x1b0] sm:$0xff] }
 0x413   : > { %v3398_v9 = vsel %vm3377_vm13, %v3365_v27, %v7754_v1  ;;  %v3399_v29 = vsel %vm3377_vm13, %v3366_v63, %v7755_v28  ;;  %v7200_v49 = vunpack.i.h.bf16 %v15367_v60  ;;  %v7199_v38 = vunpack.i.l.bf16 %v15367_v60  ;;  %v15369_v28 = vld [vmem:[#allocation24_spill] sm:$0xff] }
 0x414   : > { %v3431_v24 = vsel %vm3410_vm14, %v3398_v9, %v15363_v51  ;;  %v3432_v55 = vsel %vm3410_vm14, %v3399_v29, %v15364_v44  ;;  %v3137_v59 = vsel %vm3113_vm5, %v9297_v20, %v7120_v35  ;;  %v7125_v31 = vunpack.i.h.bf16 %v15368_v33  ;;  %v335_v29 = vld [vmem:[%s9432_s30 + $0x1e0] sm:$0xff]  ;;  %v15373_v35 = vld [vmem:[#allocation108_spill] sm:$0xff] }
 0x415   : > { %v9133_v14 = vpop.permute.xlu0 %9132  ;;  %v6917_v52 = vpack.c.bf16 %v3432_v55, %v3431_v24  ;;  %v7280_v1 = vunpack.i.h.bf16 %v15369_v28  ;;  %v7279_v4 = vunpack.i.l.bf16 %v15369_v28  ;;  %v7360_v15 = vunpack.i.h.bf16 %v15370_v37  ;;  %v15374_v55 = vld [vmem:[#allocation124_spill] sm:$0xff] }
 0x416   : > { %v9135_v62 = vunpack.i.h.bf16 %v9133_v14  ;;  %v9134_v21 = vunpack.i.l.bf16 %v9133_v14  ;;  %v7359_v6 = vunpack.i.l.bf16 %v15370_v37  ;;  %v7440_v25 = vunpack.i.h.bf16 %v15371_v32  ;;  %v15376_v60 = vld [vmem:[#allocation12_spill] sm:$0xff] }
 0x417   : > { %v7439_v27 = vunpack.i.l.bf16 %v15371_v32  ;;  %v3169_v14 = vsel %vm3146_vm6, %v3136_v30, %v7199_v38  ;;  %v7600_v17 = vunpack.i.h.bf16 %v15373_v35  ;;  %v7599_v51 = vunpack.i.l.bf16 %v15373_v35  ;;  %v15378_v32 = vld [vmem:[#allocation156_spill] sm:$0xff]  ;;  %v15383_v35 = vld [vmem:[#allocation63_spill] sm:$0xff] }
 0x418   : > { %v5390_v53 = vsel %vm5368_vm15, %v9135_v62, %v9140_v8  ;;  %v5389_v41 = vsel %vm5368_vm15, %v9134_v21, %v9139_v11  ;;  %v5453_v13 = vsel %vm5368_vm15, %v15365_v45, %v9134_v21  ;;  %v5454_v34 = vsel %vm5368_vm15, %v15366_v2, %v9135_v62  ;;  %v15372_v21 = vld [vmem:[#allocation92_spill] sm:$0xff] }
 0x419   : > { %v6951_v42 = vpack.c.bf16 %v5390_v53, %v5389_v41  ;;  %v9143_v40 = vpop.permute.xlu0 %9142  ;;  %v6915_v57 = vpack.c.bf16 %v5454_v34, %v5453_v13  ;;  %v7124_v11 = vunpack.i.l.bf16 %v15368_v33  ;;  %v3170_v62 = vsel %vm3146_vm6, %v3137_v59, %v7200_v49  ;;  %v15375_v2 = vld [vmem:[#allocation140_spill] sm:$0xff] }
 0x41a   : > { %v9145_v3 = vunpack.i.h.bf16 %v9143_v40  ;;  %v9144_v22 = vunpack.i.l.bf16 %v9143_v40  ;;  %v7520_v9 = vunpack.i.h.bf16 %v15372_v21  ;;  %v3202_v7 = vsel %vm3179_vm7, %v3169_v14, %v7279_v4 }
 0x41b   : > { %6916 = vmatprep.subr.bf16.mxu1 %v6915_v57  ;;  %6953 = vmatprep.subr.msk.bf16.mxu0 %vm13950_vm1, %v6951_v42  ;;  %v3235_v24 = vsel %vm3212_vm8, %v3202_v7, %v7359_v6  ;;  %v7680_v53 = vunpack.i.h.bf16 %v15374_v55  ;;  %v7679_v41 = vunpack.i.l.bf16 %v15374_v55  ;;  %v7760_v34 = vunpack.i.h.bf16 %v15375_v2  ;;  %v9298_v57 = vld [vmem:[%s9432_s30 + $0x1f0] sm:$0xff] }
 0x41c   : > { %v5374_v39 = vsel %vm5368_vm15, %v8900_v61, %v9145_v3  ;;  %v5373_v8 = vsel %vm5368_vm15, %v8899_v5, %v9144_v22  ;;  %6918 = vmatpush1.bf16.xpose.msra.mxu1 %v6917_v52  ;;  %v7519_v61 = vunpack.i.l.bf16 %v15372_v21  ;;  %v3203_v5 = vsel %vm3179_vm7, %v3170_v62, %v7280_v1 }
 0x41d   : > { %v6954_v63 = vpack.c.bf16 %v5374_v39, %v5373_v8  ;;  %v3236_v44 = vsel %vm3212_vm8, %v3203_v5, %v7360_v15  ;;  %v3268_v45 = vsel %vm3245_vm9, %v3235_v24, %v7439_v27  ;;  %v7759_v18 = vunpack.i.l.bf16 %v15375_v2  ;;  %v15377_v8 = vld [vmem:[#allocation27_spill] sm:$0xff] }
 0x41e   : > { %v3269_v13 = vsel %vm3245_vm9, %v3236_v44, %v7440_v25  ;;  %v3138_v30 = vsel %vm3113_vm5, %v335_v29, %v7124_v11  ;;  %v7204_v49 = vunpack.i.l.bf16 %v15376_v60  ;;  %v3301_v42 = vsel %vm3278_vm10, %v3268_v45, %v7519_v61  ;;  %v15382_v29 = vld [vmem:[#allocation198_spill] sm:$0xff] }
 0x41f   : > { %6956 = vmatpush3.bf16.xpose.msk.msra.mxu0 %vm13950_vm1, %v6954_v63  ;;  %v3302_v40 = vsel %vm3278_vm10, %v3269_v13, %v7520_v9  ;;  %v3139_v38 = vsel %vm3113_vm5, %v9298_v57, %v7125_v31  ;;  %v7205_v3 = vunpack.i.h.bf16 %v15376_v60  ;;  %v3334_v22 = vsel %vm3311_vm11, %v3301_v42, %v7599_v51  ;;  %v9153_v20 = vpop.permute.xlu0 %9152  ;;  %v15381_v9 = vld [vmem:[#allocation197_spill] sm:$0xff]  ;;  %v15385_v60 = vld [vmem:[#allocation95_spill] sm:$0xff] }
 0x420   : > { %v3335_v52 = vsel %vm3311_vm11, %v3302_v40, %v7600_v17  ;;  %v3367_v59 = vsel %vm3344_vm12, %v3334_v22, %v7679_v41  ;;  %v9155_v28 = vunpack.i.h.bf16 %v9153_v20  ;;  %v9154_v1 = vunpack.i.l.bf16 %v9153_v20 }
 0x421   : > { %v3368_v33 = vsel %vm3344_vm12, %v3335_v52, %v7680_v53  ;;  %v3400_v6 = vsel %vm3377_vm13, %v3367_v59, %v7759_v18  ;;  %v3171_v39 = vsel %vm3146_vm6, %v3138_v30, %v7204_v49  ;;  %v7284_v11 = vunpack.i.l.bf16 %v15377_v8 }
 0x422   : > { %v3401_v31 = vsel %vm3377_vm13, %v3368_v33, %v7760_v34  ;;  %v15379_v25 = vunpack.i.l.bf16 %v15378_v32  ;;  %v15380_v63 = vunpack.i.h.bf16 %v15378_v32  ;;  %v7285_v5 = vunpack.i.h.bf16 %v15377_v8  ;;  %v15384_v34 = vld [vmem:[#allocation79_spill] sm:$0xff] }
 0x423   : > { %v7365_v17 = vunpack.i.h.bf16 %v15383_v35  ;;  %v7364_v55 = vunpack.i.l.bf16 %v15383_v35  ;;  %v3172_v13 = vsel %vm3146_vm6, %v3139_v38, %v7205_v3  ;;  %v3204_v2 = vsel %vm3179_vm7, %v3171_v39, %v7284_v11  ;;  %v15386_v3 = vld [vmem:[#allocation111_spill] sm:$0xff] }
 0x424   : > { %v9148_v4 = vpop.permute.xlu1 %9147  ;;  %v3433_v27 = vsel %vm3410_vm14, %v3400_v6, %v15379_v25  ;;  %v3434_v14 = vsel %vm3410_vm14, %v3401_v31, %v15380_v63  ;;  %v7445_v18 = vunpack.i.h.bf16 %v15384_v34  ;;  %v7444_v30 = vunpack.i.l.bf16 %v15384_v34  ;;  %v15390_v35 = vld [vmem:[#allocation159_spill] sm:$0xff]  ;;  %v9299_v34 = vld [vmem:[%s9432_s30 + $0x200] sm:$0xff] }
 0x425   : > { %v9150_v37 = vunpack.i.h.bf16 %v9148_v4  ;;  %v9149_v15 = vunpack.i.l.bf16 %v9148_v4  ;;  %v6921_v45 = vpack.c.bf16 %v3434_v14, %v3433_v27  ;;  %v7525_v49 = vunpack.i.h.bf16 %v15385_v60  ;;  %v15388_v4 = vld [vmem:[#allocation143_spill] sm:$0xff]  ;;  %v15389_v27 = vld [vmem:[#allocation40_spill] sm:$0xff] }
 0x426   : > { %v7524_v42 = vunpack.i.l.bf16 %v15385_v60  ;;  %v3205_v38 = vsel %vm3179_vm7, %v3172_v13, %v7285_v5  ;;  %v7605_v22 = vunpack.i.h.bf16 %v15386_v3  ;;  %v7604_v52 = vunpack.i.l.bf16 %v15386_v3  ;;  %v15394_v13 = vld [vmem:[#allocation204_spill] sm:$0xff] }
 0x427   : > { %v5391_v62 = vsel %vm5368_vm15, %v9149_v15, %v9154_v1  ;;  %v5392_v21 = vsel %vm5368_vm15, %v9150_v37, %v9155_v28  ;;  %v5455_v61 = vsel %vm5368_vm15, %v15381_v9, %v9149_v15  ;;  %v5456_v7 = vsel %vm5368_vm15, %v15382_v29, %v9150_v37  ;;  %v15387_v28 = vld [vmem:[#allocation127_spill] sm:$0xff] }
 0x428   : > { %v6957_v51 = vpack.c.bf16 %v5392_v21, %v5391_v62  ;;  %v9158_v24 = vpop.permute.xlu1 %9157  ;;  %v6919_v44 = vpack.c.bf16 %v5456_v7, %v5455_v61  ;;  %v3237_v59 = vsel %vm3212_vm8, %v3204_v2, %v7364_v55  ;;  %v3238_v33 = vsel %vm3212_vm8, %v3205_v38, %v7365_v17 }
 0x429   : > { %v9160_v53 = vunpack.i.h.bf16 %v9158_v24  ;;  %v9159_v41 = vunpack.i.l.bf16 %v9158_v24  ;;  %v7685_v1 = vunpack.i.h.bf16 %v15387_v28  ;;  %v3270_v12 = vsel %vm3245_vm9, %v3237_v59, %v7444_v30  ;;  %v15395_v30 = vld [vmem:[#allocation10_spill] sm:$0xff]  ;;  %v15396_v59 = vld [vmem:[#allocation43_spill] sm:$0xff] }
 0x42a   : > { %6920 = vmatprep.subr.bf16.mxu1 %v6919_v44  ;;  %6959 = vmatprep.subr.msk.bf16.mxu0 %vm13950_vm1, %v6957_v51  ;;  %v7765_v37 = vunpack.i.h.bf16 %v15388_v4  ;;  %v7764_v15 = vunpack.i.l.bf16 %v15388_v4  ;;  %v3303_v31 = vsel %vm3278_vm10, %v3270_v12, %v7524_v42  ;;  %v7129_v63 = vunpack.i.l.bf16 %v15389_v27  ;;  %v15398_v12 = vld [vmem:[#allocation62_spill] sm:$0xff] }
 0x42b   : > { %v5376_v40 = vsel %vm5368_vm15, %v8935_v19, %v9160_v53  ;;  %v5375_v57 = vsel %vm5368_vm15, %v8934_v50, %v9159_v41  ;;  %6922 = vmatpush1.bf16.xpose.msra.mxu1 %v6921_v45  ;;  %v7684_v19 = vunpack.i.l.bf16 %v15387_v28  ;;  %v3271_v50 = vsel %vm3245_vm9, %v3238_v33, %v7445_v18  ;;  %v15393_v41 = vld [vmem:[#allocation203_spill] sm:$0xff] }
 0x42c   : > { %v6960_v20 = vpack.c.bf16 %v5376_v40, %v5375_v57  ;;  %v9168_v6 = vpop.permute.xlu1 %9167  ;;  %v3304_v39 = vsel %vm3278_vm10, %v3271_v50, %v7525_v49  ;;  %v3336_v8 = vsel %vm3311_vm11, %v3303_v31, %v7604_v52  ;;  %v7130_v5 = vunpack.i.h.bf16 %v15389_v27  ;;  %v9300_v52 = vld [vmem:[%s9432_s30 + $0x210] sm:$0xff]  ;;  %v15397_v28 = vld [vmem:[#allocation23_spill] sm:$0xff]  ;;  %v15399_v31 = vld [vmem:[#allocation78_spill] sm:$0xff] }
 0x42d   : > { %v3337_v11 = vsel %vm3311_vm11, %v3304_v39, %v7605_v22  ;;  %v9170_v32 = vunpack.i.h.bf16 %v9168_v6  ;;  %v9169_v25 = vunpack.i.l.bf16 %v9168_v6  ;;  %v3369_v14 = vsel %vm3344_vm12, %v3336_v8, %v7684_v19  ;;  %v15400_v27 = vld [vmem:[#allocation94_spill] sm:$0xff] }
 0x42e   : > { %6962 = vmatpush3.bf16.xpose.msk.msra.mxu0 %vm13950_vm1, %v6960_v20  ;;  %v3370_v62 = vsel %vm3344_vm12, %v3337_v11, %v7685_v1  ;;  %v3402_v29 = vsel %vm3377_vm13, %v3369_v14, %v7764_v15  ;;  %v15391_v17 = vunpack.i.l.bf16 %v15390_v35  ;;  %v15392_v24 = vunpack.i.h.bf16 %v15390_v35  ;;  %v15401_v14 = vld [vmem:[#allocation110_spill] sm:$0xff] }
 0x42f   : > { %v3403_v7 = vsel %vm3377_vm13, %v3370_v62, %v7765_v37  ;;  %v3140_v18 = vsel %vm3113_vm5, %v9299_v34, %v7129_v63  ;;  %v7210_v60 = vunpack.i.h.bf16 %v15395_v30  ;;  %v7209_v57 = vunpack.i.l.bf16 %v15395_v30  ;;  %v9302_v34 = vld [vmem:[%s9432_s30 + $0x230] sm:$0xff] }
 0x430   : > { %v3435_v51 = vsel %vm3410_vm14, %v3402_v29, %v15391_v17  ;;  %v3436_v44 = vsel %vm3410_vm14, %v3403_v7, %v15392_v24  ;;  %v3141_v20 = vsel %vm3113_vm5, %v9300_v52, %v7130_v5  ;;  %v7135_v33 = vunpack.i.h.bf16 %v15396_v59  ;;  %v15402_v29 = vld [vmem:[#allocation126_spill] sm:$0xff] }
 0x431   : > { %v6925_v22 = vpack.c.bf16 %v3436_v44, %v3435_v51  ;;  %v7290_v1 = vunpack.i.h.bf16 %v15397_v28  ;;  %v7289_v19 = vunpack.i.l.bf16 %v15397_v28  ;;  %v7370_v50 = vunpack.i.h.bf16 %v15398_v12  ;;  %v15403_v51 = vld [vmem:[#allocation142_spill] sm:$0xff] }
 0x432   : > { %v9163_v21 = vpop.permute.xlu0 %9162  ;;  %v7369_v4 = vunpack.i.l.bf16 %v15398_v12  ;;  %v7134_v6 = vunpack.i.l.bf16 %v15396_v59  ;;  %v7450_v39 = vunpack.i.h.bf16 %v15399_v31  ;;  %v7449_v8 = vunpack.i.l.bf16 %v15399_v31  ;;  %v15406_v12 = vld [vmem:[#allocation158_spill] sm:$0xff] }
 0x433   : > { %v9165_v9 = vunpack.i.h.bf16 %v9163_v21  ;;  %v9164_v61 = vunpack.i.l.bf16 %v9163_v21  ;;  %v7530_v63 = vunpack.i.h.bf16 %v15400_v27  ;;  %v7610_v62 = vunpack.i.h.bf16 %v15401_v14 }
 0x434   : > { %v7609_v21 = vunpack.i.l.bf16 %v15401_v14  ;;  %v7690_v7 = vunpack.i.h.bf16 %v15402_v29  ;;  %v7689_v5 = vunpack.i.l.bf16 %v15402_v29  ;;  %v7770_v24 = vunpack.i.h.bf16 %v15403_v51 }
 0x435   : > { %v5394_v55 = vsel %vm5368_vm15, %v9165_v9, %v9170_v32  ;;  %v5393_v53 = vsel %vm5368_vm15, %v9164_v61, %v9169_v25  ;;  %v5457_v45 = vsel %vm5368_vm15, %v15393_v41, %v9164_v61  ;;  %v5458_v2 = vsel %vm5368_vm15, %v15394_v13, %v9165_v9  ;;  %v15404_v41 = vld [vmem:[#allocation14_spill] sm:$0xff] }
 0x436   : > { %v6963_v49 = vpack.c.bf16 %v5394_v55, %v5393_v53  ;;  %v9173_v42 = vpop.permute.xlu0 %9172  ;;  %v6923_v40 = vpack.c.bf16 %v5458_v2, %v5457_v45  ;;  %v3173_v32 = vsel %vm3146_vm6, %v3140_v18, %v7209_v57  ;;  %v3174_v25 = vsel %vm3146_vm6, %v3141_v20, %v7210_v60  ;;  %v9301_v55 = vld [vmem:[%s9432_s30 + $0x220] sm:$0xff] }
 0x437   : > { %v9175_v38 = vunpack.i.h.bf16 %v9173_v42  ;;  %v9174_v3 = vunpack.i.l.bf16 %v9173_v42  ;;  %v3206_v58 = vsel %vm3179_vm7, %v3173_v32, %v7289_v19  ;;  %v7769_v44 = vunpack.i.l.bf16 %v15403_v51 }
 0x438   : > { %6924 = vmatprep.subr.bf16.mxu1 %v6923_v40  ;;  %6965 = vmatprep.subr.msk.bf16.mxu0 %vm13950_vm1, %v6963_v49  ;;  %v3239_v9 = vsel %vm3212_vm8, %v3206_v58, %v7369_v4  ;;  %v3142_v53 = vsel %vm3113_vm5, %v9301_v55, %v7134_v6  ;;  %v7214_v45 = vunpack.i.l.bf16 %v15404_v41  ;;  %v3143_v18 = vsel %vm3113_vm5, %v9302_v34, %v7135_v33 }
 0x439   : > { %v5378_v37 = vsel %vm5368_vm15, %v8970_v54, %v9175_v38  ;;  %v5377_v15 = vsel %vm5368_vm15, %v8969_v56, %v9174_v3  ;;  %6926 = vmatpush1.bf16.xpose.msra.mxu1 %v6925_v22  ;;  %v7529_v54 = vunpack.i.l.bf16 %v15400_v27  ;;  %v3207_v56 = vsel %vm3179_vm7, %v3174_v25, %v7290_v1  ;;  %v15405_v1 = vld [vmem:[#allocation49_spill] sm:$0xff] }
 0x43a   : > { %v6966_v11 = vpack.c.bf16 %v5378_v37, %v5377_v15  ;;  %v3240_v61 = vsel %vm3212_vm8, %v3207_v56, %v7370_v50  ;;  %v3272_v35 = vsel %vm3245_vm9, %v3239_v9, %v7449_v8  ;;  %v7215_v30 = vunpack.i.h.bf16 %v15404_v41  ;;  %v15411_v27 = vld [vmem:[#allocation65_spill] sm:$0xff] }
 0x43b   : > { %v3273_v17 = vsel %vm3245_vm9, %v3240_v61, %v7450_v39  ;;  %v3305_v13 = vsel %vm3278_vm10, %v3272_v35, %v7529_v54  ;;  %v9183_v42 = vpop.permute.xlu0 %9182  ;;  %v3175_v28 = vsel %vm3146_vm6, %v3142_v53, %v7214_v45  ;;  %v7294_v19 = vunpack.i.l.bf16 %v15405_v1  ;;  %v15409_v39 = vld [vmem:[#allocation201_spill] sm:$0xff] }
 0x43c   : > { %6968 = vmatpush3.bf16.xpose.msk.msra.mxu0 %vm13950_vm1, %v6966_v11  ;;  %v3306_v2 = vsel %vm3278_vm10, %v3273_v17, %v7530_v63  ;;  %v3338_v60 = vsel %vm3311_vm11, %v3305_v13, %v7609_v21  ;;  %v9185_v38 = vunpack.i.h.bf16 %v9183_v42  ;;  %v9184_v3 = vunpack.i.l.bf16 %v9183_v42  ;;  %v15410_v11 = vld [vmem:[#allocation202_spill] sm:$0xff]  ;;  %v15413_v17 = vld [vmem:[#allocation97_spill] sm:$0xff] }
 0x43d   : > { %v3339_v49 = vsel %vm3311_vm11, %v3306_v2, %v7610_v62  ;;  %v3371_v40 = vsel %vm3344_vm12, %v3338_v60, %v7689_v5  ;;  %v15407_v50 = vunpack.i.l.bf16 %v15406_v12  ;;  %v15408_v37 = vunpack.i.h.bf16 %v15406_v12  ;;  %v15414_v41 = vld [vmem:[#allocation113_spill] sm:$0xff] }
 0x43e   : > { %v3372_v57 = vsel %vm3344_vm12, %v3339_v49, %v7690_v7  ;;  %v3404_v59 = vsel %vm3377_vm13, %v3371_v40, %v7769_v44  ;;  %v7295_v25 = vunpack.i.h.bf16 %v15405_v1  ;;  %v7375_v63 = vunpack.i.h.bf16 %v15411_v27  ;;  %v15412_v7 = vld [vmem:[#allocation81_spill] sm:$0xff] }
 0x43f   : > { %v3405_v33 = vsel %vm3377_vm13, %v3372_v57, %v7770_v24  ;;  %v3437_v4 = vsel %vm3410_vm14, %v3404_v59, %v15407_v50  ;;  %v7374_v14 = vunpack.i.l.bf16 %v15411_v27  ;;  %v3176_v61 = vsel %vm3146_vm6, %v3143_v18, %v7215_v30  ;;  %v15415_v30 = vld [vmem:[#allocation129_spill] sm:$0xff]  ;;  %v15421_v27 = vld [vmem:[#allocation207_spill] sm:$0xff] }
 0x440   : > { %v3438_v15 = vsel %vm3410_vm14, %v3405_v33, %v15408_v37  ;;  %v3208_v29 = vsel %vm3179_vm7, %v3175_v28, %v7294_v19  ;;  %v7455_v5 = vunpack.i.h.bf16 %v15412_v7  ;;  %v7454_v35 = vunpack.i.l.bf16 %v15412_v7  ;;  %v15416_v49 = vld [vmem:[#allocation145_spill] sm:$0xff]  ;;  %v15417_v37 = vld [vmem:[#allocation42_spill] sm:$0xff] }
 0x441   : > { %v6929_v9 = vpack.c.bf16 %v3438_v15, %v3437_v4  ;;  %v7535_v51 = vunpack.i.h.bf16 %v15413_v17  ;;  %v7534_v24 = vunpack.i.l.bf16 %v15413_v17  ;;  %v3209_v53 = vsel %vm3179_vm7, %v3176_v61, %v7295_v25  ;;  %v9303_v17 = vld [vmem:[%s9432_s30 + $0x240] sm:$0xff] }
 0x442   : > { %v9178_v22 = vpop.permute.xlu1 %9177  ;;  %v7615_v45 = vunpack.i.h.bf16 %v15414_v41  ;;  %v7614_v13 = vunpack.i.l.bf16 %v15414_v41  ;;  %v3241_v34 = vsel %vm3212_vm8, %v3208_v29, %v7374_v14  ;;  %v3242_v18 = vsel %vm3212_vm8, %v3209_v53, %v7375_v63  ;;  %v15423_v14 = vld [vmem:[#allocation9_spill] sm:$0xff]  ;;  %v15425_v53 = vld [vmem:[#allocation64_spill] sm:$0xff] }
 0x443   : > { %v9180_v52 = vunpack.i.h.bf16 %v9178_v22  ;;  %v9179_v20 = vunpack.i.l.bf16 %v9178_v22  ;;  %v7695_v60 = vunpack.i.h.bf16 %v15415_v30  ;;  %v3274_v47 = vsel %vm3245_vm9, %v3241_v34, %v7454_v35  ;;  %v9304_v34 = vld [vmem:[%s9432_s30 + $0x250] sm:$0xff] }
 0x444   : > { %v7775_v42 = vunpack.i.h.bf16 %v15416_v49  ;;  %v7774_v40 = vunpack.i.l.bf16 %v15416_v49  ;;  %v7139_v15 = vunpack.i.l.bf16 %v15417_v37  ;;  %v7219_v29 = vunpack.i.l.bf16 %v15423_v14 }
 0x445   : > { %v5395_v6 = vsel %vm5368_vm15, %v9179_v20, %v9184_v3  ;;  %v5396_v31 = vsel %vm5368_vm15, %v9180_v52, %v9185_v38  ;;  %v5459_v8 = vsel %vm5368_vm15, %v15409_v39, %v9179_v20  ;;  %v5460_v32 = vsel %vm5368_vm15, %v15410_v11, %v9180_v52 }
 0x446   : > { %v6969_v54 = vpack.c.bf16 %v5396_v31, %v5395_v6  ;;  %v9188_v58 = vpop.permute.xlu1 %9187  ;;  %v6927_v56 = vpack.c.bf16 %v5460_v32, %v5459_v8  ;;  %v3307_v38 = vsel %vm3278_vm10, %v3274_v47, %v7534_v24  ;;  %v15418_v6 = vld [vmem:[#allocation161_spill] sm:$0xff]  ;;  %v15424_v24 = vld [vmem:[#allocation48_spill] sm:$0xff]  ;;  %v7380_v41 = vunpack.i.h.bf16 %v15425_v53 }
 0x447   : > { %v9190_v62 = vunpack.i.h.bf16 %v9188_v58  ;;  %v9189_v21 = vunpack.i.l.bf16 %v9188_v58  ;;  %v3340_v22 = vsel %vm3311_vm11, %v3307_v38, %v7614_v13  ;;  %v15419_v31 = vunpack.i.l.bf16 %v15418_v6 }
 0x448   : > { %6928 = vmatprep.subr.bf16.mxu1 %v6927_v56  ;;  %6971 = vmatprep.subr.msk.bf16.mxu0 %vm13950_vm1, %v6969_v54  ;;  %v15420_v8 = vunpack.i.h.bf16 %v15418_v6  ;;  %v15422_v54 = vld [vmem:[#allocation208_spill] sm:$0xff]  ;;  %v7140_v56 = vunpack.i.h.bf16 %v15417_v37 }
 0x449   : > { %v5380_v44 = vsel %vm5368_vm15, %v9005_v36, %v9190_v62  ;;  %v5379_v55 = vsel %vm5368_vm15, %v9004_v46, %v9189_v21  ;;  %6930 = vmatpush1.bf16.xpose.msra.mxu1 %v6929_v9  ;;  %v7694_v36 = vunpack.i.l.bf16 %v15415_v30  ;;  %v3275_v46 = vsel %vm3245_vm9, %v3242_v18, %v7455_v5  ;;  %v15426_v30 = vld [vmem:[#allocation80_spill] sm:$0xff] }
 0x44a   : > { %v6972_v2 = vpack.c.bf16 %v5380_v44, %v5379_v55  ;;  %v9198_v57 = vpop.permute.xlu1 %9197  ;;  %v3308_v3 = vsel %vm3278_vm10, %v3275_v46, %v7535_v51  ;;  %v7220_v62 = vunpack.i.h.bf16 %v15423_v14  ;;  %v3144_v51 = vsel %vm3113_vm5, %v9303_v17, %v7139_v15 }
 0x44b   : > { %v3341_v52 = vsel %vm3311_vm11, %v3308_v3, %v7615_v45  ;;  %v9200_v20 = vunpack.i.h.bf16 %v9198_v57  ;;  %v9199_v59 = vunpack.i.l.bf16 %v9198_v57  ;;  %v3373_v33 = vsel %vm3344_vm12, %v3340_v22, %v7694_v36  ;;  %v15428_v57 = vld [vmem:[#allocation112_spill] sm:$0xff] }
 0x44c   : > { %6974 = vmatpush3.bf16.xpose.msk.msra.mxu0 %vm13950_vm1, %v6972_v2  ;;  %v3374_v28 = vsel %vm3344_vm12, %v3341_v52, %v7695_v60  ;;  %v3406_v50 = vsel %vm3377_vm13, %v3373_v33, %v7774_v40  ;;  %v7300_v44 = vunpack.i.h.bf16 %v15424_v24  ;;  %v7299_v55 = vunpack.i.l.bf16 %v15424_v24 }
 0x44d   : > { %v3407_v4 = vsel %vm3377_vm13, %v3374_v28, %v7775_v42  ;;  %v3439_v39 = vsel %vm3410_vm14, %v3406_v50, %v15419_v31  ;;  %v7379_v45 = vunpack.i.l.bf16 %v15425_v53  ;;  %v3145_v18 = vsel %vm3113_vm5, %v9304_v34, %v7140_v56  ;;  %v15427_v42 = vld [vmem:[#allocation96_spill] sm:$0xff]  ;;  %v5465_v34 = vld [vmem:[%s14460_s1] sm:$0xff] }
 0x44e   : > { %v3440_v11 = vsel %vm3410_vm14, %v3407_v4, %v15420_v8  ;;  %v7460_v60 = vunpack.i.h.bf16 %v15426_v30  ;;  %v7459_v36 = vunpack.i.l.bf16 %v15426_v30  ;;  %v3177_v46 = vsel %vm3146_vm6, %v3144_v51, %v7219_v29  ;;  %v15431_v56 = vld [vmem:[#allocation160_spill] sm:$0xff] }
 0x44f   : > { %v9193_v1 = vpop.permute.xlu0 %9192  ;;  %v6933_v35 = vpack.c.bf16 %v3440_v11, %v3439_v39  ;;  %v3178_v49 = vsel %vm3146_vm6, %v3145_v18, %v7220_v62  ;;  %v7540_v40 = vunpack.i.h.bf16 %v15427_v42  ;;  %v3210_v23 = vsel %vm3179_vm7, %v3177_v46, %v7299_v55  ;;  %v5469_v18 = vld [vmem:[%s14460_s1 + $0x20] sm:$0xff]  ;;  %v5471_v30 = vld [vmem:[%s14460_s1 + $0x30] sm:$0xff]  ;;  %v5476_v46 = vld [vmem:[%s14460_s1 + $0x58] sm:$0xff] }
 0x450   : > { %v9195_v19 = vunpack.i.h.bf16 %v9193_v1  ;;  %v9194_v12 = vunpack.i.l.bf16 %v9193_v1  ;;  %v7620_v38 = vunpack.i.h.bf16 %v15428_v57  ;;  %v7619_v3 = vunpack.i.l.bf16 %v15428_v57 }
 0x451   : > { %v3243_v22 = vsel %vm3212_vm8, %v3210_v23, %v7379_v45  ;;  %v15432_v14 = vunpack.i.l.bf16 %v15431_v56 }
 0x452   : > { %v5398_v32 = vsel %vm5368_vm15, %v9195_v19, %v9200_v20  ;;  %v5397_v25 = vsel %vm5368_vm15, %v9194_v12, %v9199_v59  ;;  %v5461_v63 = vsel %vm5368_vm15, %v15421_v27, %v9194_v12  ;;  %v5462_v58 = vsel %vm5368_vm15, %v15422_v54, %v9195_v19  ;;  %v15429_v20 = vld [vmem:[#allocation128_spill] sm:$0xff] }
 0x453   : > { %v6975_v21 = vpack.c.bf16 %v5398_v32, %v5397_v25  ;;  %v9203_v9 = vpop.permute.xlu0 %9202  ;;  %v6931_v61 = vpack.c.bf16 %v5462_v58, %v5461_v63  ;;  %v7700_v59 = vunpack.i.h.bf16 %v15429_v20  ;;  %v7699_v33 = vunpack.i.l.bf16 %v15429_v20  ;;  %v15430_v19 = vld [vmem:[#allocation144_spill] sm:$0xff] }
 0x454   : > { %v9205_v7 = vunpack.i.h.bf16 %v9203_v9  ;;  %v9204_v5 = vunpack.i.l.bf16 %v9203_v9  ;;  %v3276_v28 = vsel %vm3245_vm9, %v3243_v22, %v7459_v36  ;;  %v7780_v12 = vunpack.i.h.bf16 %v15430_v19  ;;  %v5475_v36 = vld [vmem:[%s14460_s1 + $0x50] sm:$0xff] }
 0x455   : > { %6932 = vmatprep.subr.bf16.mxu1 %v6931_v61  ;;  %6977 = vmatprep.subr.msk.bf16.mxu0 %vm13950_vm1, %v6975_v21  ;;  %v7779_v50 = vunpack.i.l.bf16 %v15430_v19  ;;  %v15433_v21 = vunpack.i.h.bf16 %v15431_v56 }
 0x456   : > { %v5382_v13 = vsel %vm5368_vm15, %v9040_v16, %v9205_v7  ;;  %v5381_v2 = vsel %vm5368_vm15, %v9039_v43, %v9204_v5  ;;  %6934 = vmatpush1.bf16.xpose.msra.mxu1 %v6933_v35  ;;  %v7539_v16 = vunpack.i.l.bf16 %v15427_v42  ;;  %v3211_v43 = vsel %vm3179_vm7, %v3178_v49, %v7300_v44  ;;  %v15434_v7 = vld [vmem:[#allocation205_spill] sm:$0xff]  ;;  %v15435_v35 = vld [vmem:[#allocation206_spill] sm:$0xff] }
 0x457   : > { %v6978_v47 = vpack.c.bf16 %v5382_v13, %v5381_v2  ;;  %v3244_v52 = vsel %vm3212_vm8, %v3211_v43, %v7380_v41  ;;  %v9213_v31 = vpop.permute.xlu0 %9212 }
 0x458   : > { %v3277_v1 = vsel %vm3245_vm9, %v3244_v52, %v7460_v60  ;;  %v3309_v4 = vsel %vm3278_vm10, %v3276_v28, %v7539_v16  ;;  %v9215_v11 = vunpack.i.h.bf16 %v9213_v31  ;;  %v9214_v32 = vunpack.i.l.bf16 %v9213_v31  ;;  %v5473_v60 = vld [vmem:[%s14460_s1 + $0x40] sm:$0xff] }
 0x459   : > { %6980 = vmatpush3.bf16.xpose.msk.msra.mxu0 %vm13950_vm1, %v6978_v47  ;;  %v3310_v37 = vsel %vm3278_vm10, %v3277_v1, %v7540_v40  ;;  %v3342_v15 = vsel %vm3311_vm11, %v3309_v4, %v7619_v3  ;;  %v5474_v47 = vld [vmem:[%s14460_s1 + $0x48] sm:$0xff] }
 0x45a   : > { %v3343_v6 = vsel %vm3311_vm11, %v3310_v37, %v7620_v38  ;;  %v3375_v39 = vsel %vm3344_vm12, %v3342_v15, %v7699_v33 }
 0x45b   : > { %v3376_v8 = vsel %vm3344_vm12, %v3343_v6, %v7700_v59  ;;  %v3408_v54 = vsel %vm3377_vm13, %v3375_v39, %v7779_v50 }
 0x45c   : > { %v9208_v25 = vpop.permute.xlu1 %9207  ;;  %v3409_v58 = vsel %vm3377_vm13, %v3376_v8, %v7780_v12  ;;  %v3441_v62 = vsel %vm3410_vm14, %v3408_v54, %v15432_v14 }
 0x45d   : > { %v9210_v27 = vunpack.i.h.bf16 %v9208_v25  ;;  %v9209_v63 = vunpack.i.l.bf16 %v9208_v25  ;;  %v3442_v9 = vsel %vm3410_vm14, %v3409_v58, %v15433_v21 }
 0x45e   : > { %v6937_v41 = vpack.c.bf16 %v3442_v9, %v3441_v62 }
 0x45f   : > { %v5399_v61 = vsel %vm5368_vm15, %v9209_v63, %v9214_v32  ;;  %v5400_v29 = vsel %vm5368_vm15, %v9210_v27, %v9215_v11  ;;  %v5463_v5 = vsel %vm5368_vm15, %v15434_v7, %v9209_v63  ;;  %v5464_v17 = vsel %vm5368_vm15, %v15435_v35, %v9210_v27 }
 0x460   : > { %v6981_v51 = vpack.c.bf16 %v5400_v29, %v5399_v61  ;;  %v9218_v24 = vpop.permute.xlu1 %9217  ;;  %v6935_v44 = vpack.c.bf16 %v5464_v17, %v5463_v5 }
 0x461   : > { %v9220_v55 = vunpack.i.h.bf16 %v9218_v24  ;;  %v9219_v53 = vunpack.i.l.bf16 %v9218_v24 }
 0x462   : > { %6936 = vmatprep.subr.bf16.mxu1 %v6935_v44  ;;  %6983 = vmatprep.subr.msk.bf16.mxu0 %vm13950_vm1, %v6981_v51 }
 0x463   : > { %v5384_v45 = vsel %vm5368_vm15, %v9075_v26, %v9220_v55  ;;  %v5383_v13 = vsel %vm5368_vm15, %v9074_v0, %v9219_v53  ;;  %6938 = vmatpush1.bf16.xpose.msra.mxu1 %v6937_v41  ;;  %v5470_v26 = vld [vmem:[%s14460_s1 + $0x28] sm:$0xff]  ;;  %v5472_v0 = vld [vmem:[%s14460_s1 + $0x38] sm:$0xff] }
 0x464   : > { %v6984_v2 = vpack.c.bf16 %v5384_v45, %v5383_v13 }
 0x466   : > { %6986 = vmatpush3.bf16.xpose.msk.msra.mxu0 %vm13950_vm1, %v6984_v2 }
 0x46a   : > { %5643 = vmatmul.mubr.f32.vlgmr.msra.gmra.mrb[0].mxu1 %v5465_v34 }
 0x46b   : > { %5648 = vmatprep.mubr.f32.mxu1 %v5469_v18 }
 0x46d   : > { %6868 = vmatmul.mubr.msk.f32.vlgmr.msra.gmra.mrb[0].mxu0 %vm5501_vm0, %v9305_v10  ;;  %v5484_v49 = vpop.permute.xlu0 %5483 }
 0x46e   : > { %5649 = vmatmul.mubr.f32.gmra.mrb[2].mxu1 %v5468_v48  ;;  %6869 = vmatprep.mubr.msk.f32.mxu0 %vm5501_vm0, %v5470_v26 }
 0x46f   : > { %5654 = vmatprep.mubr.f32.mxu1 %v5472_v0  ;;  %v5794_v0 = vld [vmem:[%s286_s19] sm:$0xff] }
 0x471   : > { %6870 = vmatmul.mubr.msk.f32.gmra.mrb[2].mxu0 %vm5501_vm0, %v5470_v26  ;;  %v5489_v23 = vpop.permute.xlu1 %5488  ;;  %v5499_v11 = vpop.permute.xlu0 %5498 }
 0x472   : > { %5655 = vmatmul.mubr.f32.gmra.mrb[4].mxu1 %v5471_v30  ;;  %6871 = vmatprep.mubr.msk.f32.mxu0 %vm5501_vm0, %v5473_v60  ;;  %v5795_v30 = vld [vmem:[%s286_s19 + $0x8] sm:$0xff] }
 0x473   : > { %5660 = vmatprep.mubr.f32.mxu1 %v5475_v36 }
 0x475   : > { %6872 = vmatmul.mubr.msk.f32.gmra.mrb[4].mxu0 %vm5501_vm0, %v5473_v60  ;;  %v5494_v19 = vpop.permute.xlu1 %5493 }
 0x476   : > { %5661 = vmatmul.mubr.f32.gmra.mrb[6].mxu1 %v5474_v47  ;;  %6873 = vmatprep.mubr.msk.f32.mxu0 %vm5501_vm0, %v5476_v46 }
 0x479   : > { %6874 = vmatmul.mubr.msk.f32.gmra.mrb[6].mxu0 %vm5501_vm0, %v5476_v46 }
 0x53d   : > { %v5644_v42 = vpop.f32.mrb[0].mxu1 }
 0x53e   : > { %v5645_v40 = vadd.f32 %v5644_v42, %v5484_v49  ;;  %v5646_v16 = vpop.f32.mrb[1].mxu1 }
 0x53f   : > { %v5647_v43 = vadd.f32 %v5646_v16, %v5484_v49 }
 0x540   : > { %v5733_v57 = vpop.f32.mrb[0].mxu0 }
 0x541   : > { %v5734_v38 = vadd.f32 %v5733_v57, %v5645_v40  ;;  %v5650_v3 = vpop.f32.mrb[2].mxu1  ;;  %v5735_v22 = vpop.f32.mrb[1].mxu0 }
 0x542   : > { %v5651_v52 = vadd.f32 %v5650_v3, %v5489_v23  ;;  %v5736_v20 = vadd.f32 %v5735_v22, %v5647_v43  ;;  %v5652_v59 = vpop.f32.mrb[3].mxu1 }
 0x543   : > { %v6827_v33 = vmul.f32 -1.442695, %v5734_v38  ;;  %v5653_v28 = vadd.f32 %v5652_v59, %v5489_v23 }
 0x544   : > { %v6828_v1 = vmul.f32 -1.442695, %v5736_v20  ;;  %v5739_v12 = vpop.f32.mrb[2].mxu0 }
 0x545   : > { %9223 = vpow2.f32 %v6827_v33  ;;  %v5740_v50 = vadd.f32 %v5739_v12, %v5651_v52  ;;  %v5656_v4 = vpop.f32.mrb[4].mxu1  ;;  %v5741_v37 = vpop.f32.mrb[3].mxu0 }
 0x546   : > { %9225 = vpow2.f32 %v6828_v1  ;;  %v5657_v15 = vadd.f32 %v5656_v4, %v5494_v19  ;;  %v5742_v6 = vadd.f32 %v5741_v37, %v5653_v28  ;;  %v5658_v31 = vpop.f32.mrb[5].mxu1 }
 0x547   : > { %v6829_v39 = vmul.f32 -1.442695, %v5740_v50  ;;  %v5659_v8 = vadd.f32 %v5658_v31, %v5494_v19 }
 0x548   : > { %v6830_v32 = vmul.f32 -1.442695, %v5742_v6  ;;  %v5745_v25 = vpop.f32.mrb[4].mxu0 }
 0x549   : > { %9227 = vpow2.f32 %v6829_v39  ;;  %v5746_v27 = vadd.f32 %v5745_v25, %v5657_v15  ;;  %v5662_v63 = vpop.f32.mrb[6].mxu1  ;;  %v5747_v54 = vpop.f32.mrb[5].mxu0 }
 0x54a   : > { %9229 = vpow2.f32 %v6830_v32  ;;  %v5663_v58 = vadd.f32 %v5662_v63, %v5499_v11  ;;  %v5748_v56 = vadd.f32 %v5747_v54, %v5659_v8  ;;  %v5664_v14 = vpop.f32.mrb[7].mxu1 }
 0x54b   : > { %v6831_v62 = vmul.f32 -1.442695, %v5746_v27  ;;  %v5665_v21 = vadd.f32 %v5664_v14, %v5499_v11 }
 0x54c   : > { %v6832_v9 = vmul.f32 -1.442695, %v5748_v56  ;;  %v5751_v61 = vpop.f32.mrb[6].mxu0 }
 0x54d   : > { %v5752_v29 = vadd.f32 %v5751_v61, %v5663_v58  ;;  %v5753_v7 = vpop.f32.mrb[7].mxu0  ;;  %9231 = vpow2.f32 %v6831_v62 }
 0x54e   : > { %v5754_v5 = vadd.f32 %v5753_v7, %v5665_v21  ;;  %9233 = vpow2.f32 %v6832_v9 }
 0x54f   : > { %v9224_v35 = vpop.eup %9223  ;;  %9235 = vtanh.f32 %v5752_v29 }
 0x550   : > { %v9226_v17 = vpop.eup %9225  ;;  %v5762_v51 = vadd.f32 1.0, %v9224_v35  ;;  %9237 = vtanh.f32 %v5754_v5 }
 0x551   : > { %v5763_v24 = vadd.f32 1.0, %v9226_v17 }
 0x552   : > { %9239 = vrcp.f32 %v5762_v51 }
 0x553   : > { %v9228_v44 = vpop.eup %9227  ;;  %9241 = vrcp.f32 %v5763_v24 }
 0x554   : > { %v9230_v55 = vpop.eup %9229  ;;  %v5774_v53 = vadd.f32 1.0, %v9228_v44 }
 0x555   : > { %v5775_v41 = vadd.f32 1.0, %v9230_v55 }
 0x556   : > { %9243 = vrcp.f32 %v5774_v53 }
 0x557   : > { %9245 = vrcp.f32 %v5775_v41  ;;  %v9232_v45 = vpop.eup %9231 }
 0x558   : > { %v9234_v13 = vpop.eup %9233  ;;  %v5786_v60 = vadd.f32 1.0, %v9232_v45 }
 0x559   : > { %v9236_v2 = vpop.eup %9235  ;;  %v5787_v47 = vadd.f32 1.0, %v9234_v13 }
 0x55a   : > { %v9238_v34 = vpop.eup %9237  ;;  %9247 = vrcp.f32 %v5786_v60 }
 0x55b   : > { %9249 = vrcp.f32 %v5787_v47 }
 0x55c   : > { %v9240_v18 = vpop.eup %9239 }
 0x55d   : > { %v9242_v48 = vpop.eup %9241  ;;  %v5798_v26 = vmul.f32 %v9240_v18, %v9236_v2 }
 0x55e   : > { %v5799_v10 = vmul.f32 %v9242_v48, %v9238_v34 }
 0x560   : > { %v9244_v36 = vpop.eup %9243 }
 0x561   : > { %v9246_v46 = vpop.eup %9245  ;;  %v5796_v49 = vmul.f32 %v9244_v36, %v5794_v0 }
 0x562   : > { %v5797_v42 = vmul.f32 %v9246_v46, %v5795_v30 }
 0x563   : > { %v5800_v40 = vadd.f32 %v5798_v26, %v5796_v49 }
 0x564   : > { %v5801_v16 = vadd.f32 %v5799_v10, %v5797_v42  ;;  %v9248_v23 = vpop.eup %9247 }
 0x565   : > { %9251 = vtanh.f32 %v5800_v40  ;;  %5808 = vst [vmem:[%s306_s10] sm:$0xff] %v5800_v40  ;;  %v9250_v43 = vpop.eup %9249 }
 0x566   : > { %9253 = vtanh.f32 %v5801_v16  ;;  %5809 = vst [vmem:[%s306_s10 + $0x8] sm:$0xff] %v5801_v16 }
 0x56f   : > { %v9252_v57 = vpop.eup %9251 }
 0x570   : > { %v9254_v38 = vpop.eup %9253  ;;  %v5804_v3 = vmul.f32 %v9252_v57, %v9248_v23 }
 0x571   : > { %v5805_v22 = vmul.f32 %v9254_v38, %v9250_v43 }
 0x572   : > { %5806 = vst [vmem:[%s296_s13] sm:$0xff] %v5804_v3 }
 0x573   : > { %5807 = vst [vmem:[%s296_s13 + $0x8] sm:$0xff] %v5805_v22 }
 0x574 PF: > { %s16_s22 = sadd.s32 1, %s9344_s22   ;;  %s15436_s18 = smov %s9336_s20 }
 0x575   : > { %p13_p7 = scmp.ge.s32.totalorder %s16_s22, 6   ;;  %s15437_s19 = smov %s9340_s21 }
 0x576   : > { %s15438_s20 = smov %s15441_s23  ;;  %s15439_s21 = smov %s15445_s24 }
 0x577   :  { %15 = sbr.rel (!%p13_p7) target bundleno = 3 (0x3), region = 90 }

</bundles_post_ra>
